<compile_context>
chip_gen: v5e
topology: v5e:2x2
jax: 0.10.0
libtpu: 0.0.40
codegen_flags: <defaults>
</compile_context>

<pallas_src>
import jax
import jax.numpy as jnp
from jax.experimental import pallas as pl
from jax.experimental.pallas import tpu as pltpu

# Hidden widths of MLP5; final Linear maps 32 -> output_size.
HIDDEN_SIZES = [2048, 512, 256, 256, 128, 32]


def mlp5_forward(x, params, alphas):
    """x: (B, in_dim) f32; params: list of (w_bf16 (in,out), b_f32 (1,out)); alphas: (6,) f32."""
    B, _ = x.shape
    weights = [w for (w, _) in params]
    biases = [b for (_, b) in params]
    out_dims = [w.shape[1] for w in weights]
    out_dim = out_dims[-1]
    n_layers = len(weights)  # 7

    # ---- Pack all biases into one lane-aligned VMEM buffer (1 DMA, not 7). ----
    bias_offsets = []
    segs = []
    off = 0
    for b in biases:
        n = b.shape[1]
        pad = (-n) % 128          # keep every segment 128-lane aligned
        bias_offsets.append(off)
        segs.append(jnp.pad(b, ((0, 0), (0, pad))))
        off += n + pad
    bias_buf = jnp.concatenate(segs, axis=1)          # (1, off) f32

    # ---- w2 streaming setup: K-chunked manual double-buffered DMA pipeline. ----
    K2, N2 = weights[1].shape                         # (2048, 512)
    CK = 512                                          # 512x512 bf16 chunk = 512 KB
    assert K2 % CK == 0
    NCHUNK = K2 // CK

    def kernel(alpha_ref, x_ref, bias_ref, w1_ref, w2_hbm, w3_ref, w4_ref,
               w5_ref, w6_ref, w7_ref, out_ref, w2_buf, w2_sem):
        w_refs = [w1_ref, None, w3_ref, w4_ref, w5_ref, w6_ref, w7_ref]

        def w2_copy(k, slot):
            # All offsets are static Python ints -> contiguous 512 KB HBM reads.
            return pltpu.make_async_copy(
                w2_hbm.at[pl.ds(k * CK, CK), :], w2_buf.at[slot], w2_sem.at[slot])

        def bias(i):
            o, n = bias_offsets[i], out_dims[i]
            return bias_ref[:, o:o + n]               # free static ref view

        def prelu(h, i):
            a = alpha_ref[i]                          # single learnable slope (PyTorch default)
            return jnp.where(h > 0, h, a * h)

        # Prime the w2 stream so its first chunk DMA overlaps layer-1 compute.
        w2_copy(0, 0).start()

        # Layer 1: (B, in) -> (B, 2048); bf16 MXU matmul, f32 accumulation.
        h = jnp.dot(x_ref[...].astype(jnp.bfloat16), w1_ref[...],
                    preferred_element_type=jnp.float32) + bias(0)
        h = prelu(h, 0)

        # Layer 2: (B, 2048) -> (B, 512), K-chunked.  While the MXU consumes
        # chunk k from one VMEM slot, chunk k+1 streams into the other slot.
        acc = jnp.zeros((B, N2), jnp.float32)
        for k in range(NCHUNK):
            slot = k % 2
            w2_copy(k, slot).wait()
            if k + 1 < NCHUNK:
                w2_copy(k + 1, 1 - slot).start()
            acc = acc + jnp.dot(
                h[:, k * CK:(k + 1) * CK].astype(jnp.bfloat16), w2_buf[slot],
                preferred_element_type=jnp.float32)
        h = prelu(acc + bias(1), 1)

        # Layers 3..7 (small weights, pre-DMA'd once by the Pallas prologue).
        for i in range(2, n_layers):
            h = jnp.dot(h.astype(jnp.bfloat16), w_refs[i][...],
                        preferred_element_type=jnp.float32) + bias(i)
            if i < n_layers - 1:
                h = prelu(h, i)
            # nn.Dropout is identity at inference; nothing to do.

        out_ref[...] = h.astype(out_ref.dtype)

    in_specs = [
        pl.BlockSpec(memory_space=pltpu.MemorySpace.SMEM),   # PReLU alphas
        pl.BlockSpec(memory_space=pltpu.MemorySpace.VMEM),   # x
        pl.BlockSpec(memory_space=pltpu.MemorySpace.VMEM),   # packed biases
        pl.BlockSpec(memory_space=pltpu.MemorySpace.VMEM),   # w1 (16 KB)
        pl.BlockSpec(memory_space=pl.ANY),                   # w2 stays in HBM (manual DMA)
        pl.BlockSpec(memory_space=pltpu.MemorySpace.VMEM),   # w3
        pl.BlockSpec(memory_space=pltpu.MemorySpace.VMEM),   # w4
        pl.BlockSpec(memory_space=pltpu.MemorySpace.VMEM),   # w5
        pl.BlockSpec(memory_space=pltpu.MemorySpace.VMEM),   # w6
        pl.BlockSpec(memory_space=pltpu.MemorySpace.VMEM),   # w7
    ]

    flops = sum(2 * B * w.shape[0] * w.shape[1] for w in weights)
    bytes_accessed = (x.size * x.dtype.itemsize
                      + B * out_dim * x.dtype.itemsize
                      + bias_buf.size * bias_buf.dtype.itemsize
                      + sum(w.size * w.dtype.itemsize for w in weights))

    return pl.pallas_call(
        kernel,
        out_shape=jax.ShapeDtypeStruct((B, out_dim), x.dtype),
        in_specs=in_specs,
        out_specs=pl.BlockSpec(memory_space=pltpu.MemorySpace.VMEM),
        scratch_shapes=[
            pltpu.VMEM((2, CK, N2), weights[1].dtype),        # w2 double buffer (~1 MB)
            pltpu.SemaphoreType.DMA((2,)),
        ],
        cost_estimate=pl.CostEstimate(
            flops=flops, transcendentals=0, bytes_accessed=bytes_accessed),
        compiler_params=pltpu.CompilerParams(
            vmem_limit_bytes=32 * 1024 * 1024,   # ~3 MB resident; safe on v5e/v6e/v7x
        ),
    )(alphas, x, bias_buf, *weights)


def init_params(key, input_size, output_size):
    """PyTorch-like init U(-1/sqrt(fan_in), +); weights stored bf16, biases f32.

    NOTE: bf16 weight storage is a deliberate inference-grade deviation from
    the f32 PyTorch module (halves HBM weight traffic; MXU-native).
    PReLU default alpha = 0.25.
    """
    dims = [input_size] + HIDDEN_SIZES + [output_size]
    params = []
    for i in range(len(dims) - 1):
        key, k_w, k_b = jax.random.split(key, 3)
        bound = 1.0 / (dims[i] ** 0.5)
        w = jax.random.uniform(k_w, (dims[i], dims[i + 1]), jnp.float32, -bound, bound)
        b = jax.random.uniform(k_b, (1, dims[i + 1]), jnp.float32, -bound, bound)
        params.append((w.astype(jnp.bfloat16), b))
    alphas = jnp.full((len(dims) - 2,), 0.25, dtype=jnp.float32)  # 6 PReLU slopes
    return params, alphas


def mlp5_reference(x, params, alphas):
    """Pure-JAX reference with identical dtype semantics (bf16 weights, f32 accum)."""
    h = x.astype(jnp.float32)
    for i, (w, b) in enumerate(params):
        h = jnp.dot(h.astype(w.dtype), w, preferred_element_type=jnp.float32)
        h = h + b.astype(jnp.float32)
        if i < len(params) - 1:
            h = jnp.where(h > 0, h, alphas[i] * h)
    return h.astype(x.dtype)


if __name__ == "__main__":
    # Cartpole-like sizes: 4-dim state in, 2 actions out.
    input_size, output_size = 4, 2
    batch = 16

    key = jax.random.PRNGKey(0)
    k_x, k_p = jax.random.split(key)
    x = jax.random.normal(k_x, (batch, input_size), dtype=jnp.float32)
    params, alphas = init_params(k_p, input_size, output_size)

    out = mlp5_forward(x, params, alphas)
    jax.block_until_ready(out)

    ref = mlp5_reference(x, params, alphas)
    assert out.shape == (batch, output_size)
    assert jnp.allclose(out, ref, atol=2e-3, rtol=2e-3), "mismatch vs reference"
    print("KERNEL_OK")
</pallas_src>

<mosaic_0001>
module attributes {stable_mosaic.version = 11 : i64} {
  func.func @kernel(%arg0: memref<6xf32, #tpu.memory_space<smem>>, %arg1: memref<16x4xf32, #tpu.memory_space<vmem>>, %arg2: memref<1x3456xf32, #tpu.memory_space<vmem>>, %arg3: memref<4x2048xbf16, #tpu.memory_space<vmem>>, %arg4: memref<2048x512xbf16, #tpu.memory_space<any>>, %arg5: memref<512x256xbf16, #tpu.memory_space<vmem>>, %arg6: memref<256x256xbf16, #tpu.memory_space<vmem>>, %arg7: memref<256x128xbf16, #tpu.memory_space<vmem>>, %arg8: memref<128x32xbf16, #tpu.memory_space<vmem>>, %arg9: memref<32x2xbf16, #tpu.memory_space<vmem>>, %arg10: memref<16x2xf32, #tpu.memory_space<vmem>>, %arg11: memref<2x512x512xbf16, #tpu.memory_space<vmem>>, %arg12: memref<2x!tpu.dma_semaphore, #tpu.memory_space<semaphore_mem>>) attributes {dimension_semantics = [], scalar_prefetch = 0 : i64, scratch_operands = 2 : i64, tpu.core_type = #tpu.core_type<tc>} {
    %c0_i32 = arith.constant 0 : i32
    %c0_i32_0 = arith.constant 0 : i32
    %c0_i32_1 = arith.constant 0 : i32
    %c0_i32_2 = arith.constant 0 : i32
    %0 = tpu.memref_slice %arg4[%c0_i32_1, %c0_i32_2] : memref<2048x512xbf16, #tpu.memory_space<any>> -> memref<512x512xbf16, #tpu.memory_space<any>>
    %c0_i32_3 = arith.constant 0 : i32
    %c0_i32_4 = arith.constant 0 : i32
    %1 = tpu.memref_slice %arg11[%c0_i32, %c0_i32_3, %c0_i32_4] : memref<2x512x512xbf16, #tpu.memory_space<vmem>> -> memref<1x512x512xbf16, #tpu.memory_space<vmem>>
    %2 = tpu.memref_squeeze %1 : memref<1x512x512xbf16, #tpu.memory_space<vmem>> -> memref<512x512xbf16, #tpu.memory_space<vmem>>
    %3 = tpu.memref_slice %arg12[%c0_i32_0] : memref<2x!tpu.dma_semaphore, #tpu.memory_space<semaphore_mem>> -> memref<1x!tpu.dma_semaphore, #tpu.memory_space<semaphore_mem>>
    %4 = tpu.memref_squeeze %3 : memref<1x!tpu.dma_semaphore, #tpu.memory_space<semaphore_mem>> -> memref<!tpu.dma_semaphore, #tpu.memory_space<semaphore_mem>>
    tpu.enqueue_dma source(%0 : memref<512x512xbf16, #tpu.memory_space<any>>) target(%2 : memref<512x512xbf16, #tpu.memory_space<vmem>>) target_semaphore(%4 : memref<!tpu.dma_semaphore, #tpu.memory_space<semaphore_mem>>)
    %c0 = arith.constant 0 : index
    %c0_5 = arith.constant 0 : index
    %5 = vector.load %arg1[%c0, %c0_5] : memref<16x4xf32, #tpu.memory_space<vmem>>, vector<16x4xf32>
    %6 = arith.truncf %5 : vector<16x4xf32> to vector<16x4xbf16>
    %c0_6 = arith.constant 0 : index
    %c0_7 = arith.constant 0 : index
    %7 = vector.load %arg3[%c0_6, %c0_7] : memref<4x2048xbf16, #tpu.memory_space<vmem>>, vector<4x2048xbf16>
    %cst = arith.constant dense<0.000000e+00> : vector<16x2048xf32>
    %8 = tpu.matmul %6, %7, %cst {dimension_numbers = #tpu.dot_dimension_numbers<[1], [0], [0], [1], [0, 0, 1, 1], [], []>} : vector<16x4xbf16>, vector<4x2048xbf16>, vector<16x2048xf32> -> vector<16x2048xf32>
    %c0_8 = arith.constant 0 : index
    %c0_9 = arith.constant 0 : index
    %9 = vector.load %arg2[%c0_8, %c0_9] : memref<1x3456xf32, #tpu.memory_space<vmem>>, vector<1x2048xf32>
    %10 = vector.broadcast %9 : vector<1x2048xf32> to vector<16x2048xf32>
    %11 = arith.addf %8, %10 : vector<16x2048xf32>
    %c0_10 = arith.constant 0 : index
    %12 = memref.load %arg0[%c0_10] : memref<6xf32, #tpu.memory_space<smem>>
    %cst_11 = arith.constant 0.000000e+00 : f32
    %13 = vector.broadcast %cst_11 : f32 to vector<16x2048xf32>
    %14 = arith.cmpf ogt, %11, %13 : vector<16x2048xf32>
    %15 = vector.broadcast %12 : f32 to vector<16x2048xf32>
    %16 = arith.mulf %15, %11 : vector<16x2048xf32>
    %17 = arith.select %14, %11, %16 : vector<16x2048xi1>, vector<16x2048xf32>
    %cst_12 = arith.constant 0.000000e+00 : f32
    %18 = vector.broadcast %cst_12 : f32 to vector<16x512xf32>
    %c0_i32_13 = arith.constant 0 : i32
    %c0_i32_14 = arith.constant 0 : i32
    %c0_i32_15 = arith.constant 0 : i32
    %c0_i32_16 = arith.constant 0 : i32
    %19 = tpu.memref_slice %arg4[%c0_i32_15, %c0_i32_16] : memref<2048x512xbf16, #tpu.memory_space<any>> -> memref<512x512xbf16, #tpu.memory_space<any>>
    %c0_i32_17 = arith.constant 0 : i32
    %c0_i32_18 = arith.constant 0 : i32
    %20 = tpu.memref_slice %arg11[%c0_i32_13, %c0_i32_17, %c0_i32_18] : memref<2x512x512xbf16, #tpu.memory_space<vmem>> -> memref<1x512x512xbf16, #tpu.memory_space<vmem>>
    %21 = tpu.memref_squeeze %20 : memref<1x512x512xbf16, #tpu.memory_space<vmem>> -> memref<512x512xbf16, #tpu.memory_space<vmem>>
    %22 = tpu.memref_slice %arg12[%c0_i32_14] : memref<2x!tpu.dma_semaphore, #tpu.memory_space<semaphore_mem>> -> memref<1x!tpu.dma_semaphore, #tpu.memory_space<semaphore_mem>>
    %23 = tpu.memref_squeeze %22 : memref<1x!tpu.dma_semaphore, #tpu.memory_space<semaphore_mem>> -> memref<!tpu.dma_semaphore, #tpu.memory_space<semaphore_mem>>
    tpu.wait_dma2 semaphore(%23 : memref<!tpu.dma_semaphore, #tpu.memory_space<semaphore_mem>>) src(%19 : memref<512x512xbf16, #tpu.memory_space<any>>) dst(%21 : memref<512x512xbf16, #tpu.memory_space<vmem>>)
    %c1_i32 = arith.constant 1 : i32
    %c1_i32_19 = arith.constant 1 : i32
    %c512_i32 = arith.constant 512 : i32
    %c0_i32_20 = arith.constant 0 : i32
    %24 = tpu.memref_slice %arg4[%c512_i32, %c0_i32_20] : memref<2048x512xbf16, #tpu.memory_space<any>> -> memref<512x512xbf16, #tpu.memory_space<any>>
    %c0_i32_21 = arith.constant 0 : i32
    %c0_i32_22 = arith.constant 0 : i32
    %25 = tpu.memref_slice %arg11[%c1_i32, %c0_i32_21, %c0_i32_22] : memref<2x512x512xbf16, #tpu.memory_space<vmem>> -> memref<1x512x512xbf16, #tpu.memory_space<vmem>>
    %26 = tpu.memref_squeeze %25 : memref<1x512x512xbf16, #tpu.memory_space<vmem>> -> memref<512x512xbf16, #tpu.memory_space<vmem>>
    %27 = tpu.memref_slice %arg12[%c1_i32_19] : memref<2x!tpu.dma_semaphore, #tpu.memory_space<semaphore_mem>> -> memref<1x!tpu.dma_semaphore, #tpu.memory_space<semaphore_mem>>
    %28 = tpu.memref_squeeze %27 : memref<1x!tpu.dma_semaphore, #tpu.memory_space<semaphore_mem>> -> memref<!tpu.dma_semaphore, #tpu.memory_space<semaphore_mem>>
    tpu.enqueue_dma source(%24 : memref<512x512xbf16, #tpu.memory_space<any>>) target(%26 : memref<512x512xbf16, #tpu.memory_space<vmem>>) target_semaphore(%28 : memref<!tpu.dma_semaphore, #tpu.memory_space<semaphore_mem>>)
    %29 = vector.extract_strided_slice %17 {offsets = [0, 0], sizes = [16, 512], strides = [1, 1]} : vector<16x2048xf32> to vector<16x512xf32>
    %30 = arith.truncf %29 : vector<16x512xf32> to vector<16x512xbf16>
    %c0_23 = arith.constant 0 : index
    %c0_24 = arith.constant 0 : index
    %c0_25 = arith.constant 0 : index
    %31 = vector.load %arg11[%c0_23, %c0_24, %c0_25] : memref<2x512x512xbf16, #tpu.memory_space<vmem>>, vector<1x512x512xbf16>
    %32 = vector.shape_cast %31 : vector<1x512x512xbf16> to vector<512x512xbf16>
    %cst_26 = arith.constant dense<0.000000e+00> : vector<16x512xf32>
    %33 = tpu.matmul %30, %32, %cst_26 {dimension_numbers = #tpu.dot_dimension_numbers<[1], [0], [0], [1], [0, 0, 1, 1], [], []>} : vector<16x512xbf16>, vector<512x512xbf16>, vector<16x512xf32> -> vector<16x512xf32>
    %34 = arith.addf %18, %33 : vector<16x512xf32>
    %c1_i32_27 = arith.constant 1 : i32
    %c1_i32_28 = arith.constant 1 : i32
    %c512_i32_29 = arith.constant 512 : i32
    %c0_i32_30 = arith.constant 0 : i32
    %35 = tpu.memref_slice %arg4[%c512_i32_29, %c0_i32_30] : memref<2048x512xbf16, #tpu.memory_space<any>> -> memref<512x512xbf16, #tpu.memory_space<any>>
    %c0_i32_31 = arith.constant 0 : i32
    %c0_i32_32 = arith.constant 0 : i32
    %36 = tpu.memref_slice %arg11[%c1_i32_27, %c0_i32_31, %c0_i32_32] : memref<2x512x512xbf16, #tpu.memory_space<vmem>> -> memref<1x512x512xbf16, #tpu.memory_space<vmem>>
    %37 = tpu.memref_squeeze %36 : memref<1x512x512xbf16, #tpu.memory_space<vmem>> -> memref<512x512xbf16, #tpu.memory_space<vmem>>
    %38 = tpu.memref_slice %arg12[%c1_i32_28] : memref<2x!tpu.dma_semaphore, #tpu.memory_space<semaphore_mem>> -> memref<1x!tpu.dma_semaphore, #tpu.memory_space<semaphore_mem>>
    %39 = tpu.memref_squeeze %38 : memref<1x!tpu.dma_semaphore, #tpu.memory_space<semaphore_mem>> -> memref<!tpu.dma_semaphore, #tpu.memory_space<semaphore_mem>>
    tpu.wait_dma2 semaphore(%39 : memref<!tpu.dma_semaphore, #tpu.memory_space<semaphore_mem>>) src(%35 : memref<512x512xbf16, #tpu.memory_space<any>>) dst(%37 : memref<512x512xbf16, #tpu.memory_space<vmem>>)
    %c0_i32_33 = arith.constant 0 : i32
    %c0_i32_34 = arith.constant 0 : i32
    %c1024_i32 = arith.constant 1024 : i32
    %c0_i32_35 = arith.constant 0 : i32
    %40 = tpu.memref_slice %arg4[%c1024_i32, %c0_i32_35] : memref<2048x512xbf16, #tpu.memory_space<any>> -> memref<512x512xbf16, #tpu.memory_space<any>>
    %c0_i32_36 = arith.constant 0 : i32
    %c0_i32_37 = arith.constant 0 : i32
    %41 = tpu.memref_slice %arg11[%c0_i32_33, %c0_i32_36, %c0_i32_37] : memref<2x512x512xbf16, #tpu.memory_space<vmem>> -> memref<1x512x512xbf16, #tpu.memory_space<vmem>>
    %42 = tpu.memref_squeeze %41 : memref<1x512x512xbf16, #tpu.memory_space<vmem>> -> memref<512x512xbf16, #tpu.memory_space<vmem>>
    %43 = tpu.memref_slice %arg12[%c0_i32_34] : memref<2x!tpu.dma_semaphore, #tpu.memory_space<semaphore_mem>> -> memref<1x!tpu.dma_semaphore, #tpu.memory_space<semaphore_mem>>
    %44 = tpu.memref_squeeze %43 : memref<1x!tpu.dma_semaphore, #tpu.memory_space<semaphore_mem>> -> memref<!tpu.dma_semaphore, #tpu.memory_space<semaphore_mem>>
    tpu.enqueue_dma source(%40 : memref<512x512xbf16, #tpu.memory_space<any>>) target(%42 : memref<512x512xbf16, #tpu.memory_space<vmem>>) target_semaphore(%44 : memref<!tpu.dma_semaphore, #tpu.memory_space<semaphore_mem>>)
    %45 = vector.extract_strided_slice %17 {offsets = [0, 512], sizes = [16, 512], strides = [1, 1]} : vector<16x2048xf32> to vector<16x512xf32>
    %46 = arith.truncf %45 : vector<16x512xf32> to vector<16x512xbf16>
    %c1 = arith.constant 1 : index
    %c0_38 = arith.constant 0 : index
    %c0_39 = arith.constant 0 : index
    %47 = vector.load %arg11[%c1, %c0_38, %c0_39] : memref<2x512x512xbf16, #tpu.memory_space<vmem>>, vector<1x512x512xbf16>
    %48 = vector.shape_cast %47 : vector<1x512x512xbf16> to vector<512x512xbf16>
    %cst_40 = arith.constant dense<0.000000e+00> : vector<16x512xf32>
    %49 = tpu.matmul %46, %48, %cst_40 {dimension_numbers = #tpu.dot_dimension_numbers<[1], [0], [0], [1], [0, 0, 1, 1], [], []>} : vector<16x512xbf16>, vector<512x512xbf16>, vector<16x512xf32> -> vector<16x512xf32>
    %50 = arith.addf %34, %49 : vector<16x512xf32>
    %c0_i32_41 = arith.constant 0 : i32
    %c0_i32_42 = arith.constant 0 : i32
    %c1024_i32_43 = arith.constant 1024 : i32
    %c0_i32_44 = arith.constant 0 : i32
    %51 = tpu.memref_slice %arg4[%c1024_i32_43, %c0_i32_44] : memref<2048x512xbf16, #tpu.memory_space<any>> -> memref<512x512xbf16, #tpu.memory_space<any>>
    %c0_i32_45 = arith.constant 0 : i32
    %c0_i32_46 = arith.constant 0 : i32
    %52 = tpu.memref_slice %arg11[%c0_i32_41, %c0_i32_45, %c0_i32_46] : memref<2x512x512xbf16, #tpu.memory_space<vmem>> -> memref<1x512x512xbf16, #tpu.memory_space<vmem>>
    %53 = tpu.memref_squeeze %52 : memref<1x512x512xbf16, #tpu.memory_space<vmem>> -> memref<512x512xbf16, #tpu.memory_space<vmem>>
    %54 = tpu.memref_slice %arg12[%c0_i32_42] : memref<2x!tpu.dma_semaphore, #tpu.memory_space<semaphore_mem>> -> memref<1x!tpu.dma_semaphore, #tpu.memory_space<semaphore_mem>>
    %55 = tpu.memref_squeeze %54 : memref<1x!tpu.dma_semaphore, #tpu.memory_space<semaphore_mem>> -> memref<!tpu.dma_semaphore, #tpu.memory_space<semaphore_mem>>
    tpu.wait_dma2 semaphore(%55 : memref<!tpu.dma_semaphore, #tpu.memory_space<semaphore_mem>>) src(%51 : memref<512x512xbf16, #tpu.memory_space<any>>) dst(%53 : memref<512x512xbf16, #tpu.memory_space<vmem>>)
    %c1_i32_47 = arith.constant 1 : i32
    %c1_i32_48 = arith.constant 1 : i32
    %c1536_i32 = arith.constant 1536 : i32
    %c0_i32_49 = arith.constant 0 : i32
    %56 = tpu.memref_slice %arg4[%c1536_i32, %c0_i32_49] : memref<2048x512xbf16, #tpu.memory_space<any>> -> memref<512x512xbf16, #tpu.memory_space<any>>
    %c0_i32_50 = arith.constant 0 : i32
    %c0_i32_51 = arith.constant 0 : i32
    %57 = tpu.memref_slice %arg11[%c1_i32_47, %c0_i32_50, %c0_i32_51] : memref<2x512x512xbf16, #tpu.memory_space<vmem>> -> memref<1x512x512xbf16, #tpu.memory_space<vmem>>
    %58 = tpu.memref_squeeze %57 : memref<1x512x512xbf16, #tpu.memory_space<vmem>> -> memref<512x512xbf16, #tpu.memory_space<vmem>>
    %59 = tpu.memref_slice %arg12[%c1_i32_48] : memref<2x!tpu.dma_semaphore, #tpu.memory_space<semaphore_mem>> -> memref<1x!tpu.dma_semaphore, #tpu.memory_space<semaphore_mem>>
    %60 = tpu.memref_squeeze %59 : memref<1x!tpu.dma_semaphore, #tpu.memory_space<semaphore_mem>> -> memref<!tpu.dma_semaphore, #tpu.memory_space<semaphore_mem>>
    tpu.enqueue_dma source(%56 : memref<512x512xbf16, #tpu.memory_space<any>>) target(%58 : memref<512x512xbf16, #tpu.memory_space<vmem>>) target_semaphore(%60 : memref<!tpu.dma_semaphore, #tpu.memory_space<semaphore_mem>>)
    %61 = vector.extract_strided_slice %17 {offsets = [0, 1024], sizes = [16, 512], strides = [1, 1]} : vector<16x2048xf32> to vector<16x512xf32>
    %62 = arith.truncf %61 : vector<16x512xf32> to vector<16x512xbf16>
    %c0_52 = arith.constant 0 : index
    %c0_53 = arith.constant 0 : index
    %c0_54 = arith.constant 0 : index
    %63 = vector.load %arg11[%c0_52, %c0_53, %c0_54] : memref<2x512x512xbf16, #tpu.memory_space<vmem>>, vector<1x512x512xbf16>
    %64 = vector.shape_cast %63 : vector<1x512x512xbf16> to vector<512x512xbf16>
    %cst_55 = arith.constant dense<0.000000e+00> : vector<16x512xf32>
    %65 = tpu.matmul %62, %64, %cst_55 {dimension_numbers = #tpu.dot_dimension_numbers<[1], [0], [0], [1], [0, 0, 1, 1], [], []>} : vector<16x512xbf16>, vector<512x512xbf16>, vector<16x512xf32> -> vector<16x512xf32>
    %66 = arith.addf %50, %65 : vector<16x512xf32>
    %c1_i32_56 = arith.constant 1 : i32
    %c1_i32_57 = arith.constant 1 : i32
    %c1536_i32_58 = arith.constant 1536 : i32
    %c0_i32_59 = arith.constant 0 : i32
    %67 = tpu.memref_slice %arg4[%c1536_i32_58, %c0_i32_59] : memref<2048x512xbf16, #tpu.memory_space<any>> -> memref<512x512xbf16, #tpu.memory_space<any>>
    %c0_i32_60 = arith.constant 0 : i32
    %c0_i32_61 = arith.constant 0 : i32
    %68 = tpu.memref_slice %arg11[%c1_i32_56, %c0_i32_60, %c0_i32_61] : memref<2x512x512xbf16, #tpu.memory_space<vmem>> -> memref<1x512x512xbf16, #tpu.memory_space<vmem>>
    %69 = tpu.memref_squeeze %68 : memref<1x512x512xbf16, #tpu.memory_space<vmem>> -> memref<512x512xbf16, #tpu.memory_space<vmem>>
    %70 = tpu.memref_slice %arg12[%c1_i32_57] : memref<2x!tpu.dma_semaphore, #tpu.memory_space<semaphore_mem>> -> memref<1x!tpu.dma_semaphore, #tpu.memory_space<semaphore_mem>>
    %71 = tpu.memref_squeeze %70 : memref<1x!tpu.dma_semaphore, #tpu.memory_space<semaphore_mem>> -> memref<!tpu.dma_semaphore, #tpu.memory_space<semaphore_mem>>
    tpu.wait_dma2 semaphore(%71 : memref<!tpu.dma_semaphore, #tpu.memory_space<semaphore_mem>>) src(%67 : memref<512x512xbf16, #tpu.memory_space<any>>) dst(%69 : memref<512x512xbf16, #tpu.memory_space<vmem>>)
    %72 = vector.extract_strided_slice %17 {offsets = [0, 1536], sizes = [16, 512], strides = [1, 1]} : vector<16x2048xf32> to vector<16x512xf32>
    %73 = arith.truncf %72 : vector<16x512xf32> to vector<16x512xbf16>
    %c1_62 = arith.constant 1 : index
    %c0_63 = arith.constant 0 : index
    %c0_64 = arith.constant 0 : index
    %74 = vector.load %arg11[%c1_62, %c0_63, %c0_64] : memref<2x512x512xbf16, #tpu.memory_space<vmem>>, vector<1x512x512xbf16>
    %75 = vector.shape_cast %74 : vector<1x512x512xbf16> to vector<512x512xbf16>
    %cst_65 = arith.constant dense<0.000000e+00> : vector<16x512xf32>
    %76 = tpu.matmul %73, %75, %cst_65 {dimension_numbers = #tpu.dot_dimension_numbers<[1], [0], [0], [1], [0, 0, 1, 1], [], []>} : vector<16x512xbf16>, vector<512x512xbf16>, vector<16x512xf32> -> vector<16x512xf32>
    %77 = arith.addf %66, %76 : vector<16x512xf32>
    %c0_66 = arith.constant 0 : index
    %c2048 = arith.constant 2048 : index
    %78 = vector.load %arg2[%c0_66, %c2048] : memref<1x3456xf32, #tpu.memory_space<vmem>>, vector<1x512xf32>
    %79 = vector.broadcast %78 : vector<1x512xf32> to vector<16x512xf32>
    %80 = arith.addf %77, %79 : vector<16x512xf32>
    %c1_67 = arith.constant 1 : index
    %81 = memref.load %arg0[%c1_67] : memref<6xf32, #tpu.memory_space<smem>>
    %cst_68 = arith.constant 0.000000e+00 : f32
    %82 = vector.broadcast %cst_68 : f32 to vector<16x512xf32>
    %83 = arith.cmpf ogt, %80, %82 : vector<16x512xf32>
    %84 = vector.broadcast %81 : f32 to vector<16x512xf32>
    %85 = arith.mulf %84, %80 : vector<16x512xf32>
    %86 = arith.select %83, %80, %85 : vector<16x512xi1>, vector<16x512xf32>
    %87 = arith.truncf %86 : vector<16x512xf32> to vector<16x512xbf16>
    %c0_69 = arith.constant 0 : index
    %c0_70 = arith.constant 0 : index
    %88 = vector.load %arg5[%c0_69, %c0_70] : memref<512x256xbf16, #tpu.memory_space<vmem>>, vector<512x256xbf16>
    %cst_71 = arith.constant dense<0.000000e+00> : vector<16x256xf32>
    %89 = tpu.matmul %87, %88, %cst_71 {dimension_numbers = #tpu.dot_dimension_numbers<[1], [0], [0], [1], [0, 0, 1, 1], [], []>} : vector<16x512xbf16>, vector<512x256xbf16>, vector<16x256xf32> -> vector<16x256xf32>
    %c0_72 = arith.constant 0 : index
    %c2560 = arith.constant 2560 : index
    %90 = vector.load %arg2[%c0_72, %c2560] : memref<1x3456xf32, #tpu.memory_space<vmem>>, vector<1x256xf32>
    %91 = vector.broadcast %90 : vector<1x256xf32> to vector<16x256xf32>
    %92 = arith.addf %89, %91 : vector<16x256xf32>
    %c2 = arith.constant 2 : index
    %93 = memref.load %arg0[%c2] : memref<6xf32, #tpu.memory_space<smem>>
    %cst_73 = arith.constant 0.000000e+00 : f32
    %94 = vector.broadcast %cst_73 : f32 to vector<16x256xf32>
    %95 = arith.cmpf ogt, %92, %94 : vector<16x256xf32>
    %96 = vector.broadcast %93 : f32 to vector<16x256xf32>
    %97 = arith.mulf %96, %92 : vector<16x256xf32>
    %98 = arith.select %95, %92, %97 : vector<16x256xi1>, vector<16x256xf32>
    %99 = arith.truncf %98 : vector<16x256xf32> to vector<16x256xbf16>
    %c0_74 = arith.constant 0 : index
    %c0_75 = arith.constant 0 : index
    %100 = vector.load %arg6[%c0_74, %c0_75] : memref<256x256xbf16, #tpu.memory_space<vmem>>, vector<256x256xbf16>
    %cst_76 = arith.constant dense<0.000000e+00> : vector<16x256xf32>
    %101 = tpu.matmul %99, %100, %cst_76 {dimension_numbers = #tpu.dot_dimension_numbers<[1], [0], [0], [1], [0, 0, 1, 1], [], []>} : vector<16x256xbf16>, vector<256x256xbf16>, vector<16x256xf32> -> vector<16x256xf32>
    %c0_77 = arith.constant 0 : index
    %c2816 = arith.constant 2816 : index
    %102 = vector.load %arg2[%c0_77, %c2816] : memref<1x3456xf32, #tpu.memory_space<vmem>>, vector<1x256xf32>
    %103 = vector.broadcast %102 : vector<1x256xf32> to vector<16x256xf32>
    %104 = arith.addf %101, %103 : vector<16x256xf32>
    %c3 = arith.constant 3 : index
    %105 = memref.load %arg0[%c3] : memref<6xf32, #tpu.memory_space<smem>>
    %cst_78 = arith.constant 0.000000e+00 : f32
    %106 = vector.broadcast %cst_78 : f32 to vector<16x256xf32>
    %107 = arith.cmpf ogt, %104, %106 : vector<16x256xf32>
    %108 = vector.broadcast %105 : f32 to vector<16x256xf32>
    %109 = arith.mulf %108, %104 : vector<16x256xf32>
    %110 = arith.select %107, %104, %109 : vector<16x256xi1>, vector<16x256xf32>
    %111 = arith.truncf %110 : vector<16x256xf32> to vector<16x256xbf16>
    %c0_79 = arith.constant 0 : index
    %c0_80 = arith.constant 0 : index
    %112 = vector.load %arg7[%c0_79, %c0_80] : memref<256x128xbf16, #tpu.memory_space<vmem>>, vector<256x128xbf16>
    %cst_81 = arith.constant dense<0.000000e+00> : vector<16x128xf32>
    %113 = tpu.matmul %111, %112, %cst_81 {dimension_numbers = #tpu.dot_dimension_numbers<[1], [0], [0], [1], [0, 0, 1, 1], [], []>} : vector<16x256xbf16>, vector<256x128xbf16>, vector<16x128xf32> -> vector<16x128xf32>
    %c0_82 = arith.constant 0 : index
    %c3072 = arith.constant 3072 : index
    %114 = vector.load %arg2[%c0_82, %c3072] : memref<1x3456xf32, #tpu.memory_space<vmem>>, vector<1x128xf32>
    %115 = vector.broadcast %114 : vector<1x128xf32> to vector<16x128xf32>
    %116 = arith.addf %113, %115 : vector<16x128xf32>
    %c4 = arith.constant 4 : index
    %117 = memref.load %arg0[%c4] : memref<6xf32, #tpu.memory_space<smem>>
    %cst_83 = arith.constant 0.000000e+00 : f32
    %118 = vector.broadcast %cst_83 : f32 to vector<16x128xf32>
    %119 = arith.cmpf ogt, %116, %118 : vector<16x128xf32>
    %120 = vector.broadcast %117 : f32 to vector<16x128xf32>
    %121 = arith.mulf %120, %116 : vector<16x128xf32>
    %122 = arith.select %119, %116, %121 : vector<16x128xi1>, vector<16x128xf32>
    %123 = arith.truncf %122 : vector<16x128xf32> to vector<16x128xbf16>
    %c0_84 = arith.constant 0 : index
    %c0_85 = arith.constant 0 : index
    %124 = vector.load %arg8[%c0_84, %c0_85] : memref<128x32xbf16, #tpu.memory_space<vmem>>, vector<128x32xbf16>
    %cst_86 = arith.constant dense<0.000000e+00> : vector<16x32xf32>
    %125 = tpu.matmul %123, %124, %cst_86 {dimension_numbers = #tpu.dot_dimension_numbers<[1], [0], [0], [1], [0, 0, 1, 1], [], []>} : vector<16x128xbf16>, vector<128x32xbf16>, vector<16x32xf32> -> vector<16x32xf32>
    %c0_87 = arith.constant 0 : index
    %c3200 = arith.constant 3200 : index
    %126 = vector.load %arg2[%c0_87, %c3200] : memref<1x3456xf32, #tpu.memory_space<vmem>>, vector<1x32xf32>
    %127 = vector.broadcast %126 : vector<1x32xf32> to vector<16x32xf32>
    %128 = arith.addf %125, %127 : vector<16x32xf32>
    %c5 = arith.constant 5 : index
    %129 = memref.load %arg0[%c5] : memref<6xf32, #tpu.memory_space<smem>>
    %cst_88 = arith.constant 0.000000e+00 : f32
    %130 = vector.broadcast %cst_88 : f32 to vector<16x32xf32>
    %131 = arith.cmpf ogt, %128, %130 : vector<16x32xf32>
    %132 = vector.broadcast %129 : f32 to vector<16x32xf32>
    %133 = arith.mulf %132, %128 : vector<16x32xf32>
    %134 = arith.select %131, %128, %133 : vector<16x32xi1>, vector<16x32xf32>
    %135 = arith.truncf %134 : vector<16x32xf32> to vector<16x32xbf16>
    %c0_89 = arith.constant 0 : index
    %c0_90 = arith.constant 0 : index
    %136 = vector.load %arg9[%c0_89, %c0_90] : memref<32x2xbf16, #tpu.memory_space<vmem>>, vector<32x2xbf16>
    %cst_91 = arith.constant dense<0.000000e+00> : vector<16x2xf32>
    %137 = tpu.matmul %135, %136, %cst_91 {dimension_numbers = #tpu.dot_dimension_numbers<[1], [0], [0], [1], [0, 0, 1, 1], [], []>} : vector<16x32xbf16>, vector<32x2xbf16>, vector<16x2xf32> -> vector<16x2xf32>
    %c0_92 = arith.constant 0 : index
    %c3328 = arith.constant 3328 : index
    %138 = vector.load %arg2[%c0_92, %c3328] : memref<1x3456xf32, #tpu.memory_space<vmem>>, vector<1x2xf32>
    %139 = vector.broadcast %138 : vector<1x2xf32> to vector<16x2xf32>
    %140 = arith.addf %137, %139 : vector<16x2xf32>
    %c0_93 = arith.constant 0 : index
    %c0_94 = arith.constant 0 : index
    %141 = vector.load %arg10[%c0_93, %c0_94] : memref<16x2xf32, #tpu.memory_space<vmem>>, vector<16x2xf32>
    tpu.vector_store %arg10[%c0_93, %c0_94], %140 {strides = array<i32>} : memref<16x2xf32, #tpu.memory_space<vmem>>, vector<16x2xf32>,
    return
  }
}

</mosaic_0001>

<bundles_post_ra>
// kernel: tpu_custom_call.1
= control target key start
LH: loop header
LB: loop body
LE: loop exit
PB: predicated region body
PF: predicated region fallthrough
CT: control target
= control target key end

     0   :  { %15 = vsyncpa [#allocation6], 0  ;;  %s10528_s0 = inlined_call_operand.hbm [shape: f32[6], index: 0, kind: input, shape index: {}]   ;;  %s10529_s1 = inlined_call_operand.vmem [shape: f32[16,4], index: 1, kind: input, shape index: {}]   ;;  %s10530_s2 = inlined_call_operand.hbm [shape: f32[1,3456], index: 2, kind: input, shape index: {}]   ;;  %s10531_s3 = inlined_call_operand.hbm [shape: bf16[4,2048], index: 3, kind: input, shape index: {}]   ;;  %s10532_s4 = inlined_call_operand.hbm [shape: bf16[2048,512], index: 4, kind: input, shape index: {}]   ;;  %s10533_s5 = inlined_call_operand.hbm [shape: bf16[512,256], index: 5, kind: input, shape index: {}]   ;;  %s10534_s6 = inlined_call_operand.hbm [shape: bf16[256,256], index: 6, kind: input, shape index: {}]   ;;  %s10535_s7 = inlined_call_operand.hbm [shape: bf16[256,128], index: 7, kind: input, shape index: {}]   ;;  %s10536_s8 = inlined_call_operand.vmem [shape: bf16[128,32], index: 8, kind: input, shape index: {}]   ;;  %s10537_s9 = inlined_call_operand.vmem [shape: bf16[32,2], index: 9, kind: input, shape index: {}]   ;;  %s10538_s10 = inlined_call_operand.vmem [shape: f32[16,2], index: 10, kind: output, shape index: {}]  }
   0x1   :  { %16 = vsyncpa [#allocation5], 0 }
   0x2   :  { %17 = vsyncpa [#allocation9], 0  ;;  %s46_s15 = sshll.u32 %s10531_s3, 4  ;;  %s47_s15 = int_to_ptr.hbm [resolvable:$true] %s46_s15 }
   0x3   :  { %18 = vsyncpa [#allocation12], 0  ;;  %s9226_s16 = smov [#allocation8]   ;;  %s69_s20 = sshll.u32 %s10534_s6, 4  ;;  %s70_s20 = int_to_ptr.hbm [resolvable:$true] %s69_s20 }
   0x4   :  { %s48_s17 = sshll.u32 %s9226_s16, 4  ;;  %s9227_s21 = smov [#allocation11]   ;;  %s49_s17 = int_to_ptr.vmem [resolvable:$true] %s48_s17 }
   0x5   :  { %51 = dma.hbm_to_vmem [thread:$0]  %s47_s15, 512, %s49_s17, [#allocation9]  }
   0x6   :  { %s71_s22 = sshll.u32 %s9227_s21, 4  ;;  %s24_s25 = sshll.u32 %s10528_s0, 4  ;;  %s72_s22 = int_to_ptr.vmem [resolvable:$true] %s71_s22  ;;  %s25_s25 = int_to_ptr.hbm [resolvable:$true] %s24_s25 }
   0x7   :  { %s9228_s3 = smov 128   ;;  %s9229_s26 = smov 8  }
   0x8   :  { %77 = dma.hbm_to_vmem [thread:$0]  %s70_s20, 4096, %s72_s22, [#allocation12], %s9228_s3, %s9228_s3, %s9229_s26  }
   0x9   :  { %s35_s29 = sshll.u32 %s10530_s2, 4  ;;  %s9230_s30 = smov [#allocation4]   ;;  %s36_s29 = int_to_ptr.hbm [resolvable:$true] %s35_s29 }
   0xa   :  { %27 = dma.hbm_to_smem %s25_s25, 16, %s9230_s30, [#allocation6]  }
   0xb   :  { %s9231_s6 = smov [#allocation7]   ;;  %s56_s14 = sshll.u32 %s10533_s5, 4  ;;  %s57_s14 = int_to_ptr.hbm [resolvable:$true] %s56_s14 }
   0xc   :  { %s37_s11 = sshll.u32 %s9231_s6, 4  ;;  %s82_s16 = sshll.u32 %s10535_s7, 4  ;;  %s38_s11 = int_to_ptr.vmem [resolvable:$true] %s37_s11  ;;  %s83_s16 = int_to_ptr.hbm [resolvable:$true] %s82_s16 }
   0xd   :  { %40 = dma.hbm_to_vmem [thread:$0]  %s36_s29, 432, %s38_s11, [#allocation5]  }
   0xe   :  { %s9232_s17 = smov [#allocation10]   ;;  %s9233_s2 = smov [#allocation13]  }
   0xf   :  { %s58_s18 = sshll.u32 %s9232_s17, 4  ;;  %s84_s19 = sshll.u32 %s9233_s2, 4  ;;  %s59_s18 = int_to_ptr.vmem [resolvable:$true] %s58_s18  ;;  %s85_s19 = int_to_ptr.vmem [resolvable:$true] %s84_s19 }
  0x10   :  { %64 = dma.hbm_to_vmem [thread:$0]  %s57_s14, 8192, %s59_s18, [#allocation9], %s9228_s3, %s9228_s3, %s9229_s26  }
  0x11   :  { %s9234_s20 = smov 64   ;;  %s9235_s21 = smov 4  }
  0x12   :  { %90 = dma.hbm_to_vmem [thread:$0]  %s83_s16, 2048, %s85_s19, [#allocation12], %s9234_s20, %s9234_s20, %s9235_s21  }
  0x13   :  { %9210 = dma.done.wait [#allocation6], 16  }
  0x14   :  { %9211 = vsyncadd [#allocation6], 4294967280 }
  0x15   :  { %9212 = dma.done.wait [#allocation5], 432  }
  0x16   :  { %9213 = vsyncadd [#allocation5], 4294966864 }
  0x17   :  { %9214 = dma.done.wait [#allocation9], 8704  }
  0x18   :  { %9215 = vsyncadd [#allocation9], 4294958592 }
  0x19   :  { %9216 = dma.done.wait [#allocation12], 6144  }
  0x1a   :  { %9217 = vsyncadd [#allocation12], 4294961152 }
  0x1b   :  { %119 = sfence }
  0x1c   :  { %v137_v0 = vld [vmem:[#allocation8] sm:$0xff]  ;;  %v138_v1 = vld [vmem:[#allocation8 + $0x8] sm:$0xff]  ;;  %vm206_vm0 = vcmask 1041408   ;;  %v139_v4 = vld [vmem:[#allocation8 + $0x10] sm:$0xff]  ;;  %vm202_vm1 = vcmask 31744   ;;  %s128_s25 = sshll.u32 %s10532_s4, 4  ;;  %s129_s25 = int_to_ptr.hbm [resolvable:$true] %s128_s25 }
  0x1d   :  { %178 = vst [vmem:[#allocation1] ss:$4 sm:$0xff] %v137_v0  ;;  %v134_v2 = vld [vmem:[%s10529_s1] sm:$0xff]  ;;  %v135_v3 = vld [vmem:[%s10529_s1 + $0x8] sm:$0xff]  ;;  %s9236_s3 = smov [#allocation2]   ;;  %s463_s27 = sld [smem:[#allocation4]] }
  0x1e   :  { %181 = vst [vmem:[#allocation1 + $0x20] ss:$4 sm:$0xff] %v138_v1  ;;  %v9319_v10 = vpack.c.bf16 %v135_v3, %v134_v2  ;;  %v140_v17 = vld [vmem:[#allocation8 + $0x18] sm:$0xff]  ;;  %s9370_s26 = sshll.u32 %s9236_s3, 4  ;;  %v9375_v39 = vld [vmem:[#allocation7] sm:$0xff]  ;;  %s131_s26 = int_to_ptr.vmem [resolvable:$true] %s9370_s26 }
  0x1f   :  { %133 = dma.hbm_to_vmem [thread:$0]  %s129_s25, 16384, %s131_s26, [#allocation3]  ;;  %v145_v40 = vperm.slane %v9375_v39, 0  ;;  %v146_v41 = vperm.slane %v9375_v39, 1  ;;  %v147_v49 = vperm.slane %v9375_v39, 2  ;;  %v148_v52 = vperm.slane %v9375_v39, 3 }
  0x23   :  { %v9379_v43 = vstv %s463_s27 }
  0x24   :  { %v182_v5 = vld.sshfl [vmem:[#allocation1] sm:$0xff pattern:$0x73625140]  ;;  %v183_v6 = vld.sshfl [vmem:[#allocation1 + $0x8] sm:$0xff pattern:$0x73625140] }
  0x25   :  { %v207_v7 = vsel %vm206_vm0, %v182_v5, 0  ;;  %v209_v8 = vsel %vm206_vm0, %v183_v6, 0  ;;  %v184_v9 = vld.sshfl [vmem:[#allocation1 + $0x10] sm:$0xff pattern:$0x73625140]  ;;  %v150_v6 = vperm.slane %v9375_v39, 5 }
  0x26   :  { %246 = vmatpush.bf16.msra.mxu0 %v207_v7  ;;  %260 = vmatpush.bf16.msra.mxu1 %v209_v8  ;;  %v211_v11 = vsel %vm206_vm0, %v184_v9, 0  ;;  %v185_v12 = vld.sshfl [vmem:[#allocation1 + $0x18] sm:$0xff pattern:$0x73625140] }
  0x27   :  { %274 = vmatpush.bf16.msra.mxu2 %v211_v11  ;;  %191 = vst [vmem:[#allocation1] ss:$4 sm:$0xff] %v139_v4  ;;  %v213_v13 = vsel %vm206_vm0, %v185_v12, 0  ;;  %v188_v14 = vld.sshfl [vmem:[#allocation1 + $0x30] sm:$0xff pattern:$0x73625140] }
  0x28   :  { %288 = vmatpush.bf16.msra.mxu3 %v213_v13  ;;  %v219_v15 = vsel %vm206_vm0, %v188_v14, 0  ;;  %v189_v16 = vld.sshfl [vmem:[#allocation1 + $0x38] sm:$0xff pattern:$0x73625140]  ;;  %v149_v4 = vperm.slane %v9375_v39, 4 }
  0x29   :  { %5773 = vmatmul.msk.bf16.vlgmr.msra.gmra.mxu0 %vm202_vm1, %v9319_v10  ;;  %5774 = vmatmul.msk.bf16.vlgmr.msra.gmra.mxu1 %vm202_vm1, %v9319_v10  ;;  %v221_v18 = vsel %vm206_vm0, %v189_v16, 0  ;;  %v186_v19 = vld.sshfl [vmem:[#allocation1 + $0x20] sm:$0xff pattern:$0x73625140] }
  0x2a   :  { %5775 = vmatmul.msk.bf16.vlgmr.msra.gmra.mxu2 %vm202_vm1, %v9319_v10  ;;  %v215_v20 = vsel %vm206_vm0, %v186_v19, 0  ;;  %v187_v21 = vld.sshfl [vmem:[#allocation1 + $0x28] sm:$0xff pattern:$0x73625140] }
  0x2b   :  { %5776 = vmatmul.msk.bf16.vlgmr.msra.gmra.mxu3 %vm202_vm1, %v9319_v10  ;;  %330 = vmatpush.bf16.msrb.mxu2 %v219_v15  ;;  %193 = vst [vmem:[#allocation1 + $0x20] ss:$4 sm:$0xff] %v140_v17  ;;  %v217_v22 = vsel %vm206_vm0, %v187_v21, 0 }
  0x2c   :  { %344 = vmatpush.bf16.msrb.mxu3 %v221_v18  ;;  %302 = vmatpush.bf16.msrb.mxu0 %v215_v20  ;;  %v151_v20 = vperm.slane %v9375_v39, 6 }
  0x2d   :  { %316 = vmatpush.bf16.msrb.mxu1 %v217_v22 }
  0x2e   :  { %v196_v23 = vld.sshfl [vmem:[#allocation1 + $0x10] sm:$0xff pattern:$0x73625140]  ;;  %v197_v24 = vld.sshfl [vmem:[#allocation1 + $0x18] sm:$0xff pattern:$0x73625140] }
  0x2f   :  { %v227_v25 = vsel %vm206_vm0, %v196_v23, 0  ;;  %v229_v26 = vsel %vm206_vm0, %v197_v24, 0  ;;  %v194_v27 = vld.sshfl [vmem:[#allocation1] sm:$0xff pattern:$0x73625140]  ;;  %v152_v23 = vperm.slane %v9375_v39, 7 }
  0x30   :  { %386 = vmatpush.bf16.msra.mxu2 %v227_v25  ;;  %400 = vmatpush.bf16.msra.mxu3 %v229_v26  ;;  %v223_v28 = vsel %vm206_vm0, %v194_v27, 0  ;;  %v195_v29 = vld.sshfl [vmem:[#allocation1 + $0x8] sm:$0xff pattern:$0x73625140] }
  0x31   :  { %358 = vmatpush.bf16.msra.mxu0 %v223_v28  ;;  %v225_v30 = vsel %vm206_vm0, %v195_v29, 0 }
  0x32   :  { %372 = vmatpush.bf16.msra.mxu1 %v225_v30  ;;  %v198_v31 = vld.sshfl [vmem:[#allocation1 + $0x20] sm:$0xff pattern:$0x73625140]  ;;  %v200_v32 = vld.sshfl [vmem:[#allocation1 + $0x30] sm:$0xff pattern:$0x73625140] }
  0x33   :  { %v201_v33 = vld.sshfl [vmem:[#allocation1 + $0x38] sm:$0xff pattern:$0x73625140]  ;;  %v199_v34 = vld.sshfl [vmem:[#allocation1 + $0x28] sm:$0xff pattern:$0x73625140] }
  0x34   :  { %v231_v35 = vsel %vm206_vm0, %v198_v31, 0  ;;  %v235_v36 = vsel %vm206_vm0, %v200_v32, 0  ;;  %v237_v37 = vsel %vm206_vm0, %v201_v33, 0  ;;  %v233_v38 = vsel %vm206_vm0, %v199_v34, 0  ;;  %v9418_v34 = vld [vmem:[#allocation7 + $0x8] sm:$0xff] }
  0x39   :  { %5777 = vmatmul.msk.bf16.vlgmr.msrb.gmra.mxu0 %vm202_vm1, %v9319_v10  ;;  %5778 = vmatmul.msk.bf16.vlgmr.msrb.gmra.mxu1 %vm202_vm1, %v9319_v10 }
  0x3a   :  { %5779 = vmatmul.msk.bf16.vlgmr.msrb.gmra.mxu2 %vm202_vm1, %v9319_v10  ;;  %414 = vmatpush.bf16.msrb.mxu0 %v231_v35 }
  0x3b   :  { %5780 = vmatmul.msk.bf16.vlgmr.msrb.gmra.mxu3 %vm202_vm1, %v9319_v10  ;;  %442 = vmatpush.bf16.msrb.mxu2 %v235_v36 }
  0x3c   :  { %456 = vmatpush.bf16.msrb.mxu3 %v237_v37  ;;  %428 = vmatpush.bf16.msrb.mxu1 %v233_v38 }
  0x49   :  { %5781 = vmatmul.msk.bf16.vlgmr.msra.gmra.mxu0 %vm202_vm1, %v9319_v10  ;;  %5782 = vmatmul.msk.bf16.vlgmr.msra.gmra.mxu1 %vm202_vm1, %v9319_v10 }
  0x4a   :  { %5783 = vmatmul.msk.bf16.vlgmr.msra.gmra.mxu2 %vm202_vm1, %v9319_v10 }
  0x4b   :  { %5784 = vmatmul.msk.bf16.vlgmr.msra.gmra.mxu3 %vm202_vm1, %v9319_v10 }
  0x59   :  { %5785 = vmatmul.msk.bf16.vlgmr.msrb.gmra.mxu0 %vm202_vm1, %v9319_v10  ;;  %5786 = vmatmul.msk.bf16.vlgmr.msrb.gmra.mxu1 %vm202_vm1, %v9319_v10 }
  0x5a   :  { %5787 = vmatmul.msk.bf16.vlgmr.msrb.gmra.mxu2 %vm202_vm1, %v9319_v10 }
  0x5b   :  { %5788 = vmatmul.msk.bf16.vlgmr.msrb.gmra.mxu3 %vm202_vm1, %v9319_v10 }
  0xa6   :  { %v248_v42 = vpop.f32.mrf.mxu0  ;;  %v262_v44 = vpop.f32.mrf.mxu1 }
  0xa7   :  { %v249_v45 = vadd.f32 %v248_v42, %v145_v40  ;;  %v263_v46 = vadd.f32 %v262_v44, %v146_v41  ;;  %v154_v44 = vperm.slane %v9418_v34, 1 }
  0xa9   :  { %vm464_vm2 = vcmp.gt.f32.partialorder %v249_v45, 0.0  ;;  %v497_v47 = vmul.f32 %v9379_v43, %v249_v45  ;;  %vm465_vm3 = vcmp.gt.f32.partialorder %v263_v46, 0.0  ;;  %v498_v48 = vmul.f32 %v9379_v43, %v263_v46 }
  0xab   :  { %v9384_v50 = vsel %vm464_vm2, %v249_v45, %v497_v47  ;;  %v9386_v51 = vsel %vm465_vm3, %v263_v46, %v498_v48 }
  0xad   :  { %v276_v53 = vpop.f32.mrf.mxu2 }
  0xae   :  { %v277_v54 = vadd.f32 %v276_v53, %v147_v49  ;;  %v290_v55 = vpop.f32.mrf.mxu3  ;;  %v250_v56 = vpop.f32.mrf.mxu0 }
  0xaf   :  { %v291_v57 = vadd.f32 %v290_v55, %v148_v52  ;;  %v251_v58 = vadd.f32 %v250_v56, %v145_v40  ;;  %v264_v59 = vpop.f32.mrf.mxu1 }
  0xb0   :  { %vm466_vm4 = vcmp.gt.f32.partialorder %v277_v54, 0.0  ;;  %v499_v60 = vmul.f32 %v9379_v43, %v277_v54  ;;  %v265_v61 = vadd.f32 %v264_v59, %v146_v41  ;;  %v153_v41 = vperm.slane %v9418_v34, 0 }
  0xb1   :  { %vm467_vm5 = vcmp.gt.f32.partialorder %v291_v57, 0.0  ;;  %v500_v62 = vmul.f32 %v9379_v43, %v291_v57  ;;  %vm480_vm6 = vcmp.gt.f32.partialorder %v251_v58, 0.0  ;;  %v513_v63 = vmul.f32 %v9379_v43, %v251_v58 }
  0xb2   :  { %v9392_v0 = vsel %vm466_vm4, %v277_v54, %v499_v60  ;;  %vm481_vm7 = vcmp.gt.f32.partialorder %v265_v61, 0.0  ;;  %v514_v1 = vmul.f32 %v9379_v43, %v265_v61  ;;  %v155_v60 = vperm.slane %v9418_v34, 2 }
  0xb3   :  { %v9395_v2 = vsel %vm467_vm5, %v291_v57, %v500_v62  ;;  %v9397_v3 = vsel %vm480_vm6, %v251_v58, %v513_v63  ;;  %v156_v63 = vperm.slane %v9418_v34, 3 }
  0xb4   :  { %v9400_v5 = vsel %vm481_vm7, %v265_v61, %v514_v1 }
  0xb5   :  { %v278_v7 = vpop.f32.mrf.mxu2 }
  0xb6   :  { %v279_v8 = vadd.f32 %v278_v7, %v147_v49  ;;  %v292_v9 = vpop.f32.mrf.mxu3  ;;  %v304_v10 = vpop.f32.mrf.mxu0 }
  0xb7   :  { %v293_v11 = vadd.f32 %v292_v9, %v148_v52  ;;  %v305_v12 = vadd.f32 %v304_v10, %v149_v4  ;;  %v318_v13 = vpop.f32.mrf.mxu1 }
  0xb8   :  { %vm482_vm8 = vcmp.gt.f32.partialorder %v279_v8, 0.0  ;;  %v515_v14 = vmul.f32 %v9379_v43, %v279_v8  ;;  %v319_v15 = vadd.f32 %v318_v13, %v150_v6 }
  0xb9   :  { %vm483_vm9 = vcmp.gt.f32.partialorder %v293_v11, 0.0  ;;  %v516_v16 = vmul.f32 %v9379_v43, %v293_v11  ;;  %vm468_vm10 = vcmp.gt.f32.partialorder %v305_v12, 0.0  ;;  %v501_v17 = vmul.f32 %v9379_v43, %v305_v12 }
  0xba   :  { %v9406_v18 = vsel %vm482_vm8, %v279_v8, %v515_v14  ;;  %vm469_vm11 = vcmp.gt.f32.partialorder %v319_v15, 0.0  ;;  %v502_v19 = vmul.f32 %v9379_v43, %v319_v15 }
  0xbb   :  { %v9410_v21 = vsel %vm483_vm9, %v293_v11, %v516_v16  ;;  %v9412_v22 = vsel %vm468_vm10, %v305_v12, %v501_v17 }
  0xbc   :  { %v9415_v24 = vsel %vm469_vm11, %v319_v15, %v502_v19 }
  0xbd   :  { %v332_v25 = vpop.f32.mrf.mxu2 }
  0xbe   :  { %v333_v26 = vadd.f32 %v332_v25, %v151_v20  ;;  %v346_v27 = vpop.f32.mrf.mxu3  ;;  %v306_v28 = vpop.f32.mrf.mxu0 }
  0xbf   :  { %v347_v29 = vadd.f32 %v346_v27, %v152_v23  ;;  %v307_v30 = vadd.f32 %v306_v28, %v149_v4  ;;  %v320_v31 = vpop.f32.mrf.mxu1 }
  0xc0   :  { %vm470_vm12 = vcmp.gt.f32.partialorder %v333_v26, 0.0  ;;  %v503_v32 = vmul.f32 %v9379_v43, %v333_v26  ;;  %v321_v33 = vadd.f32 %v320_v31, %v150_v6 }
  0xc1   :  { %vm471_vm13 = vcmp.gt.f32.partialorder %v347_v29, 0.0  ;;  %v504_v35 = vmul.f32 %v9379_v43, %v347_v29  ;;  %vm484_vm14 = vcmp.gt.f32.partialorder %v307_v30, 0.0  ;;  %v517_v36 = vmul.f32 %v9379_v43, %v307_v30 }
  0xc2   :  { %v9422_v37 = vsel %vm470_vm12, %v333_v26, %v503_v32  ;;  %vm485_vm15 = vcmp.gt.f32.partialorder %v321_v33, 0.0  ;;  %v518_v38 = vmul.f32 %v9379_v43, %v321_v33  ;;  %v158_v26 = vperm.slane %v9418_v34, 5 }
  0xc3   :  { %v9425_v39 = vsel %vm471_vm13, %v347_v29, %v504_v35  ;;  %v9427_v40 = vsel %vm484_vm14, %v307_v30, %v517_v36 }
  0xc4   :  { %v9430_v42 = vsel %vm485_vm15, %v321_v33, %v518_v38 }
  0xc5   :  { %v334_v45 = vpop.f32.mrf.mxu2 }
  0xc6   :  { %v335_v46 = vadd.f32 %v334_v45, %v151_v20  ;;  %v348_v47 = vpop.f32.mrf.mxu3  ;;  %v360_v48 = vpop.f32.mrf.mxu0 }
  0xc7   :  { %v349_v49 = vadd.f32 %v348_v47, %v152_v23  ;;  %v361_v52 = vadd.f32 %v360_v48, %v153_v41  ;;  %v374_v53 = vpop.f32.mrf.mxu1  ;;  %v157_v23 = vperm.slane %v9418_v34, 4 }
  0xc8   :  { %vm486_vm0 = vcmp.gt.f32.partialorder %v335_v46, 0.0  ;;  %v519_v54 = vmul.f32 %v9379_v43, %v335_v46  ;;  %v375_v55 = vadd.f32 %v374_v53, %v154_v44 }
  0xc9   :  { %vm487_vm1 = vcmp.gt.f32.partialorder %v349_v49, 0.0  ;;  %v520_v56 = vmul.f32 %v9379_v43, %v349_v49  ;;  %vm472_vm2 = vcmp.gt.f32.partialorder %v361_v52, 0.0  ;;  %v505_v57 = vmul.f32 %v9379_v43, %v361_v52 }
  0xca   :  { %v9436_v58 = vsel %vm486_vm0, %v335_v46, %v519_v54  ;;  %vm473_vm3 = vcmp.gt.f32.partialorder %v375_v55, 0.0  ;;  %v506_v59 = vmul.f32 %v9379_v43, %v375_v55  ;;  %v159_v46 = vperm.slane %v9418_v34, 6 }
  0xcb   :  { %v9440_v61 = vsel %vm487_vm1, %v349_v49, %v520_v56  ;;  %v9442_v62 = vsel %vm472_vm2, %v361_v52, %v505_v57  ;;  %v160_v49 = vperm.slane %v9418_v34, 7 }
  0xcc   :  { %10543 = vst [vmem:[#allocation32_spill] sm:$0xff] %v9442_v62  ;;  %v9445_v1 = vsel %vm473_vm3, %v375_v55, %v506_v59 }
  0xcd   :  { %10544 = vst [vmem:[#allocation33_spill] sm:$0xff] %v9445_v1  ;;  %v388_v4 = vpop.f32.mrf.mxu2 }
  0xce   :  { %v389_v6 = vadd.f32 %v388_v4, %v155_v60  ;;  %v402_v7 = vpop.f32.mrf.mxu3  ;;  %v362_v8 = vpop.f32.mrf.mxu0 }
  0xcf   :  { %v403_v9 = vadd.f32 %v402_v7, %v156_v63  ;;  %v363_v10 = vadd.f32 %v362_v8, %v153_v41  ;;  %v376_v11 = vpop.f32.mrf.mxu1 }
  0xd0   :  { %vm474_vm4 = vcmp.gt.f32.partialorder %v389_v6, 0.0  ;;  %v507_v12 = vmul.f32 %v9379_v43, %v389_v6  ;;  %v377_v13 = vadd.f32 %v376_v11, %v154_v44 }
  0xd1   :  { %vm475_vm5 = vcmp.gt.f32.partialorder %v403_v9, 0.0  ;;  %v508_v14 = vmul.f32 %v9379_v43, %v403_v9  ;;  %vm488_vm6 = vcmp.gt.f32.partialorder %v363_v10, 0.0  ;;  %v521_v15 = vmul.f32 %v9379_v43, %v363_v10 }
  0xd2   :  { %v9450_v16 = vsel %vm474_vm4, %v389_v6, %v507_v12  ;;  %vm489_vm7 = vcmp.gt.f32.partialorder %v377_v13, 0.0  ;;  %v522_v17 = vmul.f32 %v9379_v43, %v377_v13 }
  0xd3   :  { %10545 = vst [vmem:[#allocation34_spill] sm:$0xff] %v9450_v16  ;;  %v9453_v19 = vsel %vm475_vm5, %v403_v9, %v508_v14  ;;  %v9455_v20 = vsel %vm488_vm6, %v363_v10, %v521_v15 }
  0xd4   :  { %10546 = vst [vmem:[#allocation35_spill] sm:$0xff] %v9453_v19  ;;  %v9458_v25 = vsel %vm489_vm7, %v377_v13, %v522_v17 }
  0xd5   :  { %10547 = vst [vmem:[#allocation36_spill] sm:$0xff] %v9455_v20  ;;  %v390_v27 = vpop.f32.mrf.mxu2 }
  0xd6   :  { %10548 = vst [vmem:[#allocation37_spill] sm:$0xff] %v9458_v25  ;;  %v391_v28 = vadd.f32 %v390_v27, %v155_v60  ;;  %v404_v29 = vpop.f32.mrf.mxu3  ;;  %v416_v30 = vpop.f32.mrf.mxu0 }
  0xd7   :  { %v405_v31 = vadd.f32 %v404_v29, %v156_v63  ;;  %v417_v32 = vadd.f32 %v416_v30, %v157_v23  ;;  %v430_v33 = vpop.f32.mrf.mxu1 }
  0xd8   :  { %vm490_vm8 = vcmp.gt.f32.partialorder %v391_v28, 0.0  ;;  %v523_v35 = vmul.f32 %v9379_v43, %v391_v28  ;;  %v431_v36 = vadd.f32 %v430_v33, %v158_v26 }
  0xd9   :  { %vm491_vm9 = vcmp.gt.f32.partialorder %v405_v31, 0.0  ;;  %v524_v38 = vmul.f32 %v9379_v43, %v405_v31  ;;  %vm476_vm10 = vcmp.gt.f32.partialorder %v417_v32, 0.0  ;;  %v509_v41 = vmul.f32 %v9379_v43, %v417_v32 }
  0xda   :  { %v9464_v44 = vsel %vm490_vm8, %v391_v28, %v523_v35  ;;  %vm477_vm11 = vcmp.gt.f32.partialorder %v431_v36, 0.0  ;;  %v510_v45 = vmul.f32 %v9379_v43, %v431_v36 }
  0xdb   :  { %10549 = vst [vmem:[#allocation38_spill] sm:$0xff] %v9464_v44  ;;  %v9468_v47 = vsel %vm491_vm9, %v405_v31, %v524_v38  ;;  %v9470_v48 = vsel %vm476_vm10, %v417_v32, %v509_v41 }
  0xdc   :  { %10550 = vst [vmem:[#allocation39_spill] sm:$0xff] %v9468_v47  ;;  %v9473_v52 = vsel %vm477_vm11, %v431_v36, %v510_v45 }
  0xdd   :  { %10551 = vst [vmem:[#allocation40_spill] sm:$0xff] %v9470_v48  ;;  %v444_v53 = vpop.f32.mrf.mxu2 }
  0xde   :  { %10552 = vst [vmem:[#allocation41_spill] sm:$0xff] %v9473_v52  ;;  %v445_v54 = vadd.f32 %v444_v53, %v159_v46  ;;  %v458_v55 = vpop.f32.mrf.mxu3  ;;  %v418_v56 = vpop.f32.mrf.mxu0 }
  0xdf   :  { %v459_v57 = vadd.f32 %v458_v55, %v160_v49  ;;  %v419_v59 = vadd.f32 %v418_v56, %v157_v23  ;;  %v432_v60 = vpop.f32.mrf.mxu1 }
  0xe0   :  { %vm478_vm12 = vcmp.gt.f32.partialorder %v445_v54, 0.0  ;;  %v511_v63 = vmul.f32 %v9379_v43, %v445_v54  ;;  %v433_v4 = vadd.f32 %v432_v60, %v158_v26 }
  0xe1   :  { %vm479_vm13 = vcmp.gt.f32.partialorder %v459_v57, 0.0  ;;  %v512_v6 = vmul.f32 %v9379_v43, %v459_v57  ;;  %vm492_vm14 = vcmp.gt.f32.partialorder %v419_v59, 0.0  ;;  %v525_v7 = vmul.f32 %v9379_v43, %v419_v59 }
  0xe2   :  { %v9478_v34 = vsel %vm478_vm12, %v445_v54, %v511_v63  ;;  %vm493_vm15 = vcmp.gt.f32.partialorder %v433_v4, 0.0  ;;  %v526_v8 = vmul.f32 %v9379_v43, %v433_v4 }
  0xe3   :  { %10553 = vst [vmem:[#allocation42_spill] sm:$0xff] %v9478_v34  ;;  %v9481_v9 = vsel %vm479_vm13, %v459_v57, %v512_v6  ;;  %v9483_v10 = vsel %vm492_vm14, %v419_v59, %v525_v7 }
  0xe4   :  { %10554 = vst [vmem:[#allocation43_spill] sm:$0xff] %v9481_v9  ;;  %v9485_v11 = vsel %vm493_vm15, %v433_v4, %v526_v8 }
  0xe5   :  { %10555 = vst [vmem:[#allocation44_spill] sm:$0xff] %v9483_v10  ;;  %v446_v12 = vpop.f32.mrf.mxu2 }
  0xe6   :  { %10556 = vst [vmem:[#allocation45_spill] sm:$0xff] %v9485_v11  ;;  %v447_v13 = vadd.f32 %v446_v12, %v159_v46  ;;  %v460_v14 = vpop.f32.mrf.mxu3 }
  0xe7   :  { %v461_v15 = vadd.f32 %v460_v14, %v160_v49 }
  0xe8   :  { %vm494_vm0 = vcmp.gt.f32.partialorder %v447_v13, 0.0  ;;  %v527_v17 = vmul.f32 %v9379_v43, %v447_v13 }
  0xe9   :  { %vm495_vm1 = vcmp.gt.f32.partialorder %v461_v15, 0.0  ;;  %v528_v23 = vmul.f32 %v9379_v43, %v461_v15 }
  0xea   :  { %v9489_v26 = vsel %vm494_vm0, %v447_v13, %v527_v17 }
  0xeb   :  { %10557 = vst [vmem:[#allocation46_spill] sm:$0xff] %v9489_v26  ;;  %v9491_v27 = vsel %vm495_vm1, %v461_v15, %v528_v23 }
  0xec   :  { %10558 = vst [vmem:[#allocation47_spill] sm:$0xff] %v9491_v27 }
  0xed   :  { %9218 = dma.done.wait [#allocation3], 16384 }
  0xee   :  { %9219 = vsyncadd [#allocation3], 4294950912  ;;  %s565_s30 = scalar_lea.hbm %s10532_s4, 1024  ;;  %v9498_v28 = vpack.c.bf16 %v9397_v3, %v9384_v50  ;;  %v9502_v29 = vpack.c.bf16 %v9400_v5, %v9386_v51  ;;  %v9506_v43 = vpack.c.bf16 %v9406_v18, %v9392_v0  ;;  %v9510_v30 = vpack.c.bf16 %v9410_v21, %v9395_v2  ;;  %s9237_s11 = smov [#allocation2 + $0x400]  }
  0xef   :  { %s575_s6 = sshll.u32 %s565_s30, 4  ;;  %s9512_s12 = sshll.u32 %s9237_s11, 4  ;;  %s576_s6 = int_to_ptr.hbm [resolvable:$true] %s575_s6  ;;  %s578_s12 = int_to_ptr.vmem [resolvable:$true] %s9512_s12 }
  0xf0   :  { %10559 = vst [vmem:[#allocation48_spill] sm:$0xff] %v9498_v28  ;;  %580 = dma.hbm_to_vmem [thread:$0]  %s576_s6, 16384, %s578_s12, [#allocation3 + $0x1] }
  0xf1   :  { %10560 = vst [vmem:[#allocation49_spill] sm:$0xff] %v9502_v29  ;;  %v9517_v50 = vld [vmem:[#allocation2 + $0x4] sm:$0xf]  ;;  %v9519_v51 = vld [vmem:[#allocation2] sm:$0xf] }
  0xf2   :  { %10561 = vst [vmem:[#allocation50_spill] sm:$0xff] %v9506_v43  ;;  %v9521_v0 = vld [vmem:[#allocation2 + $0xc] sm:$0xf]  ;;  %v9523_v3 = vld [vmem:[#allocation2 + $0x8] sm:$0xf] }
  0xf3   :  { %10562 = vst [vmem:[#allocation51_spill] sm:$0xff] %v9510_v30  ;;  %v9525_v2 = vld [vmem:[#allocation2 + $0x10] sm:$0xf0]  ;;  %v9527_v5 = vld [vmem:[#allocation2 + $0xc] sm:$0xf0] }
  0xf4   :  { %10563 = vst [vmem:[#allocation52_spill] sm:$0xff] %v9517_v50  ;;  %v9529_v18 = vld [vmem:[#allocation2 + $0x18] sm:$0xf0]  ;;  %v9531_v21 = vld [vmem:[#allocation2 + $0x14] sm:$0xf0] }
  0xf5   :  { %10564 = vst [vmem:[#allocation53_spill] sm:$0xff] %v9519_v51  ;;  %v9533_v31 = vld [vmem:[#allocation2 + $0x24] sm:$0xf]  ;;  %v9535_v32 = vld [vmem:[#allocation2 + $0x20] sm:$0xf] }
  0xf6   :  { %10565 = vst [vmem:[#allocation54_spill] sm:$0xff] %v9521_v0  ;;  %v9537_v33 = vld [vmem:[#allocation2 + $0x2c] sm:$0xf]  ;;  %v9539_v35 = vld [vmem:[#allocation2 + $0x28] sm:$0xf] }
  0xf7   :  { %10566 = vst [vmem:[#allocation55_spill] sm:$0xff] %v9523_v3  ;;  %v9541_v36 = vld [vmem:[#allocation2 + $0x30] sm:$0xf0]  ;;  %v9543_v38 = vld [vmem:[#allocation2 + $0x2c] sm:$0xf0] }
  0xf8   :  { %10567 = vst [vmem:[#allocation56_spill] sm:$0xff] %v9525_v2  ;;  %v9545_v41 = vld [vmem:[#allocation2 + $0x38] sm:$0xf0]  ;;  %v9547_v45 = vld [vmem:[#allocation2 + $0x34] sm:$0xf0] }
  0xf9   :  { %10568 = vst [vmem:[#allocation57_spill] sm:$0xff] %v9527_v5  ;;  %v9549_v46 = vld [vmem:[#allocation2 + $0x44] sm:$0xf]  ;;  %v9551_v49 = vld [vmem:[#allocation2 + $0x40] sm:$0xf] }
  0xfa   :  { %10569 = vst [vmem:[#allocation58_spill] sm:$0xff] %v9529_v18  ;;  %v9553_v53 = vld [vmem:[#allocation2 + $0x4c] sm:$0xf]  ;;  %v9555_v54 = vld [vmem:[#allocation2 + $0x48] sm:$0xf] }
  0xfb   :  { %10570 = vst [vmem:[#allocation59_spill] sm:$0xff] %v9531_v21  ;;  %v9557_v55 = vld [vmem:[#allocation2 + $0x50] sm:$0xf0]  ;;  %v9559_v56 = vld [vmem:[#allocation2 + $0x4c] sm:$0xf0] }
  0xfc   :  { %10571 = vst [vmem:[#allocation60_spill] sm:$0xff] %v9533_v31  ;;  %v9561_v57 = vld [vmem:[#allocation2 + $0x58] sm:$0xf0]  ;;  %v9563_v59 = vld [vmem:[#allocation2 + $0x54] sm:$0xf0] }
  0xfd   :  { %10572 = vst [vmem:[#allocation61_spill] sm:$0xff] %v9535_v32  ;;  %v9565_v60 = vld [vmem:[#allocation2 + $0x64] sm:$0xf]  ;;  %v9567_v63 = vld [vmem:[#allocation2 + $0x60] sm:$0xf] }
  0xfe   :  { %10573 = vst [vmem:[#allocation62_spill] sm:$0xff] %v9537_v33  ;;  %v9569_v4 = vld [vmem:[#allocation2 + $0x6c] sm:$0xf]  ;;  %v9571_v6 = vld [vmem:[#allocation2 + $0x68] sm:$0xf] }
  0xff   :  { %10574 = vst [vmem:[#allocation63_spill] sm:$0xff] %v9539_v35  ;;  %v9573_v7 = vld [vmem:[#allocation2 + $0x70] sm:$0xf0]  ;;  %v9575_v8 = vld [vmem:[#allocation2 + $0x6c] sm:$0xf0] }
 0x100   :  { %10575 = vst [vmem:[#allocation64_spill] sm:$0xff] %v9541_v36  ;;  %v9577_v12 = vld [vmem:[#allocation2 + $0x78] sm:$0xf0]  ;;  %v9579_v13 = vld [vmem:[#allocation2 + $0x74] sm:$0xf0] }
 0x101   :  { %10576 = vst [vmem:[#allocation65_spill] sm:$0xff] %v9543_v38  ;;  %v9581_v14 = vld [vmem:[#allocation2 + $0x84] sm:$0xf]  ;;  %v9583_v15 = vld [vmem:[#allocation2 + $0x80] sm:$0xf] }
 0x102   :  { %10577 = vst [vmem:[#allocation66_spill] sm:$0xff] %v9545_v41  ;;  %v9585_v17 = vld [vmem:[#allocation2 + $0x8c] sm:$0xf]  ;;  %v9587_v23 = vld [vmem:[#allocation2 + $0x88] sm:$0xf] }
 0x103   :  { %10578 = vst [vmem:[#allocation67_spill] sm:$0xff] %v9547_v45  ;;  %v9589_v11 = vld [vmem:[#allocation2 + $0x90] sm:$0xf0]  ;;  %v9591_v52 = vld [vmem:[#allocation2 + $0x8c] sm:$0xf0] }
 0x104   :  { %10579 = vst [vmem:[#allocation68_spill] sm:$0xff] %v9549_v46  ;;  %v9593_v10 = vld [vmem:[#allocation2 + $0x98] sm:$0xf0]  ;;  %v9595_v48 = vld [vmem:[#allocation2 + $0x94] sm:$0xf0] }
 0x105   :  { %10580 = vst [vmem:[#allocation69_spill] sm:$0xff] %v9551_v49  ;;  %v9597_v27 = vld [vmem:[#allocation2 + $0xa4] sm:$0xf]  ;;  %v9599_v9 = vld [vmem:[#allocation2 + $0xa0] sm:$0xf] }
 0x106   :  { %10581 = vst [vmem:[#allocation70_spill] sm:$0xff] %v9553_v53  ;;  %v9601_v26 = vld [vmem:[#allocation2 + $0xac] sm:$0xf]  ;;  %v9603_v34 = vld [vmem:[#allocation2 + $0xa8] sm:$0xf] }
 0x107   :  { %10582 = vst [vmem:[#allocation71_spill] sm:$0xff] %v9555_v54  ;;  %v9605_v25 = vld [vmem:[#allocation2 + $0xb0] sm:$0xf0]  ;;  %v9607_v1 = vld [vmem:[#allocation2 + $0xac] sm:$0xf0] }
 0x108   :  { %10583 = vst [vmem:[#allocation72_spill] sm:$0xff] %v9557_v55  ;;  %v9609_v20 = vld [vmem:[#allocation2 + $0xb8] sm:$0xf0]  ;;  %v9611_v62 = vld [vmem:[#allocation2 + $0xb4] sm:$0xf0] }
 0x109   :  { %10584 = vst [vmem:[#allocation73_spill] sm:$0xff] %v9559_v56  ;;  %v9613_v47 = vld [vmem:[#allocation2 + $0xc4] sm:$0xf]  ;;  %v9615_v19 = vld [vmem:[#allocation2 + $0xc0] sm:$0xf] }
 0x10a   :  { %10585 = vst [vmem:[#allocation74_spill] sm:$0xff] %v9561_v57  ;;  %v9617_v44 = vld [vmem:[#allocation2 + $0xcc] sm:$0xf]  ;;  %v9619_v16 = vld [vmem:[#allocation2 + $0xc8] sm:$0xf] }
 0x10b   :  { %10586 = vst [vmem:[#allocation75_spill] sm:$0xff] %v9563_v59  ;;  %v9621_v0 = vld [vmem:[#allocation2 + $0xd0] sm:$0xf0]  ;;  %v9623_v18 = vld [vmem:[#allocation2 + $0xcc] sm:$0xf0] }
 0x10c   :  { %10587 = vst [vmem:[#allocation76_spill] sm:$0xff] %v9565_v60  ;;  %v9625_v33 = vld [vmem:[#allocation2 + $0xd8] sm:$0xf0]  ;;  %v9627_v41 = vld [vmem:[#allocation2 + $0xd4] sm:$0xf0] }
 0x10d   :  { %10588 = vst [vmem:[#allocation77_spill] sm:$0xff] %v9567_v63  ;;  %v9629_v53 = vld [vmem:[#allocation2 + $0xe4] sm:$0xf]  ;;  %v9631_v57 = vld [vmem:[#allocation2 + $0xe0] sm:$0xf] }
 0x10e   :  { %10589 = vst [vmem:[#allocation78_spill] sm:$0xff] %v9569_v4  ;;  %v9633_v4 = vld [vmem:[#allocation2 + $0xec] sm:$0xf]  ;;  %v9651_v3 = vld [vmem:[#allocation2 + $0x108] sm:$0xf] }
 0x10f   :  { %10590 = vst [vmem:[#allocation79_spill] sm:$0xff] %v9571_v6  ;;  %v9649_v21 = vld [vmem:[#allocation2 + $0x10c] sm:$0xf]  ;;  %v9653_v45 = vld [vmem:[#allocation2 + $0x110] sm:$0xf0] }
 0x110   :  { %10591 = vst [vmem:[#allocation80_spill] sm:$0xff] %v9573_v7  ;;  %v9657_v35 = vld [vmem:[#allocation2 + $0x118] sm:$0xf0]  ;;  %v9659_v59 = vld [vmem:[#allocation2 + $0x114] sm:$0xf0] }
 0x111   :  { %10592 = vst [vmem:[#allocation81_spill] sm:$0xff] %v9575_v8  ;;  %v9661_v54 = vld [vmem:[#allocation2 + $0x124] sm:$0xf]  ;;  %v9667_v6 = vld [vmem:[#allocation2 + $0x128] sm:$0xf] }
 0x112   :  { %10593 = vst [vmem:[#allocation82_spill] sm:$0xff] %v9577_v12  ;;  %v9635_v12 = vld [vmem:[#allocation2 + $0xe8] sm:$0xf]  ;;  %v9709_v50 = vld [vmem:[#allocation2 + $0x184] sm:$0xf] }
 0x113   :  { %10594 = vst [vmem:[#allocation83_spill] sm:$0xff] %v9579_v13  ;;  %v9665_v13 = vld [vmem:[#allocation2 + $0x12c] sm:$0xf]  ;;  %v9715_v2 = vld [vmem:[#allocation2 + $0x188] sm:$0xf] }
 0x114   :  { %10595 = vst [vmem:[#allocation84_spill] sm:$0xff] %v9581_v14  ;;  %v9725_v31 = vld [vmem:[#allocation2 + $0x1a4] sm:$0xf]  ;;  %v9731_v36 = vld [vmem:[#allocation2 + $0x1a8] sm:$0xf] }
 0x115   :  { %10596 = vst [vmem:[#allocation85_spill] sm:$0xff] %v9585_v17  ;;  %v9637_v17 = vld [vmem:[#allocation2 + $0xf0] sm:$0xf0]  ;;  %v9741_v46 = vld [vmem:[#allocation2 + $0x1c4] sm:$0xf] }
 0x116   :  { %10597 = vst [vmem:[#allocation86_spill] sm:$0xff] %v9587_v23  ;;  %v9675_v23 = vld [vmem:[#allocation2 + $0x134] sm:$0xf0]  ;;  %v9747_v55 = vld [vmem:[#allocation2 + $0x1c8] sm:$0xf] }
 0x117   :  { %10598 = vst [vmem:[#allocation87_spill] sm:$0xff] %v9589_v11  ;;  %v9757_v60 = vld [vmem:[#allocation2 + $0x1e4] sm:$0xf]  ;;  %v9763_v7 = vld [vmem:[#allocation2 + $0x1e8] sm:$0xf] }
 0x118   :  { %10599 = vst [vmem:[#allocation88_spill] sm:$0xff] %v9591_v52  ;;  %v9773_v14 = vld [vmem:[#allocation2 + $0x204] sm:$0xf]  ;;  %v9779_v11 = vld [vmem:[#allocation2 + $0x208] sm:$0xf] }
 0x119   :  { %10600 = vst [vmem:[#allocation89_spill] sm:$0xff] %v9593_v10  ;;  %v9639_v10 = vld [vmem:[#allocation2 + $0xec] sm:$0xf0]  ;;  %v9805_v30 = vld [vmem:[#allocation2 + $0x244] sm:$0xf] }
 0x11a   :  { %10601 = vst [vmem:[#allocation90_spill] sm:$0xff] %v9595_v48  ;;  %v9669_v48 = vld [vmem:[#allocation2 + $0x130] sm:$0xf0]  ;;  %v9821_v43 = vld [vmem:[#allocation2 + $0x264] sm:$0xf] }
 0x11b   :  { %10602 = vst [vmem:[#allocation91_spill] sm:$0xff] %v9597_v27  ;;  %v9789_v27 = vld [vmem:[#allocation2 + $0x224] sm:$0xf]  ;;  %v9813_v29 = vld [vmem:[#allocation2 + $0x250] sm:$0xf0] }
 0x11c   :  { %10603 = vst [vmem:[#allocation92_spill] sm:$0xff] %v9601_v26  ;;  %v9641_v26 = vld [vmem:[#allocation2 + $0xf8] sm:$0xf0]  ;;  %v9829_v28 = vld [vmem:[#allocation2 + $0x270] sm:$0xf0] }
 0x11d   :  { %10604 = vst [vmem:[#allocation93_spill] sm:$0xff] %v9603_v34  ;;  %v9683_v34 = vld [vmem:[#allocation2 + $0x148] sm:$0xf]  ;;  %v9949_v5 = vld [vmem:[#allocation2 + $0x364] sm:$0xf] }
 0x11e   :  { %10605 = vst [vmem:[#allocation94_spill] sm:$0xff] %v9605_v25  ;;  %v9797_v25 = vld [vmem:[#allocation2 + $0x230] sm:$0xf0]  ;;  %v10013_v38 = vld [vmem:[#allocation2 + $0x3e4] sm:$0xf] }
 0x11f   :  { %10606 = vst [vmem:[#allocation95_spill] sm:$0xff] %v9609_v20  ;;  %v9643_v20 = vld [vmem:[#allocation2 + $0xf4] sm:$0xf0]  ;;  %v9957_v51 = vld [vmem:[#allocation2 + $0x370] sm:$0xf0] }
 0x120   :  { %10607 = vst [vmem:[#allocation96_spill] sm:$0xff] %v9611_v62  ;;  %v9677_v62 = vld [vmem:[#allocation2 + $0x144] sm:$0xf]  ;;  %v10021_v32 = vld [vmem:[#allocation2 + $0x3f0] sm:$0xf0] }
 0x121   :  { %10608 = vst [vmem:[#allocation97_spill] sm:$0xff] %v9613_v47  ;;  %v9853_v47 = vld [vmem:[#allocation2 + $0x2a4] sm:$0xf] }
 0x122   :  { %10609 = vst [vmem:[#allocation98_spill] sm:$0xff] %v9617_v44  ;;  %v9645_v44 = vld [vmem:[#allocation2 + $0x104] sm:$0xf] }
 0x123   :  { %10610 = vst [vmem:[#allocation99_spill] sm:$0xff] %v9619_v16  ;;  %v9691_v16 = vld [vmem:[#allocation2 + $0x154] sm:$0xf0] }
 0x124   :  { %10611 = vst [vmem:[#allocation100_spill] sm:$0xff] %v9621_v0  ;;  %v9861_v0 = vld [vmem:[#allocation2 + $0x2b0] sm:$0xf0] }
 0x125   :  { %10612 = vst [vmem:[#allocation101_spill] sm:$0xff] %v9625_v33  ;;  %v9647_v33 = vld [vmem:[#allocation2 + $0x100] sm:$0xf] }
 0x126   :  { %10613 = vst [vmem:[#allocation102_spill] sm:$0xff] %v9627_v41  ;;  %v9685_v41 = vld [vmem:[#allocation2 + $0x150] sm:$0xf0] }
 0x127   :  { %10614 = vst [vmem:[#allocation103_spill] sm:$0xff] %v9629_v53  ;;  %v9885_v53 = vld [vmem:[#allocation2 + $0x2e4] sm:$0xf] }
 0x128   :  { %10615 = vst [vmem:[#allocation104_spill] sm:$0xff] %v9633_v4  ;;  %v9655_v4 = vld [vmem:[#allocation2 + $0x10c] sm:$0xf0] }
 0x129   :  { %10616 = vst [vmem:[#allocation105_spill] sm:$0xff] %v9635_v12  ;;  %v9699_v12 = vld [vmem:[#allocation2 + $0x168] sm:$0xf] }
 0x12a   :  { %10617 = vst [vmem:[#allocation106_spill] sm:$0xff] %v9637_v17  ;;  %v9893_v17 = vld [vmem:[#allocation2 + $0x2f0] sm:$0xf0] }
 0x12b   :  { %10618 = vst [vmem:[#allocation107_spill] sm:$0xff] %v9641_v26  ;;  %v9663_v26 = vld [vmem:[#allocation2 + $0x120] sm:$0xf] }
 0x12c   :  { %10619 = vst [vmem:[#allocation108_spill] sm:$0xff] %v9643_v20  ;;  %v9693_v20 = vld [vmem:[#allocation2 + $0x164] sm:$0xf] }
 0x12d   :  { %10620 = vst [vmem:[#allocation109_spill] sm:$0xff] %v9645_v44  ;;  %v9701_v44 = vld [vmem:[#allocation2 + $0x170] sm:$0xf0] }
 0x12e   :  { %10621 = vst [vmem:[#allocation110_spill] sm:$0xff] %v9647_v33  ;;  %v9941_v33 = vld [vmem:[#allocation2 + $0x350] sm:$0xf0] }
 0x12f   :  { %10622 = vst [vmem:[#allocation111_spill] sm:$0xff] %v9649_v21  ;;  %v9671_v21 = vld [vmem:[#allocation2 + $0x12c] sm:$0xf0] }
 0x130   :  { %10623 = vst [vmem:[#allocation112_spill] sm:$0xff] %v9651_v3  ;;  %v9673_v3 = vld [vmem:[#allocation2 + $0x138] sm:$0xf0] }
 0x131   :  { %10624 = vst [vmem:[#allocation113_spill] sm:$0xff] %v9653_v45  ;;  %v9707_v45 = vld [vmem:[#allocation2 + $0x174] sm:$0xf0] }
 0x132   :  { %10625 = vst [vmem:[#allocation114_spill] sm:$0xff] %v9655_v4  ;;  %v9917_v4 = vld [vmem:[#allocation2 + $0x324] sm:$0xf] }
 0x133   :  { %10626 = vst [vmem:[#allocation115_spill] sm:$0xff] %v9657_v35  ;;  %v9679_v35 = vld [vmem:[#allocation2 + $0x140] sm:$0xf] }
 0x134   :  { %10627 = vst [vmem:[#allocation116_spill] sm:$0xff] %v9659_v59  ;;  %v9681_v59 = vld [vmem:[#allocation2 + $0x14c] sm:$0xf] }
 0x135   :  { %10628 = vst [vmem:[#allocation117_spill] sm:$0xff] %v9661_v54  ;;  %v9717_v54 = vld [vmem:[#allocation2 + $0x190] sm:$0xf0] }
 0x136   :  { %10629 = vst [vmem:[#allocation118_spill] sm:$0xff] %v9663_v26  ;;  %v10005_v26 = vld [vmem:[#allocation2 + $0x3d0] sm:$0xf0] }
 0x137   :  { %10630 = vst [vmem:[#allocation119_spill] sm:$0xff] %v9665_v13  ;;  %v9687_v13 = vld [vmem:[#allocation2 + $0x14c] sm:$0xf0] }
 0x138   :  { %10631 = vst [vmem:[#allocation120_spill] sm:$0xff] %v9667_v6  ;;  %v9689_v6 = vld [vmem:[#allocation2 + $0x158] sm:$0xf0] }
 0x139   :  { %10632 = vst [vmem:[#allocation121_spill] sm:$0xff] %v9669_v48  ;;  %v9723_v48 = vld [vmem:[#allocation2 + $0x194] sm:$0xf0] }
 0x13a   :  { %10633 = vst [vmem:[#allocation122_spill] sm:$0xff] %v9671_v21  ;;  %v9997_v21 = vld [vmem:[#allocation2 + $0x3c4] sm:$0xf] }
 0x13b   :  { %10634 = vst [vmem:[#allocation123_spill] sm:$0xff] %v9673_v3  ;;  %v9695_v3 = vld [vmem:[#allocation2 + $0x160] sm:$0xf] }
 0x13c   :  { %10635 = vst [vmem:[#allocation124_spill] sm:$0xff] %v9675_v23  ;;  %v9697_v23 = vld [vmem:[#allocation2 + $0x16c] sm:$0xf] }
 0x13d   :  { %10636 = vst [vmem:[#allocation125_spill] sm:$0xff] %v9677_v62  ;;  %v9733_v62 = vld [vmem:[#allocation2 + $0x1b0] sm:$0xf0] }
 0x13e   :  { %10637 = vst [vmem:[#allocation126_spill] sm:$0xff] %v9679_v35 }
 0x13f   :  { %10638 = vst [vmem:[#allocation127_spill] sm:$0xff] %v9681_v59  ;;  %v9703_v59 = vld [vmem:[#allocation2 + $0x16c] sm:$0xf0] }
 0x140   :  { %10639 = vst [vmem:[#allocation128_spill] sm:$0xff] %v9683_v34  ;;  %v9705_v34 = vld [vmem:[#allocation2 + $0x178] sm:$0xf0] }
 0x141   :  { %10640 = vst [vmem:[#allocation129_spill] sm:$0xff] %v9685_v41  ;;  %v9739_v41 = vld [vmem:[#allocation2 + $0x1b4] sm:$0xf0] }
 0x142   :  { %10641 = vst [vmem:[#allocation130_spill] sm:$0xff] %v9687_v13 }
 0x143   :  { %10642 = vst [vmem:[#allocation131_spill] sm:$0xff] %v9689_v6  ;;  %v9711_v6 = vld [vmem:[#allocation2 + $0x180] sm:$0xf] }
 0x144   :  { %10643 = vst [vmem:[#allocation132_spill] sm:$0xff] %v9691_v16  ;;  %v9713_v16 = vld [vmem:[#allocation2 + $0x18c] sm:$0xf] }
 0x145   :  { %10644 = vst [vmem:[#allocation133_spill] sm:$0xff] %v9693_v20  ;;  %v9749_v20 = vld [vmem:[#allocation2 + $0x1d0] sm:$0xf0] }
 0x146   :  { %10645 = vst [vmem:[#allocation134_spill] sm:$0xff] %v9695_v3 }
 0x147   :  { %10646 = vst [vmem:[#allocation135_spill] sm:$0xff] %v9697_v23  ;;  %v9719_v23 = vld [vmem:[#allocation2 + $0x18c] sm:$0xf0] }
 0x148   :  { %10647 = vst [vmem:[#allocation136_spill] sm:$0xff] %v9699_v12  ;;  %v9721_v12 = vld [vmem:[#allocation2 + $0x198] sm:$0xf0] }
 0x149   :  { %10648 = vst [vmem:[#allocation137_spill] sm:$0xff] %v9701_v44  ;;  %v9755_v44 = vld [vmem:[#allocation2 + $0x1d4] sm:$0xf0] }
 0x14a   :  { %10649 = vst [vmem:[#allocation138_spill] sm:$0xff] %v9703_v59 }
 0x14b   :  { %10650 = vst [vmem:[#allocation139_spill] sm:$0xff] %v9705_v34  ;;  %v9727_v34 = vld [vmem:[#allocation2 + $0x1a0] sm:$0xf] }
 0x14c   :  { %10651 = vst [vmem:[#allocation140_spill] sm:$0xff] %v9707_v45  ;;  %v9729_v45 = vld [vmem:[#allocation2 + $0x1ac] sm:$0xf] }
 0x14d   :  { %10652 = vst [vmem:[#allocation141_spill] sm:$0xff] %v9709_v50  ;;  %v9765_v50 = vld [vmem:[#allocation2 + $0x1f0] sm:$0xf0] }
 0x14e   :  { %10653 = vst [vmem:[#allocation142_spill] sm:$0xff] %v9711_v6 }
 0x14f   :  { %10654 = vst [vmem:[#allocation143_spill] sm:$0xff] %v9713_v16  ;;  %v9735_v16 = vld [vmem:[#allocation2 + $0x1ac] sm:$0xf0] }
 0x150   :  { %10655 = vst [vmem:[#allocation144_spill] sm:$0xff] %v9715_v2  ;;  %v9737_v2 = vld [vmem:[#allocation2 + $0x1b8] sm:$0xf0] }
 0x151   :  { %10656 = vst [vmem:[#allocation145_spill] sm:$0xff] %v9717_v54  ;;  %v9771_v54 = vld [vmem:[#allocation2 + $0x1f4] sm:$0xf0] }
 0x152   :  { %10657 = vst [vmem:[#allocation146_spill] sm:$0xff] %v9719_v23 }
 0x153   :  { %10658 = vst [vmem:[#allocation147_spill] sm:$0xff] %v9721_v12  ;;  %v9743_v12 = vld [vmem:[#allocation2 + $0x1c0] sm:$0xf] }
 0x154   :  { %10659 = vst [vmem:[#allocation148_spill] sm:$0xff] %v9723_v48  ;;  %v9745_v48 = vld [vmem:[#allocation2 + $0x1cc] sm:$0xf] }
 0x155   :  { %10660 = vst [vmem:[#allocation149_spill] sm:$0xff] %v9725_v31  ;;  %v9781_v31 = vld [vmem:[#allocation2 + $0x210] sm:$0xf0] }
 0x156   :  { %10661 = vst [vmem:[#allocation150_spill] sm:$0xff] %v9729_v45  ;;  %v9751_v45 = vld [vmem:[#allocation2 + $0x1cc] sm:$0xf0] }
 0x157   :  { %10662 = vst [vmem:[#allocation151_spill] sm:$0xff] %v9731_v36  ;;  %v9753_v36 = vld [vmem:[#allocation2 + $0x1d8] sm:$0xf0] }
 0x158   :  { %10663 = vst [vmem:[#allocation152_spill] sm:$0xff] %v9733_v62  ;;  %v9787_v62 = vld [vmem:[#allocation2 + $0x214] sm:$0xf0] }
 0x159   :  { %10664 = vst [vmem:[#allocation153_spill] sm:$0xff] %v9737_v2  ;;  %v9759_v2 = vld [vmem:[#allocation2 + $0x1e0] sm:$0xf] }
 0x15a   :  { %10665 = vst [vmem:[#allocation154_spill] sm:$0xff] %v9739_v41  ;;  %v9761_v41 = vld [vmem:[#allocation2 + $0x1ec] sm:$0xf] }
 0x15b   :  { %10666 = vst [vmem:[#allocation155_spill] sm:$0xff] %v9741_v46  ;;  %v9837_v46 = vld [vmem:[#allocation2 + $0x284] sm:$0xf] }
 0x15c   :  { %10667 = vst [vmem:[#allocation156_spill] sm:$0xff] %v9745_v48  ;;  %v9767_v48 = vld [vmem:[#allocation2 + $0x1ec] sm:$0xf0] }
 0x15d   :  { %10668 = vst [vmem:[#allocation157_spill] sm:$0xff] %v9747_v55  ;;  %v9769_v55 = vld [vmem:[#allocation2 + $0x1f8] sm:$0xf0] }
 0x15e   :  { %10669 = vst [vmem:[#allocation158_spill] sm:$0xff] %v9749_v20  ;;  %v9845_v20 = vld [vmem:[#allocation2 + $0x290] sm:$0xf0] }
 0x15f   :  { %10670 = vst [vmem:[#allocation159_spill] sm:$0xff] %v9753_v36  ;;  %v9775_v36 = vld [vmem:[#allocation2 + $0x200] sm:$0xf] }
 0x160   :  { %10671 = vst [vmem:[#allocation160_spill] sm:$0xff] %v9755_v44  ;;  %v9777_v44 = vld [vmem:[#allocation2 + $0x20c] sm:$0xf] }
 0x161   :  { %10672 = vst [vmem:[#allocation161_spill] sm:$0xff] %v9757_v60  ;;  %v9869_v60 = vld [vmem:[#allocation2 + $0x2c4] sm:$0xf] }
 0x162   :  { %10673 = vst [vmem:[#allocation162_spill] sm:$0xff] %v9761_v41  ;;  %v9783_v41 = vld [vmem:[#allocation2 + $0x20c] sm:$0xf0] }
 0x163   :  { %10674 = vst [vmem:[#allocation163_spill] sm:$0xff] %v9763_v7  ;;  %v9785_v7 = vld [vmem:[#allocation2 + $0x218] sm:$0xf0] }
 0x164   :  { %10675 = vst [vmem:[#allocation164_spill] sm:$0xff] %v9765_v50  ;;  %v9877_v50 = vld [vmem:[#allocation2 + $0x2d0] sm:$0xf0] }
 0x165   :  { %10676 = vst [vmem:[#allocation165_spill] sm:$0xff] %v9769_v55  ;;  %v9791_v55 = vld [vmem:[#allocation2 + $0x220] sm:$0xf] }
 0x166   :  { %10677 = vst [vmem:[#allocation166_spill] sm:$0xff] %v9771_v54  ;;  %v9793_v54 = vld [vmem:[#allocation2 + $0x22c] sm:$0xf] }
 0x167   :  { %10678 = vst [vmem:[#allocation167_spill] sm:$0xff] %v9773_v14  ;;  %v9795_v14 = vld [vmem:[#allocation2 + $0x228] sm:$0xf] }
 0x168   :  { %10679 = vst [vmem:[#allocation168_spill] sm:$0xff] %v9775_v36  ;;  %v9909_v36 = vld [vmem:[#allocation2 + $0x310] sm:$0xf0] }
 0x169   :  { %10680 = vst [vmem:[#allocation169_spill] sm:$0xff] %v9777_v44  ;;  %v9799_v44 = vld [vmem:[#allocation2 + $0x22c] sm:$0xf0] }
 0x16a   :  { %10681 = vst [vmem:[#allocation170_spill] sm:$0xff] %v9779_v11  ;;  %v9801_v11 = vld [vmem:[#allocation2 + $0x238] sm:$0xf0] }
 0x16b   :  { %10682 = vst [vmem:[#allocation171_spill] sm:$0xff] %v9781_v31  ;;  %v9803_v31 = vld [vmem:[#allocation2 + $0x234] sm:$0xf0] }
 0x16c   :  { %10683 = vst [vmem:[#allocation172_spill] sm:$0xff] %v9783_v41  ;;  %v9901_v41 = vld [vmem:[#allocation2 + $0x304] sm:$0xf] }
 0x16d   :  { %10684 = vst [vmem:[#allocation173_spill] sm:$0xff] %v9785_v7  ;;  %v9807_v7 = vld [vmem:[#allocation2 + $0x240] sm:$0xf] }
 0x16e   :  { %10685 = vst [vmem:[#allocation174_spill] sm:$0xff] %v9787_v62  ;;  %v9809_v62 = vld [vmem:[#allocation2 + $0x24c] sm:$0xf] }
 0x16f   :  { %10686 = vst [vmem:[#allocation175_spill] sm:$0xff] %v9789_v27  ;;  %v9811_v27 = vld [vmem:[#allocation2 + $0x248] sm:$0xf] }
 0x170   :  { %10687 = vst [vmem:[#allocation176_spill] sm:$0xff] %v9791_v55  ;;  %v9989_v55 = vld [vmem:[#allocation2 + $0x3b0] sm:$0xf0] }
 0x171   :  { %10688 = vst [vmem:[#allocation177_spill] sm:$0xff] %v9793_v54  ;;  %v9815_v54 = vld [vmem:[#allocation2 + $0x24c] sm:$0xf0] }
 0x172   :  { %10689 = vst [vmem:[#allocation178_spill] sm:$0xff] %v9795_v14  ;;  %v9817_v14 = vld [vmem:[#allocation2 + $0x258] sm:$0xf0] }
 0x173   :  { %10690 = vst [vmem:[#allocation179_spill] sm:$0xff] %v9797_v25  ;;  %v9819_v25 = vld [vmem:[#allocation2 + $0x254] sm:$0xf0] }
 0x174   :  { %10691 = vst [vmem:[#allocation180_spill] sm:$0xff] %v9799_v44  ;;  %v9981_v44 = vld [vmem:[#allocation2 + $0x3a4] sm:$0xf] }
 0x175   :  { %10692 = vst [vmem:[#allocation181_spill] sm:$0xff] %v9801_v11  ;;  %v9823_v11 = vld [vmem:[#allocation2 + $0x260] sm:$0xf] }
 0x176   :  { %10693 = vst [vmem:[#allocation182_spill] sm:$0xff] %v9803_v31  ;;  %v9825_v31 = vld [vmem:[#allocation2 + $0x26c] sm:$0xf] }
 0x177   :  { %10694 = vst [vmem:[#allocation183_spill] sm:$0xff] %v9805_v30  ;;  %v9827_v30 = vld [vmem:[#allocation2 + $0x268] sm:$0xf] }
 0x178   :  { %10695 = vst [vmem:[#allocation184_spill] sm:$0xff] %v9807_v7 }
 0x179   :  { %10696 = vst [vmem:[#allocation185_spill] sm:$0xff] %v9809_v62  ;;  %v9831_v62 = vld [vmem:[#allocation2 + $0x26c] sm:$0xf0] }
 0x17a   :  { %10697 = vst [vmem:[#allocation186_spill] sm:$0xff] %v9811_v27  ;;  %v9833_v27 = vld [vmem:[#allocation2 + $0x278] sm:$0xf0] }
 0x17b   :  { %10698 = vst [vmem:[#allocation187_spill] sm:$0xff] %v9813_v29  ;;  %v9835_v29 = vld [vmem:[#allocation2 + $0x274] sm:$0xf0] }
 0x17c   :  { %10699 = vst [vmem:[#allocation188_spill] sm:$0xff] %v9815_v54 }
 0x17d   :  { %10700 = vst [vmem:[#allocation189_spill] sm:$0xff] %v9817_v14  ;;  %v9839_v14 = vld [vmem:[#allocation2 + $0x280] sm:$0xf] }
 0x17e   :  { %10701 = vst [vmem:[#allocation190_spill] sm:$0xff] %v9819_v25  ;;  %v9841_v25 = vld [vmem:[#allocation2 + $0x28c] sm:$0xf] }
 0x17f   :  { %10702 = vst [vmem:[#allocation191_spill] sm:$0xff] %v9821_v43  ;;  %v9843_v43 = vld [vmem:[#allocation2 + $0x288] sm:$0xf] }
 0x180   :  { %10703 = vst [vmem:[#allocation192_spill] sm:$0xff] %v9823_v11 }
 0x181   :  { %10704 = vst [vmem:[#allocation193_spill] sm:$0xff] %v9825_v31  ;;  %v9847_v31 = vld [vmem:[#allocation2 + $0x28c] sm:$0xf0] }
 0x182   :  { %10705 = vst [vmem:[#allocation194_spill] sm:$0xff] %v9827_v30  ;;  %v9849_v30 = vld [vmem:[#allocation2 + $0x298] sm:$0xf0] }
 0x183   :  { %10706 = vst [vmem:[#allocation195_spill] sm:$0xff] %v9829_v28  ;;  %v9851_v28 = vld [vmem:[#allocation2 + $0x294] sm:$0xf0] }
 0x184   :  { %10707 = vst [vmem:[#allocation196_spill] sm:$0xff] %v9831_v62 }
 0x185   :  { %10708 = vst [vmem:[#allocation197_spill] sm:$0xff] %v9833_v27  ;;  %v9855_v27 = vld [vmem:[#allocation2 + $0x2a0] sm:$0xf] }
 0x186   :  { %10709 = vst [vmem:[#allocation198_spill] sm:$0xff] %v9835_v29  ;;  %v9857_v29 = vld [vmem:[#allocation2 + $0x2ac] sm:$0xf] }
 0x187   :  { %10710 = vst [vmem:[#allocation199_spill] sm:$0xff] %v9837_v46  ;;  %v9859_v46 = vld [vmem:[#allocation2 + $0x2a8] sm:$0xf] }
 0x188   :  { %10711 = vst [vmem:[#allocation200_spill] sm:$0xff] %v9839_v14 }
 0x189   :  { %10712 = vst [vmem:[#allocation201_spill] sm:$0xff] %v9841_v25  ;;  %v9863_v25 = vld [vmem:[#allocation2 + $0x2ac] sm:$0xf0] }
 0x18a   :  { %10713 = vst [vmem:[#allocation202_spill] sm:$0xff] %v9843_v43  ;;  %v9865_v43 = vld [vmem:[#allocation2 + $0x2b8] sm:$0xf0] }
 0x18b   :  { %10714 = vst [vmem:[#allocation203_spill] sm:$0xff] %v9845_v20  ;;  %v9867_v20 = vld [vmem:[#allocation2 + $0x2b4] sm:$0xf0] }
 0x18c   :  { %10715 = vst [vmem:[#allocation204_spill] sm:$0xff] %v9847_v31 }
 0x18d   :  { %10716 = vst [vmem:[#allocation205_spill] sm:$0xff] %v9849_v30  ;;  %v9871_v30 = vld [vmem:[#allocation2 + $0x2c0] sm:$0xf] }
 0x18e   :  { %10717 = vst [vmem:[#allocation206_spill] sm:$0xff] %v9851_v28  ;;  %v9873_v28 = vld [vmem:[#allocation2 + $0x2cc] sm:$0xf] }
 0x18f   :  { %10718 = vst [vmem:[#allocation207_spill] sm:$0xff] %v9853_v47  ;;  %v9875_v47 = vld [vmem:[#allocation2 + $0x2c8] sm:$0xf] }
 0x190   :  { %10719 = vst [vmem:[#allocation208_spill] sm:$0xff] %v9857_v29  ;;  %v9879_v29 = vld [vmem:[#allocation2 + $0x2cc] sm:$0xf0] }
 0x191   :  { %10720 = vst [vmem:[#allocation209_spill] sm:$0xff] %v9859_v46  ;;  %v9881_v46 = vld [vmem:[#allocation2 + $0x2d8] sm:$0xf0] }
 0x192   :  { %10721 = vst [vmem:[#allocation210_spill] sm:$0xff] %v9861_v0  ;;  %v9883_v0 = vld [vmem:[#allocation2 + $0x2d4] sm:$0xf0] }
 0x193   :  { %10722 = vst [vmem:[#allocation211_spill] sm:$0xff] %v9865_v43  ;;  %v9887_v43 = vld [vmem:[#allocation2 + $0x2e0] sm:$0xf] }
 0x194   :  { %10723 = vst [vmem:[#allocation212_spill] sm:$0xff] %v9867_v20  ;;  %v9889_v20 = vld [vmem:[#allocation2 + $0x2ec] sm:$0xf] }
 0x195   :  { %10724 = vst [vmem:[#allocation213_spill] sm:$0xff] %v9869_v60  ;;  %v9891_v60 = vld [vmem:[#allocation2 + $0x2e8] sm:$0xf] }
 0x196   :  { %10725 = vst [vmem:[#allocation214_spill] sm:$0xff] %v9873_v28  ;;  %v9895_v28 = vld [vmem:[#allocation2 + $0x2ec] sm:$0xf0] }
 0x197   :  { %10726 = vst [vmem:[#allocation215_spill] sm:$0xff] %v9875_v47  ;;  %v9897_v47 = vld [vmem:[#allocation2 + $0x2f8] sm:$0xf0] }
 0x198   :  { %10727 = vst [vmem:[#allocation216_spill] sm:$0xff] %v9877_v50  ;;  %v9899_v50 = vld [vmem:[#allocation2 + $0x2f4] sm:$0xf0] }
 0x199   :  { %10728 = vst [vmem:[#allocation217_spill] sm:$0xff] %v9881_v46  ;;  %v9903_v46 = vld [vmem:[#allocation2 + $0x300] sm:$0xf] }
 0x19a   :  { %10729 = vst [vmem:[#allocation218_spill] sm:$0xff] %v9883_v0  ;;  %v9905_v0 = vld [vmem:[#allocation2 + $0x30c] sm:$0xf] }
 0x19b   :  { %10730 = vst [vmem:[#allocation219_spill] sm:$0xff] %v9885_v53  ;;  %v9907_v53 = vld [vmem:[#allocation2 + $0x308] sm:$0xf] }
 0x19c   :  { %10731 = vst [vmem:[#allocation220_spill] sm:$0xff] %v9889_v20  ;;  %v9911_v20 = vld [vmem:[#allocation2 + $0x30c] sm:$0xf0] }
 0x19d   :  { %10732 = vst [vmem:[#allocation221_spill] sm:$0xff] %v9891_v60  ;;  %v9913_v60 = vld [vmem:[#allocation2 + $0x318] sm:$0xf0] }
 0x19e   :  { %10733 = vst [vmem:[#allocation222_spill] sm:$0xff] %v9893_v17  ;;  %v9915_v17 = vld [vmem:[#allocation2 + $0x314] sm:$0xf0] }
 0x19f   :  { %10734 = vst [vmem:[#allocation223_spill] sm:$0xff] %v9897_v47  ;;  %v9919_v47 = vld [vmem:[#allocation2 + $0x320] sm:$0xf] }
 0x1a0   :  { %10735 = vst [vmem:[#allocation224_spill] sm:$0xff] %v9899_v50  ;;  %v9921_v50 = vld [vmem:[#allocation2 + $0x32c] sm:$0xf] }
 0x1a1   :  { %10736 = vst [vmem:[#allocation225_spill] sm:$0xff] %v9901_v41  ;;  %v9923_v41 = vld [vmem:[#allocation2 + $0x328] sm:$0xf] }
 0x1a2   :  { %10737 = vst [vmem:[#allocation226_spill] sm:$0xff] %v9903_v46  ;;  %v9925_v46 = vld [vmem:[#allocation2 + $0x330] sm:$0xf0] }
 0x1a3   :  { %10738 = vst [vmem:[#allocation227_spill] sm:$0xff] %v9905_v0  ;;  %v9927_v0 = vld [vmem:[#allocation2 + $0x32c] sm:$0xf0] }
 0x1a4   :  { %10739 = vst [vmem:[#allocation228_spill] sm:$0xff] %v9907_v53  ;;  %v9929_v53 = vld [vmem:[#allocation2 + $0x338] sm:$0xf0] }
 0x1a5   :  { %10740 = vst [vmem:[#allocation229_spill] sm:$0xff] %v9909_v36  ;;  %v9931_v36 = vld [vmem:[#allocation2 + $0x334] sm:$0xf0] }
 0x1a6   :  { %10741 = vst [vmem:[#allocation230_spill] sm:$0xff] %v9911_v20  ;;  %v9933_v20 = vld [vmem:[#allocation2 + $0x344] sm:$0xf] }
 0x1a7   :  { %10742 = vst [vmem:[#allocation231_spill] sm:$0xff] %v9913_v60  ;;  %v9935_v60 = vld [vmem:[#allocation2 + $0x340] sm:$0xf] }
 0x1a8   :  { %10743 = vst [vmem:[#allocation232_spill] sm:$0xff] %v9915_v17  ;;  %v9937_v17 = vld [vmem:[#allocation2 + $0x34c] sm:$0xf] }
 0x1a9   :  { %10744 = vst [vmem:[#allocation233_spill] sm:$0xff] %v9917_v4  ;;  %v9939_v4 = vld [vmem:[#allocation2 + $0x348] sm:$0xf] }
 0x1aa   :  { %10745 = vst [vmem:[#allocation234_spill] sm:$0xff] %v9919_v47  ;;  %v9973_v47 = vld [vmem:[#allocation2 + $0x390] sm:$0xf0] }
 0x1ab   :  { %10746 = vst [vmem:[#allocation235_spill] sm:$0xff] %v9921_v50  ;;  %v9943_v50 = vld [vmem:[#allocation2 + $0x34c] sm:$0xf0] }
 0x1ac   :  { %10747 = vst [vmem:[#allocation236_spill] sm:$0xff] %v9923_v41  ;;  %v9945_v41 = vld [vmem:[#allocation2 + $0x358] sm:$0xf0] }
 0x1ad   :  { %10748 = vst [vmem:[#allocation237_spill] sm:$0xff] %v9925_v46  ;;  %v9947_v46 = vld [vmem:[#allocation2 + $0x354] sm:$0xf0] }
 0x1ae   :  { %10749 = vst [vmem:[#allocation238_spill] sm:$0xff] %v9927_v0  ;;  %v9965_v0 = vld [vmem:[#allocation2 + $0x384] sm:$0xf] }
 0x1af   :  { %10750 = vst [vmem:[#allocation239_spill] sm:$0xff] %v9929_v53  ;;  %v9951_v53 = vld [vmem:[#allocation2 + $0x360] sm:$0xf] }
 0x1b0   :  { %10751 = vst [vmem:[#allocation240_spill] sm:$0xff] %v9931_v36  ;;  %v9953_v36 = vld [vmem:[#allocation2 + $0x36c] sm:$0xf] }
 0x1b1   :  { %10752 = vst [vmem:[#allocation241_spill] sm:$0xff] %v9933_v20  ;;  %v9955_v20 = vld [vmem:[#allocation2 + $0x368] sm:$0xf] }
 0x1b2   :  { %10753 = vst [vmem:[#allocation242_spill] sm:$0xff] %v9935_v60 }
 0x1b3   :  { %10754 = vst [vmem:[#allocation243_spill] sm:$0xff] %v9937_v17  ;;  %v9959_v17 = vld [vmem:[#allocation2 + $0x36c] sm:$0xf0] }
 0x1b4   :  { %10755 = vst [vmem:[#allocation244_spill] sm:$0xff] %v9939_v4  ;;  %v9961_v4 = vld [vmem:[#allocation2 + $0x378] sm:$0xf0] }
 0x1b5   :  { %10756 = vst [vmem:[#allocation245_spill] sm:$0xff] %v9941_v33  ;;  %v9963_v33 = vld [vmem:[#allocation2 + $0x374] sm:$0xf0] }
 0x1b6   :  { %10757 = vst [vmem:[#allocation246_spill] sm:$0xff] %v9943_v50 }
 0x1b7   :  { %10758 = vst [vmem:[#allocation247_spill] sm:$0xff] %v9945_v41  ;;  %v9967_v41 = vld [vmem:[#allocation2 + $0x380] sm:$0xf] }
 0x1b8   :  { %10759 = vst [vmem:[#allocation248_spill] sm:$0xff] %v9947_v46  ;;  %v9969_v46 = vld [vmem:[#allocation2 + $0x38c] sm:$0xf] }
 0x1b9   :  { %10760 = vst [vmem:[#allocation249_spill] sm:$0xff] %v9949_v5  ;;  %v9971_v5 = vld [vmem:[#allocation2 + $0x388] sm:$0xf] }
 0x1ba   :  { %10761 = vst [vmem:[#allocation250_spill] sm:$0xff] %v9951_v53 }
 0x1bb   :  { %10762 = vst [vmem:[#allocation251_spill] sm:$0xff] %v9953_v36  ;;  %v9975_v36 = vld [vmem:[#allocation2 + $0x38c] sm:$0xf0] }
 0x1bc   :  { %10763 = vst [vmem:[#allocation252_spill] sm:$0xff] %v9955_v20  ;;  %v9977_v20 = vld [vmem:[#allocation2 + $0x398] sm:$0xf0] }
 0x1bd   :  { %10764 = vst [vmem:[#allocation253_spill] sm:$0xff] %v9957_v51  ;;  %v9979_v51 = vld [vmem:[#allocation2 + $0x394] sm:$0xf0] }
 0x1be   :  { %10765 = vst [vmem:[#allocation254_spill] sm:$0xff] %v9959_v17 }
 0x1bf   :  { %10766 = vst [vmem:[#allocation255_spill] sm:$0xff] %v9961_v4  ;;  %v9983_v4 = vld [vmem:[#allocation2 + $0x3a0] sm:$0xf] }
 0x1c0   :  { %10767 = vst [vmem:[#allocation256_spill] sm:$0xff] %v9963_v33  ;;  %v9985_v33 = vld [vmem:[#allocation2 + $0x3ac] sm:$0xf] }
 0x1c1   :  { %10768 = vst [vmem:[#allocation257_spill] sm:$0xff] %v9965_v0  ;;  %v9987_v0 = vld [vmem:[#allocation2 + $0x3a8] sm:$0xf] }
 0x1c2   :  { %10769 = vst [vmem:[#allocation258_spill] sm:$0xff] %v9967_v41 }
 0x1c3   :  { %10770 = vst [vmem:[#allocation259_spill] sm:$0xff] %v9969_v46  ;;  %v9991_v46 = vld [vmem:[#allocation2 + $0x3ac] sm:$0xf0] }
 0x1c4   :  { %10771 = vst [vmem:[#allocation260_spill] sm:$0xff] %v9971_v5  ;;  %v9993_v5 = vld [vmem:[#allocation2 + $0x3b8] sm:$0xf0] }
 0x1c5   :  { %10772 = vst [vmem:[#allocation261_spill] sm:$0xff] %v9973_v47  ;;  %v9995_v47 = vld [vmem:[#allocation2 + $0x3b4] sm:$0xf0] }
 0x1c6   :  { %10773 = vst [vmem:[#allocation262_spill] sm:$0xff] %v9975_v36 }
 0x1c7   :  { %10774 = vst [vmem:[#allocation263_spill] sm:$0xff] %v9977_v20  ;;  %v9999_v20 = vld [vmem:[#allocation2 + $0x3c0] sm:$0xf] }
 0x1c8   :  { %10775 = vst [vmem:[#allocation264_spill] sm:$0xff] %v9979_v51  ;;  %v10001_v51 = vld [vmem:[#allocation2 + $0x3cc] sm:$0xf] }
 0x1c9   :  { %10776 = vst [vmem:[#allocation265_spill] sm:$0xff] %v9981_v44  ;;  %v10003_v44 = vld [vmem:[#allocation2 + $0x3c8] sm:$0xf] }
 0x1ca   :  { %10777 = vst [vmem:[#allocation266_spill] sm:$0xff] %v9985_v33  ;;  %v10007_v33 = vld [vmem:[#allocation2 + $0x3cc] sm:$0xf0] }
 0x1cb   :  { %10778 = vst [vmem:[#allocation267_spill] sm:$0xff] %v9987_v0  ;;  %v10009_v0 = vld [vmem:[#allocation2 + $0x3d8] sm:$0xf0] }
 0x1cc   :  { %10779 = vst [vmem:[#allocation268_spill] sm:$0xff] %v9989_v55  ;;  %v10011_v55 = vld [vmem:[#allocation2 + $0x3d4] sm:$0xf0] }
 0x1cd   :  { %10780 = vst [vmem:[#allocation269_spill] sm:$0xff] %v9993_v5  ;;  %v10015_v5 = vld [vmem:[#allocation2 + $0x3e0] sm:$0xf] }
 0x1ce   :  { %10781 = vst [vmem:[#allocation270_spill] sm:$0xff] %v9995_v47  ;;  %v10017_v47 = vld [vmem:[#allocation2 + $0x3ec] sm:$0xf] }
 0x1cf   :  { %10782 = vst [vmem:[#allocation271_spill] sm:$0xff] %v9997_v21  ;;  %v10019_v21 = vld [vmem:[#allocation2 + $0x3e8] sm:$0xf] }
 0x1d0   :  { %10783 = vst [vmem:[#allocation272_spill] sm:$0xff] %v10001_v51  ;;  %v10023_v51 = vld [vmem:[#allocation2 + $0x3ec] sm:$0xf0] }
 0x1d1   :  { %10784 = vst [vmem:[#allocation273_spill] sm:$0xff] %v10003_v44  ;;  %v10025_v44 = vld [vmem:[#allocation2 + $0x3f8] sm:$0xf0] }
 0x1d2   :  { %10785 = vst [vmem:[#allocation274_spill] sm:$0xff] %v10005_v26  ;;  %v10027_v26 = vld [vmem:[#allocation2 + $0x3f4] sm:$0xf0] }
 0x1d3   :  { %10786 = vst [vmem:[#allocation275_spill] sm:$0xff] %v10009_v0 }
 0x1d4   :  { %10787 = vst [vmem:[#allocation276_spill] sm:$0xff] %v10011_v55 }
 0x1d5   :  { %10788 = vst [vmem:[#allocation277_spill] sm:$0xff] %v10013_v38 }
 0x1d6   :  { %10789 = vst [vmem:[#allocation278_spill] sm:$0xff] %v10017_v47 }
 0x1d7   :  { %10790 = vst [vmem:[#allocation279_spill] sm:$0xff] %v10019_v21 }
 0x1d8   :  { %10791 = vst [vmem:[#allocation280_spill] sm:$0xff] %v10021_v32 }
 0x1d9   :  { %10792 = vst [vmem:[#allocation281_spill] sm:$0xff] %v10025_v44 }
 0x1da   :  { %10793 = vst [vmem:[#allocation282_spill] sm:$0xff] %v10027_v26 }
 0x1db   :  { %9220 = dma.done.wait [#allocation3 + $0x1], 16384 }
 0x1dc   :  { %9221 = vsyncadd [#allocation3 + $0x1], 4294950912  ;;  %s715_s0 = scalar_lea.hbm %s10532_s4, 2048 }
 0x1dd   :  { %s723_s15 = sshll.u32 %s715_s0, 4  ;;  %s724_s15 = int_to_ptr.hbm [resolvable:$true] %s723_s15 }
 0x1de   :  { %728 = dma.hbm_to_vmem [thread:$0]  %s724_s15, 16384, %s131_s26, [#allocation3] }
 0x1df   :  { %v5903_v0 = vld [vmem:[#allocation2 + $0x4e0] sm:$0xf]  ;;  %v8491_v47 = vld [vmem:[#allocation2 + $0x4ec] sm:$0xf0]  ;;  %v6161_v14 = vld [vmem:[#allocation2 + $0x6f0] sm:$0xf0] }
 0x1e0   :  { %v6031_v55 = vld [vmem:[#allocation2 + $0x5e0] sm:$0xf]  ;;  %v5904_v21 = vor.u32 %v8491_v47, %v5903_v0  ;;  %v8523_v38 = vld [vmem:[#allocation2 + $0x5ec] sm:$0xf0]  ;;  %v5889_v23 = vld [vmem:[#allocation2 + $0x4d0] sm:$0xf0] }
 0x1e1   :  { %v6159_v32 = vld [vmem:[#allocation2 + $0x6e0] sm:$0xf]  ;;  %v8555_v44 = vld [vmem:[#allocation2 + $0x6ec] sm:$0xf0]  ;;  %v6032_v50 = vor.u32 %v8523_v38, %v6031_v55  ;;  %v8517_v6 = vld [vmem:[#allocation2 + $0x5c4] sm:$0xf] }
 0x1e2   :  { %v6160_v26 = vor.u32 %v8555_v44, %v6159_v32  ;;  %v6287_v60 = vld [vmem:[#allocation2 + $0x7e0] sm:$0xf]  ;;  %v8587_v54 = vld [vmem:[#allocation2 + $0x7ec] sm:$0xf0]  ;;  %1501 = vmatpush.bf16.msra.mxu0 %v5904_v21  ;;  %v6145_v52 = vld [vmem:[#allocation2 + $0x6d0] sm:$0xf0] }
 0x1e3   :  { %v5887_v7 = vld [vmem:[#allocation2 + $0x4c0] sm:$0xf]  ;;  %v6288_v13 = vor.u32 %v8587_v54, %v6287_v60  ;;  %v8487_v35 = vld [vmem:[#allocation2 + $0x4cc] sm:$0xf0]  ;;  %1515 = vmatpush.bf16.msra.mxu1 %v6032_v50 }
 0x1e4   :  { %v6015_v56 = vld [vmem:[#allocation2 + $0x5c0] sm:$0xf]  ;;  %v8519_v49 = vld [vmem:[#allocation2 + $0x5cc] sm:$0xf0]  ;;  %1529 = vmatpush.bf16.msra.mxu2 %v6160_v26  ;;  %v5888_v17 = vor.u32 %v8487_v35, %v5887_v7 }
 0x1e5   :  { %v6016_v53 = vor.u32 %v8519_v49, %v6015_v56  ;;  %v6143_v62 = vld [vmem:[#allocation2 + $0x6c0] sm:$0xf]  ;;  %v8551_v11 = vld [vmem:[#allocation2 + $0x6cc] sm:$0xf0]  ;;  %1543 = vmatpush.bf16.msra.mxu3 %v6288_v13 }
 0x1e6   :  { %v6271_v47 = vld [vmem:[#allocation2 + $0x7c0] sm:$0xf]  ;;  %v6144_v0 = vor.u32 %v8551_v11, %v6143_v62  ;;  %v8583_v59 = vld [vmem:[#allocation2 + $0x7cc] sm:$0xf0]  ;;  %1502 = vmatpush.bf16.msra.mxu0 %v5888_v17 }
 0x1e7   :  { %v5871_v38 = vld [vmem:[#allocation2 + $0x4a0] sm:$0xf]  ;;  %v8483_v44 = vld [vmem:[#allocation2 + $0x4ac] sm:$0xf0]  ;;  %v6272_v32 = vor.u32 %v8583_v59, %v6271_v47  ;;  %1516 = vmatpush.bf16.msra.mxu1 %v6016_v53 }
 0x1e8   :  { %v5999_v55 = vld [vmem:[#allocation2 + $0x5a0] sm:$0xf]  ;;  %v8515_v3 = vld [vmem:[#allocation2 + $0x5ac] sm:$0xf0]  ;;  %v5872_v54 = vor.u32 %v8483_v44, %v5871_v38  ;;  %1530 = vmatpush.bf16.msra.mxu2 %v6144_v0 }
 0x1e9   :  { %v6127_v21 = vld [vmem:[#allocation2 + $0x6a0] sm:$0xf]  ;;  %v8547_v60 = vld [vmem:[#allocation2 + $0x6ac] sm:$0xf0]  ;;  %v6000_v26 = vor.u32 %v8515_v3, %v5999_v55  ;;  %1544 = vmatpush.bf16.msra.mxu3 %v6272_v32 }
 0x1ea   :  { %v6255_v8 = vld [vmem:[#allocation2 + $0x7a0] sm:$0xf]  ;;  %v8579_v50 = vld [vmem:[#allocation2 + $0x7ac] sm:$0xf0]  ;;  %v6128_v35 = vor.u32 %v8547_v60, %v6127_v21  ;;  %1503 = vmatpush.bf16.msra.mxu0 %v5872_v54 }
 0x1eb   :  { %v5855_v49 = vld [vmem:[#allocation2 + $0x480] sm:$0xf]  ;;  %v8479_v56 = vld [vmem:[#allocation2 + $0x48c] sm:$0xf0]  ;;  %v6256_v62 = vor.u32 %v8579_v50, %v6255_v8  ;;  %1517 = vmatpush.bf16.msra.mxu1 %v6000_v26 }
 0x1ec   :  { %v5983_v7 = vld [vmem:[#allocation2 + $0x580] sm:$0xf]  ;;  %v8511_v11 = vld [vmem:[#allocation2 + $0x58c] sm:$0xf0]  ;;  %v5856_v17 = vor.u32 %v8479_v56, %v5855_v49  ;;  %1531 = vmatpush.bf16.msra.mxu2 %v6128_v35 }
 0x1ed   :  { %v6111_v13 = vld [vmem:[#allocation2 + $0x680] sm:$0xf]  ;;  %v8543_v59 = vld [vmem:[#allocation2 + $0x68c] sm:$0xf0]  ;;  %v5984_v38 = vor.u32 %v8511_v11, %v5983_v7  ;;  %1545 = vmatpush.bf16.msra.mxu3 %v6256_v62 }
 0x1ee   :  { %v6239_v47 = vld [vmem:[#allocation2 + $0x780] sm:$0xf]  ;;  %v8575_v63 = vld [vmem:[#allocation2 + $0x78c] sm:$0xf0]  ;;  %v6112_v44 = vor.u32 %v8543_v59, %v6111_v13  ;;  %1504 = vmatpush.bf16.msra.mxu0 %v5856_v17 }
 0x1ef   :  { %v5839_v53 = vld [vmem:[#allocation2 + $0x460] sm:$0xf]  ;;  %v8475_v0 = vld [vmem:[#allocation2 + $0x46c] sm:$0xf0]  ;;  %v6240_v55 = vor.u32 %v8575_v63, %v6239_v47  ;;  %1518 = vmatpush.bf16.msra.mxu1 %v5984_v38 }
 0x1f0   :  { %v5967_v3 = vld [vmem:[#allocation2 + $0x560] sm:$0xf]  ;;  %v8507_v21 = vld [vmem:[#allocation2 + $0x56c] sm:$0xf0]  ;;  %v5840_v36 = vor.u32 %v8475_v0, %v5839_v53  ;;  %1532 = vmatpush.bf16.msra.mxu2 %v6112_v44 }
 0x1f1   :  { %v6095_v60 = vld [vmem:[#allocation2 + $0x660] sm:$0xf]  ;;  %v8539_v32 = vld [vmem:[#allocation2 + $0x66c] sm:$0xf0]  ;;  %v5968_v54 = vor.u32 %v8507_v21, %v5967_v3  ;;  %1546 = vmatpush.bf16.msra.mxu3 %v6240_v55 }
 0x1f2   :  { %v6223_v8 = vld [vmem:[#allocation2 + $0x760] sm:$0xf]  ;;  %v8571_v50 = vld [vmem:[#allocation2 + $0x76c] sm:$0xf0]  ;;  %v6096_v49 = vor.u32 %v8539_v32, %v6095_v60  ;;  %1505 = vmatpush.bf16.msra.mxu0 %v5840_v36 }
 0x1f3   :  { %v5823_v26 = vld [vmem:[#allocation2 + $0x440] sm:$0xf]  ;;  %v8471_v35 = vld [vmem:[#allocation2 + $0x44c] sm:$0xf0]  ;;  %v6224_v7 = vor.u32 %v8571_v50, %v6223_v8  ;;  %1519 = vmatpush.bf16.msra.mxu1 %v5968_v54 }
 0x1f4   :  { %v5951_v56 = vld [vmem:[#allocation2 + $0x540] sm:$0xf]  ;;  %v8503_v11 = vld [vmem:[#allocation2 + $0x54c] sm:$0xf0]  ;;  %v5824_v47 = vor.u32 %v8471_v35, %v5823_v26  ;;  %1533 = vmatpush.bf16.msra.mxu2 %v6096_v49 }
 0x1f5   :  { %v6079_v13 = vld [vmem:[#allocation2 + $0x640] sm:$0xf]  ;;  %v8535_v62 = vld [vmem:[#allocation2 + $0x64c] sm:$0xf0]  ;;  %v5952_v17 = vor.u32 %v8503_v11, %v5951_v56  ;;  %1547 = vmatpush.bf16.msra.mxu3 %v6224_v7 }
 0x1f6   :  { %v6207_v63 = vld [vmem:[#allocation2 + $0x740] sm:$0xf]  ;;  %v8567_v59 = vld [vmem:[#allocation2 + $0x74c] sm:$0xf0]  ;;  %v6080_v53 = vor.u32 %v8535_v62, %v6079_v13  ;;  %1506 = vmatpush.bf16.msra.mxu0 %v5824_v47  ;;  %v8489_v62 = vld [vmem:[#allocation2 + $0x4e4] sm:$0xf] }
 0x1f7   :  { %v5807_v38 = vld [vmem:[#allocation2 + $0x420] sm:$0xf]  ;;  %v8467_v44 = vld [vmem:[#allocation2 + $0x42c] sm:$0xf0]  ;;  %v6208_v3 = vor.u32 %v8567_v59, %v6207_v63  ;;  %1520 = vmatpush.bf16.msra.mxu1 %v5952_v17  ;;  %v5905_v63 = vld [vmem:[#allocation2 + $0x4f0] sm:$0xf0] }
 0x1f8   :  { %v5935_v0 = vld [vmem:[#allocation2 + $0x520] sm:$0xf]  ;;  %v8499_v21 = vld [vmem:[#allocation2 + $0x52c] sm:$0xf0]  ;;  %v5808_v50 = vor.u32 %v8467_v44, %v5807_v38  ;;  %1534 = vmatpush.bf16.msra.mxu2 %v6080_v53  ;;  %v8521_v59 = vld [vmem:[#allocation2 + $0x5e4] sm:$0xf] }
 0x1f9   :  { %v6063_v60 = vld [vmem:[#allocation2 + $0x620] sm:$0xf]  ;;  %v8531_v55 = vld [vmem:[#allocation2 + $0x62c] sm:$0xf0]  ;;  %v5936_v36 = vor.u32 %v8499_v21, %v5935_v0  ;;  %1548 = vmatpush.bf16.msra.mxu3 %v6208_v3  ;;  %v6033_v38 = vld [vmem:[#allocation2 + $0x5f0] sm:$0xf0] }
 0x1fa   :  { %v6191_v32 = vld [vmem:[#allocation2 + $0x720] sm:$0xf]  ;;  %v8563_v8 = vld [vmem:[#allocation2 + $0x72c] sm:$0xf0]  ;;  %v6064_v54 = vor.u32 %v8531_v55, %v6063_v60  ;;  %1507 = vmatpush.bf16.msra.mxu0 %v5808_v50  ;;  %v8553_v44 = vld [vmem:[#allocation2 + $0x6e4] sm:$0xf]  ;;  %v5908_v60 = vor.u32 %v8489_v62, %v5905_v63  ;;  %v6036_v55 = vor.u32 %v8521_v59, %v6033_v38 }
 0x1fb   :  { %v5791_v41 = vld [vmem:[#allocation2 + $0x400] sm:$0xf]  ;;  %v8463_v31 = vld [vmem:[#allocation2 + $0x40c] sm:$0xf0]  ;;  %v6192_v56 = vor.u32 %v8563_v8, %v6191_v32  ;;  %1521 = vmatpush.bf16.msra.mxu1 %v5936_v36  ;;  %v8585_v0 = vld [vmem:[#allocation2 + $0x7e4] sm:$0xf]  ;;  %v6164_v32 = vor.u32 %v8553_v44, %v6161_v14  ;;  %v10036_v36 = vpack.c.bf16 %v9436_v58, %v9422_v37  ;;  %v10044_v14 = vpack.c.bf16 %v9427_v40, %v9412_v22 }
 0x1fc   :  { %v5919_v49 = vld [vmem:[#allocation2 + $0x500] sm:$0xf]  ;;  %v8495_v26 = vld [vmem:[#allocation2 + $0x50c] sm:$0xf0]  ;;  %v5792_v47 = vor.u32 %v8463_v31, %v5791_v41  ;;  %1535 = vmatpush.bf16.msra.mxu2 %v6064_v54  ;;  %v6289_v21 = vld [vmem:[#allocation2 + $0x7f0] sm:$0xf0] }
 0x1fd   :  { %v6047_v35 = vld [vmem:[#allocation2 + $0x600] sm:$0xf]  ;;  %v8527_v7 = vld [vmem:[#allocation2 + $0x60c] sm:$0xf0]  ;;  %v5920_v17 = vor.u32 %v8495_v26, %v5919_v49  ;;  %1549 = vmatpush.bf16.msra.mxu3 %v6192_v56  ;;  %v8485_v8 = vld [vmem:[#allocation2 + $0x4c4] sm:$0xf]  ;;  %v6292_v50 = vor.u32 %v8585_v0, %v6289_v21  ;;  %v10040_v26 = vpack.c.bf16 %v9440_v61, %v9425_v39  ;;  %v10048_v56 = vpack.c.bf16 %v9430_v42, %v9415_v24 }
 0x1fe   :  { %v6175_v11 = vld [vmem:[#allocation2 + $0x700] sm:$0xf]  ;;  %v8559_v13 = vld [vmem:[#allocation2 + $0x70c] sm:$0xf0]  ;;  %v6048_v53 = vor.u32 %v8527_v7, %v6047_v35  ;;  %1508 = vmatpush.bf16.msra.mxu0 %v5792_v47  ;;  %v6017_v31 = vld [vmem:[#allocation2 + $0x5d0] sm:$0xf0]  ;;  %v5892_v35 = vor.u32 %v8485_v8, %v5889_v23 }
 0x1ff   :  { %v6176_v3 = vor.u32 %v8559_v13, %v6175_v11  ;;  %v8549_v41 = vld [vmem:[#allocation2 + $0x6c4] sm:$0xf]  ;;  %1522 = vmatpush.bf16.msra.mxu1 %v5920_v17  ;;  %v6273_v49 = vld [vmem:[#allocation2 + $0x7d0] sm:$0xf0]  ;;  %v6020_v37 = vor.u32 %v8517_v6, %v6017_v31 }
 0x200   :  { %1536 = vmatpush.bf16.msra.mxu2 %v6048_v53  ;;  %v8581_v54 = vld [vmem:[#allocation2 + $0x7c4] sm:$0xf]  ;;  %v6148_v58 = vor.u32 %v8549_v41, %v6145_v52  ;;  %v5873_v11 = vld [vmem:[#allocation2 + $0x4b0] sm:$0xf0] }
 0x201   :  { %1550 = vmatpush.bf16.msra.mxu3 %v6176_v3  ;;  %v8481_v7 = vld [vmem:[#allocation2 + $0x4a4] sm:$0xf]  ;;  %v6276_v39 = vor.u32 %v8581_v54, %v6273_v49  ;;  %v6001_v61 = vld [vmem:[#allocation2 + $0x5b0] sm:$0xf0]  ;;  %1509 = vmatmul.bf16.vlgmr.msra.gmra.mxu0 %v10044_v14 }
 0x202   :  { %1557 = vmatpush.bf16.msrb.mxu0 %v5908_v60  ;;  %v8513_v13 = vld [vmem:[#allocation2 + $0x5a4] sm:$0xf]  ;;  %v6129_v22 = vld [vmem:[#allocation2 + $0x6b0] sm:$0xf0]  ;;  %v5876_v24 = vor.u32 %v8481_v7, %v5873_v11  ;;  %1523 = vmatmul.bf16.vlgmr.msra.gmra.mxu1 %v10048_v56 }
 0x203   :  { %1571 = vmatpush.bf16.msrb.mxu1 %v6036_v55  ;;  %v8545_v62 = vld [vmem:[#allocation2 + $0x6a4] sm:$0xf]  ;;  %1537 = vmatmul.bf16.vlgmr.msra.gmra.mxu2 %v10036_v36  ;;  %v6257_v23 = vld [vmem:[#allocation2 + $0x7b0] sm:$0xf0]  ;;  %v6004_v42 = vor.u32 %v8513_v13, %v6001_v61 }
 0x204   :  { %1585 = vmatpush.bf16.msrb.mxu2 %v6164_v32  ;;  %v8577_v40 = vld [vmem:[#allocation2 + $0x7a4] sm:$0xf]  ;;  %1551 = vmatmul.bf16.vlgmr.msra.gmra.mxu3 %v10040_v26  ;;  %v6132_v52 = vor.u32 %v8545_v62, %v6129_v22  ;;  %v5857_v63 = vld [vmem:[#allocation2 + $0x490] sm:$0xf0] }
 0x205   :  { %1599 = vmatpush.bf16.msrb.mxu3 %v6292_v50  ;;  %v8477_v6 = vld [vmem:[#allocation2 + $0x484] sm:$0xf]  ;;  %v6260_v47 = vor.u32 %v8577_v40, %v6257_v23  ;;  %v5985_v38 = vld [vmem:[#allocation2 + $0x590] sm:$0xf0] }
 0x206   :  { %1558 = vmatpush.bf16.msrb.mxu0 %v5892_v35  ;;  %v8509_v59 = vld [vmem:[#allocation2 + $0x584] sm:$0xf]  ;;  %v6113_v17 = vld [vmem:[#allocation2 + $0x690] sm:$0xf0]  ;;  %v5860_v21 = vor.u32 %v8477_v6, %v5857_v63 }
 0x207   :  { %1572 = vmatpush.bf16.msrb.mxu1 %v6020_v37  ;;  %v8541_v44 = vld [vmem:[#allocation2 + $0x684] sm:$0xf]  ;;  %v6241_v0 = vld [vmem:[#allocation2 + $0x790] sm:$0xf0]  ;;  %v5988_v3 = vor.u32 %v8509_v59, %v5985_v38 }
 0x208   :  { %1586 = vmatpush.bf16.msrb.mxu2 %v6148_v58  ;;  %v8573_v53 = vld [vmem:[#allocation2 + $0x784] sm:$0xf]  ;;  %v6116_v60 = vor.u32 %v8541_v44, %v6113_v17  ;;  %v5841_v32 = vld [vmem:[#allocation2 + $0x470] sm:$0xf0] }
 0x209   :  { %1600 = vmatpush.bf16.msrb.mxu3 %v6276_v39  ;;  %v8473_v55 = vld [vmem:[#allocation2 + $0x464] sm:$0xf]  ;;  %v6244_v50 = vor.u32 %v8573_v53, %v6241_v0  ;;  %v5969_v31 = vld [vmem:[#allocation2 + $0x570] sm:$0xf0] }
 0x20a   :  { %1559 = vmatpush.bf16.msrb.mxu0 %v5876_v24  ;;  %v8505_v8 = vld [vmem:[#allocation2 + $0x564] sm:$0xf]  ;;  %v6097_v54 = vld [vmem:[#allocation2 + $0x670] sm:$0xf0]  ;;  %v5844_v37 = vor.u32 %v8473_v55, %v5841_v32 }
 0x20b   :  { %1573 = vmatpush.bf16.msrb.mxu1 %v6004_v42  ;;  %v8537_v41 = vld [vmem:[#allocation2 + $0x664] sm:$0xf]  ;;  %v6225_v35 = vld [vmem:[#allocation2 + $0x770] sm:$0xf0]  ;;  %v5972_v58 = vor.u32 %v8505_v8, %v5969_v31 }
 0x20c   :  { %1587 = vmatpush.bf16.msrb.mxu2 %v6132_v52  ;;  %v8569_v49 = vld [vmem:[#allocation2 + $0x764] sm:$0xf]  ;;  %v6100_v7 = vor.u32 %v8537_v41, %v6097_v54  ;;  %v5825_v13 = vld [vmem:[#allocation2 + $0x450] sm:$0xf0] }
 0x20d   :  { %1601 = vmatpush.bf16.msrb.mxu3 %v6260_v47  ;;  %v8469_v11 = vld [vmem:[#allocation2 + $0x444] sm:$0xf]  ;;  %v6228_v61 = vor.u32 %v8569_v49, %v6225_v35  ;;  %v5953_v62 = vld [vmem:[#allocation2 + $0x550] sm:$0xf0] }
 0x20e   :  { %1560 = vmatpush.bf16.msrb.mxu0 %v5860_v21  ;;  %v8501_v39 = vld [vmem:[#allocation2 + $0x544] sm:$0xf]  ;;  %v6081_v40 = vld [vmem:[#allocation2 + $0x650] sm:$0xf0]  ;;  %v5828_v42 = vor.u32 %v8469_v11, %v5825_v13  ;;  %v6039_v11 = vld [vmem:[#allocation2 + $0x5e8] sm:$0xf] }
 0x20f   :  { %1574 = vmatpush.bf16.msrb.mxu1 %v5988_v3  ;;  %v8533_v22 = vld [vmem:[#allocation2 + $0x644] sm:$0xf]  ;;  %v6209_v24 = vld [vmem:[#allocation2 + $0x750] sm:$0xf0]  ;;  %v5956_v52 = vor.u32 %v8501_v39, %v5953_v62  ;;  %v8524_v39 = vld [vmem:[#allocation2 + $0x5f4] sm:$0xf0] }
 0x210   :  { %1588 = vmatpush.bf16.msrb.mxu2 %v6116_v60  ;;  %v8565_v23 = vld [vmem:[#allocation2 + $0x744] sm:$0xf]  ;;  %v6084_v6 = vor.u32 %v8533_v22, %v6081_v40  ;;  %v5809_v59 = vld [vmem:[#allocation2 + $0x430] sm:$0xf0]  ;;  %v8556_v62 = vld [vmem:[#allocation2 + $0x6f4] sm:$0xf0] }
 0x211   :  { %1602 = vmatpush.bf16.msrb.mxu3 %v6244_v50  ;;  %v8465_v63 = vld [vmem:[#allocation2 + $0x424] sm:$0xf]  ;;  %v6212_v38 = vor.u32 %v8565_v23, %v6209_v24  ;;  %v5937_v44 = vld [vmem:[#allocation2 + $0x530] sm:$0xf0]  ;;  %v6295_v23 = vld [vmem:[#allocation2 + $0x7e8] sm:$0xf] }
 0x212   :  { %1561 = vmatpush.bf16.msrb.mxu0 %v5844_v37  ;;  %v8497_v47 = vld [vmem:[#allocation2 + $0x524] sm:$0xf]  ;;  %v6065_v53 = vld [vmem:[#allocation2 + $0x630] sm:$0xf0]  ;;  %v5812_v3 = vor.u32 %v8465_v63, %v5809_v59  ;;  %v8588_v24 = vld [vmem:[#allocation2 + $0x7f4] sm:$0xf0] }
 0x213   :  { %1575 = vmatpush.bf16.msrb.mxu1 %v5972_v58  ;;  %v8529_v17 = vld [vmem:[#allocation2 + $0x624] sm:$0xf]  ;;  %v6193_v21 = vld [vmem:[#allocation2 + $0x730] sm:$0xf0]  ;;  %v5940_v32 = vor.u32 %v8497_v47, %v5937_v44  ;;  %v5911_v58 = vld [vmem:[#allocation2 + $0x4e8] sm:$0xf]  ;;  %v6296_v44 = vor.u32 %v8588_v24, %v6295_v23 }
 0x214   :  { %1589 = vmatpush.bf16.msrb.mxu2 %v6100_v7  ;;  %v8561_v0 = vld [vmem:[#allocation2 + $0x724] sm:$0xf]  ;;  %v5793_v55 = vld [vmem:[#allocation2 + $0x410] sm:$0xf0]  ;;  %v6068_v8 = vor.u32 %v8529_v17, %v6065_v53  ;;  %v8492_v7 = vld [vmem:[#allocation2 + $0x4f4] sm:$0xf0] }
 0x215   :  { %1603 = vmatpush.bf16.msrb.mxu3 %v6228_v61  ;;  %v8461_v60 = vld [vmem:[#allocation2 + $0x404] sm:$0xf]  ;;  %v5921_v31 = vld [vmem:[#allocation2 + $0x510] sm:$0xf0]  ;;  %v6196_v54 = vor.u32 %v8561_v0, %v6193_v21  ;;  %v6167_v61 = vld [vmem:[#allocation2 + $0x6e8] sm:$0xf] }
 0x216   :  { %1562 = vmatpush.bf16.msrb.mxu0 %v5828_v42  ;;  %v8493_v50 = vld [vmem:[#allocation2 + $0x504] sm:$0xf]  ;;  %v6049_v49 = vld [vmem:[#allocation2 + $0x610] sm:$0xf0]  ;;  %v5796_v13 = vor.u32 %v8461_v60, %v5793_v55  ;;  %v6168_v63 = vor.u32 %v8556_v62, %v6167_v61  ;;  %v5895_v59 = vld [vmem:[#allocation2 + $0x4c8] sm:$0xf] }
 0x217   :  { %1576 = vmatpush.bf16.msrb.mxu1 %v5956_v52  ;;  %v8525_v41 = vld [vmem:[#allocation2 + $0x604] sm:$0xf]  ;;  %v6177_v37 = vld [vmem:[#allocation2 + $0x710] sm:$0xf0]  ;;  %v5924_v22 = vor.u32 %v8493_v50, %v5921_v31  ;;  %v5912_v52 = vor.u32 %v8492_v7, %v5911_v58  ;;  %v8488_v47 = vld [vmem:[#allocation2 + $0x4d4] sm:$0xf0] }
 0x218   :  { %1590 = vmatpush.bf16.msrb.mxu2 %v6084_v6  ;;  %v8557_v35 = vld [vmem:[#allocation2 + $0x704] sm:$0xf]  ;;  %v6052_v40 = vor.u32 %v8525_v41, %v6049_v49  ;;  %v6040_v6 = vor.u32 %v8524_v39, %v6039_v11  ;;  %v8520_v17 = vld [vmem:[#allocation2 + $0x5d4] sm:$0xf0]  ;;  %v6151_v53 = vld [vmem:[#allocation2 + $0x6c8] sm:$0xf]  ;;  %v5896_v60 = vor.u32 %v8488_v47, %v5895_v59 }
 0x219   :  { %1604 = vmatpush.bf16.msrb.mxu3 %v6212_v38  ;;  %v6180_v42 = vor.u32 %v8557_v35, %v6177_v37  ;;  %v6023_v38 = vld [vmem:[#allocation2 + $0x5c8] sm:$0xf]  ;;  %v8552_v0 = vld [vmem:[#allocation2 + $0x6d4] sm:$0xf0] }
 0x21a   :  { %1563 = vmatpush.bf16.msrb.mxu0 %v5812_v3  ;;  %v6279_v21 = vld [vmem:[#allocation2 + $0x7c8] sm:$0xf]  ;;  %v8584_v3 = vld [vmem:[#allocation2 + $0x7d4] sm:$0xf0]  ;;  %v6024_v55 = vor.u32 %v8520_v17, %v6023_v38 }
 0x21b   :  { %1577 = vmatpush.bf16.msrb.mxu1 %v5940_v32  ;;  %v6152_v32 = vor.u32 %v8552_v0, %v6151_v53  ;;  %v8484_v50 = vld [vmem:[#allocation2 + $0x4b4] sm:$0xf0]  ;;  %v6007_v31 = vld [vmem:[#allocation2 + $0x5a8] sm:$0xf]  ;;  %v6280_v41 = vor.u32 %v8584_v3, %v6279_v21 }
 0x21c   :  { %1591 = vmatpush.bf16.msrb.mxu2 %v6068_v8  ;;  %v5879_v8 = vld [vmem:[#allocation2 + $0x4a8] sm:$0xf]  ;;  %v8548_v35 = vld [vmem:[#allocation2 + $0x6b4] sm:$0xf0] }
 0x21d   :  { %1605 = vmatpush.bf16.msrb.mxu3 %v6196_v54  ;;  %v8516_v54 = vld [vmem:[#allocation2 + $0x5b4] sm:$0xf0]  ;;  %v6135_v49 = vld [vmem:[#allocation2 + $0x6a8] sm:$0xf]  ;;  %v5880_v7 = vor.u32 %v8484_v50, %v5879_v8 }
 0x21e   :  { %1564 = vmatpush.bf16.msrb.mxu0 %v5796_v13  ;;  %v6263_v37 = vld [vmem:[#allocation2 + $0x7a8] sm:$0xf]  ;;  %v8580_v58 = vld [vmem:[#allocation2 + $0x7b4] sm:$0xf0]  ;;  %v6008_v11 = vor.u32 %v8516_v54, %v6007_v31  ;;  %v6136_v13 = vor.u32 %v8548_v35, %v6135_v49 }
 0x21f   :  { %1578 = vmatpush.bf16.msrb.mxu1 %v5924_v22  ;;  %v5863_v39 = vld [vmem:[#allocation2 + $0x488] sm:$0xf]  ;;  %v8480_v61 = vld [vmem:[#allocation2 + $0x494] sm:$0xf0]  ;;  %v6264_v22 = vor.u32 %v8580_v58, %v6263_v37 }
 0x220   :  { %1592 = vmatpush.bf16.msrb.mxu2 %v6052_v40  ;;  %v5991_v62 = vld [vmem:[#allocation2 + $0x588] sm:$0xf]  ;;  %v8512_v40 = vld [vmem:[#allocation2 + $0x594] sm:$0xf0] }
 0x221   :  { %1606 = vmatpush.bf16.msrb.mxu3 %v6180_v42  ;;  %1565 = vmatmul.bf16.vlgmr.msrb.gmra.mxu0 %v10044_v14  ;;  %v6119_v23 = vld [vmem:[#allocation2 + $0x688] sm:$0xf]  ;;  %v8544_v24 = vld [vmem:[#allocation2 + $0x694] sm:$0xf0] }
 0x222   :  { %1613 = vmatpush.bf16.msra.mxu0 %v5912_v52  ;;  %1579 = vmatmul.bf16.vlgmr.msrb.gmra.mxu1 %v10048_v56  ;;  %v6247_v42 = vld [vmem:[#allocation2 + $0x788] sm:$0xf]  ;;  %v8576_v52 = vld [vmem:[#allocation2 + $0x794] sm:$0xf0]  ;;  %v6120_v59 = vor.u32 %v8544_v24, %v6119_v23 }
 0x223   :  { %1627 = vmatpush.bf16.msra.mxu1 %v6040_v6  ;;  %1593 = vmatmul.bf16.vlgmr.msrb.gmra.mxu2 %v10036_v36  ;;  %v5864_v6 = vor.u32 %v8480_v61, %v5863_v39  ;;  %v5847_v47 = vld [vmem:[#allocation2 + $0x468] sm:$0xf]  ;;  %v8476_v38 = vld [vmem:[#allocation2 + $0x474] sm:$0xf0]  ;;  %v6248_v17 = vor.u32 %v8576_v52, %v6247_v42 }
 0x224   :  { %1641 = vmatpush.bf16.msra.mxu2 %v6168_v63  ;;  %1607 = vmatmul.bf16.vlgmr.msrb.gmra.mxu3 %v10040_v26  ;;  %v5992_v63 = vor.u32 %v8512_v40, %v5991_v62  ;;  %v8508_v53 = vld [vmem:[#allocation2 + $0x574] sm:$0xf0]  ;;  %v6103_v0 = vld [vmem:[#allocation2 + $0x668] sm:$0xf] }
 0x225   :  { %1655 = vmatpush.bf16.msra.mxu3 %v6296_v44  ;;  %v5975_v44 = vld [vmem:[#allocation2 + $0x568] sm:$0xf]  ;;  %v8540_v21 = vld [vmem:[#allocation2 + $0x674] sm:$0xf0] }
 0x226   :  { %1614 = vmatpush.bf16.msra.mxu0 %v5896_v60  ;;  %v6231_v3 = vld [vmem:[#allocation2 + $0x768] sm:$0xf]  ;;  %v8572_v60 = vld [vmem:[#allocation2 + $0x774] sm:$0xf0]  ;;  %v6104_v8 = vor.u32 %v8540_v21, %v6103_v0 }
 0x227   :  { %1628 = vmatpush.bf16.msra.mxu1 %v6024_v55  ;;  %v5848_v55 = vor.u32 %v8476_v38, %v5847_v47  ;;  %v5831_v50 = vld [vmem:[#allocation2 + $0x448] sm:$0xf]  ;;  %v8472_v31 = vld [vmem:[#allocation2 + $0x454] sm:$0xf0]  ;;  %v6232_v54 = vor.u32 %v8572_v60, %v6231_v3 }
 0x228   :  { %1642 = vmatpush.bf16.msra.mxu2 %v6152_v32  ;;  %v5976_v32 = vor.u32 %v8508_v53, %v5975_v44  ;;  %v8504_v49 = vld [vmem:[#allocation2 + $0x554] sm:$0xf0]  ;;  %v6087_v35 = vld [vmem:[#allocation2 + $0x648] sm:$0xf] }
 0x229   :  { %1656 = vmatpush.bf16.msra.mxu3 %v6280_v41  ;;  %v5959_v41 = vld [vmem:[#allocation2 + $0x548] sm:$0xf]  ;;  %v8536_v37 = vld [vmem:[#allocation2 + $0x654] sm:$0xf0] }
 0x22a   :  { %1615 = vmatpush.bf16.msra.mxu0 %v5880_v7  ;;  %v6215_v58 = vld [vmem:[#allocation2 + $0x748] sm:$0xf]  ;;  %v8568_v7 = vld [vmem:[#allocation2 + $0x754] sm:$0xf0]  ;;  %v6088_v39 = vor.u32 %v8536_v37, %v6087_v35 }
 0x22b   :  { %1629 = vmatpush.bf16.msra.mxu1 %v6008_v11  ;;  %v5832_v11 = vor.u32 %v8472_v31, %v5831_v50  ;;  %v5815_v61 = vld [vmem:[#allocation2 + $0x428] sm:$0xf]  ;;  %v8468_v62 = vld [vmem:[#allocation2 + $0x434] sm:$0xf0]  ;;  %v6216_v40 = vor.u32 %v8568_v7, %v6215_v58  ;;  %v8522_v50 = vld [vmem:[#allocation2 + $0x5ec] sm:$0xf] }
 0x22c   :  { %1643 = vmatpush.bf16.msra.mxu2 %v6136_v13  ;;  %v5960_v13 = vor.u32 %v8504_v49, %v5959_v41  ;;  %v8500_v23 = vld [vmem:[#allocation2 + $0x534] sm:$0xf0]  ;;  %v6071_v24 = vld [vmem:[#allocation2 + $0x628] sm:$0xf]  ;;  %v6041_v41 = vld [vmem:[#allocation2 + $0x5f8] sm:$0xf0] }
 0x22d   :  { %1657 = vmatpush.bf16.msra.mxu3 %v6264_v22  ;;  %v5943_v22 = vld [vmem:[#allocation2 + $0x528] sm:$0xf]  ;;  %v8532_v42 = vld [vmem:[#allocation2 + $0x634] sm:$0xf0]  ;;  %v6169_v49 = vld [vmem:[#allocation2 + $0x6f8] sm:$0xf0] }
 0x22e   :  { %1616 = vmatpush.bf16.msra.mxu0 %v5864_v6  ;;  %v6199_v52 = vld [vmem:[#allocation2 + $0x728] sm:$0xf]  ;;  %v8564_v6 = vld [vmem:[#allocation2 + $0x734] sm:$0xf0]  ;;  %v5944_v38 = vor.u32 %v8500_v23, %v5943_v22  ;;  %v6072_v44 = vor.u32 %v8532_v42, %v6071_v24  ;;  %v8586_v58 = vld [vmem:[#allocation2 + $0x7ec] sm:$0xf] }
 0x22f   :  { %1630 = vmatpush.bf16.msra.mxu1 %v5992_v63  ;;  %v5816_v63 = vor.u32 %v8468_v62, %v5815_v61  ;;  %v8464_v47 = vld [vmem:[#allocation2 + $0x414] sm:$0xf0]  ;;  %v6055_v0 = vld [vmem:[#allocation2 + $0x608] sm:$0xf]  ;;  %v6200_v21 = vor.u32 %v8564_v6, %v6199_v52  ;;  %v6297_v7 = vld [vmem:[#allocation2 + $0x7f8] sm:$0xf0] }
 0x230   :  { %1644 = vmatpush.bf16.msra.mxu2 %v6120_v59  ;;  %v5799_v59 = vld [vmem:[#allocation2 + $0x408] sm:$0xf]  ;;  %v8496_v53 = vld [vmem:[#allocation2 + $0x514] sm:$0xf0]  ;;  %v8486_v62 = vld [vmem:[#allocation2 + $0x4cc] sm:$0xf]  ;;  %v6300_v23 = vor.u32 %v8586_v58, %v6297_v7 }
 0x231   :  { %1658 = vmatpush.bf16.msra.mxu3 %v6248_v17  ;;  %v5927_v17 = vld [vmem:[#allocation2 + $0x508] sm:$0xf]  ;;  %v8528_v3 = vld [vmem:[#allocation2 + $0x614] sm:$0xf0]  ;;  %v5800_v31 = vor.u32 %v8464_v47, %v5799_v59  ;;  %v5897_v22 = vld [vmem:[#allocation2 + $0x4d8] sm:$0xf0] }
 0x232   :  { %1617 = vmatpush.bf16.msra.mxu0 %v5848_v55  ;;  %v6183_v60 = vld [vmem:[#allocation2 + $0x708] sm:$0xf]  ;;  %v8560_v55 = vld [vmem:[#allocation2 + $0x714] sm:$0xf0]  ;;  %v5928_v35 = vor.u32 %v8496_v53, %v5927_v17  ;;  %v6056_v37 = vor.u32 %v8528_v3, %v6055_v0  ;;  %v6025_v24 = vld [vmem:[#allocation2 + $0x5d8] sm:$0xf0]  ;;  %v5900_v59 = vor.u32 %v8486_v62, %v5897_v22 }
 0x233   :  { %1631 = vmatpush.bf16.msra.mxu1 %v5976_v32  ;;  %v8490_v32 = vld [vmem:[#allocation2 + $0x4ec] sm:$0xf]  ;;  %v6153_v52 = vld [vmem:[#allocation2 + $0x6d8] sm:$0xf0] }
 0x234   :  { %1645 = vmatpush.bf16.msra.mxu2 %v6104_v8  ;;  %v5913_v8 = vld [vmem:[#allocation2 + $0x4f8] sm:$0xf0]  ;;  %v8550_v42 = vld [vmem:[#allocation2 + $0x6cc] sm:$0xf] }
 0x235   :  { %1659 = vmatpush.bf16.msra.mxu3 %v6232_v54  ;;  %v8554_v54 = vld [vmem:[#allocation2 + $0x6ec] sm:$0xf]  ;;  %v5881_v17 = vld [vmem:[#allocation2 + $0x4b8] sm:$0xf0] }
 0x236   :  { %1618 = vmatpush.bf16.msra.mxu0 %v5832_v11  ;;  %v6184_v11 = vor.u32 %v8560_v55, %v6183_v60  ;;  %v6172_v61 = vor.u32 %v8554_v54, %v6169_v49  ;;  %v8582_v6 = vld [vmem:[#allocation2 + $0x7cc] sm:$0xf]  ;;  %v6137_v60 = vld [vmem:[#allocation2 + $0x6b8] sm:$0xf0] }
 0x237   :  { %1632 = vmatpush.bf16.msra.mxu1 %v5960_v13  ;;  %v5916_v13 = vor.u32 %v8490_v32, %v5913_v8  ;;  %v8514_v53 = vld [vmem:[#allocation2 + $0x5ac] sm:$0xf]  ;;  %v6265_v32 = vld [vmem:[#allocation2 + $0x7b8] sm:$0xf0] }
 0x238   :  { %1646 = vmatpush.bf16.msra.mxu2 %v6088_v39  ;;  %v6044_v39 = vor.u32 %v8522_v50, %v6041_v41  ;;  %v8546_v3 = vld [vmem:[#allocation2 + $0x6ac] sm:$0xf]  ;;  %v5865_v54 = vld [vmem:[#allocation2 + $0x498] sm:$0xf0] }
 0x239   :  { %1660 = vmatpush.bf16.msra.mxu3 %v6216_v40  ;;  %v8518_v40 = vld [vmem:[#allocation2 + $0x5cc] sm:$0xf]  ;;  %v6121_v7 = vld [vmem:[#allocation2 + $0x698] sm:$0xf0] }
 0x23a   :  { %1619 = vmatpush.bf16.msra.mxu0 %v5816_v63  ;;  %v6281_v63 = vld [vmem:[#allocation2 + $0x7d8] sm:$0xf0]  ;;  %v6028_v47 = vor.u32 %v8518_v40, %v6025_v24  ;;  %v8578_v55 = vld [vmem:[#allocation2 + $0x7ac] sm:$0xf] }
 0x23b   :  { %1633 = vmatpush.bf16.msra.mxu1 %v5944_v38  ;;  %v6156_v38 = vor.u32 %v8550_v42, %v6153_v52  ;;  %v6284_v0 = vor.u32 %v8582_v6, %v6281_v63  ;;  %v8478_v41 = vld [vmem:[#allocation2 + $0x48c] sm:$0xf]  ;;  %v5849_v40 = vld [vmem:[#allocation2 + $0x478] sm:$0xf0] }
 0x23c   :  { %1647 = vmatpush.bf16.msra.mxu2 %v6072_v44  ;;  %v8482_v44 = vld [vmem:[#allocation2 + $0x4ac] sm:$0xf]  ;;  %v5977_v42 = vld [vmem:[#allocation2 + $0x578] sm:$0xf0] }
 0x23d   :  { %1661 = vmatpush.bf16.msra.mxu3 %v6200_v21  ;;  %v6009_v21 = vld [vmem:[#allocation2 + $0x5b8] sm:$0xf0]  ;;  %v5884_v8 = vor.u32 %v8482_v44, %v5881_v17  ;;  %v8510_v49 = vld [vmem:[#allocation2 + $0x58c] sm:$0xf] }
 0x23e   :  { %1620 = vmatpush.bf16.msra.mxu0 %v5800_v31  ;;  %v6012_v50 = vor.u32 %v8514_v53, %v6009_v21  ;;  %v6140_v31 = vor.u32 %v8546_v3, %v6137_v60  ;;  %v8542_v58 = vld [vmem:[#allocation2 + $0x68c] sm:$0xf]  ;;  %v6105_v6 = vld [vmem:[#allocation2 + $0x678] sm:$0xf0] }
 0x23f   :  { %1634 = vmatpush.bf16.msra.mxu1 %v5928_v35  ;;  %v6268_v35 = vor.u32 %v8578_v55, %v6265_v32  ;;  %v6124_v62 = vor.u32 %v8542_v58, %v6121_v7  ;;  %v8474_v22 = vld [vmem:[#allocation2 + $0x46c] sm:$0xf]  ;;  %v5833_v53 = vld [vmem:[#allocation2 + $0x458] sm:$0xf0] }
 0x240   :  { %1648 = vmatpush.bf16.msra.mxu2 %v6056_v37  ;;  %v5993_v37 = vld [vmem:[#allocation2 + $0x598] sm:$0xf0]  ;;  %v8538_v52 = vld [vmem:[#allocation2 + $0x66c] sm:$0xf] }
 0x241   :  { %1662 = vmatpush.bf16.msra.mxu3 %v6184_v11  ;;  %1621 = vmatmul.bf16.vlgmr.msra.gmra.mxu0 %v10044_v14  ;;  %v8574_v11 = vld [vmem:[#allocation2 + $0x78c] sm:$0xf]  ;;  %v6108_v44 = vor.u32 %v8538_v52, %v6105_v6  ;;  %v5961_v3 = vld [vmem:[#allocation2 + $0x558] sm:$0xf0] }
 0x242   :  { %1669 = vmatpush.bf16.msrb.mxu0 %v5916_v13  ;;  %1635 = vmatmul.bf16.vlgmr.msra.gmra.mxu1 %v10048_v56  ;;  %v6249_v13 = vld [vmem:[#allocation2 + $0x798] sm:$0xf0]  ;;  %v8570_v63 = vld [vmem:[#allocation2 + $0x76c] sm:$0xf] }
 0x243   :  { %1683 = vmatpush.bf16.msrb.mxu1 %v6044_v39  ;;  %1649 = vmatmul.bf16.vlgmr.msra.gmra.mxu2 %v10036_v36  ;;  %v5868_v39 = vor.u32 %v8478_v41, %v5865_v54  ;;  %v6252_v24 = vor.u32 %v8574_v11, %v6249_v13  ;;  %v8470_v17 = vld [vmem:[#allocation2 + $0x44c] sm:$0xf]  ;;  %v6089_v55 = vld [vmem:[#allocation2 + $0x658] sm:$0xf0] }
 0x244   :  { %1697 = vmatpush.bf16.msrb.mxu2 %v6172_v61  ;;  %1663 = vmatmul.bf16.vlgmr.msra.gmra.mxu3 %v10040_v26  ;;  %v5996_v61 = vor.u32 %v8510_v49, %v5993_v37  ;;  %v8534_v60 = vld [vmem:[#allocation2 + $0x64c] sm:$0xf]  ;;  %v5817_v49 = vld [vmem:[#allocation2 + $0x438] sm:$0xf0] }
 0x245   :  { %1711 = vmatpush.bf16.msrb.mxu3 %v6300_v23  ;;  %v8506_v23 = vld [vmem:[#allocation2 + $0x56c] sm:$0xf]  ;;  %v6092_v41 = vor.u32 %v8534_v60, %v6089_v55  ;;  %v5945_v58 = vld [vmem:[#allocation2 + $0x538] sm:$0xf0]  ;;  %v6800_v60 = vor.u32 %v10023_v51, %v10015_v5  ;;  %v6400_v55 = vor.u32 %v9623_v18, %v9615_v19  ;;  %v6384_v19 = vor.u32 %v9607_v1, %v9599_v9 }
 0x246   :  { %1670 = vmatpush.bf16.msrb.mxu0 %v5900_v59  ;;  %v6233_v59 = vld [vmem:[#allocation2 + $0x778] sm:$0xf0]  ;;  %v8566_v32 = vld [vmem:[#allocation2 + $0x74c] sm:$0xf] }
 0x247   :  { %1684 = vmatpush.bf16.msrb.mxu1 %v6028_v47  ;;  %v5852_v47 = vor.u32 %v8474_v22, %v5849_v40  ;;  %v6236_v21 = vor.u32 %v8570_v63, %v6233_v59  ;;  %v8466_v54 = vld [vmem:[#allocation2 + $0x42c] sm:$0xf]  ;;  %v6073_v11 = vld [vmem:[#allocation2 + $0x638] sm:$0xf0] }
 0x248   :  { %1698 = vmatpush.bf16.msrb.mxu2 %v6156_v38  ;;  %v5980_v38 = vor.u32 %v8506_v23, %v5977_v42  ;;  %v8530_v7 = vld [vmem:[#allocation2 + $0x62c] sm:$0xf]  ;;  %v5801_v23 = vld [vmem:[#allocation2 + $0x418] sm:$0xf0] }
 0x249   :  { %1712 = vmatpush.bf16.msrb.mxu3 %v6284_v0  ;;  %v8502_v0 = vld [vmem:[#allocation2 + $0x54c] sm:$0xf]  ;;  %v6076_v22 = vor.u32 %v8530_v7, %v6073_v11  ;;  %v5929_v52 = vld [vmem:[#allocation2 + $0x518] sm:$0xf0] }
 0x24a   :  { %1671 = vmatpush.bf16.msrb.mxu0 %v5884_v8  ;;  %v6217_v8 = vld [vmem:[#allocation2 + $0x758] sm:$0xf0]  ;;  %v8562_v13 = vld [vmem:[#allocation2 + $0x72c] sm:$0xf] }
 0x24b   :  { %1685 = vmatpush.bf16.msrb.mxu1 %v6012_v50  ;;  %v5836_v50 = vor.u32 %v8470_v17, %v5833_v53  ;;  %v6220_v37 = vor.u32 %v8566_v32, %v6217_v8  ;;  %v8462_v40 = vld [vmem:[#allocation2 + $0x40c] sm:$0xf]  ;;  %v6057_v63 = vld [vmem:[#allocation2 + $0x618] sm:$0xf0]  ;;  %v10809_v8 = vld [vmem:[#allocation69_spill] sm:$0xff] }
 0x24c   :  { %1699 = vmatpush.bf16.msrb.mxu2 %v6140_v31  ;;  %v5964_v31 = vor.u32 %v8502_v0, %v5961_v3  ;;  %v8526_v6 = vld [vmem:[#allocation2 + $0x60c] sm:$0xf]  ;;  %v6416_v0 = vor.u32 %v9639_v10, %v9631_v57  ;;  %v6672_v3 = vor.u32 %v9895_v28, %v9887_v43  ;;  %v6528_v10 = vor.u32 %v9751_v45, %v9743_v12  ;;  %v10797_v5 = vld [vmem:[#allocation200_spill] sm:$0xff]  ;;  %v10802_v45 = vld [vmem:[#allocation81_spill] sm:$0xff] }
 0x24d   :  { %1713 = vmatpush.bf16.msrb.mxu3 %v6268_v35  ;;  %v8498_v35 = vld [vmem:[#allocation2 + $0x52c] sm:$0xf]  ;;  %v6060_v17 = vor.u32 %v8526_v6, %v6057_v63  ;;  %v6784_v28 = vor.u32 %v10007_v33, %v9999_v20  ;;  %v6640_v20 = vor.u32 %v9863_v25, %v9855_v27  ;;  %v6768_v43 = vor.u32 %v9991_v46, %v9983_v4  ;;  %v10798_v18 = vld [vmem:[#allocation204_spill] sm:$0xff]  ;;  %v10801_v27 = vld [vmem:[#allocation77_spill] sm:$0xff] }
 0x24e   :  { %1672 = vmatpush.bf16.msrb.mxu0 %v5868_v39  ;;  %v6201_v39 = vld [vmem:[#allocation2 + $0x738] sm:$0xf0]  ;;  %v8558_v59 = vld [vmem:[#allocation2 + $0x70c] sm:$0xf]  ;;  %v6624_v33 = vor.u32 %v10798_v18, %v10797_v5  ;;  %v6352_v46 = vor.u32 %v10802_v45, %v10801_v27  ;;  %v10840_v5 = vld [vmem:[#allocation277_spill] sm:$0xff] }
 0x24f   :  { %1686 = vmatpush.bf16.msrb.mxu1 %v5996_v61  ;;  %v5820_v61 = vor.u32 %v8466_v54, %v5817_v49  ;;  %v6204_v42 = vor.u32 %v8562_v13, %v6201_v39  ;;  %v10795_v1 = vld [vmem:[#allocation142_spill] sm:$0xff]  ;;  %v10817_v39 = vld [vmem:[#allocation61_spill] sm:$0xff]  ;;  %v10844_v27 = vld [vmem:[#allocation155_spill] sm:$0xff] }
 0x250   :  { %1700 = vmatpush.bf16.msrb.mxu2 %v6124_v62  ;;  %v5948_v62 = vor.u32 %v8498_v35, %v5945_v58  ;;  %v10796_v9 = vld [vmem:[#allocation146_spill] sm:$0xff]  ;;  %v10813_v35 = vld [vmem:[#allocation184_spill] sm:$0xff] }
 0x251   :  { %1714 = vmatpush.bf16.msrb.mxu3 %v6252_v24  ;;  %v8494_v24 = vld [vmem:[#allocation2 + $0x50c] sm:$0xf] }
 0x252   :  { %1673 = vmatpush.bf16.msrb.mxu0 %v5852_v47  ;;  %v6185_v47 = vld [vmem:[#allocation2 + $0x718] sm:$0xf0]  ;;  %v10803_v57 = vld [vmem:[#allocation134_spill] sm:$0xff] }
 0x253   :  { %1687 = vmatpush.bf16.msrb.mxu1 %v5980_v38  ;;  %v5804_v38 = vor.u32 %v8462_v40, %v5801_v23  ;;  %v6188_v53 = vor.u32 %v8558_v59, %v6185_v47  ;;  %v10804_v4 = vld [vmem:[#allocation138_spill] sm:$0xff]  ;;  %v10825_v47 = vld [vmem:[#allocation53_spill] sm:$0xff] }
 0x254   :  { %1701 = vmatpush.bf16.msrb.mxu2 %v6108_v44  ;;  %v5932_v44 = vor.u32 %v8494_v24, %v5929_v52  ;;  %v6480_v12 = vor.u32 %v10804_v4, %v10803_v57  ;;  %v10812_v54 = vld [vmem:[#allocation130_spill] sm:$0xff]  ;;  %v10821_v24 = vld [vmem:[#allocation176_spill] sm:$0xff]  ;;  %v10846_v57 = vld [vmem:[#allocation213_spill] sm:$0xff] }
 0x255   :  { %1715 = vmatpush.bf16.msrb.mxu3 %v6236_v21  ;;  %v6544_v21 = vor.u32 %v9767_v48, %v9759_v2  ;;  %v6656_v48 = vor.u32 %v9879_v29, %v9871_v30  ;;  %v6512_v29 = vor.u32 %v9735_v16, %v9727_v34  ;;  %v10794_v30 = vld [vmem:[#allocation88_spill] sm:$0xff]  ;;  %v6496_v2 = vor.u32 %v10796_v9, %v10795_v1  ;;  %v10799_v16 = vld [vmem:[#allocation258_spill] sm:$0xff]  ;;  %v10838_v1 = vld [vmem:[#allocation219_spill] sm:$0xff] }
 0x256   :  { %1674 = vmatpush.bf16.msrb.mxu0 %v5836_v50  ;;  %v6368_v51 = vor.u32 %v10794_v30, %v9583_v15  ;;  %v10800_v34 = vld [vmem:[#allocation262_spill] sm:$0xff]  ;;  %v10805_v15 = vld [vmem:[#allocation192_spill] sm:$0xff]  ;;  %v10810_v50 = vld [vmem:[#allocation73_spill] sm:$0xff] }
 0x257   :  { %1688 = vmatpush.bf16.msrb.mxu1 %v5964_v31  ;;  %v6752_v25 = vor.u32 %v10800_v34, %v10799_v16  ;;  %v6336_v31 = vor.u32 %v10810_v50, %v10809_v8  ;;  %v10815_v7 = vld [vmem:[#allocation242_spill] sm:$0xff]  ;;  %v10842_v16 = vld [vmem:[#allocation97_spill] sm:$0xff]  ;;  %v10854_v50 = vld [vmem:[#allocation91_spill] sm:$0xff] }
 0x258   :  { %1702 = vmatpush.bf16.msrb.mxu2 %v6092_v41  ;;  %v10811_v41 = vld [vmem:[#allocation126_spill] sm:$0xff] }
 0x259   :  { %1716 = vmatpush.bf16.msrb.mxu3 %v6220_v37  ;;  %v6464_v49 = vor.u32 %v10812_v54, %v10811_v41  ;;  %v10814_v37 = vld [vmem:[#allocation188_spill] sm:$0xff]  ;;  %v10816_v11 = vld [vmem:[#allocation246_spill] sm:$0xff]  ;;  %v10856_v54 = vld [vmem:[#allocation149_spill] sm:$0xff] }
 0x25a   :  { %1675 = vmatpush.bf16.msrb.mxu0 %v5820_v61  ;;  %v6592_v58 = vor.u32 %v10814_v37, %v10813_v35  ;;  %v6720_v13 = vor.u32 %v10816_v11, %v10815_v7  ;;  %v10818_v61 = vld [vmem:[#allocation65_spill] sm:$0xff]  ;;  %v10820_v40 = vld [vmem:[#allocation122_spill] sm:$0xff]  ;;  %v10855_v41 = vld [vmem:[#allocation152_spill] sm:$0xff] }
 0x25b   :  { %1689 = vmatpush.bf16.msrb.mxu1 %v5948_v62  ;;  %v6320_v62 = vor.u32 %v10818_v61, %v10817_v39  ;;  %v10823_v6 = vld [vmem:[#allocation234_spill] sm:$0xff]  ;;  %v10858_v37 = vld [vmem:[#allocation207_spill] sm:$0xff]  ;;  %v10859_v7 = vld [vmem:[#allocation268_spill] sm:$0xff] }
 0x25c   :  { %1703 = vmatpush.bf16.msrb.mxu2 %v6076_v22  ;;  %v10819_v22 = vld [vmem:[#allocation118_spill] sm:$0xff]  ;;  %v10860_v11 = vld [vmem:[#allocation265_spill] sm:$0xff]  ;;  %v10861_v39 = vld [vmem:[#allocation87_spill] sm:$0xff] }
 0x25d   :  { %1717 = vmatpush.bf16.msrb.mxu3 %v6204_v42  ;;  %v6448_v23 = vor.u32 %v10820_v40, %v10819_v22  ;;  %v10822_v42 = vld [vmem:[#allocation180_spill] sm:$0xff]  ;;  %v10824_v63 = vld [vmem:[#allocation238_spill] sm:$0xff]  ;;  %v10863_v40 = vld [vmem:[#allocation145_spill] sm:$0xff] }
 0x25e   :  { %1676 = vmatpush.bf16.msrb.mxu0 %v5804_v38  ;;  %v6576_v52 = vor.u32 %v10822_v42, %v10821_v24  ;;  %v6704_v59 = vor.u32 %v10824_v63, %v10823_v6  ;;  %v10826_v38 = vld [vmem:[#allocation57_spill] sm:$0xff]  ;;  %v10853_v8 = vld [vmem:[#allocation94_spill] sm:$0xff]  ;;  %v10862_v61 = vld [vmem:[#allocation84_spill] sm:$0xff] }
 0x25f   :  { %1690 = vmatpush.bf16.msrb.mxu1 %v5932_v44  ;;  %v6304_v44 = vor.u32 %v10826_v38, %v10825_v47  ;;  %v10857_v35 = vld [vmem:[#allocation210_spill] sm:$0xff]  ;;  %v10865_v42 = vld [vmem:[#allocation203_spill] sm:$0xff]  ;;  %v10868_v47 = vld [vmem:[#allocation257_spill] sm:$0xff] }
 0x260   :  { %1704 = vmatpush.bf16.msrb.mxu2 %v6060_v17  ;;  %v10827_v17 = vld [vmem:[#allocation110_spill] sm:$0xff] }
 0x261   :  { %1718 = vmatpush.bf16.msrb.mxu3 %v6188_v53  ;;  %1677 = vmatmul.bf16.vlgmr.msrb.gmra.mxu0 %v10044_v14  ;;  %v10807_v14 = vld [vmem:[#allocation250_spill] sm:$0xff] }
 0x262   :  { %2365 = vmatpush.bf16.msra.mxu0 %v6416_v0  ;;  %1691 = vmatmul.bf16.vlgmr.msrb.gmra.mxu1 %v10048_v56  ;;  %v10808_v56 = vld [vmem:[#allocation254_spill] sm:$0xff] }
 0x263   :  { %2379 = vmatpush.bf16.msra.mxu1 %v6544_v21  ;;  %1705 = vmatmul.bf16.vlgmr.msrb.gmra.mxu2 %v10036_v36  ;;  %v10806_v36 = vld [vmem:[#allocation196_spill] sm:$0xff]  ;;  %v6736_v32 = vor.u32 %v10808_v56, %v10807_v14  ;;  %v10828_v53 = vld [vmem:[#allocation114_spill] sm:$0xff]  ;;  %v10851_v56 = vld [vmem:[#allocation49_spill] sm:$0xff] }
 0x264   :  { %2393 = vmatpush.bf16.msra.mxu2 %v6672_v3  ;;  %1719 = vmatmul.bf16.vlgmr.msrb.gmra.mxu3 %v10040_v26  ;;  %v6608_v26 = vor.u32 %v10806_v36, %v10805_v15  ;;  %v6432_v0 = vor.u32 %v10828_v53, %v10827_v17  ;;  %v10829_v21 = vld [vmem:[#allocation168_spill] sm:$0xff]  ;;  %v10848_v15 = vld [vmem:[#allocation274_spill] sm:$0xff]  ;;  %v10849_v36 = vld [vmem:[#allocation271_spill] sm:$0xff] }
 0x265   :  { %2407 = vmatpush.bf16.msra.mxu3 %v6800_v60  ;;  %v10830_v3 = vld [vmem:[#allocation172_spill] sm:$0xff]  ;;  %v10850_v14 = vld [vmem:[#allocation50_spill] sm:$0xff] }
 0x266   :  { %2366 = vmatpush.bf16.msra.mxu0 %v6400_v55  ;;  %v6560_v60 = vor.u32 %v10830_v3, %v10829_v21  ;;  %v10831_v55 = vld [vmem:[#allocation226_spill] sm:$0xff]  ;;  %v10869_v17 = vld [vmem:[#allocation80_spill] sm:$0xff]  ;;  %v10871_v21 = vld [vmem:[#allocation137_spill] sm:$0xff] }
 0x267   :  { %2380 = vmatpush.bf16.msra.mxu1 %v6528_v10  ;;  %v10832_v10 = vld [vmem:[#allocation230_spill] sm:$0xff]  ;;  %v10870_v53 = vld [vmem:[#allocation76_spill] sm:$0xff]  ;;  %v10872_v3 = vld [vmem:[#allocation133_spill] sm:$0xff] }
 0x268   :  { %2394 = vmatpush.bf16.msra.mxu2 %v6656_v48  ;;  %v6688_v48 = vor.u32 %v10832_v10, %v10831_v55  ;;  %v10873_v55 = vld [vmem:[#allocation195_spill] sm:$0xff] }
 0x269   :  { %2408 = vmatpush.bf16.msra.mxu3 %v6784_v28  ;;  %v10833_v28 = vld [vmem:[#allocation106_spill] sm:$0xff]  ;;  %v10874_v10 = vld [vmem:[#allocation191_spill] sm:$0xff] }
 0x26a   :  { %2367 = vmatpush.bf16.msra.mxu0 %v6384_v19  ;;  %v10834_v19 = vld [vmem:[#allocation103_spill] sm:$0xff] }
 0x26b   :  { %2381 = vmatpush.bf16.msra.mxu1 %v6512_v29  ;;  %v6420_v29 = vor.u32 %v10834_v19, %v10833_v28  ;;  %v10875_v19 = vld [vmem:[#allocation253_spill] sm:$0xff] }
 0x26c   :  { %2395 = vmatpush.bf16.msra.mxu2 %v6640_v20  ;;  %v10835_v20 = vld [vmem:[#allocation164_spill] sm:$0xff] }
 0x26d   :  { %2409 = vmatpush.bf16.msra.mxu3 %v6768_v43  ;;  %v10836_v43 = vld [vmem:[#allocation161_spill] sm:$0xff] }
 0x26e   :  { %2368 = vmatpush.bf16.msra.mxu0 %v6368_v51  ;;  %v6548_v30 = vor.u32 %v10836_v43, %v10835_v20  ;;  %v10837_v51 = vld [vmem:[#allocation222_spill] sm:$0xff] }
 0x26f   :  { %2382 = vmatpush.bf16.msra.mxu1 %v6496_v2  ;;  %v6676_v9 = vor.u32 %v10838_v1, %v10837_v51  ;;  %v10839_v2 = vld [vmem:[#allocation280_spill] sm:$0xff] }
 0x270   :  { %2396 = vmatpush.bf16.msra.mxu2 %v6624_v33  ;;  %v6804_v18 = vor.u32 %v10840_v5, %v10839_v2  ;;  %v10841_v33 = vld [vmem:[#allocation100_spill] sm:$0xff] }
 0x271   :  { %2410 = vmatpush.bf16.msra.mxu3 %v6752_v25  ;;  %v6404_v34 = vor.u32 %v10842_v16, %v10841_v33  ;;  %v10843_v25 = vld [vmem:[#allocation158_spill] sm:$0xff]  ;;  %v10877_v51 = vld [vmem:[#allocation72_spill] sm:$0xff]  ;;  %v10880_v33 = vld [vmem:[#allocation125_spill] sm:$0xff] }
 0x272   :  { %2369 = vmatpush.bf16.msra.mxu0 %v6352_v46  ;;  %v6532_v45 = vor.u32 %v10844_v27, %v10843_v25  ;;  %v10845_v46 = vld [vmem:[#allocation216_spill] sm:$0xff]  ;;  %v10882_v25 = vld [vmem:[#allocation183_spill] sm:$0xff] }
 0x273   :  { %2383 = vmatpush.bf16.msra.mxu1 %v6480_v12  ;;  %v6660_v4 = vor.u32 %v10846_v57, %v10845_v46  ;;  %v10847_v12 = vld [vmem:[#allocation48_spill] sm:$0xff]  ;;  %v10883_v46 = vld [vmem:[#allocation245_spill] sm:$0xff] }
 0x274   :  { %2397 = vmatpush.bf16.msra.mxu2 %v6608_v26  ;;  %v6788_v26 = vor.u32 %v10849_v36, %v10848_v15  ;;  %v10878_v1 = vld [vmem:[#allocation68_spill] sm:$0xff]  ;;  %v10884_v57 = vld [vmem:[#allocation241_spill] sm:$0xff] }
 0x275   :  { %2411 = vmatpush.bf16.msra.mxu3 %v6736_v32  ;;  %v10852_v32 = vld [vmem:[#allocation51_spill] sm:$0xff]  ;;  %v10885_v36 = vld [vmem:[#allocation64_spill] sm:$0xff] }
 0x276   :  { %2370 = vmatpush.bf16.msra.mxu0 %v6336_v31  ;;  %v6388_v31 = vor.u32 %v10854_v50, %v10853_v8  ;;  %v10887_v50 = vld [vmem:[#allocation121_spill] sm:$0xff] }
 0x277   :  { %2384 = vmatpush.bf16.msra.mxu1 %v6464_v49  ;;  %v6516_v49 = vor.u32 %v10856_v54, %v10855_v41  ;;  %v10889_v54 = vld [vmem:[#allocation179_spill] sm:$0xff] }
 0x278   :  { %2398 = vmatpush.bf16.msra.mxu2 %v6592_v58  ;;  %v6644_v58 = vor.u32 %v10858_v37, %v10857_v35 }
 0x279   :  { %2412 = vmatpush.bf16.msra.mxu3 %v6720_v13  ;;  %v6772_v13 = vor.u32 %v10860_v11, %v10859_v7  ;;  %v10892_v7 = vld [vmem:[#allocation233_spill] sm:$0xff] }
 0x27a   :  { %2371 = vmatpush.bf16.msra.mxu0 %v6320_v62  ;;  %v6372_v62 = vor.u32 %v10862_v61, %v10861_v39  ;;  %v10893_v61 = vld [vmem:[#allocation56_spill] sm:$0xff] }
 0x27b   :  { %2385 = vmatpush.bf16.msra.mxu1 %v6448_v23  ;;  %v10864_v23 = vld [vmem:[#allocation141_spill] sm:$0xff] }
 0x27c   :  { %2399 = vmatpush.bf16.msra.mxu2 %v6576_v52  ;;  %v6500_v24 = vor.u32 %v10864_v23, %v10863_v40  ;;  %v10866_v52 = vld [vmem:[#allocation199_spill] sm:$0xff]  ;;  %v10895_v23 = vld [vmem:[#allocation113_spill] sm:$0xff] }
 0x27d   :  { %2413 = vmatpush.bf16.msra.mxu3 %v6704_v59  ;;  %v6628_v6 = vor.u32 %v10866_v52, %v10865_v42  ;;  %v10867_v59 = vld [vmem:[#allocation261_spill] sm:$0xff]  ;;  %v10897_v52 = vld [vmem:[#allocation171_spill] sm:$0xff] }
 0x27e   :  { %2372 = vmatpush.bf16.msra.mxu0 %v6304_v44  ;;  %v1510_v22 = vpop.f32.mrf.mxu0  ;;  %v6756_v38 = vor.u32 %v10868_v47, %v10867_v59  ;;  %v10899_v59 = vld [vmem:[#allocation229_spill] sm:$0xff] }
 0x27f   :  { %2386 = vmatpush.bf16.msra.mxu1 %v6432_v0  ;;  %v1524_v63 = vpop.f32.mrf.mxu1  ;;  %v6356_v0 = vor.u32 %v10870_v53, %v10869_v17  ;;  %v10900_v47 = vld [vmem:[#allocation225_spill] sm:$0xff]  ;;  %v10902_v17 = vld [vmem:[#allocation108_spill] sm:$0xff] }
 0x280   :  { %2400 = vmatpush.bf16.msra.mxu2 %v6560_v60  ;;  %v1525_v44 = vadd.f32 %v1524_v63, %v1510_v22  ;;  %v6484_v60 = vor.u32 %v10872_v3, %v10871_v21  ;;  %v10904_v21 = vld [vmem:[#allocation166_spill] sm:$0xff] }
 0x281   :  { %2414 = vmatpush.bf16.msra.mxu3 %v6688_v48  ;;  %2373 = vmatmul.bf16.vlgmr.msra.gmra.mxu0 %v10847_v12  ;;  %v6612_v48 = vor.u32 %v10874_v10, %v10873_v55  ;;  %v10906_v55 = vld [vmem:[#allocation224_spill] sm:$0xff] }
 0x282   :  { %2421 = vmatpush.bf16.msrb.mxu0 %v6420_v29  ;;  %2387 = vmatmul.bf16.vlgmr.msra.gmra.mxu1 %v10851_v56  ;;  %v10876_v29 = vld [vmem:[#allocation249_spill] sm:$0xff] }
 0x283   :  { %2435 = vmatpush.bf16.msrb.mxu1 %v6548_v30  ;;  %2401 = vmatmul.bf16.vlgmr.msra.gmra.mxu2 %v10850_v14  ;;  %v6740_v20 = vor.u32 %v10876_v29, %v10875_v19  ;;  %v10909_v29 = vld [vmem:[#allocation99_spill] sm:$0xff] }
 0x284   :  { %2449 = vmatpush.bf16.msrb.mxu2 %v6676_v9  ;;  %2415 = vmatmul.bf16.vlgmr.msra.gmra.mxu3 %v10852_v32  ;;  %v6340_v9 = vor.u32 %v10878_v1, %v10877_v51  ;;  %v10912_v51 = vld [vmem:[#allocation160_spill] sm:$0xff] }
 0x285   :  { %2463 = vmatpush.bf16.msrb.mxu3 %v6804_v18  ;;  %v10879_v18 = vld [vmem:[#allocation129_spill] sm:$0xff] }
 0x286   :  { %2422 = vmatpush.bf16.msrb.mxu0 %v6404_v34  ;;  %v1538_v28 = vpop.f32.mrf.mxu2  ;;  %v1512_v5 = vpop.f32.mrf.mxu0  ;;  %v6468_v16 = vor.u32 %v10880_v33, %v10879_v18  ;;  %v10881_v34 = vld [vmem:[#allocation187_spill] sm:$0xff]  ;;  %v10915_v33 = vld [vmem:[#allocation273_spill] sm:$0xff] }
 0x287   :  { %2436 = vmatpush.bf16.msrb.mxu1 %v6532_v45  ;;  %v1539_v43 = vadd.f32 %v1538_v28, %v1525_v44  ;;  %v1552_v30 = vpop.f32.mrf.mxu3  ;;  %v6596_v27 = vor.u32 %v10882_v25, %v10881_v34  ;;  %v1526_v45 = vpop.f32.mrf.mxu1  ;;  %v10901_v44 = vld [vmem:[#allocation105_spill] sm:$0xff]  ;;  %v10908_v28 = vld [vmem:[#allocation282_spill] sm:$0xff] }
 0x288   :  { %2450 = vmatpush.bf16.msrb.mxu2 %v6660_v4  ;;  %v6724_v4 = vor.u32 %v10884_v57, %v10883_v46  ;;  %v1527_v15 = vadd.f32 %v1526_v45, %v1512_v5  ;;  %v6424_v53 = vor.u32 %v10902_v17, %v10901_v44  ;;  %v10914_v5 = vld [vmem:[#allocation218_spill] sm:$0xff]  ;;  %v10917_v25 = vld [vmem:[#allocation93_spill] sm:$0xff]  ;;  %v10919_v46 = vld [vmem:[#allocation151_spill] sm:$0xff] }
 0x289   :  { %2464 = vmatpush.bf16.msrb.mxu3 %v6788_v26  ;;  %v10176_v2 = vadd.f32 %v1552_v30, %v1539_v43  ;;  %v10886_v26 = vld [vmem:[#allocation60_spill] sm:$0xff]  ;;  %v10911_v30 = vld [vmem:[#allocation157_spill] sm:$0xff]  ;;  %v10920_v57 = vld [vmem:[#allocation154_spill] sm:$0xff] }
 0x28a   :  { %2423 = vmatpush.bf16.msrb.mxu0 %v6388_v31  ;;  %v6324_v8 = vor.u32 %v10886_v26, %v10885_v36  ;;  %v10888_v31 = vld [vmem:[#allocation117_spill] sm:$0xff]  ;;  %v6536_v1 = vor.u32 %v10912_v51, %v10911_v30  ;;  %v10922_v36 = vld [vmem:[#allocation212_spill] sm:$0xff]  ;;  %v10938_v44 = vld [vmem:[#allocation198_spill] sm:$0xff] }
 0x28b   :  { %2437 = vmatpush.bf16.msrb.mxu1 %v6516_v49  ;;  %v6452_v41 = vor.u32 %v10888_v31, %v10887_v50  ;;  %v10890_v49 = vld [vmem:[#allocation175_spill] sm:$0xff]  ;;  %v10924_v50 = vld [vmem:[#allocation270_spill] sm:$0xff] }
 0x28c   :  { %2451 = vmatpush.bf16.msrb.mxu2 %v6644_v58  ;;  %v6580_v35 = vor.u32 %v10890_v49, %v10889_v54  ;;  %v10891_v58 = vld [vmem:[#allocation237_spill] sm:$0xff]  ;;  %v10926_v54 = vld [vmem:[#allocation90_spill] sm:$0xff] }
 0x28d   :  { %2465 = vmatpush.bf16.msrb.mxu3 %v6772_v13  ;;  %v6708_v11 = vor.u32 %v10892_v7, %v10891_v58  ;;  %v10928_v58 = vld [vmem:[#allocation148_spill] sm:$0xff]  ;;  %v10945_v51 = vld [vmem:[#allocation186_spill] sm:$0xff] }
 0x28e   :  { %2424 = vmatpush.bf16.msrb.mxu0 %v6372_v62  ;;  %v1540_v37 = vpop.f32.mrf.mxu2  ;;  %v10894_v62 = vld [vmem:[#allocation52_spill] sm:$0xff] }
 0x28f   :  { %2438 = vmatpush.bf16.msrb.mxu1 %v6500_v24  ;;  %v1541_v13 = vadd.f32 %v1540_v37, %v1527_v15  ;;  %v1554_v39 = vpop.f32.mrf.mxu3  ;;  %v6308_v22 = vor.u32 %v10894_v62, %v10893_v61  ;;  %v10896_v24 = vld [vmem:[#allocation109_spill] sm:$0xff]  ;;  %v10927_v37 = vld [vmem:[#allocation144_spill] sm:$0xff] }
 0x290   :  { %2452 = vmatpush.bf16.msrb.mxu2 %v6628_v6  ;;  %v6436_v42 = vor.u32 %v10896_v24, %v10895_v23  ;;  %v10898_v6 = vld [vmem:[#allocation167_spill] sm:$0xff]  ;;  %v10921_v15 = vld [vmem:[#allocation209_spill] sm:$0xff]  ;;  %v6504_v7 = vor.u32 %v10928_v58, %v10927_v37  ;;  %v10931_v62 = vld [vmem:[#allocation260_spill] sm:$0xff] }
 0x291   :  { %2466 = vmatpush.bf16.msrb.mxu3 %v6756_v38  ;;  %v10194_v40 = vadd.f32 %v1554_v39, %v1541_v13  ;;  %v6564_v63 = vor.u32 %v10898_v6, %v10897_v52  ;;  %v6692_v38 = vor.u32 %v10900_v47, %v10899_v59  ;;  %v6648_v26 = vor.u32 %v10922_v36, %v10921_v15  ;;  %v10930_v13 = vld [vmem:[#allocation206_spill] sm:$0xff]  ;;  %v10934_v52 = vld [vmem:[#allocation83_spill] sm:$0xff]  ;;  %v10936_v59 = vld [vmem:[#allocation140_spill] sm:$0xff] }
 0x292   :  { %2425 = vmatpush.bf16.msrb.mxu0 %v6356_v0  ;;  %v10903_v0 = vld [vmem:[#allocation163_spill] sm:$0xff]  ;;  %v10953_v15 = vld [vmem:[#allocation178_spill] sm:$0xff] }
 0x293   :  { %2439 = vmatpush.bf16.msrb.mxu1 %v6484_v60  ;;  %v6552_v3 = vor.u32 %v10904_v21, %v10903_v0  ;;  %v10905_v60 = vld [vmem:[#allocation221_spill] sm:$0xff]  ;;  %v10939_v0 = vld [vmem:[#allocation252_spill] sm:$0xff]  ;;  %v10954_v36 = vld [vmem:[#allocation182_spill] sm:$0xff] }
 0x294   :  { %2453 = vmatpush.bf16.msrb.mxu2 %v6612_v48  ;;  %v6680_v10 = vor.u32 %v10906_v55, %v10905_v60  ;;  %v10907_v48 = vld [vmem:[#allocation279_spill] sm:$0xff]  ;;  %v10940_v21 = vld [vmem:[#allocation256_spill] sm:$0xff] }
 0x295   :  { %2467 = vmatpush.bf16.msrb.mxu3 %v6740_v20  ;;  %v6808_v19 = vor.u32 %v10908_v28, %v10907_v48  ;;  %v10910_v20 = vld [vmem:[#allocation102_spill] sm:$0xff]  ;;  %v10942_v48 = vld [vmem:[#allocation75_spill] sm:$0xff] }
 0x296   :  { %2426 = vmatpush.bf16.msrb.mxu0 %v6340_v9  ;;  %v6408_v43 = vor.u32 %v10910_v20, %v10909_v29  ;;  %v10913_v9 = vld [vmem:[#allocation215_spill] sm:$0xff]  ;;  %v10943_v20 = vld [vmem:[#allocation128_spill] sm:$0xff] }
 0x297   :  { %2440 = vmatpush.bf16.msrb.mxu1 %v6468_v16  ;;  %v6664_v18 = vor.u32 %v10914_v5, %v10913_v9  ;;  %v10916_v16 = vld [vmem:[#allocation276_spill] sm:$0xff]  ;;  %v10958_v37 = vld [vmem:[#allocation59_spill] sm:$0xff] }
 0x298   :  { %2454 = vmatpush.bf16.msrb.mxu2 %v6596_v27  ;;  %v6792_v34 = vor.u32 %v10916_v16, %v10915_v33  ;;  %v10918_v27 = vld [vmem:[#allocation96_spill] sm:$0xff] }
 0x299   :  { %2468 = vmatpush.bf16.msrb.mxu3 %v6724_v4  ;;  %v6392_v45 = vor.u32 %v10918_v27, %v10917_v25  ;;  %v6520_v4 = vor.u32 %v10920_v57, %v10919_v46  ;;  %v10948_v33 = vld [vmem:[#allocation248_spill] sm:$0xff]  ;;  %v10949_v25 = vld [vmem:[#allocation63_spill] sm:$0xff] }
 0x29a   :  { %2427 = vmatpush.bf16.msrb.mxu0 %v6324_v8  ;;  %v10923_v8 = vld [vmem:[#allocation267_spill] sm:$0xff]  ;;  %v10951_v46 = vld [vmem:[#allocation120_spill] sm:$0xff] }
 0x29b   :  { %2441 = vmatpush.bf16.msrb.mxu1 %v6452_v41  ;;  %v6776_v31 = vor.u32 %v10924_v50, %v10923_v8  ;;  %v10925_v41 = vld [vmem:[#allocation86_spill] sm:$0xff]  ;;  %v10950_v27 = vld [vmem:[#allocation67_spill] sm:$0xff]  ;;  %v10952_v57 = vld [vmem:[#allocation124_spill] sm:$0xff] }
 0x29c   :  { %2455 = vmatpush.bf16.msrb.mxu2 %v6580_v35  ;;  %v6376_v49 = vor.u32 %v10926_v54, %v10925_v41  ;;  %v10955_v50 = vld [vmem:[#allocation236_spill] sm:$0xff] }
 0x29d   :  { %2469 = vmatpush.bf16.msrb.mxu3 %v6708_v11  ;;  %v10929_v11 = vld [vmem:[#allocation202_spill] sm:$0xff] }
 0x29e   :  { %2428 = vmatpush.bf16.msrb.mxu0 %v6308_v22  ;;  %v1566_v35 = vpop.f32.mrf.mxu0  ;;  %v6632_v39 = vor.u32 %v10930_v13, %v10929_v11  ;;  %v10932_v22 = vld [vmem:[#allocation264_spill] sm:$0xff] }
 0x29f   :  { %2442 = vmatpush.bf16.msrb.mxu1 %v6436_v42  ;;  %v1580_v61 = vpop.f32.mrf.mxu1  ;;  %v6760_v23 = vor.u32 %v10932_v22, %v10931_v62  ;;  %v10933_v42 = vld [vmem:[#allocation79_spill] sm:$0xff]  ;;  %v10959_v11 = vld [vmem:[#allocation112_spill] sm:$0xff]  ;;  %v10962_v62 = vld [vmem:[#allocation174_spill] sm:$0xff] }
 0x2a0   :  { %2456 = vmatpush.bf16.msrb.mxu2 %v6564_v63  ;;  %v1581_v24 = vadd.f32 %v1580_v61, %v1566_v35  ;;  %v6360_v6 = vor.u32 %v10934_v52, %v10933_v42  ;;  %v10935_v63 = vld [vmem:[#allocation136_spill] sm:$0xff]  ;;  %v10957_v35 = vld [vmem:[#allocation55_spill] sm:$0xff]  ;;  %v10961_v61 = vld [vmem:[#allocation170_spill] sm:$0xff] }
 0x2a1   :  { %2470 = vmatpush.bf16.msrb.mxu3 %v6692_v38  ;;  %2429 = vmatmul.bf16.vlgmr.msrb.gmra.mxu0 %v10847_v12  ;;  %v6488_v47 = vor.u32 %v10936_v59, %v10935_v63  ;;  %v10937_v38 = vld [vmem:[#allocation194_spill] sm:$0xff]  ;;  %v6312_v58 = vor.u32 %v10958_v37, %v10957_v35  ;;  %v10960_v13 = vld [vmem:[#allocation116_spill] sm:$0xff]  ;;  %v6568_v22 = vor.u32 %v10962_v62, %v10961_v61  ;;  %v10965_v52 = vld [vmem:[#allocation107_spill] sm:$0xff] }
 0x2a2   :  { %2477 = vmatpush.bf16.msra.mxu0 %v6424_v53  ;;  %2443 = vmatmul.bf16.vlgmr.msrb.gmra.mxu1 %v10851_v56  ;;  %v6616_v17 = vor.u32 %v10938_v44, %v10937_v38  ;;  %v10967_v59 = vld [vmem:[#allocation165_spill] sm:$0xff]  ;;  %v10969_v44 = vld [vmem:[#allocation223_spill] sm:$0xff]  ;;  %v10997_v62 = vld [vmem:[#allocation82_spill] sm:$0xff] }
 0x2a3   :  { %2491 = vmatpush.bf16.msra.mxu1 %v6552_v3  ;;  %2457 = vmatmul.bf16.vlgmr.msrb.gmra.mxu2 %v10850_v14  ;;  %v6744_v3 = vor.u32 %v10940_v21, %v10939_v0  ;;  %v10971_v0 = vld [vmem:[#allocation281_spill] sm:$0xff]  ;;  %v10972_v21 = vld [vmem:[#allocation278_spill] sm:$0xff] }
 0x2a4   :  { %2505 = vmatpush.bf16.msra.mxu2 %v6680_v10  ;;  %2471 = vmatmul.bf16.vlgmr.msrb.gmra.mxu3 %v10852_v32  ;;  %v10941_v10 = vld [vmem:[#allocation71_spill] sm:$0xff]  ;;  %v10994_v35 = vld [vmem:[#allocation201_spill] sm:$0xff] }
 0x2a5   :  { %2519 = vmatpush.bf16.msra.mxu3 %v6808_v19  ;;  %v6344_v28 = vor.u32 %v10942_v48, %v10941_v10  ;;  %v10975_v48 = vld [vmem:[#allocation159_spill] sm:$0xff] }
 0x2a6   :  { %2478 = vmatpush.bf16.msra.mxu0 %v6408_v43  ;;  %v1594_v53 = vpop.f32.mrf.mxu2  ;;  %v1568_v29 = vpop.f32.mrf.mxu0  ;;  %v10944_v43 = vld [vmem:[#allocation132_spill] sm:$0xff] }
 0x2a7   :  { %2492 = vmatpush.bf16.msra.mxu1 %v6536_v1  ;;  %v1595_v60 = vadd.f32 %v1594_v53, %v1581_v24  ;;  %v1608_v55 = vpop.f32.mrf.mxu3  ;;  %v6472_v30 = vor.u32 %v10944_v43, %v10943_v20  ;;  %v10946_v1 = vld [vmem:[#allocation190_spill] sm:$0xff]  ;;  %v1582_v5 = vpop.f32.mrf.mxu1  ;;  %v10964_v24 = vld [vmem:[#allocation232_spill] sm:$0xff]  ;;  %v10977_v20 = vld [vmem:[#allocation217_spill] sm:$0xff] }
 0x2a8   :  { %2506 = vmatpush.bf16.msra.mxu2 %v6664_v18  ;;  %v6600_v9 = vor.u32 %v10946_v1, %v10945_v51  ;;  %v10947_v18 = vld [vmem:[#allocation244_spill] sm:$0xff]  ;;  %v10978_v43 = vld [vmem:[#allocation214_spill] sm:$0xff]  ;;  %v10979_v51 = vld [vmem:[#allocation275_spill] sm:$0xff] }
 0x2a9   :  { %2520 = vmatpush.bf16.msra.mxu3 %v6792_v34  ;;  %v10248_v19 = vadd.f32 %v1608_v55, %v1595_v60  ;;  %v6728_v16 = vor.u32 %v10948_v33, %v10947_v18  ;;  %v1583_v34 = vadd.f32 %v1582_v5, %v1568_v29  ;;  %v10973_v60 = vld [vmem:[#allocation101_spill] sm:$0xff]  ;;  %v10974_v55 = vld [vmem:[#allocation98_spill] sm:$0xff]  ;;  %v10980_v1 = vld [vmem:[#allocation272_spill] sm:$0xff] }
 0x2aa   :  { %2479 = vmatpush.bf16.msra.mxu0 %v6392_v45  ;;  %v6328_v45 = vor.u32 %v10950_v27, %v10949_v25  ;;  %v6412_v10 = vor.u32 %v10974_v55, %v10973_v60  ;;  %v10981_v5 = vld [vmem:[#allocation95_spill] sm:$0xff]  ;;  %v10982_v18 = vld [vmem:[#allocation92_spill] sm:$0xff] }
 0x2ab   :  { %2493 = vmatpush.bf16.msra.mxu1 %v6520_v4  ;;  %v6456_v4 = vor.u32 %v10952_v57, %v10951_v46  ;;  %v6396_v33 = vor.u32 %v10982_v18, %v10981_v5  ;;  %v10985_v27 = vld [vmem:[#allocation211_spill] sm:$0xff]  ;;  %v10987_v57 = vld [vmem:[#allocation269_spill] sm:$0xff] }
 0x2ac   :  { %2507 = vmatpush.bf16.msra.mxu2 %v6648_v26  ;;  %v6584_v26 = vor.u32 %v10954_v36, %v10953_v15  ;;  %v10989_v36 = vld [vmem:[#allocation89_spill] sm:$0xff] }
 0x2ad   :  { %2521 = vmatpush.bf16.msra.mxu3 %v6776_v31  ;;  %v10956_v31 = vld [vmem:[#allocation240_spill] sm:$0xff] }
 0x2ae   :  { %2480 = vmatpush.bf16.msra.mxu0 %v6376_v49  ;;  %v1596_v8 = vpop.f32.mrf.mxu2  ;;  %v6712_v41 = vor.u32 %v10956_v31, %v10955_v50  ;;  %v10991_v31 = vld [vmem:[#allocation147_spill] sm:$0xff] }
 0x2af   :  { %2494 = vmatpush.bf16.msra.mxu1 %v6504_v7  ;;  %v1597_v54 = vadd.f32 %v1596_v8, %v1583_v34  ;;  %v1610_v49 = vpop.f32.mrf.mxu3  ;;  %v10984_v34 = vld [vmem:[#allocation150_spill] sm:$0xff] }
 0x2b0   :  { %2508 = vmatpush.bf16.msra.mxu2 %v6632_v39  ;;  %v6440_v39 = vor.u32 %v10960_v13, %v10959_v11  ;;  %v10995_v11 = vld [vmem:[#allocation263_spill] sm:$0xff] }
 0x2b1   :  { %2522 = vmatpush.bf16.msra.mxu3 %v6760_v23  ;;  %v10266_v7 = vadd.f32 %v1610_v49, %v1597_v54  ;;  %v10963_v23 = vld [vmem:[#allocation228_spill] sm:$0xff]  ;;  %v10993_v49 = vld [vmem:[#allocation205_spill] sm:$0xff]  ;;  %v10996_v13 = vld [vmem:[#allocation259_spill] sm:$0xff] }
 0x2b2   :  { %2481 = vmatpush.bf16.msra.mxu0 %v6360_v6  ;;  %v6696_v42 = vor.u32 %v10964_v24, %v10963_v23  ;;  %v10966_v6 = vld [vmem:[#allocation104_spill] sm:$0xff]  ;;  %v6636_v37 = vor.u32 %v10994_v35, %v10993_v49  ;;  %v10999_v24 = vld [vmem:[#allocation139_spill] sm:$0xff] }
 0x2b3   :  { %2495 = vmatpush.bf16.msra.mxu1 %v6488_v47  ;;  %v6428_v63 = vor.u32 %v10966_v6, %v10965_v52  ;;  %v10968_v47 = vld [vmem:[#allocation162_spill] sm:$0xff]  ;;  %v11001_v6 = vld [vmem:[#allocation197_spill] sm:$0xff] }
 0x2b4   :  { %2509 = vmatpush.bf16.msra.mxu2 %v6616_v17  ;;  %v6556_v38 = vor.u32 %v10968_v47, %v10967_v59  ;;  %v10970_v17 = vld [vmem:[#allocation220_spill] sm:$0xff] }
 0x2b5   :  { %2523 = vmatpush.bf16.msra.mxu3 %v6744_v3  ;;  %v6684_v53 = vor.u32 %v10970_v17, %v10969_v44  ;;  %v6812_v3 = vor.u32 %v10972_v21, %v10971_v0  ;;  %v11004_v44 = vld [vmem:[#allocation251_spill] sm:$0xff]  ;;  %v11005_v21 = vld [vmem:[#allocation74_spill] sm:$0xff] }
 0x2b6   :  { %2482 = vmatpush.bf16.msra.mxu0 %v6344_v28  ;;  %v10976_v28 = vld [vmem:[#allocation156_spill] sm:$0xff] }
 0x2b7   :  { %2496 = vmatpush.bf16.msra.mxu1 %v6472_v30  ;;  %v6540_v29 = vor.u32 %v10976_v28, %v10975_v48  ;;  %v6668_v30 = vor.u32 %v10978_v43, %v10977_v20  ;;  %v11007_v48 = vld [vmem:[#allocation131_spill] sm:$0xff]  ;;  %v11009_v20 = vld [vmem:[#allocation189_spill] sm:$0xff] }
 0x2b8   :  { %2510 = vmatpush.bf16.msra.mxu2 %v6600_v9  ;;  %v6796_v9 = vor.u32 %v10980_v1, %v10979_v51  ;;  %v11008_v28 = vld [vmem:[#allocation127_spill] sm:$0xff]  ;;  %v11010_v43 = vld [vmem:[#allocation185_spill] sm:$0xff] }
 0x2b9   :  { %2524 = vmatpush.bf16.msra.mxu3 %v6728_v16  ;;  %v10983_v16 = vld [vmem:[#allocation153_spill] sm:$0xff]  ;;  %v11011_v1 = vld [vmem:[#allocation247_spill] sm:$0xff] }
 0x2ba   :  { %2483 = vmatpush.bf16.msra.mxu0 %v6328_v45  ;;  %v6524_v25 = vor.u32 %v10984_v34, %v10983_v16  ;;  %v10986_v45 = vld [vmem:[#allocation208_spill] sm:$0xff]  ;;  %v11014_v16 = vld [vmem:[#allocation62_spill] sm:$0xff] }
 0x2bb   :  { %2497 = vmatpush.bf16.msra.mxu1 %v6456_v4  ;;  %v6652_v46 = vor.u32 %v10986_v45, %v10985_v27  ;;  %v10988_v4 = vld [vmem:[#allocation266_spill] sm:$0xff]  ;;  %v11016_v27 = vld [vmem:[#allocation119_spill] sm:$0xff] }
 0x2bc   :  { %2511 = vmatpush.bf16.msra.mxu2 %v6584_v26  ;;  %v6780_v15 = vor.u32 %v10988_v4, %v10987_v57  ;;  %v10990_v26 = vld [vmem:[#allocation85_spill] sm:$0xff] }
 0x2bd   :  { %2525 = vmatpush.bf16.msra.mxu3 %v6712_v41  ;;  %v6380_v8 = vor.u32 %v10990_v26, %v10989_v36  ;;  %v10992_v41 = vld [vmem:[#allocation143_spill] sm:$0xff]  ;;  %v11018_v57 = vld [vmem:[#allocation177_spill] sm:$0xff] }
 0x2be   :  { %2484 = vmatpush.bf16.msra.mxu0 %v6312_v58  ;;  %v1622_v50 = vpop.f32.mrf.mxu0  ;;  %v6508_v54 = vor.u32 %v10992_v41, %v10991_v31  ;;  %v11019_v36 = vld [vmem:[#allocation239_spill] sm:$0xff]  ;;  %v11021_v41 = vld [vmem:[#allocation58_spill] sm:$0xff] }
 0x2bf   :  { %2498 = vmatpush.bf16.msra.mxu1 %v6440_v39  ;;  %v1636_v58 = vpop.f32.mrf.mxu1  ;;  %v6764_v39 = vor.u32 %v10996_v13, %v10995_v11  ;;  %v11020_v26 = vld [vmem:[#allocation235_spill] sm:$0xff]  ;;  %v11025_v13 = vld [vmem:[#allocation173_spill] sm:$0xff] }
 0x2c0   :  { %2512 = vmatpush.bf16.msra.mxu2 %v6568_v22  ;;  %v1637_v61 = vadd.f32 %v1636_v58, %v1622_v50  ;;  %v10998_v22 = vld [vmem:[#allocation78_spill] sm:$0xff]  ;;  %v11024_v58 = vld [vmem:[#allocation111_spill] sm:$0xff] }
 0x2c1   :  { %2526 = vmatpush.bf16.msra.mxu3 %v6696_v42  ;;  %2485 = vmatmul.bf16.vlgmr.msra.gmra.mxu0 %v10847_v12  ;;  %v6364_v23 = vor.u32 %v10998_v22, %v10997_v62  ;;  %v11000_v42 = vld [vmem:[#allocation135_spill] sm:$0xff] }
 0x2c2   :  { %2533 = vmatpush.bf16.msrb.mxu0 %v6428_v63  ;;  %2499 = vmatmul.bf16.vlgmr.msra.gmra.mxu1 %v10851_v56  ;;  %v6492_v52 = vor.u32 %v11000_v42, %v10999_v24  ;;  %v11002_v63 = vld [vmem:[#allocation193_spill] sm:$0xff]  ;;  %v11027_v62 = vld [vmem:[#allocation231_spill] sm:$0xff] }
 0x2c3   :  { %2547 = vmatpush.bf16.msrb.mxu1 %v6556_v38  ;;  %2513 = vmatmul.bf16.vlgmr.msra.gmra.mxu2 %v10850_v14  ;;  %v6620_v59 = vor.u32 %v11002_v63, %v11001_v6  ;;  %v11003_v38 = vld [vmem:[#allocation255_spill] sm:$0xff] }
 0x2c4   :  { %2561 = vmatpush.bf16.msrb.mxu2 %v6684_v53  ;;  %2527 = vmatmul.bf16.vlgmr.msra.gmra.mxu3 %v10852_v32  ;;  %v6748_v17 = vor.u32 %v11004_v44, %v11003_v38  ;;  %v11028_v22 = vld [vmem:[#allocation227_spill] sm:$0xff] }
 0x2c5   :  { %2575 = vmatpush.bf16.msrb.mxu3 %v6812_v3  ;;  %v11006_v3 = vld [vmem:[#allocation70_spill] sm:$0xff] }
 0x2c6   :  { %2534 = vmatpush.bf16.msrb.mxu0 %v6412_v10  ;;  %v1650_v47 = vpop.f32.mrf.mxu2  ;;  %v6348_v60 = vor.u32 %v11006_v3, %v11005_v21  ;;  %v1624_v10 = vpop.f32.mrf.mxu0 }
 0x2c7   :  { %2548 = vmatpush.bf16.msrb.mxu1 %v6540_v29  ;;  %v1651_v53 = vadd.f32 %v1650_v47, %v1637_v61  ;;  %v1664_v0 = vpop.f32.mrf.mxu3  ;;  %v6476_v29 = vor.u32 %v11008_v28, %v11007_v48  ;;  %v1638_v51 = vpop.f32.mrf.mxu1 }
 0x2c8   :  { %2562 = vmatpush.bf16.msrb.mxu2 %v6668_v30  ;;  %v6604_v30 = vor.u32 %v11010_v43, %v11009_v20  ;;  %v1639_v18 = vadd.f32 %v1638_v51, %v1624_v10 }
 0x2c9   :  { %2576 = vmatpush.bf16.msrb.mxu3 %v6796_v9  ;;  %v10320_v55 = vadd.f32 %v1664_v0, %v1651_v53  ;;  %v11012_v9 = vld [vmem:[#allocation243_spill] sm:$0xff] }
 0x2ca   :  { %2535 = vmatpush.bf16.msrb.mxu0 %v6396_v33  ;;  %v6732_v5 = vor.u32 %v11012_v9, %v11011_v1  ;;  %v11013_v33 = vld [vmem:[#allocation66_spill] sm:$0xff] }
 0x2cb   :  { %2549 = vmatpush.bf16.msrb.mxu1 %v6524_v25  ;;  %v6332_v34 = vor.u32 %v11014_v16, %v11013_v33  ;;  %v11015_v25 = vld [vmem:[#allocation123_spill] sm:$0xff] }
 0x2cc   :  { %2563 = vmatpush.bf16.msrb.mxu2 %v6652_v46  ;;  %v6460_v45 = vor.u32 %v11016_v27, %v11015_v25  ;;  %v11017_v46 = vld [vmem:[#allocation181_spill] sm:$0xff] }
 0x2cd   :  { %2577 = vmatpush.bf16.msrb.mxu3 %v6780_v15  ;;  %v6588_v4 = vor.u32 %v11018_v57, %v11017_v46 }
 0x2ce   :  { %2536 = vmatpush.bf16.msrb.mxu0 %v6380_v8  ;;  %v1652_v15 = vpop.f32.mrf.mxu2  ;;  %v6716_v8 = vor.u32 %v11020_v26, %v11019_v36 }
 0x2cf   :  { %2550 = vmatpush.bf16.msrb.mxu1 %v6508_v54  ;;  %v1653_v50 = vadd.f32 %v1652_v15, %v1639_v18  ;;  %v1666_v31 = vpop.f32.mrf.mxu3  ;;  %v11022_v54 = vld [vmem:[#allocation54_spill] sm:$0xff] }
 0x2d0   :  { %2564 = vmatpush.bf16.msrb.mxu2 %v6636_v37  ;;  %v6316_v49 = vor.u32 %v11022_v54, %v11021_v41  ;;  %v11023_v37 = vld [vmem:[#allocation115_spill] sm:$0xff] }
 0x2d1   :  { %2578 = vmatpush.bf16.msrb.mxu3 %v6764_v39  ;;  %v10338_v35 = vadd.f32 %v1666_v31, %v1653_v50  ;;  %v6444_v11 = vor.u32 %v11024_v58, %v11023_v37  ;;  %v11026_v39 = vld [vmem:[#allocation169_spill] sm:$0xff] }
 0x2d2   :  { %2537 = vmatpush.bf16.msrb.mxu0 %v6364_v23  ;;  %v6572_v61 = vor.u32 %v11026_v39, %v11025_v13  ;;  %v6700_v23 = vor.u32 %v11028_v22, %v11027_v62 }
 0x2d3   :  { %2551 = vmatpush.bf16.msrb.mxu1 %v6492_v52 }
 0x2d4   :  { %2565 = vmatpush.bf16.msrb.mxu2 %v6620_v59 }
 0x2d5   :  { %2579 = vmatpush.bf16.msrb.mxu3 %v6748_v17 }
 0x2d6   :  { %2538 = vmatpush.bf16.msrb.mxu0 %v6348_v60 }
 0x2d7   :  { %2552 = vmatpush.bf16.msrb.mxu1 %v6476_v29 }
 0x2d8   :  { %2566 = vmatpush.bf16.msrb.mxu2 %v6604_v30 }
 0x2d9   :  { %2580 = vmatpush.bf16.msrb.mxu3 %v6732_v5 }
 0x2da   :  { %2539 = vmatpush.bf16.msrb.mxu0 %v6332_v34 }
 0x2db   :  { %2553 = vmatpush.bf16.msrb.mxu1 %v6460_v45 }
 0x2dc   :  { %2567 = vmatpush.bf16.msrb.mxu2 %v6588_v4 }
 0x2dd   :  { %2581 = vmatpush.bf16.msrb.mxu3 %v6716_v8 }
 0x2de   :  { %2540 = vmatpush.bf16.msrb.mxu0 %v6316_v49  ;;  %v1678_v24 = vpop.f32.mrf.mxu0 }
 0x2df   :  { %2554 = vmatpush.bf16.msrb.mxu1 %v6444_v11  ;;  %v1692_v42 = vpop.f32.mrf.mxu1 }
 0x2e0   :  { %2568 = vmatpush.bf16.msrb.mxu2 %v6572_v61  ;;  %v1693_v52 = vadd.f32 %v1692_v42, %v1678_v24 }
 0x2e1   :  { %2582 = vmatpush.bf16.msrb.mxu3 %v6700_v23  ;;  %2541 = vmatmul.bf16.vlgmr.msrb.gmra.mxu0 %v10847_v12 }
 0x2e2   :  { %2555 = vmatmul.bf16.vlgmr.msrb.gmra.mxu1 %v10851_v56 }
 0x2e3   :  { %2569 = vmatmul.bf16.vlgmr.msrb.gmra.mxu2 %v10850_v14 }
 0x2e4   :  { %2583 = vmatmul.bf16.vlgmr.msrb.gmra.mxu3 %v10852_v32 }
 0x2e6   :  { %v1706_v6 = vpop.f32.mrf.mxu2  ;;  %v1680_v38 = vpop.f32.mrf.mxu0 }
 0x2e7   :  { %v1707_v63 = vadd.f32 %v1706_v6, %v1693_v52  ;;  %v1720_v59 = vpop.f32.mrf.mxu3  ;;  %v1694_v44 = vpop.f32.mrf.mxu1 }
 0x2e8   :  { %v1695_v62 = vadd.f32 %v1694_v44, %v1680_v38 }
 0x2e9   :  { %v1721_v47 = vadd.f32 %v1720_v59, %v1707_v63 }
 0x2ee   :  { %v1708_v17 = vpop.f32.mrf.mxu2 }
 0x2ef   :  { %v1722_v53 = vpop.f32.mrf.mxu3  ;;  %v1709_v24 = vadd.f32 %v1708_v17, %v1695_v62 }
 0x2f1   :  { %v1723_v6 = vadd.f32 %v1722_v53, %v1709_v24 }
 0x2fe   :  { %v2374_v0 = vpop.f32.mrf.mxu0 }
 0x2ff   :  { %v2388_v21 = vpop.f32.mrf.mxu1  ;;  %v2375_v12 = vadd.f32 %v2374_v0, %v10176_v2 }
 0x301   :  { %v2389_v56 = vadd.f32 %v2388_v21, %v2375_v12 }
 0x306   :  { %v2402_v3 = vpop.f32.mrf.mxu2  ;;  %v2376_v60 = vpop.f32.mrf.mxu0 }
 0x307   :  { %v2403_v14 = vadd.f32 %v2402_v3, %v2389_v56  ;;  %v2416_v32 = vpop.f32.mrf.mxu3  ;;  %v2377_v10 = vadd.f32 %v2376_v60, %v10194_v40  ;;  %v2390_v28 = vpop.f32.mrf.mxu1 }
 0x309   :  { %v10352_v48 = vadd.f32 %v2416_v32, %v2403_v14  ;;  %v2391_v29 = vadd.f32 %v2390_v28, %v2377_v10 }
 0x30e   :  { %v2404_v20 = vpop.f32.mrf.mxu2 }
 0x30f   :  { %v2405_v43 = vadd.f32 %v2404_v20, %v2391_v29  ;;  %v2418_v30 = vpop.f32.mrf.mxu3 }
 0x311   :  { %v10354_v51 = vadd.f32 %v2418_v30, %v2405_v43 }
 0x31e   :  { %v2430_v1 = vpop.f32.mrf.mxu0 }
 0x31f   :  { %v2444_v9 = vpop.f32.mrf.mxu1  ;;  %v2431_v2 = vadd.f32 %v2430_v1, %v10248_v19 }
 0x321   :  { %v2445_v5 = vadd.f32 %v2444_v9, %v2431_v2 }
 0x326   :  { %v2458_v18 = vpop.f32.mrf.mxu2  ;;  %v2432_v16 = vpop.f32.mrf.mxu0 }
 0x327   :  { %v2459_v33 = vadd.f32 %v2458_v18, %v2445_v5  ;;  %v2472_v34 = vpop.f32.mrf.mxu3  ;;  %v2433_v40 = vadd.f32 %v2432_v16, %v10266_v7  ;;  %v2446_v27 = vpop.f32.mrf.mxu1 }
 0x329   :  { %v10358_v25 = vadd.f32 %v2472_v34, %v2459_v33  ;;  %v2447_v45 = vadd.f32 %v2446_v27, %v2433_v40 }
 0x32e   :  { %v2460_v46 = vpop.f32.mrf.mxu2 }
 0x32f   :  { %v2461_v57 = vadd.f32 %v2460_v46, %v2447_v45  ;;  %v2474_v4 = vpop.f32.mrf.mxu3 }
 0x331   :  { %v10360_v15 = vadd.f32 %v2474_v4, %v2461_v57 }
 0x33e   :  { %v2486_v36 = vpop.f32.mrf.mxu0 }
 0x33f   :  { %v2500_v26 = vpop.f32.mrf.mxu1  ;;  %v2487_v19 = vadd.f32 %v2486_v36, %v10320_v55 }
 0x341   :  { %v2501_v8 = vadd.f32 %v2500_v26, %v2487_v19 }
 0x346   :  { %v2514_v50 = vpop.f32.mrf.mxu2  ;;  %v2488_v41 = vpop.f32.mrf.mxu0 }
 0x347   :  { %v2515_v31 = vadd.f32 %v2514_v50, %v2501_v8  ;;  %v2528_v54 = vpop.f32.mrf.mxu3  ;;  %v2489_v7 = vadd.f32 %v2488_v41, %v10338_v35  ;;  %v2502_v37 = vpop.f32.mrf.mxu1 }
 0x349   :  { %v10364_v49 = vadd.f32 %v2528_v54, %v2515_v31  ;;  %v2503_v58 = vadd.f32 %v2502_v37, %v2489_v7 }
 0x34e   :  { %v2516_v11 = vpop.f32.mrf.mxu2 }
 0x34f   :  { %v2517_v13 = vadd.f32 %v2516_v11, %v2503_v58  ;;  %v2530_v39 = vpop.f32.mrf.mxu3 }
 0x351   :  { %v10366_v61 = vadd.f32 %v2530_v39, %v2517_v13 }
 0x35e   :  { %v2542_v22 = vpop.f32.mrf.mxu0 }
 0x35f   :  { %v2543_v23 = vadd.f32 %v2542_v22, %v1721_v47  ;;  %v2556_v55 = vpop.f32.mrf.mxu1 }
 0x361   :  { %v2557_v42 = vadd.f32 %v2556_v55, %v2543_v23 }
 0x366   :  { %v2570_v52 = vpop.f32.mrf.mxu2  ;;  %v2544_v35 = vpop.f32.mrf.mxu0 }
 0x367   :  { %v2571_v63 = vadd.f32 %v2570_v52, %v2557_v42  ;;  %v2584_v59 = vpop.f32.mrf.mxu3  ;;  %v2545_v21 = vadd.f32 %v2544_v35, %v1723_v6  ;;  %v2558_v12 = vpop.f32.mrf.mxu1 }
 0x369   :  { %v10368_v0 = vadd.f32 %v2584_v59, %v2571_v63  ;;  %v2559_v56 = vadd.f32 %v2558_v12, %v2545_v21 }
 0x36e   :  { %v2572_v3 = vpop.f32.mrf.mxu2 }
 0x36f   :  { %v2573_v14 = vadd.f32 %v2572_v3, %v2559_v56  ;;  %v2586_v60 = vpop.f32.mrf.mxu3 }
 0x371   :  { %v10370_v32 = vadd.f32 %v2586_v60, %v2573_v14 }
 0x372   :  { %9222 = dma.done.wait [#allocation3], 16384 }
 0x373   :  { %9223 = vsyncadd [#allocation3], 4294950912  ;;  %s2591_s18 = scalar_lea.hbm %s10532_s4, 3072 }
 0x374   :  { %s2599_s2 = sshll.u32 %s2591_s18, 4  ;;  %s2600_s2 = int_to_ptr.hbm [resolvable:$true] %s2599_s2 }
 0x375   :  { %2604 = dma.hbm_to_vmem [thread:$0]  %s2600_s2, 16384, %s578_s12, [#allocation3 + $0x1] }
 0x376   :  { %v6927_v47 = vld [vmem:[#allocation2 + $0xe0] sm:$0xf]  ;;  %v8619_v38 = vld [vmem:[#allocation2 + $0xec] sm:$0xf0] }
 0x377   :  { %v7055_v44 = vld [vmem:[#allocation2 + $0x1e0] sm:$0xf]  ;;  %v6928_v17 = vor.u32 %v8619_v38, %v6927_v47  ;;  %v8651_v53 = vld [vmem:[#allocation2 + $0x1ec] sm:$0xf0] }
 0x378   :  { %v7183_v10 = vld [vmem:[#allocation2 + $0x2e0] sm:$0xf]  ;;  %v8683_v28 = vld [vmem:[#allocation2 + $0x2ec] sm:$0xf0]  ;;  %v7056_v29 = vor.u32 %v8651_v53, %v7055_v44 }
 0x379   :  { %v7184_v20 = vor.u32 %v8683_v28, %v7183_v10  ;;  %v7311_v43 = vld [vmem:[#allocation2 + $0x3e0] sm:$0xf]  ;;  %v8715_v30 = vld [vmem:[#allocation2 + $0x3ec] sm:$0xf0]  ;;  %3377 = vmatpush.bf16.msra.mxu0 %v6928_v17 }
 0x37a   :  { %v6911_v1 = vld [vmem:[#allocation2 + $0xc0] sm:$0xf]  ;;  %v7312_v9 = vor.u32 %v8715_v30, %v7311_v43  ;;  %v8615_v2 = vld [vmem:[#allocation2 + $0xcc] sm:$0xf0]  ;;  %3391 = vmatpush.bf16.msra.mxu1 %v7056_v29 }
 0x37b   :  { %v7039_v5 = vld [vmem:[#allocation2 + $0x1c0] sm:$0xf]  ;;  %v8647_v18 = vld [vmem:[#allocation2 + $0x1cc] sm:$0xf0]  ;;  %3405 = vmatpush.bf16.msra.mxu2 %v7184_v20  ;;  %v6912_v33 = vor.u32 %v8615_v2, %v6911_v1 }
 0x37c   :  { %v7040_v16 = vor.u32 %v8647_v18, %v7039_v5  ;;  %v7167_v34 = vld [vmem:[#allocation2 + $0x2c0] sm:$0xf]  ;;  %v8679_v40 = vld [vmem:[#allocation2 + $0x2cc] sm:$0xf0]  ;;  %3419 = vmatpush.bf16.msra.mxu3 %v7312_v9 }
 0x37d   :  { %v7295_v27 = vld [vmem:[#allocation2 + $0x3c0] sm:$0xf]  ;;  %v7168_v45 = vor.u32 %v8679_v40, %v7167_v34  ;;  %v8711_v46 = vld [vmem:[#allocation2 + $0x3cc] sm:$0xf0]  ;;  %3378 = vmatpush.bf16.msra.mxu0 %v6912_v33 }
 0x37e   :  { %v6895_v57 = vld [vmem:[#allocation2 + $0xa0] sm:$0xf]  ;;  %v8611_v4 = vld [vmem:[#allocation2 + $0xac] sm:$0xf0]  ;;  %v7296_v36 = vor.u32 %v8711_v46, %v7295_v27  ;;  %3392 = vmatpush.bf16.msra.mxu1 %v7040_v16 }
 0x37f   :  { %v7023_v26 = vld [vmem:[#allocation2 + $0x1a0] sm:$0xf]  ;;  %v8643_v19 = vld [vmem:[#allocation2 + $0x1ac] sm:$0xf0]  ;;  %v6896_v50 = vor.u32 %v8611_v4, %v6895_v57  ;;  %3406 = vmatpush.bf16.msra.mxu2 %v7168_v45 }
 0x380   :  { %v7151_v8 = vld [vmem:[#allocation2 + $0x2a0] sm:$0xf]  ;;  %v8675_v31 = vld [vmem:[#allocation2 + $0x2ac] sm:$0xf0]  ;;  %v7024_v7 = vor.u32 %v8643_v19, %v7023_v26  ;;  %3420 = vmatpush.bf16.msra.mxu3 %v7296_v36 }
 0x381   :  { %v7279_v41 = vld [vmem:[#allocation2 + $0x3a0] sm:$0xf]  ;;  %v8707_v54 = vld [vmem:[#allocation2 + $0x3ac] sm:$0xf0]  ;;  %v7152_v37 = vor.u32 %v8675_v31, %v7151_v8  ;;  %3379 = vmatpush.bf16.msra.mxu0 %v6896_v50 }
 0x382   :  { %v6879_v58 = vld [vmem:[#allocation2 + $0x80] sm:$0xf]  ;;  %v8607_v11 = vld [vmem:[#allocation2 + $0x8c] sm:$0xf0]  ;;  %v7280_v39 = vor.u32 %v8707_v54, %v7279_v41  ;;  %3393 = vmatpush.bf16.msra.mxu1 %v7024_v7 }
 0x383   :  { %v7007_v13 = vld [vmem:[#allocation2 + $0x180] sm:$0xf]  ;;  %v8639_v62 = vld [vmem:[#allocation2 + $0x18c] sm:$0xf0]  ;;  %v6880_v42 = vor.u32 %v8607_v11, %v6879_v58  ;;  %3407 = vmatpush.bf16.msra.mxu2 %v7152_v37  ;;  %v8617_v11 = vld [vmem:[#allocation2 + $0xe4] sm:$0xf] }
 0x384   :  { %v7135_v22 = vld [vmem:[#allocation2 + $0x280] sm:$0xf]  ;;  %v8671_v23 = vld [vmem:[#allocation2 + $0x28c] sm:$0xf0]  ;;  %v7008_v52 = vor.u32 %v8639_v62, %v7007_v13  ;;  %3421 = vmatpush.bf16.msra.mxu3 %v7280_v39  ;;  %v6929_v13 = vld [vmem:[#allocation2 + $0xf0] sm:$0xf0] }
 0x385   :  { %v7263_v55 = vld [vmem:[#allocation2 + $0x380] sm:$0xf]  ;;  %v8703_v24 = vld [vmem:[#allocation2 + $0x38c] sm:$0xf0]  ;;  %v7136_v6 = vor.u32 %v8671_v23, %v7135_v22  ;;  %3380 = vmatpush.bf16.msra.mxu0 %v6880_v42  ;;  %v8649_v39 = vld [vmem:[#allocation2 + $0x1e4] sm:$0xf] }
 0x386   :  { %v6863_v63 = vld [vmem:[#allocation2 + $0x60] sm:$0xf]  ;;  %v8603_v59 = vld [vmem:[#allocation2 + $0x6c] sm:$0xf0]  ;;  %v7264_v21 = vor.u32 %v8703_v24, %v7263_v55  ;;  %3394 = vmatpush.bf16.msra.mxu1 %v7008_v52  ;;  %v7057_v22 = vld [vmem:[#allocation2 + $0x1f0] sm:$0xf0] }
 0x387   :  { %v6991_v35 = vld [vmem:[#allocation2 + $0x160] sm:$0xf]  ;;  %v8635_v12 = vld [vmem:[#allocation2 + $0x16c] sm:$0xf0]  ;;  %v6864_v47 = vor.u32 %v8603_v59, %v6863_v63  ;;  %3408 = vmatpush.bf16.msra.mxu2 %v7136_v6  ;;  %v8681_v23 = vld [vmem:[#allocation2 + $0x2e4] sm:$0xf]  ;;  %v6932_v59 = vor.u32 %v8617_v11, %v6929_v13 }
 0x388   :  { %v7119_v56 = vld [vmem:[#allocation2 + $0x260] sm:$0xf]  ;;  %v8667_v3 = vld [vmem:[#allocation2 + $0x26c] sm:$0xf0]  ;;  %v6992_v38 = vor.u32 %v8635_v12, %v6991_v35  ;;  %3422 = vmatpush.bf16.msra.mxu3 %v7264_v21  ;;  %v7185_v55 = vld [vmem:[#allocation2 + $0x2f0] sm:$0xf0]  ;;  %v7060_v35 = vor.u32 %v8649_v39, %v7057_v22 }
 0x389   :  { %v7247_v14 = vld [vmem:[#allocation2 + $0x360] sm:$0xf]  ;;  %v8699_v60 = vld [vmem:[#allocation2 + $0x36c] sm:$0xf0]  ;;  %v7120_v44 = vor.u32 %v8667_v3, %v7119_v56  ;;  %3381 = vmatpush.bf16.msra.mxu0 %v6864_v47  ;;  %v8713_v52 = vld [vmem:[#allocation2 + $0x3e4] sm:$0xf]  ;;  %v7188_v21 = vor.u32 %v8681_v23, %v7185_v55 }
 0x38a   :  { %v6847_v17 = vld [vmem:[#allocation2 + $0x40] sm:$0xf]  ;;  %v8599_v53 = vld [vmem:[#allocation2 + $0x4c] sm:$0xf0]  ;;  %v7248_v28 = vor.u32 %v8699_v60, %v7247_v14  ;;  %3395 = vmatpush.bf16.msra.mxu1 %v6992_v38  ;;  %v7313_v6 = vld [vmem:[#allocation2 + $0x3f0] sm:$0xf0] }
 0x38b   :  { %v6975_v10 = vld [vmem:[#allocation2 + $0x140] sm:$0xf]  ;;  %v8631_v29 = vld [vmem:[#allocation2 + $0x14c] sm:$0xf0]  ;;  %v6848_v9 = vor.u32 %v8599_v53, %v6847_v17  ;;  %3409 = vmatpush.bf16.msra.mxu2 %v7120_v44  ;;  %v8613_v12 = vld [vmem:[#allocation2 + $0xc4] sm:$0xf]  ;;  %v7316_v14 = vor.u32 %v8713_v52, %v7313_v6 }
 0x38c   :  { %v7103_v20 = vld [vmem:[#allocation2 + $0x240] sm:$0xf]  ;;  %v8663_v43 = vld [vmem:[#allocation2 + $0x24c] sm:$0xf0]  ;;  %v6976_v2 = vor.u32 %v8631_v29, %v6975_v10  ;;  %3423 = vmatpush.bf16.msra.mxu3 %v7248_v28  ;;  %v6913_v56 = vld [vmem:[#allocation2 + $0xd0] sm:$0xf0] }
 0x38d   :  { %v7231_v30 = vld [vmem:[#allocation2 + $0x340] sm:$0xf]  ;;  %v8695_v1 = vld [vmem:[#allocation2 + $0x34c] sm:$0xf0]  ;;  %v7104_v5 = vor.u32 %v8663_v43, %v7103_v20  ;;  %3382 = vmatpush.bf16.msra.mxu0 %v6848_v9  ;;  %v8645_v3 = vld [vmem:[#allocation2 + $0x1c4] sm:$0xf] }
 0x38e   :  { %v6831_v18 = vld [vmem:[#allocation2 + $0x20] sm:$0xf]  ;;  %v8595_v33 = vld [vmem:[#allocation2 + $0x2c] sm:$0xf0]  ;;  %v7232_v34 = vor.u32 %v8695_v1, %v7231_v30  ;;  %3396 = vmatpush.bf16.msra.mxu1 %v6976_v2  ;;  %v7041_v60 = vld [vmem:[#allocation2 + $0x1d0] sm:$0xf0]  ;;  %v6916_v2 = vor.u32 %v8613_v12, %v6913_v56 }
 0x38f   :  { %v6959_v16 = vld [vmem:[#allocation2 + $0x120] sm:$0xf]  ;;  %v8627_v40 = vld [vmem:[#allocation2 + $0x12c] sm:$0xf0]  ;;  %v6832_v4 = vor.u32 %v8595_v33, %v6831_v18  ;;  %3410 = vmatpush.bf16.msra.mxu2 %v7104_v5  ;;  %v8677_v47 = vld [vmem:[#allocation2 + $0x2c4] sm:$0xf] }
 0x390   :  { %v7087_v27 = vld [vmem:[#allocation2 + $0x220] sm:$0xf]  ;;  %v8659_v45 = vld [vmem:[#allocation2 + $0x22c] sm:$0xf0]  ;;  %v6960_v19 = vor.u32 %v8627_v40, %v6959_v16  ;;  %3424 = vmatpush.bf16.msra.mxu3 %v7232_v34  ;;  %v7169_v38 = vld [vmem:[#allocation2 + $0x2d0] sm:$0xf0]  ;;  %v7044_v16 = vor.u32 %v8645_v3, %v7041_v60 }
 0x391   :  { %v7215_v46 = vld [vmem:[#allocation2 + $0x320] sm:$0xf]  ;;  %v8691_v57 = vld [vmem:[#allocation2 + $0x32c] sm:$0xf0]  ;;  %v7088_v8 = vor.u32 %v8659_v45, %v7087_v27  ;;  %3383 = vmatpush.bf16.msra.mxu0 %v6832_v4  ;;  %v8709_v10 = vld [vmem:[#allocation2 + $0x3c4] sm:$0xf]  ;;  %v7172_v34 = vor.u32 %v8677_v47, %v7169_v38 }
 0x392   :  { %v6815_v36 = vld [vmem:[#allocation2] sm:$0xf]  ;;  %v8591_v26 = vld [vmem:[#allocation2 + $0xc] sm:$0xf0]  ;;  %v7216_v54 = vor.u32 %v8691_v57, %v7215_v46  ;;  %3397 = vmatpush.bf16.msra.mxu1 %v6960_v19  ;;  %v7297_v28 = vld [vmem:[#allocation2 + $0x3d0] sm:$0xf0] }
 0x393   :  { %v6943_v50 = vld [vmem:[#allocation2 + $0x100] sm:$0xf]  ;;  %v8623_v31 = vld [vmem:[#allocation2 + $0x10c] sm:$0xf0]  ;;  %v6816_v62 = vor.u32 %v8591_v26, %v6815_v36  ;;  %3411 = vmatpush.bf16.msra.mxu2 %v7088_v8  ;;  %v11031_v29 = vld [vmem:[#allocation35_spill] sm:$0xff]  ;;  %v7300_v46 = vor.u32 %v8709_v10, %v7297_v28 }
 0x394   :  { %v7071_v41 = vld [vmem:[#allocation2 + $0x200] sm:$0xf]  ;;  %v8655_v7 = vld [vmem:[#allocation2 + $0x20c] sm:$0xf0]  ;;  %v6944_v24 = vor.u32 %v8623_v31, %v6943_v50  ;;  %3425 = vmatpush.bf16.msra.mxu3 %v7216_v54  ;;  %v11032_v20 = vld [vmem:[#allocation39_spill] sm:$0xff] }
 0x395   :  { %v7199_v37 = vld [vmem:[#allocation2 + $0x300] sm:$0xf]  ;;  %v8687_v58 = vld [vmem:[#allocation2 + $0x30c] sm:$0xf0]  ;;  %v7072_v42 = vor.u32 %v8655_v7, %v7071_v41  ;;  %3384 = vmatpush.bf16.msra.mxu0 %v6816_v62  ;;  %v10383_v43 = vpack.c.bf16 %v11032_v20, %v11031_v29  ;;  %v11035_v5 = vld [vmem:[#allocation33_spill] sm:$0xff] }
 0x396   :  { %v7200_v63 = vor.u32 %v8687_v58, %v7199_v37  ;;  %v11029_v44 = vld [vmem:[#allocation34_spill] sm:$0xff]  ;;  %3398 = vmatpush.bf16.msra.mxu1 %v6944_v24  ;;  %v11033_v30 = vld [vmem:[#allocation32_spill] sm:$0xff]  ;;  %v11036_v18 = vld [vmem:[#allocation37_spill] sm:$0xff] }
 0x397   :  { %v11030_v17 = vld [vmem:[#allocation38_spill] sm:$0xff]  ;;  %3412 = vmatpush.bf16.msra.mxu2 %v7072_v42  ;;  %v11034_v1 = vld [vmem:[#allocation36_spill] sm:$0xff]  ;;  %v10391_v33 = vpack.c.bf16 %v11036_v18, %v11035_v5  ;;  %v8609_v40 = vld [vmem:[#allocation2 + $0xa4] sm:$0xf] }
 0x398   :  { %v10379_v53 = vpack.c.bf16 %v11030_v17, %v11029_v44  ;;  %v10387_v9 = vpack.c.bf16 %v11034_v1, %v11033_v30  ;;  %3426 = vmatpush.bf16.msra.mxu3 %v7200_v63  ;;  %v6897_v27 = vld [vmem:[#allocation2 + $0xb0] sm:$0xf0]  ;;  %v8641_v45 = vld [vmem:[#allocation2 + $0x1a4] sm:$0xf] }
 0x399   :  { %3433 = vmatpush.bf16.msrb.mxu0 %v6932_v59  ;;  %v7025_v57 = vld [vmem:[#allocation2 + $0x1b0] sm:$0xf0]  ;;  %v8673_v4 = vld [vmem:[#allocation2 + $0x2a4] sm:$0xf]  ;;  %v6900_v8 = vor.u32 %v8609_v40, %v6897_v27  ;;  %3399 = vmatmul.bf16.vlgmr.msra.gmra.mxu1 %v10391_v33 }
 0x39a   :  { %3447 = vmatpush.bf16.msrb.mxu1 %v7060_v35  ;;  %v7153_v36 = vld [vmem:[#allocation2 + $0x2b0] sm:$0xf0]  ;;  %3413 = vmatmul.bf16.vlgmr.msra.gmra.mxu2 %v10379_v53  ;;  %v8705_v26 = vld [vmem:[#allocation2 + $0x3a4] sm:$0xf]  ;;  %v7028_v50 = vor.u32 %v8641_v45, %v7025_v57 }
 0x39b   :  { %3461 = vmatpush.bf16.msrb.mxu2 %v7188_v21  ;;  %v7281_v19 = vld [vmem:[#allocation2 + $0x3b0] sm:$0xf0]  ;;  %3427 = vmatmul.bf16.vlgmr.msra.gmra.mxu3 %v10383_v43  ;;  %v7156_v31 = vor.u32 %v8673_v4, %v7153_v36  ;;  %v8605_v41 = vld [vmem:[#allocation2 + $0x84] sm:$0xf] }
 0x39c   :  { %3475 = vmatpush.bf16.msrb.mxu3 %v7316_v14  ;;  %3385 = vmatmul.bf16.vlgmr.msra.gmra.mxu0 %v10387_v9  ;;  %v6881_v54 = vld [vmem:[#allocation2 + $0x90] sm:$0xf0]  ;;  %v8637_v7 = vld [vmem:[#allocation2 + $0x184] sm:$0xf]  ;;  %v7284_v37 = vor.u32 %v8705_v26, %v7281_v19 }
 0x39d   :  { %3434 = vmatpush.bf16.msrb.mxu0 %v6916_v2  ;;  %v7009_v58 = vld [vmem:[#allocation2 + $0x190] sm:$0xf0]  ;;  %v8669_v11 = vld [vmem:[#allocation2 + $0x284] sm:$0xf]  ;;  %v6884_v22 = vor.u32 %v8605_v41, %v6881_v54 }
 0x39e   :  { %3448 = vmatpush.bf16.msrb.mxu1 %v7044_v16  ;;  %v7137_v13 = vld [vmem:[#allocation2 + $0x290] sm:$0xf0]  ;;  %v8701_v39 = vld [vmem:[#allocation2 + $0x384] sm:$0xf]  ;;  %v7012_v23 = vor.u32 %v8637_v7, %v7009_v58 }
 0x39f   :  { %3462 = vmatpush.bf16.msrb.mxu2 %v7172_v34  ;;  %v7265_v62 = vld [vmem:[#allocation2 + $0x390] sm:$0xf0]  ;;  %v7140_v55 = vor.u32 %v8669_v11, %v7137_v13  ;;  %v8601_v24 = vld [vmem:[#allocation2 + $0x64] sm:$0xf]  ;;  %v6935_v11 = vld [vmem:[#allocation2 + $0xe8] sm:$0xf] }
 0x3a0   :  { %3476 = vmatpush.bf16.msrb.mxu3 %v7300_v46  ;;  %v6865_v42 = vld [vmem:[#allocation2 + $0x70] sm:$0xf0]  ;;  %v8633_v52 = vld [vmem:[#allocation2 + $0x164] sm:$0xf]  ;;  %v7268_v6 = vor.u32 %v8701_v39, %v7265_v62  ;;  %v8620_v13 = vld [vmem:[#allocation2 + $0xf4] sm:$0xf0] }
 0x3a1   :  { %3435 = vmatpush.bf16.msrb.mxu0 %v6900_v8  ;;  %v6993_v63 = vld [vmem:[#allocation2 + $0x170] sm:$0xf0]  ;;  %v8665_v59 = vld [vmem:[#allocation2 + $0x264] sm:$0xf]  ;;  %v6868_v56 = vor.u32 %v8601_v24, %v6865_v42  ;;  %v7063_v39 = vld [vmem:[#allocation2 + $0x1e8] sm:$0xf] }
 0x3a2   :  { %3449 = vmatpush.bf16.msrb.mxu1 %v7028_v50  ;;  %v7121_v35 = vld [vmem:[#allocation2 + $0x270] sm:$0xf0]  ;;  %v8697_v21 = vld [vmem:[#allocation2 + $0x364] sm:$0xf]  ;;  %v6996_v3 = vor.u32 %v8633_v52, %v6993_v63  ;;  %v7319_v52 = vld [vmem:[#allocation2 + $0x3e8] sm:$0xf] }
 0x3a3   :  { %3463 = vmatpush.bf16.msrb.mxu2 %v7156_v31  ;;  %v7249_v12 = vld [vmem:[#allocation2 + $0x370] sm:$0xf0]  ;;  %v7124_v14 = vor.u32 %v8665_v59, %v7121_v35  ;;  %v8597_v60 = vld [vmem:[#allocation2 + $0x44] sm:$0xf]  ;;  %v6936_v59 = vor.u32 %v8620_v13, %v6935_v11  ;;  %v8604_v11 = vld [vmem:[#allocation2 + $0x74] sm:$0xf0] }
 0x3a4   :  { %3477 = vmatpush.bf16.msrb.mxu3 %v7284_v37  ;;  %v6849_v47 = vld [vmem:[#allocation2 + $0x50] sm:$0xf0]  ;;  %v8629_v38 = vld [vmem:[#allocation2 + $0x144] sm:$0xf]  ;;  %v7252_v44 = vor.u32 %v8697_v21, %v7249_v12  ;;  %v6919_v12 = vld [vmem:[#allocation2 + $0xc8] sm:$0xf] }
 0x3a5   :  { %3436 = vmatpush.bf16.msrb.mxu0 %v6884_v22  ;;  %v6977_v17 = vld [vmem:[#allocation2 + $0x150] sm:$0xf0]  ;;  %v8661_v10 = vld [vmem:[#allocation2 + $0x244] sm:$0xf]  ;;  %v6852_v30 = vor.u32 %v8597_v60, %v6849_v47  ;;  %v8652_v22 = vld [vmem:[#allocation2 + $0x1f4] sm:$0xf0] }
 0x3a6   :  { %3450 = vmatpush.bf16.msrb.mxu1 %v7012_v23  ;;  %v7105_v28 = vld [vmem:[#allocation2 + $0x250] sm:$0xf0]  ;;  %v8693_v29 = vld [vmem:[#allocation2 + $0x344] sm:$0xf]  ;;  %v6980_v1 = vor.u32 %v8629_v38, %v6977_v17  ;;  %v7191_v23 = vld [vmem:[#allocation2 + $0x2e8] sm:$0xf]  ;;  %v7064_v35 = vor.u32 %v8652_v22, %v7063_v39 }
 0x3a7   :  { %3464 = vmatpush.bf16.msrb.mxu2 %v7140_v55  ;;  %v7233_v20 = vld [vmem:[#allocation2 + $0x350] sm:$0xf0]  ;;  %v7108_v2 = vor.u32 %v8661_v10, %v7105_v28  ;;  %v8593_v5 = vld [vmem:[#allocation2 + $0x24] sm:$0xf]  ;;  %v8684_v55 = vld [vmem:[#allocation2 + $0x2f4] sm:$0xf0] }
 0x3a8   :  { %3478 = vmatpush.bf16.msrb.mxu3 %v7268_v6  ;;  %v6833_v18 = vld [vmem:[#allocation2 + $0x30] sm:$0xf0]  ;;  %v8625_v16 = vld [vmem:[#allocation2 + $0x124] sm:$0xf]  ;;  %v7236_v34 = vor.u32 %v8693_v29, %v7233_v20  ;;  %v8716_v6 = vld [vmem:[#allocation2 + $0x3f4] sm:$0xf0]  ;;  %v7192_v21 = vor.u32 %v8684_v55, %v7191_v23 }
 0x3a9   :  { %3437 = vmatpush.bf16.msrb.mxu0 %v6868_v56  ;;  %v6961_v40 = vld [vmem:[#allocation2 + $0x130] sm:$0xf0]  ;;  %v8657_v27 = vld [vmem:[#allocation2 + $0x224] sm:$0xf]  ;;  %v6836_v4 = vor.u32 %v8593_v5, %v6833_v18  ;;  %v8616_v56 = vld [vmem:[#allocation2 + $0xd4] sm:$0xf0] }
 0x3aa   :  { %3451 = vmatpush.bf16.msrb.mxu1 %v6996_v3  ;;  %v7089_v45 = vld [vmem:[#allocation2 + $0x230] sm:$0xf0]  ;;  %v8689_v46 = vld [vmem:[#allocation2 + $0x324] sm:$0xf]  ;;  %v6964_v19 = vor.u32 %v8625_v16, %v6961_v40  ;;  %v7047_v3 = vld [vmem:[#allocation2 + $0x1c8] sm:$0xf]  ;;  %v6920_v10 = vor.u32 %v8616_v56, %v6919_v12 }
 0x3ab   :  { %3465 = vmatpush.bf16.msrb.mxu2 %v7124_v14  ;;  %v7217_v57 = vld [vmem:[#allocation2 + $0x330] sm:$0xf0]  ;;  %v8589_v36 = vld [vmem:[#allocation2 + $0x4] sm:$0xf]  ;;  %v7092_v8 = vor.u32 %v8657_v27, %v7089_v45  ;;  %v7320_v14 = vor.u32 %v8716_v6, %v7319_v52  ;;  %v8648_v60 = vld [vmem:[#allocation2 + $0x1d4] sm:$0xf0] }
 0x3ac   :  { %3479 = vmatpush.bf16.msrb.mxu3 %v7252_v44  ;;  %v6817_v26 = vld [vmem:[#allocation2 + $0x10] sm:$0xf0]  ;;  %v8621_v50 = vld [vmem:[#allocation2 + $0x104] sm:$0xf]  ;;  %v7220_v54 = vor.u32 %v8689_v46, %v7217_v57  ;;  %v7175_v47 = vld [vmem:[#allocation2 + $0x2c8] sm:$0xf]  ;;  %v7048_v28 = vor.u32 %v8648_v60, %v7047_v3 }
 0x3ad   :  { %3438 = vmatpush.bf16.msrb.mxu0 %v6852_v30  ;;  %v6945_v31 = vld [vmem:[#allocation2 + $0x110] sm:$0xf0]  ;;  %v8653_v41 = vld [vmem:[#allocation2 + $0x204] sm:$0xf]  ;;  %v6820_v62 = vor.u32 %v8589_v36, %v6817_v26  ;;  %v8680_v38 = vld [vmem:[#allocation2 + $0x2d4] sm:$0xf0] }
 0x3ae   :  { %3452 = vmatpush.bf16.msrb.mxu1 %v6980_v1  ;;  %v7073_v7 = vld [vmem:[#allocation2 + $0x210] sm:$0xf0]  ;;  %v8685_v37 = vld [vmem:[#allocation2 + $0x304] sm:$0xf]  ;;  %v6948_v24 = vor.u32 %v8621_v50, %v6945_v31  ;;  %v7303_v44 = vld [vmem:[#allocation2 + $0x3c8] sm:$0xf]  ;;  %v7176_v29 = vor.u32 %v8680_v38, %v7175_v47 }
 0x3af   :  { %3466 = vmatpush.bf16.msrb.mxu2 %v7108_v2  ;;  %v7201_v58 = vld [vmem:[#allocation2 + $0x310] sm:$0xf0]  ;;  %v7076_v42 = vor.u32 %v8653_v41, %v7073_v7  ;;  %v8712_v17 = vld [vmem:[#allocation2 + $0x3d4] sm:$0xf0]  ;;  %v6903_v20 = vld [vmem:[#allocation2 + $0xa8] sm:$0xf] }
 0x3b0   :  { %3480 = vmatpush.bf16.msrb.mxu3 %v7236_v34  ;;  %v7204_v63 = vor.u32 %v8685_v37, %v7201_v58  ;;  %v8612_v30 = vld [vmem:[#allocation2 + $0xb4] sm:$0xf0]  ;;  %v7031_v1 = vld [vmem:[#allocation2 + $0x1a8] sm:$0xf]  ;;  %v7304_v2 = vor.u32 %v8712_v17, %v7303_v44 }
 0x3b1   :  { %3439 = vmatpush.bf16.msrb.mxu0 %v6836_v4  ;;  %v8644_v5 = vld [vmem:[#allocation2 + $0x1b4] sm:$0xf0]  ;;  %v7159_v18 = vld [vmem:[#allocation2 + $0x2a8] sm:$0xf]  ;;  %v6904_v27 = vor.u32 %v8612_v30, %v6903_v20 }
 0x3b2   :  { %3453 = vmatpush.bf16.msrb.mxu1 %v6964_v19  ;;  %v8676_v16 = vld [vmem:[#allocation2 + $0x2b4] sm:$0xf0]  ;;  %v7287_v34 = vld [vmem:[#allocation2 + $0x3a8] sm:$0xf]  ;;  %v7032_v45 = vor.u32 %v8644_v5, %v7031_v1 }
 0x3b3   :  { %3467 = vmatpush.bf16.msrb.mxu2 %v7092_v8  ;;  %v8708_v40 = vld [vmem:[#allocation2 + $0x3b4] sm:$0xf0]  ;;  %v7160_v46 = vor.u32 %v8676_v16, %v7159_v18  ;;  %v6887_v57 = vld [vmem:[#allocation2 + $0x88] sm:$0xf] }
 0x3b4   :  { %3481 = vmatpush.bf16.msrb.mxu3 %v7220_v54  ;;  %v8608_v4 = vld [vmem:[#allocation2 + $0x94] sm:$0xf0]  ;;  %v7015_v36 = vld [vmem:[#allocation2 + $0x188] sm:$0xf]  ;;  %v7288_v26 = vor.u32 %v8708_v40, %v7287_v34 }
 0x3b5   :  { %3440 = vmatpush.bf16.msrb.mxu0 %v6820_v62  ;;  %v8640_v19 = vld [vmem:[#allocation2 + $0x194] sm:$0xf0]  ;;  %v7143_v8 = vld [vmem:[#allocation2 + $0x288] sm:$0xf]  ;;  %v6888_v54 = vor.u32 %v8608_v4, %v6887_v57 }
 0x3b6   :  { %3454 = vmatpush.bf16.msrb.mxu1 %v6948_v24  ;;  %v8672_v50 = vld [vmem:[#allocation2 + $0x294] sm:$0xf0]  ;;  %v7271_v31 = vld [vmem:[#allocation2 + $0x388] sm:$0xf]  ;;  %v7016_v7 = vor.u32 %v8640_v19, %v7015_v36 }
 0x3b7   :  { %3468 = vmatpush.bf16.msrb.mxu2 %v7076_v42  ;;  %v8704_v41 = vld [vmem:[#allocation2 + $0x394] sm:$0xf0]  ;;  %v7144_v37 = vor.u32 %v8672_v50, %v7143_v8  ;;  %v6871_v58 = vld [vmem:[#allocation2 + $0x68] sm:$0xf]  ;;  %v8618_v8 = vld [vmem:[#allocation2 + $0xec] sm:$0xf] }
 0x3b8   :  { %3482 = vmatpush.bf16.msrb.mxu3 %v7204_v63  ;;  %3441 = vmatmul.bf16.vlgmr.msrb.gmra.mxu0 %v10387_v9  ;;  %v6999_v13 = vld [vmem:[#allocation2 + $0x168] sm:$0xf]  ;;  %v7272_v39 = vor.u32 %v8704_v41, %v7271_v31  ;;  %v8636_v62 = vld [vmem:[#allocation2 + $0x174] sm:$0xf0]  ;;  %v6872_v42 = vor.u32 %v8604_v11, %v6871_v58  ;;  %v6937_v50 = vld [vmem:[#allocation2 + $0xf8] sm:$0xf0] }
 0x3b9   :  { %3489 = vmatpush.bf16.msra.mxu0 %v6936_v59  ;;  %3455 = vmatmul.bf16.vlgmr.msrb.gmra.mxu1 %v10391_v33  ;;  %v7127_v22 = vld [vmem:[#allocation2 + $0x268] sm:$0xf]  ;;  %v8668_v23 = vld [vmem:[#allocation2 + $0x274] sm:$0xf0]  ;;  %v7000_v52 = vor.u32 %v8636_v62, %v6999_v13  ;;  %v8650_v31 = vld [vmem:[#allocation2 + $0x1ec] sm:$0xf] }
 0x3ba   :  { %3503 = vmatpush.bf16.msra.mxu1 %v7064_v35  ;;  %3469 = vmatmul.bf16.vlgmr.msrb.gmra.mxu2 %v10379_v53  ;;  %v7255_v55 = vld [vmem:[#allocation2 + $0x368] sm:$0xf]  ;;  %v8700_v24 = vld [vmem:[#allocation2 + $0x374] sm:$0xf0]  ;;  %v7128_v6 = vor.u32 %v8668_v23, %v7127_v22  ;;  %v8714_v13 = vld [vmem:[#allocation2 + $0x3ec] sm:$0xf]  ;;  %v6940_v22 = vor.u32 %v8618_v8, %v6937_v50 }
 0x3bb   :  { %3517 = vmatpush.bf16.msra.mxu2 %v7192_v21  ;;  %3483 = vmatmul.bf16.vlgmr.msrb.gmra.mxu3 %v10383_v43  ;;  %v6855_v63 = vld [vmem:[#allocation2 + $0x48] sm:$0xf]  ;;  %v8600_v59 = vld [vmem:[#allocation2 + $0x54] sm:$0xf0]  ;;  %v7256_v21 = vor.u32 %v8700_v24, %v7255_v55  ;;  %v8614_v24 = vld [vmem:[#allocation2 + $0xcc] sm:$0xf] }
 0x3bc   :  { %3531 = vmatpush.bf16.msra.mxu3 %v7320_v14  ;;  %v6983_v35 = vld [vmem:[#allocation2 + $0x148] sm:$0xf]  ;;  %v8632_v12 = vld [vmem:[#allocation2 + $0x154] sm:$0xf0]  ;;  %v6856_v47 = vor.u32 %v8600_v59, %v6855_v63  ;;  %v7049_v63 = vld [vmem:[#allocation2 + $0x1d8] sm:$0xf0] }
 0x3bd   :  { %3490 = vmatpush.bf16.msra.mxu0 %v6920_v10  ;;  %v7111_v56 = vld [vmem:[#allocation2 + $0x248] sm:$0xf]  ;;  %v8664_v3 = vld [vmem:[#allocation2 + $0x254] sm:$0xf0]  ;;  %v6984_v38 = vor.u32 %v8632_v12, %v6983_v35  ;;  %v8678_v59 = vld [vmem:[#allocation2 + $0x2cc] sm:$0xf] }
 0x3be   :  { %3504 = vmatpush.bf16.msra.mxu1 %v7048_v28  ;;  %v7239_v14 = vld [vmem:[#allocation2 + $0x348] sm:$0xf]  ;;  %v8696_v60 = vld [vmem:[#allocation2 + $0x354] sm:$0xf0]  ;;  %v7112_v44 = vor.u32 %v8664_v3, %v7111_v56  ;;  %v7177_v35 = vld [vmem:[#allocation2 + $0x2d8] sm:$0xf0] }
 0x3bf   :  { %3518 = vmatpush.bf16.msra.mxu2 %v7176_v29  ;;  %v6839_v17 = vld [vmem:[#allocation2 + $0x28] sm:$0xf]  ;;  %v8596_v10 = vld [vmem:[#allocation2 + $0x34] sm:$0xf0]  ;;  %v7240_v29 = vor.u32 %v8696_v60, %v7239_v14  ;;  %v7305_v12 = vld [vmem:[#allocation2 + $0x3d8] sm:$0xf0]  ;;  %v7180_v14 = vor.u32 %v8678_v59, %v7177_v35 }
 0x3c0   :  { %3532 = vmatpush.bf16.msra.mxu3 %v7304_v2  ;;  %v6967_v28 = vld [vmem:[#allocation2 + $0x128] sm:$0xf]  ;;  %v8628_v20 = vld [vmem:[#allocation2 + $0x134] sm:$0xf0]  ;;  %v6840_v18 = vor.u32 %v8596_v10, %v6839_v17  ;;  %v8610_v60 = vld [vmem:[#allocation2 + $0xac] sm:$0xf] }
 0x3c1   :  { %3491 = vmatpush.bf16.msra.mxu0 %v6904_v27  ;;  %v7095_v30 = vld [vmem:[#allocation2 + $0x228] sm:$0xf]  ;;  %v8660_v1 = vld [vmem:[#allocation2 + $0x234] sm:$0xf0]  ;;  %v6968_v40 = vor.u32 %v8628_v20, %v6967_v28  ;;  %v7033_v17 = vld [vmem:[#allocation2 + $0x1b8] sm:$0xf0] }
 0x3c2   :  { %3505 = vmatpush.bf16.msra.mxu1 %v7032_v45  ;;  %v7223_v2 = vld [vmem:[#allocation2 + $0x328] sm:$0xf]  ;;  %v8692_v5 = vld [vmem:[#allocation2 + $0x334] sm:$0xf0]  ;;  %v7096_v27 = vor.u32 %v8660_v1, %v7095_v30  ;;  %v8674_v10 = vld [vmem:[#allocation2 + $0x2ac] sm:$0xf] }
 0x3c3   :  { %3519 = vmatpush.bf16.msra.mxu2 %v7160_v46  ;;  %v6823_v16 = vld [vmem:[#allocation2 + $0x8] sm:$0xf]  ;;  %v8592_v34 = vld [vmem:[#allocation2 + $0x14] sm:$0xf0]  ;;  %v7224_v4 = vor.u32 %v8692_v5, %v7223_v2  ;;  %v7161_v28 = vld [vmem:[#allocation2 + $0x2b8] sm:$0xf0] }
 0x3c4   :  { %3533 = vmatpush.bf16.msra.mxu3 %v7288_v26  ;;  %v6951_v45 = vld [vmem:[#allocation2 + $0x108] sm:$0xf]  ;;  %v8624_v46 = vld [vmem:[#allocation2 + $0x114] sm:$0xf0]  ;;  %v6824_v41 = vor.u32 %v8592_v34, %v6823_v16  ;;  %v7289_v20 = vld [vmem:[#allocation2 + $0x3b8] sm:$0xf0]  ;;  %v7164_v2 = vor.u32 %v8674_v10, %v7161_v28 }
 0x3c5   :  { %3492 = vmatpush.bf16.msra.mxu0 %v6888_v54  ;;  %v7079_v57 = vld [vmem:[#allocation2 + $0x208] sm:$0xf]  ;;  %v8656_v36 = vld [vmem:[#allocation2 + $0x214] sm:$0xf0]  ;;  %v7065_v54 = vld [vmem:[#allocation2 + $0x1f8] sm:$0xf0]  ;;  %v6952_v58 = vor.u32 %v8624_v46, %v6951_v45 }
 0x3c6   :  { %3506 = vmatpush.bf16.msra.mxu1 %v7016_v7  ;;  %v7207_v26 = vld [vmem:[#allocation2 + $0x308] sm:$0xf]  ;;  %v8688_v19 = vld [vmem:[#allocation2 + $0x314] sm:$0xf0]  ;;  %v8682_v7 = vld [vmem:[#allocation2 + $0x2ec] sm:$0xf]  ;;  %v7080_v11 = vor.u32 %v8656_v36, %v7079_v57  ;;  %v7068_v23 = vor.u32 %v8650_v31, %v7065_v54 }
 0x3c7   :  { %3520 = vmatpush.bf16.msra.mxu2 %v7144_v37  ;;  %v7193_v37 = vld [vmem:[#allocation2 + $0x2f8] sm:$0xf0]  ;;  %v7208_v62 = vor.u32 %v8688_v19, %v7207_v26  ;;  %v8606_v5 = vld [vmem:[#allocation2 + $0x8c] sm:$0xf] }
 0x3c8   :  { %3534 = vmatpush.bf16.msra.mxu3 %v7272_v39  ;;  %v7321_v39 = vld [vmem:[#allocation2 + $0x3f8] sm:$0xf0]  ;;  %v7196_v55 = vor.u32 %v8682_v7, %v7193_v37  ;;  %v8638_v16 = vld [vmem:[#allocation2 + $0x18c] sm:$0xf] }
 0x3c9   :  { %3493 = vmatpush.bf16.msra.mxu0 %v6872_v42  ;;  %v6921_v42 = vld [vmem:[#allocation2 + $0xd8] sm:$0xf0]  ;;  %v8702_v46 = vld [vmem:[#allocation2 + $0x38c] sm:$0xf] }
 0x3ca   :  { %3507 = vmatpush.bf16.msra.mxu1 %v7000_v52  ;;  %v8646_v52 = vld [vmem:[#allocation2 + $0x1cc] sm:$0xf]  ;;  %v6924_v56 = vor.u32 %v8614_v24, %v6921_v42  ;;  %v7145_v45 = vld [vmem:[#allocation2 + $0x298] sm:$0xf0] }
 0x3cb   :  { %3521 = vmatpush.bf16.msra.mxu2 %v7128_v6  ;;  %v7324_v6 = vor.u32 %v8714_v13, %v7321_v39  ;;  %v7052_v3 = vor.u32 %v8646_v52, %v7049_v63  ;;  %v7273_v57 = vld [vmem:[#allocation2 + $0x398] sm:$0xf0]  ;;  %v8602_v19 = vld [vmem:[#allocation2 + $0x6c] sm:$0xf] }
 0x3cc   :  { %3535 = vmatpush.bf16.msra.mxu3 %v7256_v21  ;;  %v8710_v21 = vld [vmem:[#allocation2 + $0x3cc] sm:$0xf]  ;;  %v6873_v8 = vld [vmem:[#allocation2 + $0x78] sm:$0xf0]  ;;  %v7276_v31 = vor.u32 %v8702_v46, %v7273_v57 }
 0x3cd   :  { %3494 = vmatpush.bf16.msra.mxu0 %v6856_v47  ;;  %v6905_v47 = vld [vmem:[#allocation2 + $0xb8] sm:$0xf0]  ;;  %v8634_v50 = vld [vmem:[#allocation2 + $0x16c] sm:$0xf] }
 0x3ce   :  { %3508 = vmatpush.bf16.msra.mxu1 %v6984_v38  ;;  %v8642_v38 = vld [vmem:[#allocation2 + $0x1ac] sm:$0xf]  ;;  %v6908_v30 = vor.u32 %v8610_v60, %v6905_v47  ;;  %v7129_v7 = vld [vmem:[#allocation2 + $0x278] sm:$0xf0] }
 0x3cf   :  { %3522 = vmatpush.bf16.msra.mxu2 %v7112_v44  ;;  %v7308_v44 = vor.u32 %v8710_v21, %v7305_v12  ;;  %v7036_v1 = vor.u32 %v8642_v38, %v7033_v17  ;;  %v8666_v54 = vld [vmem:[#allocation2 + $0x26c] sm:$0xf]  ;;  %v6985_v24 = vld [vmem:[#allocation2 + $0x158] sm:$0xf0] }
 0x3d0   :  { %3536 = vmatpush.bf16.msra.mxu3 %v7240_v29  ;;  %v8706_v29 = vld [vmem:[#allocation2 + $0x3ac] sm:$0xf]  ;;  %v7132_v39 = vor.u32 %v8666_v54, %v7129_v7  ;;  %v7113_v52 = vld [vmem:[#allocation2 + $0x258] sm:$0xf0] }
 0x3d1   :  { %3495 = vmatpush.bf16.msra.mxu0 %v6840_v18  ;;  %v6889_v18 = vld [vmem:[#allocation2 + $0x98] sm:$0xf0]  ;;  %v7292_v34 = vor.u32 %v8706_v29, %v7289_v20  ;;  %v8698_v37 = vld [vmem:[#allocation2 + $0x36c] sm:$0xf] }
 0x3d2   :  { %3509 = vmatpush.bf16.msra.mxu1 %v6968_v40  ;;  %v7017_v40 = vld [vmem:[#allocation2 + $0x198] sm:$0xf0]  ;;  %v8662_v42 = vld [vmem:[#allocation2 + $0x24c] sm:$0xf] }
 0x3d3   :  { %3523 = vmatpush.bf16.msra.mxu2 %v7096_v27  ;;  %v8670_v27 = vld [vmem:[#allocation2 + $0x28c] sm:$0xf]  ;;  %v7020_v36 = vor.u32 %v8638_v16, %v7017_v40  ;;  %v7241_v63 = vld [vmem:[#allocation2 + $0x358] sm:$0xf0]  ;;  %v7116_v21 = vor.u32 %v8662_v42, %v7113_v52 }
 0x3d4   :  { %3537 = vmatpush.bf16.msra.mxu3 %v7224_v4  ;;  %v6892_v4 = vor.u32 %v8606_v5, %v6889_v18  ;;  %v7148_v26 = vor.u32 %v8670_v27, %v7145_v45  ;;  %v8594_v12 = vld [vmem:[#allocation2 + $0x2c] sm:$0xf]  ;;  %v6969_v60 = vld [vmem:[#allocation2 + $0x138] sm:$0xf0] }
 0x3d5   :  { %3496 = vmatpush.bf16.msra.mxu0 %v6824_v41  ;;  %v7001_v41 = vld [vmem:[#allocation2 + $0x178] sm:$0xf0]  ;;  %v8658_v47 = vld [vmem:[#allocation2 + $0x22c] sm:$0xf] }
 0x3d6   :  { %3510 = vmatpush.bf16.msra.mxu1 %v6952_v58  ;;  %v7257_v58 = vld [vmem:[#allocation2 + $0x378] sm:$0xf0]  ;;  %v7004_v13 = vor.u32 %v8634_v50, %v7001_v41  ;;  %v8590_v20 = vld [vmem:[#allocation2 + $0xc] sm:$0xf] }
 0x3d7   :  { %3524 = vmatpush.bf16.msra.mxu2 %v7080_v11  ;;  %v6876_v11 = vor.u32 %v8602_v19, %v6873_v8  ;;  %v7097_v38 = vld [vmem:[#allocation2 + $0x238] sm:$0xf0]  ;;  %v8654_v18 = vld [vmem:[#allocation2 + $0x20c] sm:$0xf] }
 0x3d8   :  { %3538 = vmatpush.bf16.msra.mxu3 %v7208_v62  ;;  %3497 = vmatmul.bf16.vlgmr.msra.gmra.mxu0 %v10387_v9  ;;  %v8598_v62 = vld [vmem:[#allocation2 + $0x4c] sm:$0xf]  ;;  %v7225_v17 = vld [vmem:[#allocation2 + $0x338] sm:$0xf0]  ;;  %v7100_v29 = vor.u32 %v8658_v47, %v7097_v38 }
 0x3d9   :  { %3545 = vmatpush.bf16.msrb.mxu0 %v6940_v22  ;;  %3511 = vmatmul.bf16.vlgmr.msra.gmra.mxu1 %v10391_v33  ;;  %v6857_v22 = vld [vmem:[#allocation2 + $0x58] sm:$0xf0] }
 0x3da   :  { %3559 = vmatpush.bf16.msrb.mxu1 %v7068_v23  ;;  %3525 = vmatmul.bf16.vlgmr.msra.gmra.mxu2 %v10379_v53  ;;  %v8630_v23 = vld [vmem:[#allocation2 + $0x14c] sm:$0xf]  ;;  %v6860_v59 = vor.u32 %v8598_v62, %v6857_v22  ;;  %v6953_v5 = vld [vmem:[#allocation2 + $0x118] sm:$0xf0] }
 0x3db   :  { %3573 = vmatpush.bf16.msrb.mxu2 %v7196_v55  ;;  %3539 = vmatmul.bf16.vlgmr.msra.gmra.mxu3 %v10383_v43  ;;  %v7260_v55 = vor.u32 %v8698_v37, %v7257_v58  ;;  %v6988_v35 = vor.u32 %v8630_v23, %v6985_v24  ;;  %v7081_v16 = vld [vmem:[#allocation2 + $0x218] sm:$0xf0] }
 0x3dc   :  { %3587 = vmatpush.bf16.msrb.mxu3 %v7324_v6  ;;  %v8694_v6 = vld [vmem:[#allocation2 + $0x34c] sm:$0xf]  ;;  %v7209_v40 = vld [vmem:[#allocation2 + $0x318] sm:$0xf0]  ;;  %v7084_v46 = vor.u32 %v8654_v18, %v7081_v16 }
 0x3dd   :  { %3546 = vmatpush.bf16.msrb.mxu0 %v6924_v56  ;;  %v6841_v56 = vld [vmem:[#allocation2 + $0x38] sm:$0xf0] }
 0x3de   :  { %3560 = vmatpush.bf16.msrb.mxu1 %v7052_v3  ;;  %v8626_v3 = vld [vmem:[#allocation2 + $0x12c] sm:$0xf]  ;;  %v6844_v10 = vor.u32 %v8594_v12, %v6841_v56 }
 0x3df   :  { %3574 = vmatpush.bf16.msrb.mxu2 %v7180_v14  ;;  %v7244_v14 = vor.u32 %v8694_v6, %v7241_v63  ;;  %v6972_v28 = vor.u32 %v8626_v3, %v6969_v60 }
 0x3e0   :  { %3588 = vmatpush.bf16.msrb.mxu3 %v7308_v44  ;;  %v8690_v44 = vld [vmem:[#allocation2 + $0x32c] sm:$0xf] }
 0x3e1   :  { %3547 = vmatpush.bf16.msrb.mxu0 %v6908_v30  ;;  %v6825_v30 = vld [vmem:[#allocation2 + $0x18] sm:$0xf0] }
 0x3e2   :  { %3561 = vmatpush.bf16.msrb.mxu1 %v7036_v1  ;;  %v8622_v1 = vld [vmem:[#allocation2 + $0x10c] sm:$0xf]  ;;  %v6828_v27 = vor.u32 %v8590_v20, %v6825_v30 }
 0x3e3   :  { %3575 = vmatpush.bf16.msrb.mxu2 %v7164_v2  ;;  %v7228_v2 = vor.u32 %v8690_v44, %v7225_v17  ;;  %v6956_v45 = vor.u32 %v8622_v1, %v6953_v5 }
 0x3e4   :  { %3589 = vmatpush.bf16.msrb.mxu3 %v7292_v34  ;;  %v8686_v34 = vld [vmem:[#allocation2 + $0x30c] sm:$0xf] }
 0x3e5   :  { %3548 = vmatpush.bf16.msrb.mxu0 %v6892_v4  ;;  %v7212_v57 = vor.u32 %v8686_v34, %v7209_v40 }
 0x3e6   :  { %3562 = vmatpush.bf16.msrb.mxu1 %v7020_v36 }
 0x3e7   :  { %3576 = vmatpush.bf16.msrb.mxu2 %v7148_v26 }
 0x3e8   :  { %3590 = vmatpush.bf16.msrb.mxu3 %v7276_v31 }
 0x3e9   :  { %3549 = vmatpush.bf16.msrb.mxu0 %v6876_v11 }
 0x3ea   :  { %3563 = vmatpush.bf16.msrb.mxu1 %v7004_v13 }
 0x3eb   :  { %3577 = vmatpush.bf16.msrb.mxu2 %v7132_v39 }
 0x3ec   :  { %3591 = vmatpush.bf16.msrb.mxu3 %v7260_v55 }
 0x3ed   :  { %3550 = vmatpush.bf16.msrb.mxu0 %v6860_v59 }
 0x3ee   :  { %3564 = vmatpush.bf16.msrb.mxu1 %v6988_v35 }
 0x3ef   :  { %3578 = vmatpush.bf16.msrb.mxu2 %v7116_v21 }
 0x3f0   :  { %3592 = vmatpush.bf16.msrb.mxu3 %v7244_v14 }
 0x3f1   :  { %3551 = vmatpush.bf16.msrb.mxu0 %v6844_v10 }
 0x3f2   :  { %3565 = vmatpush.bf16.msrb.mxu1 %v6972_v28 }
 0x3f3   :  { %3579 = vmatpush.bf16.msrb.mxu2 %v7100_v29 }
 0x3f4   :  { %3593 = vmatpush.bf16.msrb.mxu3 %v7228_v2 }
 0x3f5   :  { %3552 = vmatpush.bf16.msrb.mxu0 %v6828_v27 }
 0x3f6   :  { %3566 = vmatpush.bf16.msrb.mxu1 %v6956_v45 }
 0x3f7   :  { %3580 = vmatpush.bf16.msrb.mxu2 %v7084_v46 }
 0x3f8   :  { %3594 = vmatpush.bf16.msrb.mxu3 %v7212_v57  ;;  %3553 = vmatmul.bf16.vlgmr.msrb.gmra.mxu0 %v10387_v9 }
 0x3f9   :  { %3567 = vmatmul.bf16.vlgmr.msrb.gmra.mxu1 %v10391_v33 }
 0x3fa   :  { %3581 = vmatmul.bf16.vlgmr.msrb.gmra.mxu2 %v10379_v53 }
 0x3fb   :  { %3595 = vmatmul.bf16.vlgmr.msrb.gmra.mxu3 %v10383_v43 }
 0x416   :  { %v3400_v36 = vpop.f32.mrf.mxu1 }
 0x419   :  { %v3386_v4 = vpop.f32.mrf.mxu0 }
 0x41a   :  { %v3401_v26 = vadd.f32 %v3400_v36, %v3386_v4 }
 0x41d   :  { %v3414_v19 = vpop.f32.mrf.mxu2 }
 0x41e   :  { %v3415_v8 = vadd.f32 %v3414_v19, %v3401_v26  ;;  %v3428_v50 = vpop.f32.mrf.mxu3  ;;  %v3402_v54 = vpop.f32.mrf.mxu1 }
 0x420   :  { %v3429_v31 = vadd.f32 %v3428_v50, %v3415_v8 }
 0x421   :  { %v3388_v41 = vpop.f32.mrf.mxu0 }
 0x422   :  { %v10410_v7 = vadd.f32 %v3429_v31, %v10352_v48  ;;  %v3403_v37 = vadd.f32 %v3402_v54, %v3388_v41 }
 0x425   :  { %v3416_v9 = vpop.f32.mrf.mxu2 }
 0x426   :  { %v3417_v58 = vadd.f32 %v3416_v9, %v3403_v37  ;;  %v3430_v33 = vpop.f32.mrf.mxu3 }
 0x428   :  { %v3431_v11 = vadd.f32 %v3430_v33, %v3417_v58 }
 0x42a   :  { %v10413_v53 = vadd.f32 %v3431_v11, %v10354_v51 }
 0x435   :  { %v3442_v43 = vpop.f32.mrf.mxu0 }
 0x436   :  { %v3456_v13 = vpop.f32.mrf.mxu1 }
 0x437   :  { %v3457_v39 = vadd.f32 %v3456_v13, %v3442_v43 }
 0x43d   :  { %v3470_v62 = vpop.f32.mrf.mxu2  ;;  %v3444_v24 = vpop.f32.mrf.mxu0 }
 0x43e   :  { %v3471_v22 = vadd.f32 %v3470_v62, %v3457_v39  ;;  %v3484_v23 = vpop.f32.mrf.mxu3  ;;  %v3458_v42 = vpop.f32.mrf.mxu1 }
 0x43f   :  { %v3459_v52 = vadd.f32 %v3458_v42, %v3444_v24 }
 0x440   :  { %v3485_v55 = vadd.f32 %v3484_v23, %v3471_v22 }
 0x442   :  { %v10416_v48 = vadd.f32 %v3485_v55, %v10358_v25 }
 0x445   :  { %v3472_v6 = vpop.f32.mrf.mxu2 }
 0x446   :  { %v3473_v63 = vadd.f32 %v3472_v6, %v3459_v52  ;;  %v3486_v59 = vpop.f32.mrf.mxu3 }
 0x448   :  { %v3487_v35 = vadd.f32 %v3486_v59, %v3473_v63 }
 0x44a   :  { %v10419_v51 = vadd.f32 %v3487_v35, %v10360_v15 }
 0x455   :  { %v3498_v21 = vpop.f32.mrf.mxu0 }
 0x456   :  { %v3512_v12 = vpop.f32.mrf.mxu1 }
 0x457   :  { %v3513_v56 = vadd.f32 %v3512_v12, %v3498_v21 }
 0x45d   :  { %v3526_v3 = vpop.f32.mrf.mxu2  ;;  %v3500_v38 = vpop.f32.mrf.mxu0 }
 0x45e   :  { %v3527_v14 = vadd.f32 %v3526_v3, %v3513_v56  ;;  %v3540_v60 = vpop.f32.mrf.mxu3  ;;  %v3514_v44 = vpop.f32.mrf.mxu1 }
 0x45f   :  { %v3515_v17 = vadd.f32 %v3514_v44, %v3500_v38 }
 0x460   :  { %v3541_v47 = vadd.f32 %v3540_v60, %v3527_v14 }
 0x462   :  { %v10422_v25 = vadd.f32 %v3541_v47, %v10364_v49 }
 0x465   :  { %v3528_v10 = vpop.f32.mrf.mxu2 }
 0x466   :  { %v3529_v28 = vadd.f32 %v3528_v10, %v3515_v17  ;;  %v3542_v29 = vpop.f32.mrf.mxu3 }
 0x468   :  { %v3543_v20 = vadd.f32 %v3542_v29, %v3529_v28 }
 0x46a   :  { %v10425_v15 = vadd.f32 %v3543_v20, %v10366_v61 }
 0x475   :  { %v3554_v30 = vpop.f32.mrf.mxu0 }
 0x476   :  { %v3568_v1 = vpop.f32.mrf.mxu1 }
 0x477   :  { %v3569_v2 = vadd.f32 %v3568_v1, %v3554_v30 }
 0x47d   :  { %v3582_v5 = vpop.f32.mrf.mxu2  ;;  %v3556_v40 = vpop.f32.mrf.mxu0 }
 0x47e   :  { %v3583_v18 = vadd.f32 %v3582_v5, %v3569_v2  ;;  %v3596_v16 = vpop.f32.mrf.mxu3  ;;  %v3570_v27 = vpop.f32.mrf.mxu1 }
 0x47f   :  { %v3571_v45 = vadd.f32 %v3570_v27, %v3556_v40 }
 0x480   :  { %v3597_v34 = vadd.f32 %v3596_v16, %v3583_v18 }
 0x482   :  { %v10428_v49 = vadd.f32 %v3597_v34, %v10368_v0 }
 0x485   :  { %v3584_v46 = vpop.f32.mrf.mxu2 }
 0x486   :  { %v3585_v57 = vadd.f32 %v3584_v46, %v3571_v45  ;;  %v3598_v4 = vpop.f32.mrf.mxu3 }
 0x488   :  { %v3599_v36 = vadd.f32 %v3598_v4, %v3585_v57 }
 0x48a   :  { %v10431_v61 = vadd.f32 %v3599_v36, %v10370_v32 }
 0x48b   :  { %9224 = dma.done.wait [#allocation3 + $0x1], 16384 }
 0x48c   :  { %9225 = vsyncadd [#allocation3 + $0x1], 4294950912  ;;  %v7439_v26 = vld [vmem:[#allocation2 + $0x4e0] sm:$0xf]  ;;  %v8747_v19 = vld [vmem:[#allocation2 + $0x4ec] sm:$0xf0] }
 0x48d   :  { %v7567_v8 = vld [vmem:[#allocation2 + $0x5e0] sm:$0xf]  ;;  %v7440_v50 = vor.u32 %v8747_v19, %v7439_v26  ;;  %v8779_v31 = vld [vmem:[#allocation2 + $0x5ec] sm:$0xf0]  ;;  %s10467_s4 = sld [smem:[#allocation4 + $0x1]] }
 0x48e   :  { %v7695_v41 = vld [vmem:[#allocation2 + $0x6e0] sm:$0xf]  ;;  %v8811_v54 = vld [vmem:[#allocation2 + $0x6ec] sm:$0xf0]  ;;  %v7568_v37 = vor.u32 %v8779_v31, %v7567_v8  ;;  %s8094_s19 = sld [smem:[#allocation4 + $0x2]] }
 0x48f   :  { %v7696_v0 = vor.u32 %v8811_v54, %v7695_v41  ;;  %v7823_v9 = vld [vmem:[#allocation2 + $0x7e0] sm:$0xf]  ;;  %v8843_v58 = vld [vmem:[#allocation2 + $0x7ec] sm:$0xf0]  ;;  %4383 = vmatpush.bf16.msra.mxu0 %v7440_v50  ;;  %s8223_s1 = sld [smem:[#allocation4 + $0x3]] }
 0x490   :  { %v7423_v33 = vld [vmem:[#allocation2 + $0x4c0] sm:$0xf]  ;;  %v7824_v11 = vor.u32 %v8843_v58, %v7823_v9  ;;  %v8743_v43 = vld [vmem:[#allocation2 + $0x4cc] sm:$0xf0]  ;;  %4397 = vmatpush.bf16.msra.mxu1 %v7568_v37  ;;  %s8288_s12 = sld [smem:[#allocation4 + $0x4]] }
 0x491   :  { %v7551_v13 = vld [vmem:[#allocation2 + $0x5c0] sm:$0xf]  ;;  %v8775_v32 = vld [vmem:[#allocation2 + $0x5cc] sm:$0xf0]  ;;  %4411 = vmatpush.bf16.msra.mxu2 %v7696_v0  ;;  %v7424_v39 = vor.u32 %v8743_v43, %v7423_v33  ;;  %s8321_s15 = sld [smem:[#allocation4 + $0x5]] }
 0x492   :  { %v7552_v62 = vor.u32 %v8775_v32, %v7551_v13  ;;  %v7679_v22 = vld [vmem:[#allocation2 + $0x6c0] sm:$0xf]  ;;  %v8807_v23 = vld [vmem:[#allocation2 + $0x6cc] sm:$0xf0]  ;;  %4425 = vmatpush.bf16.msra.mxu3 %v7824_v11 }
 0x493   :  { %v7807_v55 = vld [vmem:[#allocation2 + $0x7c0] sm:$0xf]  ;;  %v7680_v24 = vor.u32 %v8807_v23, %v7679_v22  ;;  %v8839_v42 = vld [vmem:[#allocation2 + $0x7cc] sm:$0xf0]  ;;  %4384 = vmatpush.bf16.msra.mxu0 %v7424_v39 }
 0x494   :  { %v7407_v52 = vld [vmem:[#allocation2 + $0x4a0] sm:$0xf]  ;;  %v8739_v6 = vld [vmem:[#allocation2 + $0x4ac] sm:$0xf0]  ;;  %v7808_v63 = vor.u32 %v8839_v42, %v7807_v55  ;;  %4398 = vmatpush.bf16.msra.mxu1 %v7552_v62 }
 0x495   :  { %v7535_v59 = vld [vmem:[#allocation2 + $0x5a0] sm:$0xf]  ;;  %v8771_v35 = vld [vmem:[#allocation2 + $0x5ac] sm:$0xf0]  ;;  %v7408_v12 = vor.u32 %v8739_v6, %v7407_v52  ;;  %4412 = vmatpush.bf16.msra.mxu2 %v7680_v24 }
 0x496   :  { %v7663_v21 = vld [vmem:[#allocation2 + $0x6a0] sm:$0xf]  ;;  %v8803_v56 = vld [vmem:[#allocation2 + $0x6ac] sm:$0xf0]  ;;  %v7536_v60 = vor.u32 %v8771_v35, %v7535_v59  ;;  %4426 = vmatpush.bf16.msra.mxu3 %v7808_v63 }
 0x497   :  { %v7791_v3 = vld [vmem:[#allocation2 + $0x7a0] sm:$0xf]  ;;  %v8835_v14 = vld [vmem:[#allocation2 + $0x7ac] sm:$0xf0]  ;;  %v7664_v47 = vor.u32 %v8803_v56, %v7663_v21  ;;  %4385 = vmatpush.bf16.msra.mxu0 %v7408_v12 }
 0x498   :  { %v7391_v38 = vld [vmem:[#allocation2 + $0x480] sm:$0xf]  ;;  %v8735_v44 = vld [vmem:[#allocation2 + $0x48c] sm:$0xf0]  ;;  %v7792_v10 = vor.u32 %v8835_v14, %v7791_v3  ;;  %4399 = vmatpush.bf16.msra.mxu1 %v7536_v60 }
 0x499   :  { %v7519_v17 = vld [vmem:[#allocation2 + $0x580] sm:$0xf]  ;;  %v8767_v28 = vld [vmem:[#allocation2 + $0x58c] sm:$0xf0]  ;;  %v7392_v2 = vor.u32 %v8735_v44, %v7391_v38  ;;  %4413 = vmatpush.bf16.msra.mxu2 %v7664_v47  ;;  %v8745_v44 = vld [vmem:[#allocation2 + $0x4e4] sm:$0xf] }
 0x49a   :  { %v7647_v29 = vld [vmem:[#allocation2 + $0x680] sm:$0xf]  ;;  %v8799_v20 = vld [vmem:[#allocation2 + $0x68c] sm:$0xf0]  ;;  %v7520_v5 = vor.u32 %v8767_v28, %v7519_v17  ;;  %4427 = vmatpush.bf16.msra.mxu3 %v7792_v10  ;;  %v7441_v17 = vld [vmem:[#allocation2 + $0x4f0] sm:$0xf0] }
 0x49b   :  { %v7775_v30 = vld [vmem:[#allocation2 + $0x780] sm:$0xf]  ;;  %v8831_v1 = vld [vmem:[#allocation2 + $0x78c] sm:$0xf0]  ;;  %v7648_v18 = vor.u32 %v8799_v20, %v7647_v29  ;;  %4386 = vmatpush.bf16.msra.mxu0 %v7392_v2  ;;  %v8777_v10 = vld [vmem:[#allocation2 + $0x5e4] sm:$0xf] }
 0x49c   :  { %v7375_v16 = vld [vmem:[#allocation2 + $0x460] sm:$0xf]  ;;  %v8731_v34 = vld [vmem:[#allocation2 + $0x46c] sm:$0xf0]  ;;  %v7776_v27 = vor.u32 %v8831_v1, %v7775_v30  ;;  %4400 = vmatpush.bf16.msra.mxu1 %v7520_v5  ;;  %v7569_v29 = vld [vmem:[#allocation2 + $0x5f0] sm:$0xf0] }
 0x49d   :  { %v7503_v40 = vld [vmem:[#allocation2 + $0x560] sm:$0xf]  ;;  %v8763_v45 = vld [vmem:[#allocation2 + $0x56c] sm:$0xf0]  ;;  %v7376_v26 = vor.u32 %v8731_v34, %v7375_v16  ;;  %4414 = vmatpush.bf16.msra.mxu2 %v7648_v18  ;;  %v8809_v20 = vld [vmem:[#allocation2 + $0x6e4] sm:$0xf]  ;;  %v7444_v34 = vor.u32 %v8745_v44, %v7441_v17 }
 0x49e   :  { %v7631_v46 = vld [vmem:[#allocation2 + $0x660] sm:$0xf]  ;;  %v8795_v57 = vld [vmem:[#allocation2 + $0x66c] sm:$0xf0]  ;;  %v7504_v19 = vor.u32 %v8763_v45, %v7503_v40  ;;  %4428 = vmatpush.bf16.msra.mxu3 %v7776_v27  ;;  %v7697_v30 = vld [vmem:[#allocation2 + $0x6f0] sm:$0xf0]  ;;  %v7572_v40 = vor.u32 %v8777_v10, %v7569_v29 }
 0x49f   :  { %v7759_v4 = vld [vmem:[#allocation2 + $0x760] sm:$0xf]  ;;  %v8827_v36 = vld [vmem:[#allocation2 + $0x76c] sm:$0xf0]  ;;  %v7632_v8 = vor.u32 %v8795_v57, %v7631_v46  ;;  %4387 = vmatpush.bf16.msra.mxu0 %v7376_v26  ;;  %v8841_v5 = vld [vmem:[#allocation2 + $0x7e4] sm:$0xf]  ;;  %v7700_v27 = vor.u32 %v8809_v20, %v7697_v30 }
 0x4a0   :  { %v7359_v50 = vld [vmem:[#allocation2 + $0x440] sm:$0xf]  ;;  %v8727_v31 = vld [vmem:[#allocation2 + $0x44c] sm:$0xf0]  ;;  %v7760_v54 = vor.u32 %v8827_v36, %v7759_v4  ;;  %4401 = vmatpush.bf16.msra.mxu1 %v7504_v19  ;;  %v7825_v18 = vld [vmem:[#allocation2 + $0x7f0] sm:$0xf0] }
 0x4a1   :  { %v7487_v41 = vld [vmem:[#allocation2 + $0x540] sm:$0xf]  ;;  %v8759_v37 = vld [vmem:[#allocation2 + $0x54c] sm:$0xf0]  ;;  %v7360_v11 = vor.u32 %v8727_v31, %v7359_v50  ;;  %4415 = vmatpush.bf16.msra.mxu2 %v7632_v8  ;;  %v8741_v45 = vld [vmem:[#allocation2 + $0x4c4] sm:$0xf]  ;;  %v7828_v4 = vor.u32 %v8841_v5, %v7825_v18 }
 0x4a2   :  { %v7615_v0 = vld [vmem:[#allocation2 + $0x640] sm:$0xf]  ;;  %v8791_v9 = vld [vmem:[#allocation2 + $0x64c] sm:$0xf0]  ;;  %v7488_v43 = vor.u32 %v8759_v37, %v7487_v41  ;;  %4429 = vmatpush.bf16.msra.mxu3 %v7760_v54  ;;  %v7425_v46 = vld [vmem:[#allocation2 + $0x4d0] sm:$0xf0] }
 0x4a3   :  { %v7743_v58 = vld [vmem:[#allocation2 + $0x740] sm:$0xf]  ;;  %v8823_v33 = vld [vmem:[#allocation2 + $0x74c] sm:$0xf0]  ;;  %v7616_v13 = vor.u32 %v8791_v9, %v7615_v0  ;;  %4388 = vmatpush.bf16.msra.mxu0 %v7360_v11  ;;  %v8773_v57 = vld [vmem:[#allocation2 + $0x5c4] sm:$0xf] }
 0x4a4   :  { %v7343_v32 = vld [vmem:[#allocation2 + $0x420] sm:$0xf]  ;;  %v8723_v39 = vld [vmem:[#allocation2 + $0x42c] sm:$0xf0]  ;;  %v7744_v22 = vor.u32 %v8823_v33, %v7743_v58  ;;  %4402 = vmatpush.bf16.msra.mxu1 %v7488_v43  ;;  %v7553_v8 = vld [vmem:[#allocation2 + $0x5d0] sm:$0xf0]  ;;  %v7428_v43 = vor.u32 %v8741_v45, %v7425_v46 }
 0x4a5   :  { %v7471_v62 = vld [vmem:[#allocation2 + $0x520] sm:$0xf]  ;;  %v8755_v23 = vld [vmem:[#allocation2 + $0x52c] sm:$0xf0]  ;;  %v7344_v6 = vor.u32 %v8723_v39, %v7343_v32  ;;  %4416 = vmatpush.bf16.msra.mxu2 %v7616_v13  ;;  %v8805_v50 = vld [vmem:[#allocation2 + $0x6c4] sm:$0xf] }
 0x4a6   :  { %v7599_v55 = vld [vmem:[#allocation2 + $0x620] sm:$0xf]  ;;  %v8787_v24 = vld [vmem:[#allocation2 + $0x62c] sm:$0xf0]  ;;  %v7472_v35 = vor.u32 %v8755_v23, %v7471_v62  ;;  %4430 = vmatpush.bf16.msra.mxu3 %v7744_v22  ;;  %v7681_v31 = vld [vmem:[#allocation2 + $0x6d0] sm:$0xf0]  ;;  %v7556_v62 = vor.u32 %v8773_v57, %v7553_v8 }
 0x4a7   :  { %v7727_v42 = vld [vmem:[#allocation2 + $0x720] sm:$0xf]  ;;  %v8819_v52 = vld [vmem:[#allocation2 + $0x72c] sm:$0xf0]  ;;  %v7600_v21 = vor.u32 %v8787_v24, %v7599_v55  ;;  %4389 = vmatpush.bf16.msra.mxu0 %v7344_v6  ;;  %v11039_v41 = vld [vmem:[#allocation43_spill] sm:$0xff]  ;;  %v7684_v22 = vor.u32 %v8805_v50, %v7681_v31 }
 0x4a8   :  { %v7327_v63 = vld [vmem:[#allocation2 + $0x400] sm:$0xf]  ;;  %v8719_v59 = vld [vmem:[#allocation2 + $0x40c] sm:$0xf0]  ;;  %v7728_v14 = vor.u32 %v8819_v52, %v7727_v42  ;;  %4403 = vmatpush.bf16.msra.mxu1 %v7472_v35  ;;  %v11040_v54 = vld [vmem:[#allocation47_spill] sm:$0xff] }
 0x4a9   :  { %v7455_v12 = vld [vmem:[#allocation2 + $0x500] sm:$0xf]  ;;  %v8751_v56 = vld [vmem:[#allocation2 + $0x50c] sm:$0xf0]  ;;  %v7328_v28 = vor.u32 %v8719_v59, %v7327_v63  ;;  %4417 = vmatpush.bf16.msra.mxu2 %v7600_v21  ;;  %v10439_v37 = vpack.c.bf16 %v11040_v54, %v11039_v41  ;;  %v8837_v0 = vld [vmem:[#allocation2 + $0x7c4] sm:$0xf] }
 0x4aa   :  { %v7583_v3 = vld [vmem:[#allocation2 + $0x600] sm:$0xf]  ;;  %v8783_v60 = vld [vmem:[#allocation2 + $0x60c] sm:$0xf0]  ;;  %v7456_v1 = vor.u32 %v8751_v56, %v7455_v12  ;;  %4431 = vmatpush.bf16.msra.mxu3 %v7728_v14  ;;  %v7809_v9 = vld [vmem:[#allocation2 + $0x7d0] sm:$0xf0] }
 0x4ab   :  { %v7711_v47 = vld [vmem:[#allocation2 + $0x700] sm:$0xf]  ;;  %v8815_v38 = vld [vmem:[#allocation2 + $0x70c] sm:$0xf0]  ;;  %v7584_v2 = vor.u32 %v8783_v60, %v7583_v3  ;;  %4390 = vmatpush.bf16.msra.mxu0 %v7328_v28  ;;  %v11043_v13 = vld [vmem:[#allocation41_spill] sm:$0xff]  ;;  %v7812_v42 = vor.u32 %v8837_v0, %v7809_v9 }
 0x4ac   :  { %v7712_v16 = vor.u32 %v8815_v38, %v7711_v47  ;;  %v11037_v36 = vld [vmem:[#allocation42_spill] sm:$0xff]  ;;  %4404 = vmatpush.bf16.msra.mxu1 %v7456_v1  ;;  %v11041_v58 = vld [vmem:[#allocation40_spill] sm:$0xff]  ;;  %v11044_v32 = vld [vmem:[#allocation45_spill] sm:$0xff] }
 0x4ad   :  { %v11038_v26 = vld [vmem:[#allocation46_spill] sm:$0xff]  ;;  %4418 = vmatpush.bf16.msra.mxu2 %v7584_v2  ;;  %v11042_v33 = vld [vmem:[#allocation44_spill] sm:$0xff]  ;;  %v10447_v39 = vpack.c.bf16 %v11044_v32, %v11043_v13  ;;  %v8737_v23 = vld [vmem:[#allocation2 + $0x4a4] sm:$0xf] }
 0x4ae   :  { %v10435_v19 = vpack.c.bf16 %v11038_v26, %v11037_v36  ;;  %v10443_v11 = vpack.c.bf16 %v11042_v33, %v11041_v58  ;;  %4432 = vmatpush.bf16.msra.mxu3 %v7712_v16  ;;  %v7409_v55 = vld [vmem:[#allocation2 + $0x4b0] sm:$0xf0]  ;;  %v8769_v24 = vld [vmem:[#allocation2 + $0x5a4] sm:$0xf] }
 0x4af   :  { %4439 = vmatpush.bf16.msrb.mxu0 %v7444_v34  ;;  %v7537_v52 = vld [vmem:[#allocation2 + $0x5b0] sm:$0xf0]  ;;  %v8801_v6 = vld [vmem:[#allocation2 + $0x6a4] sm:$0xf]  ;;  %4405 = vmatmul.bf16.vlgmr.msra.gmra.mxu1 %v10447_v39  ;;  %v7412_v21 = vor.u32 %v8737_v23, %v7409_v55 }
 0x4b0   :  { %4453 = vmatpush.bf16.msrb.mxu1 %v7572_v40  ;;  %4419 = vmatmul.bf16.vlgmr.msra.gmra.mxu2 %v10435_v19  ;;  %v7665_v63 = vld [vmem:[#allocation2 + $0x6b0] sm:$0xf0]  ;;  %v8833_v59 = vld [vmem:[#allocation2 + $0x7a4] sm:$0xf]  ;;  %v7540_v12 = vor.u32 %v8769_v24, %v7537_v52 }
 0x4b1   :  { %4467 = vmatpush.bf16.msrb.mxu2 %v7700_v27  ;;  %4433 = vmatmul.bf16.vlgmr.msra.gmra.mxu3 %v10439_v37  ;;  %v7793_v35 = vld [vmem:[#allocation2 + $0x7b0] sm:$0xf0]  ;;  %v7668_v56 = vor.u32 %v8801_v6, %v7665_v63  ;;  %v8733_v3 = vld [vmem:[#allocation2 + $0x484] sm:$0xf] }
 0x4b2   :  { %4481 = vmatpush.bf16.msrb.mxu3 %v7828_v4  ;;  %4391 = vmatmul.bf16.vlgmr.msra.gmra.mxu0 %v10443_v11  ;;  %v7393_v14 = vld [vmem:[#allocation2 + $0x490] sm:$0xf0]  ;;  %v8765_v60 = vld [vmem:[#allocation2 + $0x584] sm:$0xf]  ;;  %v7796_v47 = vor.u32 %v8833_v59, %v7793_v35 }
 0x4b3   :  { %4440 = vmatpush.bf16.msrb.mxu0 %v7428_v43  ;;  %v7521_v38 = vld [vmem:[#allocation2 + $0x590] sm:$0xf0]  ;;  %v8797_v44 = vld [vmem:[#allocation2 + $0x684] sm:$0xf]  ;;  %v7396_v29 = vor.u32 %v8733_v3, %v7393_v14 }
 0x4b4   :  { %4454 = vmatpush.bf16.msrb.mxu1 %v7556_v62  ;;  %v7649_v17 = vld [vmem:[#allocation2 + $0x690] sm:$0xf0]  ;;  %v8829_v10 = vld [vmem:[#allocation2 + $0x784] sm:$0xf]  ;;  %v7524_v20 = vor.u32 %v8765_v60, %v7521_v38 }
 0x4b5   :  { %4468 = vmatpush.bf16.msrb.mxu2 %v7684_v22  ;;  %v7777_v28 = vld [vmem:[#allocation2 + $0x790] sm:$0xf0]  ;;  %v7652_v30 = vor.u32 %v8797_v44, %v7649_v17  ;;  %v8729_v1 = vld [vmem:[#allocation2 + $0x464] sm:$0xf]  ;;  %v7447_v44 = vld [vmem:[#allocation2 + $0x4e8] sm:$0xf] }
 0x4b6   :  { %4482 = vmatpush.bf16.msrb.mxu3 %v7812_v42  ;;  %v7377_v2 = vld [vmem:[#allocation2 + $0x470] sm:$0xf0]  ;;  %v8761_v5 = vld [vmem:[#allocation2 + $0x564] sm:$0xf]  ;;  %v7780_v18 = vor.u32 %v8829_v10, %v7777_v28  ;;  %v8748_v17 = vld [vmem:[#allocation2 + $0x4f4] sm:$0xf0] }
 0x4b7   :  { %4441 = vmatpush.bf16.msrb.mxu0 %v7412_v21  ;;  %v7505_v16 = vld [vmem:[#allocation2 + $0x570] sm:$0xf0]  ;;  %v8793_v34 = vld [vmem:[#allocation2 + $0x664] sm:$0xf]  ;;  %v7380_v46 = vor.u32 %v8729_v1, %v7377_v2  ;;  %v7575_v10 = vld [vmem:[#allocation2 + $0x5e8] sm:$0xf] }
 0x4b8   :  { %4455 = vmatpush.bf16.msrb.mxu1 %v7540_v12  ;;  %v7633_v40 = vld [vmem:[#allocation2 + $0x670] sm:$0xf0]  ;;  %v8825_v27 = vld [vmem:[#allocation2 + $0x764] sm:$0xf]  ;;  %v7508_v57 = vor.u32 %v8761_v5, %v7505_v16  ;;  %v7831_v5 = vld [vmem:[#allocation2 + $0x7e8] sm:$0xf] }
 0x4b9   :  { %4469 = vmatpush.bf16.msrb.mxu2 %v7668_v56  ;;  %v7761_v45 = vld [vmem:[#allocation2 + $0x770] sm:$0xf0]  ;;  %v7636_v4 = vor.u32 %v8793_v34, %v7633_v40  ;;  %v8725_v36 = vld [vmem:[#allocation2 + $0x444] sm:$0xf]  ;;  %v7448_v34 = vor.u32 %v8748_v17, %v7447_v44  ;;  %v8732_v44 = vld [vmem:[#allocation2 + $0x474] sm:$0xf0] }
 0x4ba   :  { %4483 = vmatpush.bf16.msrb.mxu3 %v7796_v47  ;;  %v7361_v26 = vld [vmem:[#allocation2 + $0x450] sm:$0xf0]  ;;  %v8757_v8 = vld [vmem:[#allocation2 + $0x544] sm:$0xf]  ;;  %v7764_v50 = vor.u32 %v8825_v27, %v7761_v45  ;;  %v7431_v45 = vld [vmem:[#allocation2 + $0x4c8] sm:$0xf] }
 0x4bb   :  { %4442 = vmatpush.bf16.msrb.mxu0 %v7396_v29  ;;  %v7489_v31 = vld [vmem:[#allocation2 + $0x550] sm:$0xf0]  ;;  %v8789_v41 = vld [vmem:[#allocation2 + $0x644] sm:$0xf]  ;;  %v7364_v58 = vor.u32 %v8725_v36, %v7361_v26  ;;  %v8780_v29 = vld [vmem:[#allocation2 + $0x5f4] sm:$0xf0] }
 0x4bc   :  { %4456 = vmatpush.bf16.msrb.mxu1 %v7524_v20  ;;  %v7617_v54 = vld [vmem:[#allocation2 + $0x650] sm:$0xf0]  ;;  %v8821_v0 = vld [vmem:[#allocation2 + $0x744] sm:$0xf]  ;;  %v7492_v33 = vor.u32 %v8757_v8, %v7489_v31  ;;  %v7703_v20 = vld [vmem:[#allocation2 + $0x6e8] sm:$0xf]  ;;  %v7576_v40 = vor.u32 %v8780_v29, %v7575_v10 }
 0x4bd   :  { %4470 = vmatpush.bf16.msrb.mxu2 %v7652_v30  ;;  %v7745_v9 = vld [vmem:[#allocation2 + $0x750] sm:$0xf0]  ;;  %v7620_v43 = vor.u32 %v8789_v41, %v7617_v54  ;;  %v8721_v13 = vld [vmem:[#allocation2 + $0x424] sm:$0xf]  ;;  %v8812_v30 = vld [vmem:[#allocation2 + $0x6f4] sm:$0xf0] }
 0x4be   :  { %4484 = vmatpush.bf16.msrb.mxu3 %v7780_v18  ;;  %v7345_v32 = vld [vmem:[#allocation2 + $0x430] sm:$0xf0]  ;;  %v8753_v62 = vld [vmem:[#allocation2 + $0x524] sm:$0xf]  ;;  %v7748_v22 = vor.u32 %v8821_v0, %v7745_v9  ;;  %v8844_v18 = vld [vmem:[#allocation2 + $0x7f4] sm:$0xf0]  ;;  %v7704_v27 = vor.u32 %v8812_v30, %v7703_v20 }
 0x4bf   :  { %4443 = vmatpush.bf16.msrb.mxu0 %v7380_v46  ;;  %v7473_v23 = vld [vmem:[#allocation2 + $0x530] sm:$0xf0]  ;;  %v8785_v55 = vld [vmem:[#allocation2 + $0x624] sm:$0xf]  ;;  %v7348_v6 = vor.u32 %v8721_v13, %v7345_v32  ;;  %v8744_v46 = vld [vmem:[#allocation2 + $0x4d4] sm:$0xf0] }
 0x4c0   :  { %4457 = vmatpush.bf16.msrb.mxu1 %v7508_v57  ;;  %v7601_v24 = vld [vmem:[#allocation2 + $0x630] sm:$0xf0]  ;;  %v8817_v42 = vld [vmem:[#allocation2 + $0x724] sm:$0xf]  ;;  %v7476_v35 = vor.u32 %v8753_v62, %v7473_v23  ;;  %v7559_v57 = vld [vmem:[#allocation2 + $0x5c8] sm:$0xf]  ;;  %v7432_v41 = vor.u32 %v8744_v46, %v7431_v45 }
 0x4c1   :  { %4471 = vmatpush.bf16.msrb.mxu2 %v7636_v4  ;;  %v7729_v52 = vld [vmem:[#allocation2 + $0x730] sm:$0xf0]  ;;  %v8717_v63 = vld [vmem:[#allocation2 + $0x404] sm:$0xf]  ;;  %v7604_v21 = vor.u32 %v8785_v55, %v7601_v24  ;;  %v7832_v4 = vor.u32 %v8844_v18, %v7831_v5  ;;  %v8776_v36 = vld [vmem:[#allocation2 + $0x5d4] sm:$0xf0] }
 0x4c2   :  { %4485 = vmatpush.bf16.msrb.mxu3 %v7764_v50  ;;  %v7329_v59 = vld [vmem:[#allocation2 + $0x410] sm:$0xf0]  ;;  %v8749_v12 = vld [vmem:[#allocation2 + $0x504] sm:$0xf]  ;;  %v7732_v14 = vor.u32 %v8817_v42, %v7729_v52  ;;  %v7687_v26 = vld [vmem:[#allocation2 + $0x6c8] sm:$0xf]  ;;  %v7560_v54 = vor.u32 %v8776_v36, %v7559_v57 }
 0x4c3   :  { %4444 = vmatpush.bf16.msrb.mxu0 %v7364_v58  ;;  %v7457_v56 = vld [vmem:[#allocation2 + $0x510] sm:$0xf0]  ;;  %v8781_v3 = vld [vmem:[#allocation2 + $0x604] sm:$0xf]  ;;  %v7332_v28 = vor.u32 %v8717_v63, %v7329_v59  ;;  %v8808_v8 = vld [vmem:[#allocation2 + $0x6d4] sm:$0xf0] }
 0x4c4   :  { %4458 = vmatpush.bf16.msrb.mxu1 %v7492_v33  ;;  %v7585_v60 = vld [vmem:[#allocation2 + $0x610] sm:$0xf0]  ;;  %v8813_v47 = vld [vmem:[#allocation2 + $0x704] sm:$0xf]  ;;  %v7460_v1 = vor.u32 %v8749_v12, %v7457_v56  ;;  %v7815_v50 = vld [vmem:[#allocation2 + $0x7c8] sm:$0xf]  ;;  %v7688_v0 = vor.u32 %v8808_v8, %v7687_v26 }
 0x4c5   :  { %4472 = vmatpush.bf16.msrb.mxu2 %v7620_v43  ;;  %v7713_v38 = vld [vmem:[#allocation2 + $0x710] sm:$0xf0]  ;;  %v7588_v2 = vor.u32 %v8781_v3, %v7585_v60  ;;  %v8840_v31 = vld [vmem:[#allocation2 + $0x7d4] sm:$0xf0]  ;;  %v7415_v9 = vld [vmem:[#allocation2 + $0x4a8] sm:$0xf] }
 0x4c6   :  { %4486 = vmatpush.bf16.msrb.mxu3 %v7748_v22  ;;  %v7716_v16 = vor.u32 %v8813_v47, %v7713_v38  ;;  %v8740_v58 = vld [vmem:[#allocation2 + $0x4b4] sm:$0xf0]  ;;  %v7543_v33 = vld [vmem:[#allocation2 + $0x5a8] sm:$0xf]  ;;  %v7816_v43 = vor.u32 %v8840_v31, %v7815_v50 }
 0x4c7   :  { %4445 = vmatpush.bf16.msrb.mxu0 %v7348_v6  ;;  %v8772_v13 = vld [vmem:[#allocation2 + $0x5b4] sm:$0xf0]  ;;  %v7671_v32 = vld [vmem:[#allocation2 + $0x6a8] sm:$0xf]  ;;  %v7416_v55 = vor.u32 %v8740_v58, %v7415_v9 }
 0x4c8   :  { %4459 = vmatpush.bf16.msrb.mxu1 %v7476_v35  ;;  %v8804_v62 = vld [vmem:[#allocation2 + $0x6b4] sm:$0xf0]  ;;  %v7799_v22 = vld [vmem:[#allocation2 + $0x7a8] sm:$0xf]  ;;  %v7544_v24 = vor.u32 %v8772_v13, %v7543_v33 }
 0x4c9   :  { %4473 = vmatpush.bf16.msrb.mxu2 %v7604_v21  ;;  %v8836_v23 = vld [vmem:[#allocation2 + $0x7b4] sm:$0xf0]  ;;  %v7672_v42 = vor.u32 %v8804_v62, %v7671_v32  ;;  %v7399_v52 = vld [vmem:[#allocation2 + $0x488] sm:$0xf] }
 0x4ca   :  { %4487 = vmatpush.bf16.msrb.mxu3 %v7732_v14  ;;  %v8736_v6 = vld [vmem:[#allocation2 + $0x494] sm:$0xf0]  ;;  %v7527_v63 = vld [vmem:[#allocation2 + $0x588] sm:$0xf]  ;;  %v7800_v59 = vor.u32 %v8836_v23, %v7799_v22 }
 0x4cb   :  { %4446 = vmatpush.bf16.msrb.mxu0 %v7332_v28  ;;  %v8768_v35 = vld [vmem:[#allocation2 + $0x594] sm:$0xf0]  ;;  %v7655_v21 = vld [vmem:[#allocation2 + $0x688] sm:$0xf]  ;;  %v7400_v14 = vor.u32 %v8736_v6, %v7399_v52 }
 0x4cc   :  { %4460 = vmatpush.bf16.msrb.mxu1 %v7460_v1  ;;  %v8800_v12 = vld [vmem:[#allocation2 + $0x694] sm:$0xf0]  ;;  %v7783_v56 = vld [vmem:[#allocation2 + $0x788] sm:$0xf]  ;;  %v7528_v60 = vor.u32 %v8768_v35, %v7527_v63 }
 0x4cd   :  { %4474 = vmatpush.bf16.msrb.mxu2 %v7588_v2  ;;  %v8832_v3 = vld [vmem:[#allocation2 + $0x794] sm:$0xf0]  ;;  %v7656_v47 = vor.u32 %v8800_v12, %v7655_v21  ;;  %v7383_v38 = vld [vmem:[#allocation2 + $0x468] sm:$0xf]  ;;  %v8746_v21 = vld [vmem:[#allocation2 + $0x4ec] sm:$0xf] }
 0x4ce   :  { %4488 = vmatpush.bf16.msrb.mxu3 %v7716_v16  ;;  %4447 = vmatmul.bf16.vlgmr.msrb.gmra.mxu0 %v10443_v11  ;;  %v7511_v17 = vld [vmem:[#allocation2 + $0x568] sm:$0xf]  ;;  %v7784_v10 = vor.u32 %v8832_v3, %v7783_v56  ;;  %v8764_v28 = vld [vmem:[#allocation2 + $0x574] sm:$0xf0]  ;;  %v7384_v2 = vor.u32 %v8732_v44, %v7383_v38  ;;  %v7449_v12 = vld [vmem:[#allocation2 + $0x4f8] sm:$0xf0] }
 0x4cf   :  { %4495 = vmatpush.bf16.msra.mxu0 %v7448_v34  ;;  %4461 = vmatmul.bf16.vlgmr.msrb.gmra.mxu1 %v10447_v39  ;;  %v7639_v29 = vld [vmem:[#allocation2 + $0x668] sm:$0xf]  ;;  %v8796_v20 = vld [vmem:[#allocation2 + $0x674] sm:$0xf0]  ;;  %v7512_v18 = vor.u32 %v8764_v28, %v7511_v17  ;;  %v8778_v56 = vld [vmem:[#allocation2 + $0x5ec] sm:$0xf] }
 0x4d0   :  { %4509 = vmatpush.bf16.msra.mxu1 %v7576_v40  ;;  %4475 = vmatmul.bf16.vlgmr.msrb.gmra.mxu2 %v10435_v19  ;;  %v7767_v30 = vld [vmem:[#allocation2 + $0x768] sm:$0xf]  ;;  %v8828_v1 = vld [vmem:[#allocation2 + $0x774] sm:$0xf0]  ;;  %v7640_v16 = vor.u32 %v8796_v20, %v7639_v29  ;;  %v8842_v17 = vld [vmem:[#allocation2 + $0x7ec] sm:$0xf]  ;;  %v7452_v29 = vor.u32 %v8746_v21, %v7449_v12 }
 0x4d1   :  { %4523 = vmatpush.bf16.msra.mxu2 %v7704_v27  ;;  %4489 = vmatmul.bf16.vlgmr.msrb.gmra.mxu3 %v10439_v37  ;;  %v7367_v5 = vld [vmem:[#allocation2 + $0x448] sm:$0xf]  ;;  %v8728_v34 = vld [vmem:[#allocation2 + $0x454] sm:$0xf0]  ;;  %v7768_v45 = vor.u32 %v8828_v1, %v7767_v30  ;;  %v8742_v1 = vld [vmem:[#allocation2 + $0x4cc] sm:$0xf] }
 0x4d2   :  { %4537 = vmatpush.bf16.msra.mxu3 %v7832_v4  ;;  %v7495_v40 = vld [vmem:[#allocation2 + $0x548] sm:$0xf]  ;;  %v8760_v27 = vld [vmem:[#allocation2 + $0x554] sm:$0xf0]  ;;  %v7368_v26 = vor.u32 %v8728_v34, %v7367_v5  ;;  %v8774_v5 = vld [vmem:[#allocation2 + $0x5cc] sm:$0xf] }
 0x4d3   :  { %4496 = vmatpush.bf16.msra.mxu0 %v7432_v41  ;;  %v7623_v46 = vld [vmem:[#allocation2 + $0x648] sm:$0xf]  ;;  %v8792_v57 = vld [vmem:[#allocation2 + $0x654] sm:$0xf0]  ;;  %v7496_v8 = vor.u32 %v8760_v27, %v7495_v40  ;;  %v8806_v34 = vld [vmem:[#allocation2 + $0x6cc] sm:$0xf] }
 0x4d4   :  { %4510 = vmatpush.bf16.msra.mxu1 %v7560_v54  ;;  %v7751_v4 = vld [vmem:[#allocation2 + $0x748] sm:$0xf]  ;;  %v8824_v36 = vld [vmem:[#allocation2 + $0x754] sm:$0xf0]  ;;  %v7624_v50 = vor.u32 %v8792_v57, %v7623_v46  ;;  %v7689_v40 = vld [vmem:[#allocation2 + $0x6d8] sm:$0xf0] }
 0x4d5   :  { %4524 = vmatpush.bf16.msra.mxu2 %v7688_v0  ;;  %v7351_v31 = vld [vmem:[#allocation2 + $0x428] sm:$0xf]  ;;  %v8724_v41 = vld [vmem:[#allocation2 + $0x434] sm:$0xf0]  ;;  %v7752_v0 = vor.u32 %v8824_v36, %v7751_v4  ;;  %v8838_v27 = vld [vmem:[#allocation2 + $0x7cc] sm:$0xf]  ;;  %v7692_v4 = vor.u32 %v8806_v34, %v7689_v40 }
 0x4d6   :  { %4538 = vmatpush.bf16.msra.mxu3 %v7816_v43  ;;  %v7479_v54 = vld [vmem:[#allocation2 + $0x528] sm:$0xf]  ;;  %v8756_v9 = vld [vmem:[#allocation2 + $0x534] sm:$0xf0]  ;;  %v7352_v32 = vor.u32 %v8724_v41, %v7351_v31  ;;  %v8738_v36 = vld [vmem:[#allocation2 + $0x4ac] sm:$0xf] }
 0x4d7   :  { %4497 = vmatpush.bf16.msra.mxu0 %v7416_v55  ;;  %v7607_v58 = vld [vmem:[#allocation2 + $0x628] sm:$0xf]  ;;  %v8788_v33 = vld [vmem:[#allocation2 + $0x634] sm:$0xf0]  ;;  %v7480_v23 = vor.u32 %v8756_v9, %v7479_v54  ;;  %v7545_v31 = vld [vmem:[#allocation2 + $0x5b8] sm:$0xf0] }
 0x4d8   :  { %4511 = vmatpush.bf16.msra.mxu1 %v7544_v24  ;;  %v7735_v43 = vld [vmem:[#allocation2 + $0x728] sm:$0xf]  ;;  %v8820_v13 = vld [vmem:[#allocation2 + $0x734] sm:$0xf0]  ;;  %v7608_v55 = vor.u32 %v8788_v33, %v7607_v58  ;;  %v8802_v41 = vld [vmem:[#allocation2 + $0x6ac] sm:$0xf] }
 0x4d9   :  { %4525 = vmatpush.bf16.msra.mxu2 %v7672_v42  ;;  %v7335_v62 = vld [vmem:[#allocation2 + $0x408] sm:$0xf]  ;;  %v8720_v22 = vld [vmem:[#allocation2 + $0x414] sm:$0xf0]  ;;  %v7736_v6 = vor.u32 %v8820_v13, %v7735_v43  ;;  %v7673_v54 = vld [vmem:[#allocation2 + $0x6b8] sm:$0xf0] }
 0x4da   :  { %4539 = vmatpush.bf16.msra.mxu3 %v7800_v59  ;;  %v7463_v24 = vld [vmem:[#allocation2 + $0x508] sm:$0xf]  ;;  %v8752_v42 = vld [vmem:[#allocation2 + $0x514] sm:$0xf0]  ;;  %v7336_v3 = vor.u32 %v8720_v22, %v7335_v62  ;;  %v7801_v9 = vld [vmem:[#allocation2 + $0x7b8] sm:$0xf0]  ;;  %v7676_v43 = vor.u32 %v8802_v41, %v7673_v54 }
 0x4db   :  { %4498 = vmatpush.bf16.msra.mxu0 %v7400_v14  ;;  %v7591_v52 = vld [vmem:[#allocation2 + $0x608] sm:$0xf]  ;;  %v8784_v63 = vld [vmem:[#allocation2 + $0x614] sm:$0xf0]  ;;  %v7577_v14 = vld [vmem:[#allocation2 + $0x5f8] sm:$0xf0]  ;;  %v7464_v38 = vor.u32 %v8752_v42, %v7463_v24 }
 0x4dc   :  { %4512 = vmatpush.bf16.msra.mxu1 %v7528_v60  ;;  %v7719_v59 = vld [vmem:[#allocation2 + $0x708] sm:$0xf]  ;;  %v8816_v35 = vld [vmem:[#allocation2 + $0x714] sm:$0xf0]  ;;  %v8810_v60 = vld [vmem:[#allocation2 + $0x6ec] sm:$0xf]  ;;  %v7592_v44 = vor.u32 %v8784_v63, %v7591_v52  ;;  %v7580_v20 = vor.u32 %v8778_v56, %v7577_v14 }
 0x4dd   :  { %4526 = vmatpush.bf16.msra.mxu2 %v7656_v47  ;;  %v7705_v47 = vld [vmem:[#allocation2 + $0x6f8] sm:$0xf0]  ;;  %v7720_v28 = vor.u32 %v8816_v35, %v7719_v59  ;;  %v8734_v13 = vld [vmem:[#allocation2 + $0x48c] sm:$0xf] }
 0x4de   :  { %4540 = vmatpush.bf16.msra.mxu3 %v7784_v10  ;;  %v7833_v10 = vld [vmem:[#allocation2 + $0x7f8] sm:$0xf0]  ;;  %v7708_v30 = vor.u32 %v8810_v60, %v7705_v47  ;;  %v8766_v62 = vld [vmem:[#allocation2 + $0x58c] sm:$0xf] }
 0x4df   :  { %4499 = vmatpush.bf16.msra.mxu0 %v7384_v2  ;;  %v7433_v2 = vld [vmem:[#allocation2 + $0x4d8] sm:$0xf0]  ;;  %v8830_v42 = vld [vmem:[#allocation2 + $0x78c] sm:$0xf] }
 0x4e0   :  { %4513 = vmatpush.bf16.msra.mxu1 %v7512_v18  ;;  %v7836_v18 = vor.u32 %v8842_v17, %v7833_v10  ;;  %v7436_v46 = vor.u32 %v8742_v1, %v7433_v2  ;;  %v7657_v24 = vld [vmem:[#allocation2 + $0x698] sm:$0xf0]  ;;  %v8730_v35 = vld [vmem:[#allocation2 + $0x46c] sm:$0xf] }
 0x4e1   :  { %4527 = vmatpush.bf16.msra.mxu2 %v7640_v16  ;;  %v7561_v16 = vld [vmem:[#allocation2 + $0x5d8] sm:$0xf0]  ;;  %v8762_v12 = vld [vmem:[#allocation2 + $0x56c] sm:$0xf] }
 0x4e2   :  { %4541 = vmatpush.bf16.msra.mxu3 %v7768_v45  ;;  %v7817_v45 = vld [vmem:[#allocation2 + $0x7d8] sm:$0xf0]  ;;  %v7564_v57 = vor.u32 %v8774_v5, %v7561_v16  ;;  %v8794_v14 = vld [vmem:[#allocation2 + $0x66c] sm:$0xf] }
 0x4e3   :  { %4500 = vmatpush.bf16.msra.mxu0 %v7368_v26  ;;  %v7417_v26 = vld [vmem:[#allocation2 + $0x4b8] sm:$0xf0]  ;;  %v8826_v47 = vld [vmem:[#allocation2 + $0x76c] sm:$0xf] }
 0x4e4   :  { %4514 = vmatpush.bf16.msra.mxu1 %v7496_v8  ;;  %v8770_v8 = vld [vmem:[#allocation2 + $0x5ac] sm:$0xf]  ;;  %v7420_v58 = vor.u32 %v8738_v36, %v7417_v26  ;;  %v7785_v52 = vld [vmem:[#allocation2 + $0x798] sm:$0xf0] }
 0x4e5   :  { %4528 = vmatpush.bf16.msra.mxu2 %v7624_v50  ;;  %v7820_v50 = vor.u32 %v8838_v27, %v7817_v45  ;;  %v7548_v33 = vor.u32 %v8770_v8, %v7545_v31  ;;  %v7385_v21 = vld [vmem:[#allocation2 + $0x478] sm:$0xf0]  ;;  %v7788_v56 = vor.u32 %v8830_v42, %v7785_v52  ;;  %v8790_v2 = vld [vmem:[#allocation2 + $0x64c] sm:$0xf] }
 0x4e6   :  { %4542 = vmatpush.bf16.msra.mxu3 %v7752_v0  ;;  %v8834_v0 = vld [vmem:[#allocation2 + $0x7ac] sm:$0xf]  ;;  %v7641_v60 = vld [vmem:[#allocation2 + $0x678] sm:$0xf0] }
 0x4e7   :  { %4501 = vmatpush.bf16.msra.mxu0 %v7352_v32  ;;  %v7401_v32 = vld [vmem:[#allocation2 + $0x498] sm:$0xf0]  ;;  %v7804_v22 = vor.u32 %v8834_v0, %v7801_v9  ;;  %v7644_v10 = vor.u32 %v8794_v14, %v7641_v60  ;;  %v8722_v45 = vld [vmem:[#allocation2 + $0x42c] sm:$0xf] }
 0x4e8   :  { %4515 = vmatpush.bf16.msra.mxu1 %v7480_v23  ;;  %v7529_v23 = vld [vmem:[#allocation2 + $0x598] sm:$0xf0]  ;;  %v8786_v26 = vld [vmem:[#allocation2 + $0x62c] sm:$0xf] }
 0x4e9   :  { %4529 = vmatpush.bf16.msra.mxu2 %v7608_v55  ;;  %v8798_v55 = vld [vmem:[#allocation2 + $0x68c] sm:$0xf]  ;;  %v7532_v63 = vor.u32 %v8766_v62, %v7529_v23  ;;  %v7497_v1 = vld [vmem:[#allocation2 + $0x558] sm:$0xf0] }
 0x4ea   :  { %4543 = vmatpush.bf16.msra.mxu3 %v7736_v6  ;;  %v7404_v6 = vor.u32 %v8734_v13, %v7401_v32  ;;  %v7660_v59 = vor.u32 %v8798_v55, %v7657_v24  ;;  %v7625_v5 = vld [vmem:[#allocation2 + $0x658] sm:$0xf0]  ;;  %v8718_v54 = vld [vmem:[#allocation2 + $0x40c] sm:$0xf]  ;;  %v8860_v24 = vld [vmem:[#allocation10 + $0x74] sm:$0xf0] }
 0x4eb   :  { %4502 = vmatpush.bf16.msra.mxu0 %v7336_v3  ;;  %v7513_v3 = vld [vmem:[#allocation2 + $0x578] sm:$0xf0]  ;;  %v7628_v27 = vor.u32 %v8790_v2, %v7625_v5  ;;  %v8782_v32 = vld [vmem:[#allocation2 + $0x60c] sm:$0xf]  ;;  %v8846_v5 = vld [vmem:[#allocation10 + $0x4] sm:$0xf0] }
 0x4ec   :  { %4516 = vmatpush.bf16.msra.mxu1 %v7464_v38  ;;  %v7769_v38 = vld [vmem:[#allocation2 + $0x778] sm:$0xf0]  ;;  %v7516_v17 = vor.u32 %v8762_v12, %v7513_v3  ;;  %v7896_v55 = vld [vmem:[#allocation10 + $0x70] sm:$0xf]  ;;  %v8856_v3 = vld [vmem:[#allocation10 + $0x54] sm:$0xf0] }
 0x4ed   :  { %4530 = vmatpush.bf16.msra.mxu2 %v7592_v44  ;;  %v7388_v44 = vor.u32 %v8730_v35, %v7385_v21  ;;  %v7753_v16 = vld [vmem:[#allocation2 + $0x758] sm:$0xf0]  ;;  %v8858_v21 = vld [vmem:[#allocation10 + $0x64] sm:$0xf0] }
 0x4ee   :  { %4544 = vmatpush.bf16.msra.mxu3 %v7720_v28  ;;  %4503 = vmatmul.bf16.vlgmr.msra.gmra.mxu0 %v10443_v11  ;;  %v8726_v28 = vld [vmem:[#allocation2 + $0x44c] sm:$0xf]  ;;  %v7481_v36 = vld [vmem:[#allocation2 + $0x538] sm:$0xf0] }
 0x4ef   :  { %4551 = vmatpush.bf16.msrb.mxu0 %v7452_v29  ;;  %4517 = vmatmul.bf16.vlgmr.msra.gmra.mxu1 %v10447_v39  ;;  %v7369_v29 = vld [vmem:[#allocation2 + $0x458] sm:$0xf0] }
 0x4f0   :  { %4565 = vmatpush.bf16.msrb.mxu1 %v7580_v20  ;;  %4531 = vmatmul.bf16.vlgmr.msra.gmra.mxu2 %v10435_v19  ;;  %v8758_v20 = vld [vmem:[#allocation2 + $0x54c] sm:$0xf]  ;;  %v7372_v34 = vor.u32 %v8726_v28, %v7369_v29  ;;  %v7609_v8 = vld [vmem:[#allocation2 + $0x638] sm:$0xf0] }
 0x4f1   :  { %4579 = vmatpush.bf16.msrb.mxu2 %v7708_v30  ;;  %4545 = vmatmul.bf16.vlgmr.msra.gmra.mxu3 %v10439_v37  ;;  %v7772_v30 = vor.u32 %v8826_v47, %v7769_v38  ;;  %v7500_v40 = vor.u32 %v8758_v20, %v7497_v1  ;;  %v7737_v31 = vld [vmem:[#allocation2 + $0x738] sm:$0xf0]  ;;  %v7612_v9 = vor.u32 %v8786_v26, %v7609_v8  ;;  %v8854_v47 = vld [vmem:[#allocation10 + $0x44] sm:$0xf0]  ;;  %v7848_v20 = vld [vmem:[#allocation10 + $0x10] sm:$0xf] }
 0x4f2   :  { %4593 = vmatpush.bf16.msrb.mxu3 %v7836_v18  ;;  %v8822_v18 = vld [vmem:[#allocation2 + $0x74c] sm:$0xf]  ;;  %v7593_v62 = vld [vmem:[#allocation2 + $0x618] sm:$0xf0]  ;;  %v8872_v26 = vld [vmem:[#allocation10 + $0xd4] sm:$0xf0] }
 0x4f3   :  { %4552 = vmatpush.bf16.msrb.mxu0 %v7436_v46  ;;  %v7353_v46 = vld [vmem:[#allocation2 + $0x438] sm:$0xf0] }
 0x4f4   :  { %4566 = vmatpush.bf16.msrb.mxu1 %v7564_v57  ;;  %v8754_v57 = vld [vmem:[#allocation2 + $0x52c] sm:$0xf]  ;;  %v7356_v41 = vor.u32 %v8722_v45, %v7353_v46  ;;  %v7721_v23 = vld [vmem:[#allocation2 + $0x718] sm:$0xf0] }
 0x4f5   :  { %4580 = vmatpush.bf16.msrb.mxu2 %v7692_v4  ;;  %v7756_v4 = vor.u32 %v8822_v18, %v7753_v16  ;;  %v7484_v0 = vor.u32 %v8754_v57, %v7481_v36  ;;  %v7888_v35 = vld [vmem:[#allocation10 + $0x60] sm:$0xf]  ;;  %v8859_v18 = vld [vmem:[#allocation10 + $0x74] sm:$0xf]  ;;  %v7898_v16 = vld [vmem:[#allocation10 + $0x78] sm:$0xf0] }
 0x4f6   :  { %4594 = vmatpush.bf16.msrb.mxu3 %v7820_v50  ;;  %v8818_v50 = vld [vmem:[#allocation2 + $0x72c] sm:$0xf]  ;;  %v7889_v12 = vor.u32 %v8858_v21, %v7888_v35  ;;  %v7872_v60 = vld [vmem:[#allocation10 + $0x40] sm:$0xf]  ;;  %v7901_v46 = vor.u32 %v8859_v18, %v7898_v16  ;;  %v8857_v57 = vld [vmem:[#allocation10 + $0x64] sm:$0xf] }
 0x4f7   :  { %4553 = vmatpush.bf16.msrb.mxu0 %v7420_v58  ;;  %v7337_v58 = vld [vmem:[#allocation2 + $0x418] sm:$0xf0]  ;;  %v7740_v13 = vor.u32 %v8818_v50, %v7737_v31  ;;  %v7873_v38 = vor.u32 %v8854_v47, %v7872_v60  ;;  %v7944_v36 = vld [vmem:[#allocation10 + $0xd0] sm:$0xf]  ;;  %v8855_v31 = vld [vmem:[#allocation10 + $0x54] sm:$0xf] }
 0x4f8   :  { %4567 = vmatpush.bf16.msrb.mxu1 %v7548_v33  ;;  %v8750_v33 = vld [vmem:[#allocation2 + $0x50c] sm:$0xf]  ;;  %v7340_v42 = vor.u32 %v8718_v54, %v7337_v58  ;;  %v7856_v28 = vld [vmem:[#allocation10 + $0x20] sm:$0xf]  ;;  %v7945_v8 = vor.u32 %v8872_v26, %v7944_v36  ;;  %v8849_v21 = vld [vmem:[#allocation10 + $0x24] sm:$0xf] }
 0x4f9   :  { %4581 = vmatpush.bf16.msrb.mxu2 %v7676_v43  ;;  %v7465_v43 = vld [vmem:[#allocation2 + $0x518] sm:$0xf0]  ;;  %v8892_v18 = vld [vmem:[#allocation10 + $0x174] sm:$0xf0] }
 0x4fa   :  { %4595 = vmatpush.bf16.msrb.mxu3 %v7804_v22  ;;  %v8814_v22 = vld [vmem:[#allocation2 + $0x70c] sm:$0xf]  ;;  %v7468_v52 = vor.u32 %v8750_v33, %v7465_v43  ;;  %v7840_v2 = vld [vmem:[#allocation10] sm:$0xf]  ;;  %v8868_v43 = vld [vmem:[#allocation10 + $0xb4] sm:$0xf0] }
 0x4fb   :  { %4554 = vmatpush.bf16.msrb.mxu0 %v7404_v6  ;;  %v7596_v6 = vor.u32 %v8782_v32, %v7593_v62  ;;  %v7936_v54 = vld [vmem:[#allocation10 + $0xc0] sm:$0xf]  ;;  %v7928_v33 = vld [vmem:[#allocation10 + $0xb0] sm:$0xf]  ;;  %v7874_v32 = vld [vmem:[#allocation10 + $0x48] sm:$0xf0] }
 0x4fc   :  { %4568 = vmatpush.bf16.msrb.mxu1 %v7532_v63  ;;  %v7724_v63 = vor.u32 %v8814_v22, %v7721_v23  ;;  %v7929_v62 = vor.u32 %v8868_v43, %v7928_v33  ;;  %v8851_v23 = vld [vmem:[#allocation10 + $0x34] sm:$0xf] }
 0x4fd   :  { %4582 = vmatpush.bf16.msrb.mxu2 %v7660_v59  ;;  %v7897_v59 = vor.u32 %v8860_v24, %v7896_v55  ;;  %v7866_v24 = vld [vmem:[#allocation10 + $0x38] sm:$0xf0] }
 0x4fe   :  { %4596 = vmatpush.bf16.msrb.mxu3 %v7788_v56  ;;  %v7880_v56 = vld [vmem:[#allocation10 + $0x50] sm:$0xf]  ;;  %v7869_v35 = vor.u32 %v8851_v23, %v7866_v24 }
 0x4ff   :  { %4555 = vmatpush.bf16.msrb.mxu0 %v7388_v44  ;;  %v7881_v14 = vor.u32 %v8856_v3, %v7880_v56  ;;  %v7864_v44 = vld [vmem:[#allocation10 + $0x30] sm:$0xf] }
 0x500   :  { %4569 = vmatpush.bf16.msrb.mxu1 %v7516_v17  ;;  %v8852_v17 = vld [vmem:[#allocation10 + $0x34] sm:$0xf0]  ;;  %v7912_v3 = vld [vmem:[#allocation10 + $0x90] sm:$0xf] }
 0x501   :  { %4583 = vmatpush.bf16.msrb.mxu2 %v7644_v10  ;;  %v7865_v10 = vor.u32 %v8852_v17, %v7864_v44  ;;  %v10465_v44 = vld [vmem:[#allocation7 + $0x10] sm:$0xf] }
 0x502   :  { %4597 = vmatpush.bf16.msrb.mxu3 %v7772_v30  ;;  %v7960_v30 = vld [vmem:[#allocation10 + $0xf0] sm:$0xf] }
 0x503   :  { %4556 = vmatpush.bf16.msrb.mxu0 %v7372_v34  ;;  %v7952_v34 = vld [vmem:[#allocation10 + $0xe0] sm:$0xf] }
 0x504   :  { %4570 = vmatpush.bf16.msrb.mxu1 %v7500_v40  ;;  %v8874_v40 = vld [vmem:[#allocation10 + $0xe4] sm:$0xf0] }
 0x505   :  { %4584 = vmatpush.bf16.msrb.mxu2 %v7628_v27  ;;  %v7841_v27 = vor.u32 %v8846_v5, %v7840_v2  ;;  %v7953_v45 = vor.u32 %v8874_v40, %v7952_v34  ;;  %v8024_v5 = vld [vmem:[#allocation10 + $0x170] sm:$0xf]  ;;  %v8875_v40 = vld [vmem:[#allocation10 + $0xf4] sm:$0xf] }
 0x506   :  { %4598 = vmatpush.bf16.msrb.mxu3 %v7756_v4  ;;  %v7890_v4 = vld [vmem:[#allocation10 + $0x68] sm:$0xf0]  ;;  %v8025_v34 = vor.u32 %v8892_v18, %v8024_v5  ;;  %v8880_v5 = vld [vmem:[#allocation10 + $0x114] sm:$0xf0]  ;;  %v8863_v18 = vld [vmem:[#allocation10 + $0x94] sm:$0xf] }
 0x507   :  { %4557 = vmatpush.bf16.msrb.mxu0 %v7356_v41  ;;  %v7893_v50 = vor.u32 %v8857_v57, %v7890_v4  ;;  %v7882_v41 = vld [vmem:[#allocation10 + $0x58] sm:$0xf0] }
 0x508   :  { %4571 = vmatpush.bf16.msrb.mxu1 %v7484_v0  ;;  %v8870_v0 = vld [vmem:[#allocation10 + $0xc4] sm:$0xf0]  ;;  %v7885_v58 = vor.u32 %v8855_v31, %v7882_v41  ;;  %v10472_v31 = vstv %s10467_s4 }
 0x509   :  { %4585 = vmatpush.bf16.msrb.mxu2 %v7612_v9  ;;  %v7937_v9 = vor.u32 %v8870_v0, %v7936_v54  ;;  %v8873_v0 = vld [vmem:[#allocation10 + $0xe4] sm:$0xf] }
 0x50a   :  { %4599 = vmatpush.bf16.msrb.mxu3 %v7740_v13  ;;  %v8853_v13 = vld [vmem:[#allocation10 + $0x44] sm:$0xf] }
 0x50b   :  { %4558 = vmatpush.bf16.msrb.mxu0 %v7340_v42  ;;  %v7877_v22 = vor.u32 %v8853_v13, %v7874_v32  ;;  %v7920_v42 = vld [vmem:[#allocation10 + $0xa0] sm:$0xf]  ;;  %v8008_v32 = vld [vmem:[#allocation10 + $0x150] sm:$0xf] }
 0x50c   :  { %4572 = vmatpush.bf16.msrb.mxu1 %v7468_v52  ;;  %v8866_v52 = vld [vmem:[#allocation10 + $0xa4] sm:$0xf0] }
 0x50d   :  { %4586 = vmatpush.bf16.msrb.mxu2 %v7596_v6 }
 0x50e   :  { %4600 = vmatpush.bf16.msrb.mxu3 %v7724_v63  ;;  %4559 = vmatmul.bf16.vlgmr.msrb.gmra.mxu0 %v10443_v11  ;;  %v8850_v11 = vld [vmem:[#allocation10 + $0x24] sm:$0xf0]  ;;  %v7921_v63 = vor.u32 %v8866_v52, %v7920_v42 }
 0x50f   :  { %5053 = vmatpush.bf16.msra.mxu0 %v7897_v59  ;;  %4573 = vmatmul.bf16.vlgmr.msrb.gmra.mxu1 %v10447_v39  ;;  %v7857_v29 = vor.u32 %v8850_v11, %v7856_v28  ;;  %v8848_v39 = vld [vmem:[#allocation10 + $0x14] sm:$0xf0]  ;;  %v8847_v11 = vld [vmem:[#allocation10 + $0x14] sm:$0xf] }
 0x510   :  { %4587 = vmatmul.bf16.vlgmr.msrb.gmra.mxu2 %v10435_v19  ;;  %v8876_v19 = vld [vmem:[#allocation10 + $0xf4] sm:$0xf0] }
 0x511   :  { %4601 = vmatmul.bf16.vlgmr.msrb.gmra.mxu3 %v10439_v37  ;;  %v7849_v37 = vor.u32 %v8848_v39, %v7848_v20  ;;  %v7961_v1 = vor.u32 %v8876_v19, %v7960_v30  ;;  %v7904_v39 = vld [vmem:[#allocation10 + $0x80] sm:$0xf]  ;;  %v8862_v30 = vld [vmem:[#allocation10 + $0x84] sm:$0xf0]  ;;  %5081 = vmatpush.bf16.msra.mxu2 %v8025_v34 }
 0x512   :  { %v7905_v2 = vor.u32 %v8862_v30, %v7904_v39 }
 0x513   :  { %5054 = vmatpush.bf16.msra.mxu0 %v7889_v12  ;;  %5067 = vmatpush.bf16.msra.mxu1 %v7961_v1  ;;  %v7858_v12 = vld [vmem:[#allocation10 + $0x28] sm:$0xf0] }
 0x514   :  { %v7861_v17 = vor.u32 %v8849_v21, %v7858_v12  ;;  %v7938_v21 = vld [vmem:[#allocation10 + $0xc8] sm:$0xf0] }
 0x517   :  { %5055 = vmatpush.bf16.msra.mxu0 %v7881_v14  ;;  %5068 = vmatpush.bf16.msra.mxu1 %v7953_v45  ;;  %v8864_v14 = vld [vmem:[#allocation10 + $0x94] sm:$0xf0]  ;;  %v8845_v45 = vld [vmem:[#allocation10 + $0x4] sm:$0xf] }
 0x51b   :  { %5056 = vmatpush.bf16.msra.mxu0 %v7873_v38  ;;  %5069 = vmatpush.bf16.msra.mxu1 %v7945_v8  ;;  %v7913_v38 = vor.u32 %v8864_v14, %v7912_v3  ;;  %v8016_v8 = vld [vmem:[#allocation10 + $0x160] sm:$0xf]  ;;  %v7992_v14 = vld [vmem:[#allocation10 + $0x130] sm:$0xf] }
 0x51f   :  { %5057 = vmatpush.bf16.msra.mxu0 %v7865_v10  ;;  %5070 = vmatpush.bf16.msra.mxu1 %v7937_v9  ;;  %v7954_v9 = vld [vmem:[#allocation10 + $0xe8] sm:$0xf0] }
 0x520   :  { %v7957_v33 = vor.u32 %v8873_v0, %v7954_v9  ;;  %v8088_v0 = vld [vmem:[#allocation10 + $0x1f0] sm:$0xf] }
 0x523   :  { %5058 = vmatpush.bf16.msra.mxu0 %v7857_v29  ;;  %5071 = vmatpush.bf16.msra.mxu1 %v7929_v62  ;;  %v7850_v29 = vld [vmem:[#allocation10 + $0x18] sm:$0xf0]  ;;  %v8888_v62 = vld [vmem:[#allocation10 + $0x154] sm:$0xf0] }
 0x524   :  { %v7853_v16 = vor.u32 %v8847_v11, %v7850_v29  ;;  %v8009_v23 = vor.u32 %v8888_v62, %v8008_v32  ;;  %v7984_v11 = vld [vmem:[#allocation10 + $0x120] sm:$0xf]  ;;  %v8882_v29 = vld [vmem:[#allocation10 + $0x124] sm:$0xf0]  ;;  %v8026_v32 = vld [vmem:[#allocation10 + $0x178] sm:$0xf0] }
 0x525   :  { %v7985_v30 = vor.u32 %v8882_v29, %v7984_v11  ;;  %v8885_v11 = vld [vmem:[#allocation10 + $0x144] sm:$0xf] }
 0x527   :  { %5059 = vmatpush.bf16.msra.mxu0 %v7849_v37  ;;  %5072 = vmatpush.bf16.msra.mxu1 %v7921_v63  ;;  %v4617_v37 = vperm.slane %v10465_v44, 0  ;;  %v8000_v63 = vld [vmem:[#allocation10 + $0x140] sm:$0xf] }
 0x52b   :  { %5060 = vmatpush.bf16.msra.mxu0 %v7841_v27  ;;  %5073 = vmatpush.bf16.msra.mxu1 %v7913_v38  ;;  %v7962_v27 = vld [vmem:[#allocation10 + $0xf8] sm:$0xf0] }
 0x52c   :  { %v4406_v6 = vpop.f32.mrf.mxu1  ;;  %v7965_v57 = vor.u32 %v8875_v40, %v7962_v27  ;;  %v7914_v40 = vld [vmem:[#allocation10 + $0x98] sm:$0xf0] }
 0x52f   :  { %5109 = vmatpush.bf16.msrb.mxu0 %v7901_v46  ;;  %v4392_v55 = vpop.f32.mrf.mxu0  ;;  %5074 = vmatpush.bf16.msra.mxu1 %v7905_v2  ;;  %v7842_v46 = vld [vmem:[#allocation10 + $0x8] sm:$0xf0]  ;;  %v7976_v2 = vld [vmem:[#allocation10 + $0x110] sm:$0xf] }
 0x530   :  { %v4407_v59 = vadd.f32 %v4406_v6, %v4392_v55  ;;  %v7845_v41 = vor.u32 %v8845_v45, %v7842_v46  ;;  %v7946_v55 = vld [vmem:[#allocation10 + $0xd8] sm:$0xf0]  ;;  %v7977_v34 = vor.u32 %v8880_v5, %v7976_v2  ;;  %v7917_v46 = vor.u32 %v8863_v18, %v7914_v40  ;;  %v8900_v2 = vld [vmem:[#allocation10 + $0x1b4] sm:$0xf0]  ;;  %v8883_v5 = vld [vmem:[#allocation10 + $0x134] sm:$0xf] }
 0x531   :  { %v8048_v40 = vld [vmem:[#allocation10 + $0x1a0] sm:$0xf] }
 0x533   :  { %5110 = vmatpush.bf16.msrb.mxu0 %v7893_v50  ;;  %v4420_v56 = vpop.f32.mrf.mxu2  ;;  %5123 = vmatpush.bf16.msrb.mxu1 %v7965_v57  ;;  %v8890_v50 = vld [vmem:[#allocation10 + $0x164] sm:$0xf0] }
 0x534   :  { %v4421_v60 = vadd.f32 %v4420_v56, %v4407_v59  ;;  %v4434_v47 = vpop.f32.mrf.mxu3  ;;  %v4408_v20 = vpop.f32.mrf.mxu1  ;;  %v8017_v54 = vor.u32 %v8890_v50, %v8016_v8  ;;  %v8886_v59 = vld [vmem:[#allocation10 + $0x144] sm:$0xf0] }
 0x536   :  { %v4435_v10 = vadd.f32 %v4434_v47, %v4421_v60  ;;  %5082 = vmatpush.bf16.msra.mxu2 %v8017_v54  ;;  %v8884_v60 = vld [vmem:[#allocation10 + $0x134] sm:$0xf0]  ;;  %v8867_v47 = vld [vmem:[#allocation10 + $0xb4] sm:$0xf]  ;;  %v7906_v54 = vld [vmem:[#allocation10 + $0x88] sm:$0xf0] }
 0x537   :  { %5111 = vmatpush.bf16.msrb.mxu0 %v7885_v58  ;;  %v4394_v28 = vpop.f32.mrf.mxu0  ;;  %5124 = vmatpush.bf16.msrb.mxu1 %v7957_v33  ;;  %v7993_v38 = vor.u32 %v8884_v60, %v7992_v14 }
 0x538   :  { %v4607_v19 = vadd.f32 %v4435_v10, %v10410_v7  ;;  %v4409_v1 = vadd.f32 %v4408_v20, %v4394_v28  ;;  %v8865_v20 = vld [vmem:[#allocation10 + $0xa4] sm:$0xf] }
 0x53a   :  { %v4625_v36 = vadd.f32 %v4617_v37, %v4607_v19  ;;  %5083 = vmatpush.bf16.msra.mxu2 %v8009_v23  ;;  %v7922_v19 = vld [vmem:[#allocation10 + $0xa8] sm:$0xf0] }
 0x53b   :  { %5112 = vmatpush.bf16.msrb.mxu0 %v7877_v22  ;;  %v4422_v4 = vpop.f32.mrf.mxu2  ;;  %v8871_v22 = vld [vmem:[#allocation10 + $0xd4] sm:$0xf] }
 0x53c   :  { %v4423_v7 = vadd.f32 %v4422_v4, %v4409_v1  ;;  %v4436_v26 = vpop.f32.mrf.mxu3  ;;  %v4643_v43 = vmul.f32 %v10472_v31, %v4625_v36  ;;  %vm4634_vm2 = vcmp.gt.f32.partialorder %v4625_v36, 0.0  ;;  %v7949_v42 = vor.u32 %v8871_v22, %v7946_v55  ;;  %v8080_v55 = vld [vmem:[#allocation10 + $0x1e0] sm:$0xf] }
 0x53d   :  { %v7925_v1 = vor.u32 %v8865_v20, %v7922_v19  ;;  %v4618_v4 = vperm.slane %v10465_v44, 1 }
 0x53e   :  { %v4437_v58 = vadd.f32 %v4436_v26, %v4423_v7  ;;  %v4651_v52 = vsel %vm4634_vm2, %v4625_v36, %v4643_v43  ;;  %5125 = vmatpush.bf16.msrb.mxu1 %v7949_v42  ;;  %v7968_v7 = vld [vmem:[#allocation10 + $0x100] sm:$0xf]  ;;  %v8878_v26 = vld [vmem:[#allocation10 + $0x104] sm:$0xf0]  ;;  %v8908_v43 = vld [vmem:[#allocation10 + $0x1f4] sm:$0xf0] }
 0x53f   :  { %5113 = vmatpush.bf16.msrb.mxu0 %v7869_v35  ;;  %v8001_v35 = vor.u32 %v8886_v59, %v8000_v63  ;;  %v7969_v50 = vor.u32 %v8878_v26, %v7968_v7  ;;  %v8089_v62 = vor.u32 %v8908_v43, %v8088_v0  ;;  %v8889_v42 = vld [vmem:[#allocation10 + $0x164] sm:$0xf]  ;;  %v8018_v59 = vld [vmem:[#allocation10 + $0x168] sm:$0xf0]  ;;  %v7978_v0 = vld [vmem:[#allocation10 + $0x118] sm:$0xf0] }
 0x540   :  { %v4611_v13 = vadd.f32 %v4437_v58, %v10413_v53  ;;  %v8869_v53 = vld [vmem:[#allocation10 + $0xc4] sm:$0xf] }
 0x541   :  { %v7941_v56 = vor.u32 %v8869_v53, %v7938_v21  ;;  %5084 = vmatpush.bf16.msra.mxu2 %v8001_v35  ;;  %5095 = vmatpush.bf16.msra.mxu3 %v8089_v62  ;;  %v8021_v35 = vor.u32 %v8889_v42, %v8018_v59  ;;  %v8072_v21 = vld [vmem:[#allocation10 + $0x1d0] sm:$0xf]  ;;  %v8877_v62 = vld [vmem:[#allocation10 + $0x104] sm:$0xf]  ;;  %v8907_v42 = vld [vmem:[#allocation10 + $0x1f4] sm:$0xf] }
 0x542   :  { %v4629_v24 = vadd.f32 %v4617_v37, %v4611_v13  ;;  %v8891_v13 = vld [vmem:[#allocation10 + $0x174] sm:$0xf]  ;;  %v4619_v59 = vperm.slane %v10465_v44, 2 }
 0x543   :  { %5114 = vmatpush.bf16.msrb.mxu0 %v7861_v17  ;;  %5126 = vmatpush.bf16.msrb.mxu1 %v7941_v56  ;;  %v7930_v17 = vld [vmem:[#allocation10 + $0xb8] sm:$0xf0]  ;;  %v8029_v22 = vor.u32 %v8891_v13, %v8026_v32  ;;  %v8887_v56 = vld [vmem:[#allocation10 + $0x154] sm:$0xf]  ;;  %v8032_v13 = vld [vmem:[#allocation10 + $0x180] sm:$0xf] }
 0x544   :  { %vm4638_vm3 = vcmp.gt.f32.partialorder %v4629_v24, 0.0  ;;  %v4647_v6 = vmul.f32 %v10472_v31, %v4629_v24  ;;  %v7933_v10 = vor.u32 %v8867_v47, %v7930_v17  ;;  %v8010_v47 = vld [vmem:[#allocation10 + $0x158] sm:$0xf0]  ;;  %v8894_v32 = vld [vmem:[#allocation10 + $0x184] sm:$0xf0] }
 0x545   :  { %5085 = vmatpush.bf16.msra.mxu2 %v7993_v38  ;;  %v8013_v38 = vor.u32 %v8887_v56, %v8010_v47 }
 0x546   :  { %v4655_v12 = vsel %vm4638_vm3, %v4629_v24, %v4647_v6  ;;  %v8906_v24 = vld [vmem:[#allocation10 + $0x1e4] sm:$0xf0] }
 0x547   :  { %5115 = vmatpush.bf16.msrb.mxu0 %v7853_v16  ;;  %v4659_v3 = vpack.c.bf16 %v4655_v12, %v4651_v52  ;;  %5127 = vmatpush.bf16.msrb.mxu1 %v7933_v10  ;;  %v8904_v12 = vld [vmem:[#allocation10 + $0x1d4] sm:$0xf0]  ;;  %v8064_v10 = vld [vmem:[#allocation10 + $0x1c0] sm:$0xf] }
 0x548   :  { %v8073_v60 = vor.u32 %v8904_v12, %v8072_v21  ;;  %v8905_v21 = vld [vmem:[#allocation10 + $0x1e4] sm:$0xf]  ;;  %v8082_v12 = vld [vmem:[#allocation10 + $0x1e8] sm:$0xf0] }
 0x549   :  { %5061 = vmatmul.bf16.vlgmr.msra.gmra.mxu0 %v4659_v3  ;;  %5086 = vmatpush.bf16.msra.mxu2 %v7985_v30  ;;  %v8002_v30 = vld [vmem:[#allocation10 + $0x148] sm:$0xf0] }
 0x54a   :  { %v8005_v19 = vor.u32 %v8885_v11, %v8002_v30 }
 0x54b   :  { %5116 = vmatpush.bf16.msrb.mxu0 %v7845_v41  ;;  %v4448_v28 = vpop.f32.mrf.mxu0  ;;  %5128 = vmatpush.bf16.msrb.mxu1 %v7925_v1  ;;  %v8861_v41 = vld [vmem:[#allocation10 + $0x84] sm:$0xf]  ;;  %v8056_v1 = vld [vmem:[#allocation10 + $0x1b0] sm:$0xf] }
 0x54c   :  { %v4462_v39 = vpop.f32.mrf.mxu1  ;;  %v7909_v33 = vor.u32 %v8861_v41, %v7906_v54  ;;  %v8057_v18 = vor.u32 %v8900_v2, %v8056_v1  ;;  %v8879_v41 = vld [vmem:[#allocation10 + $0x114] sm:$0xf]  ;;  %v8058_v2 = vld [vmem:[#allocation10 + $0x1b8] sm:$0xf0] }
 0x54d   :  { %v4463_v37 = vadd.f32 %v4462_v39, %v4448_v28  ;;  %5087 = vmatpush.bf16.msra.mxu2 %v7977_v34  ;;  %v8902_v28 = vld [vmem:[#allocation10 + $0x1c4] sm:$0xf0]  ;;  %v8899_v1 = vld [vmem:[#allocation10 + $0x1b4] sm:$0xf] }
 0x54e   :  { %v8065_v39 = vor.u32 %v8902_v28, %v8064_v10  ;;  %v8074_v10 = vld [vmem:[#allocation10 + $0x1d8] sm:$0xf0] }
 0x54f   :  { %5129 = vmatpush.bf16.msrb.mxu1 %v7917_v46 }
 0x551   :  { %5088 = vmatpush.bf16.msra.mxu2 %v7969_v50  ;;  %v8896_v50 = vld [vmem:[#allocation10 + $0x194] sm:$0xf0] }
 0x553   :  { %v4476_v16 = vpop.f32.mrf.mxu2  ;;  %v4450_v36 = vpop.f32.mrf.mxu0  ;;  %5130 = vmatpush.bf16.msrb.mxu1 %v7909_v33 }
 0x554   :  { %v4477_v27 = vadd.f32 %v4476_v16, %v4463_v37  ;;  %v4490_v45 = vpop.f32.mrf.mxu3  ;;  %v4464_v8 = vpop.f32.mrf.mxu1  ;;  %v7994_v16 = vld [vmem:[#allocation10 + $0x138] sm:$0xf0] }
 0x555   :  { %v4465_v58 = vadd.f32 %v4464_v8, %v4450_v36  ;;  %5137 = vmatpush.bf16.msrb.mxu2 %v8029_v22  ;;  %v7997_v34 = vor.u32 %v8883_v5, %v7994_v16  ;;  %v8040_v8 = vld [vmem:[#allocation10 + $0x190] sm:$0xf]  ;;  %v8897_v16 = vld [vmem:[#allocation10 + $0x1a4] sm:$0xf] }
 0x556   :  { %v4491_v57 = vadd.f32 %v4490_v45, %v4477_v27  ;;  %v8898_v27 = vld [vmem:[#allocation10 + $0x1a4] sm:$0xf0]  ;;  %v8881_v45 = vld [vmem:[#allocation10 + $0x124] sm:$0xf]  ;;  %v8041_v54 = vor.u32 %v8896_v50, %v8040_v8 }
 0x557   :  { %v8049_v46 = vor.u32 %v8898_v27, %v8048_v40 }
 0x558   :  { %v4608_v9 = vadd.f32 %v4491_v57, %v10416_v48  ;;  %v8081_v48 = vor.u32 %v8906_v24, %v8080_v55  ;;  %v7986_v57 = vld [vmem:[#allocation10 + $0x128] sm:$0xf0]  ;;  %v8033_v55 = vor.u32 %v8894_v32, %v8032_v13 }
 0x559   :  { %5117 = vmatmul.bf16.vlgmr.msrb.gmra.mxu0 %v4659_v3  ;;  %5138 = vmatpush.bf16.msrb.mxu2 %v8021_v35  ;;  %v7989_v36 = vor.u32 %v8881_v45, %v7986_v57  ;;  %v7970_v24 = vld [vmem:[#allocation10 + $0x108] sm:$0xf0]  ;;  %v8895_v45 = vld [vmem:[#allocation10 + $0x194] sm:$0xf] }
 0x55a   :  { %v4626_v52 = vadd.f32 %v4618_v4, %v4608_v9  ;;  %5096 = vmatpush.bf16.msra.mxu3 %v8081_v48 }
 0x55b   :  { %v4478_v23 = vpop.f32.mrf.mxu2 }
 0x55c   :  { %v4479_v6 = vadd.f32 %v4478_v23, %v4465_v58  ;;  %v4492_v63 = vpop.f32.mrf.mxu3  ;;  %v4644_v14 = vmul.f32 %v10472_v31, %v4626_v52  ;;  %vm4635_vm4 = vcmp.gt.f32.partialorder %v4626_v52, 0.0  ;;  %v7981_v58 = vor.u32 %v8879_v41, %v7978_v0 }
 0x55d   :  { %5139 = vmatpush.bf16.msrb.mxu2 %v8013_v38 }
 0x55e   :  { %v4493_v53 = vadd.f32 %v4492_v63, %v4479_v6  ;;  %5097 = vmatpush.bf16.msra.mxu3 %v8073_v60  ;;  %v4652_v29 = vsel %vm4635_vm4, %v4626_v52, %v4644_v14  ;;  %v7973_v6 = vor.u32 %v8877_v62, %v7970_v24  ;;  %v8090_v63 = vld [vmem:[#allocation10 + $0x1f8] sm:$0xf0]  ;;  %v8085_v14 = vor.u32 %v8905_v21, %v8082_v12  ;;  %v8922_v12 = vld [vmem:[#allocation11 + $0x64] sm:$0xf0] }
 0x560   :  { %v4612_v3 = vadd.f32 %v4493_v53, %v10419_v51  ;;  %v8093_v53 = vor.u32 %v8907_v42, %v8090_v63 }
 0x561   :  { %5140 = vmatpush.bf16.msrb.mxu2 %v8005_v19 }
 0x562   :  { %v4630_v17 = vadd.f32 %v4618_v4, %v4612_v3  ;;  %5098 = vmatpush.bf16.msra.mxu3 %v8065_v39  ;;  %v8066_v39 = vld [vmem:[#allocation10 + $0x1c8] sm:$0xf0] }
 0x564   :  { %vm4639_vm5 = vcmp.gt.f32.partialorder %v4630_v17, 0.0  ;;  %v4648_v20 = vmul.f32 %v10472_v31, %v4630_v17 }
 0x565   :  { %5141 = vmatpush.bf16.msrb.mxu2 %v7997_v34  ;;  %v8050_v34 = vld [vmem:[#allocation10 + $0x1a8] sm:$0xf0] }
 0x566   :  { %v4656_v37 = vsel %vm4639_vm5, %v4630_v17, %v4648_v20  ;;  %5099 = vmatpush.bf16.msra.mxu3 %v8057_v18  ;;  %v8903_v17 = vld [vmem:[#allocation10 + $0x1d4] sm:$0xf]  ;;  %v8901_v20 = vld [vmem:[#allocation10 + $0x1c4] sm:$0xf]  ;;  %v8061_v18 = vor.u32 %v8899_v1, %v8058_v2  ;;  %v8940_v2 = vld [vmem:[#allocation11 + $0xf4] sm:$0xf0] }
 0x567   :  { %v4660_v51 = vpack.c.bf16 %v4656_v37, %v4652_v29  ;;  %v8069_v30 = vor.u32 %v8901_v20, %v8066_v39  ;;  %v8131_v39 = vld [vmem:[#allocation11 + $0x48] sm:$0xf0] }
 0x569   :  { %5075 = vmatmul.bf16.vlgmr.msra.gmra.mxu1 %v4660_v51  ;;  %5142 = vmatpush.bf16.msrb.mxu2 %v7989_v36  ;;  %v8893_v36 = vld [vmem:[#allocation10 + $0x184] sm:$0xf] }
 0x56a   :  { %5100 = vmatpush.bf16.msra.mxu3 %v8049_v46  ;;  %v8042_v46 = vld [vmem:[#allocation10 + $0x198] sm:$0xf0] }
 0x56b   :  { %v4504_v4 = vpop.f32.mrf.mxu0 }
 0x56c   :  { %v4518_v7 = vpop.f32.mrf.mxu1 }
 0x56d   :  { %v4519_v26 = vadd.f32 %v4518_v7, %v4504_v4  ;;  %5143 = vmatpush.bf16.msrb.mxu2 %v7981_v58  ;;  %v8045_v4 = vor.u32 %v8895_v45, %v8042_v46  ;;  %v8034_v7 = vld [vmem:[#allocation10 + $0x188] sm:$0xf0]  ;;  %v8113_v45 = vld [vmem:[#allocation11 + $0x20] sm:$0xf]  ;;  %v8914_v46 = vld [vmem:[#allocation11 + $0x24] sm:$0xf0] }
 0x56e   :  { %5101 = vmatpush.bf16.msra.mxu3 %v8041_v54  ;;  %v8037_v41 = vor.u32 %v8893_v36, %v8034_v7  ;;  %v8938_v36 = vld [vmem:[#allocation11 + $0xe4] sm:$0xf0]  ;;  %v8913_v7 = vld [vmem:[#allocation11 + $0x24] sm:$0xf] }
 0x571   :  { %5144 = vmatpush.bf16.msrb.mxu2 %v7973_v6 }
 0x572   :  { %5102 = vmatpush.bf16.msra.mxu3 %v8033_v55 }
 0x573   :  { %v4532_v9 = vpop.f32.mrf.mxu2  ;;  %v4506_v23 = vpop.f32.mrf.mxu0 }
 0x574   :  { %v4533_v33 = vadd.f32 %v4532_v9, %v4519_v26  ;;  %v4546_v43 = vpop.f32.mrf.mxu3  ;;  %v4520_v52 = vpop.f32.mrf.mxu1 }
 0x575   :  { %v4521_v35 = vadd.f32 %v4520_v52, %v4506_v23 }
 0x576   :  { %v4547_v22 = vadd.f32 %v4546_v43, %v4533_v33  ;;  %5151 = vmatpush.bf16.msrb.mxu3 %v8093_v53  ;;  %v4620_v33 = vperm.slane %v10465_v44, 3  ;;  %v8153_v44 = vld [vmem:[#allocation11 + $0x70] sm:$0xf]  ;;  %v8155_v53 = vld [vmem:[#allocation11 + $0x78] sm:$0xf0] }
 0x578   :  { %v4609_v48 = vadd.f32 %v4547_v22, %v10422_v25  ;;  %v8077_v25 = vor.u32 %v8903_v17, %v8074_v10  ;;  %v8139_v17 = vld [vmem:[#allocation11 + $0x58] sm:$0xf0] }
 0x579   :  { %5131 = vmatmul.bf16.vlgmr.msrb.gmra.mxu1 %v4660_v51 }
 0x57a   :  { %v4627_v3 = vadd.f32 %v4619_v59, %v4609_v48  ;;  %5152 = vmatpush.bf16.msrb.mxu3 %v8085_v14  ;;  %v8924_v48 = vld [vmem:[#allocation11 + $0x74] sm:$0xf0] }
 0x57b   :  { %v4534_v56 = vpop.f32.mrf.mxu2 }
 0x57c   :  { %v4535_v60 = vadd.f32 %v4534_v56, %v4521_v35  ;;  %v4548_v47 = vpop.f32.mrf.mxu3  ;;  %v4645_v28 = vmul.f32 %v10472_v31, %v4627_v3  ;;  %vm4636_vm6 = vcmp.gt.f32.partialorder %v4627_v3, 0.0  ;;  %v8154_v35 = vor.u32 %v8924_v48, %v8153_v44  ;;  %v8921_v56 = vld [vmem:[#allocation11 + $0x64] sm:$0xf]  ;;  %v8934_v44 = vld [vmem:[#allocation11 + $0xc4] sm:$0xf0] }
 0x57d   :  { %v8909_v48 = vld [vmem:[#allocation11 + $0x4] sm:$0xf] }
 0x57e   :  { %v4549_v38 = vadd.f32 %v4548_v47, %v4535_v60  ;;  %5153 = vmatpush.bf16.msrb.mxu3 %v8077_v25  ;;  %v4653_v19 = vsel %vm4636_vm6, %v4627_v3, %v4645_v28  ;;  %5379 = vmatpush.bf16.msra.mxu0 %v8154_v35  ;;  %v8147_v3 = vld [vmem:[#allocation11 + $0x68] sm:$0xf0]  ;;  %v8137_v60 = vld [vmem:[#allocation11 + $0x50] sm:$0xf]  ;;  %v8129_v28 = vld [vmem:[#allocation11 + $0x40] sm:$0xf] }
 0x57f   :  { %v8150_v47 = vor.u32 %v8921_v56, %v8147_v3  ;;  %v8185_v56 = vld [vmem:[#allocation11 + $0xb0] sm:$0xf]  ;;  %v8931_v3 = vld [vmem:[#allocation11 + $0xb4] sm:$0xf]  ;;  %vm5731_vm6 = vcmask 261120  }
 0x580   :  { %v4613_v11 = vadd.f32 %v4549_v38, %v10425_v15  ;;  %v8053_v15 = vor.u32 %v8897_v16, %v8050_v34  ;;  %v8919_v38 = vld [vmem:[#allocation11 + $0x54] sm:$0xf] }
 0x581   :  { %v8142_v25 = vor.u32 %v8919_v38, %v8139_v17  ;;  %v8177_v17 = vld [vmem:[#allocation11 + $0xa0] sm:$0xf] }
 0x582   :  { %v4631_v29 = vadd.f32 %v4619_v59, %v4613_v11  ;;  %5154 = vmatpush.bf16.msrb.mxu3 %v8069_v30  ;;  %v8923_v59 = vld [vmem:[#allocation11 + $0x74] sm:$0xf]  ;;  %v8918_v11 = vld [vmem:[#allocation11 + $0x44] sm:$0xf0] }
 0x583   :  { %v8158_v21 = vor.u32 %v8923_v59, %v8155_v53  ;;  %v8130_v20 = vor.u32 %v8918_v11, %v8129_v28  ;;  %v8099_v59 = vld [vmem:[#allocation11 + $0x8] sm:$0xf0] }
 0x584   :  { %vm4640_vm7 = vcmp.gt.f32.partialorder %v4631_v29, 0.0  ;;  %v4649_v37 = vmul.f32 %v10472_v31, %v4631_v29  ;;  %v8102_v53 = vor.u32 %v8909_v48, %v8099_v59 }
 0x586   :  { %v4657_v51 = vsel %vm4640_vm7, %v4631_v29, %v4649_v37  ;;  %5155 = vmatpush.bf16.msrb.mxu3 %v8061_v18  ;;  %v8917_v29 = vld [vmem:[#allocation11 + $0x44] sm:$0xf]  ;;  %v8916_v37 = vld [vmem:[#allocation11 + $0x34] sm:$0xf0]  ;;  %v8123_v18 = vld [vmem:[#allocation11 + $0x38] sm:$0xf0] }
 0x587   :  { %v4661_v5 = vpack.c.bf16 %v4657_v51, %v4653_v19  ;;  %v8134_v30 = vor.u32 %v8917_v29, %v8131_v39  ;;  %v8121_v19 = vld [vmem:[#allocation11 + $0x30] sm:$0xf]  ;;  %v8179_v29 = vld [vmem:[#allocation11 + $0xa8] sm:$0xf0]  ;;  %v4727_v39 = vld [vmem:[#allocation7 + $0x14] sm:$0x3] }
 0x588   :  { %v8217_v51 = vld [vmem:[#allocation11 + $0xf0] sm:$0xf]  ;;  %v8122_v1 = vor.u32 %v8916_v37, %v8121_v19  ;;  %v8928_v37 = vld [vmem:[#allocation11 + $0x94] sm:$0xf0]  ;;  %vm5749_vm7 = vcmask 15360  }
 0x589   :  { %5089 = vmatmul.bf16.vlgmr.msra.gmra.mxu2 %v4661_v5  ;;  %v8218_v16 = vor.u32 %v8940_v2, %v8217_v51  ;;  %v8169_v19 = vld [vmem:[#allocation11 + $0x90] sm:$0xf]  ;;  %v8927_v51 = vld [vmem:[#allocation11 + $0x94] sm:$0xf]  ;;  %v8171_v2 = vld [vmem:[#allocation11 + $0x98] sm:$0xf0] }
 0x58a   :  { %5156 = vmatpush.bf16.msrb.mxu3 %v8053_v15  ;;  %5407 = vmatpush.bf16.msra.mxu2 %v8158_v21  ;;  %v8939_v15 = vld [vmem:[#allocation11 + $0xf4] sm:$0xf]  ;;  %v8933_v21 = vld [vmem:[#allocation11 + $0xc4] sm:$0xf] }
 0x58b   :  { %v4560_v40 = vpop.f32.mrf.mxu0  ;;  %5393 = vmatpush.bf16.msra.mxu1 %v8218_v16  ;;  %v8161_v16 = vld [vmem:[#allocation11 + $0x80] sm:$0xf] }
 0x58c   :  { %v4574_v27 = vpop.f32.mrf.mxu1 }
 0x58d   :  { %v4575_v57 = vadd.f32 %v4574_v27, %v4560_v40  ;;  %v8219_v40 = vld [vmem:[#allocation11 + $0xf8] sm:$0xf0] }
 0x58e   :  { %5157 = vmatpush.bf16.msrb.mxu3 %v8045_v4  ;;  %5408 = vmatpush.bf16.msra.mxu2 %v8150_v47  ;;  %v8222_v27 = vor.u32 %v8939_v15, %v8219_v40  ;;  %v8114_v4 = vor.u32 %v8914_v46, %v8113_v45  ;;  %v8925_v15 = vld [vmem:[#allocation11 + $0x84] sm:$0xf]  ;;  %v8163_v45 = vld [vmem:[#allocation11 + $0x88] sm:$0xf0] }
 0x58f   :  { %v8166_v46 = vor.u32 %v8925_v15, %v8163_v45  ;;  %v5213_v15 = vld [vmem:[#allocation7 + $0x16] sm:$0x3] }
 0x592   :  { %5158 = vmatpush.bf16.msrb.mxu3 %v8037_v41  ;;  %5409 = vmatpush.bf16.msra.mxu2 %v8142_v25  ;;  %v8937_v41 = vld [vmem:[#allocation11 + $0xe4] sm:$0xf] }
 0x593   :  { %v4588_v26 = vpop.f32.mrf.mxu2  ;;  %v4562_v0 = vpop.f32.mrf.mxu0  ;;  %v8929_v25 = vld [vmem:[#allocation11 + $0xa4] sm:$0xf] }
 0x594   :  { %v4589_v8 = vadd.f32 %v4588_v26, %v4575_v57  ;;  %v4602_v50 = vpop.f32.mrf.mxu3  ;;  %v4576_v9 = vpop.f32.mrf.mxu1  ;;  %v8209_v57 = vld [vmem:[#allocation11 + $0xe0] sm:$0xf]  ;;  %v8115_v26 = vld [vmem:[#allocation11 + $0x28] sm:$0xf0] }
 0x595   :  { %v4577_v43 = vadd.f32 %v4576_v9, %v4562_v0  ;;  %v8105_v9 = vld [vmem:[#allocation11 + $0x10] sm:$0xf] }
 0x596   :  { %v4603_v54 = vadd.f32 %v4602_v50, %v4589_v8  ;;  %5410 = vmatpush.bf16.msra.mxu2 %v8134_v30  ;;  %v8210_v8 = vor.u32 %v8938_v36, %v8209_v57  ;;  %v8118_v50 = vor.u32 %v8913_v7, %v8115_v26 }
 0x598   :  { %v4610_v58 = vadd.f32 %v4603_v54, %v10428_v49  ;;  %v8211_v54 = vld [vmem:[#allocation11 + $0xe8] sm:$0xf0]  ;;  %5394 = vmatpush.bf16.msra.mxu1 %v8210_v8 }
 0x599   :  { %5145 = vmatmul.bf16.vlgmr.msrb.gmra.mxu2 %v4661_v5  ;;  %v8915_v5 = vld [vmem:[#allocation11 + $0x34] sm:$0xf]  ;;  %v8214_v0 = vor.u32 %v8937_v41, %v8211_v54 }
 0x59a   :  { %v4628_v22 = vadd.f32 %v4620_v33, %v4610_v58  ;;  %v8126_v34 = vor.u32 %v8915_v5, %v8123_v18  ;;  %v8912_v58 = vld [vmem:[#allocation11 + $0x14] sm:$0xf0]  ;;  %v8174_v5 = vor.u32 %v8927_v51, %v8171_v2  ;;  %v4729_v18 = vperm.slane %v4727_v39, 0  ;;  %v8951_v51 = vld [vmem:[#allocation13 + $0x50] sm:$0xff]  ;;  %v8950_v2 = vld [vmem:[#allocation13 + $0x48] sm:$0xff] }
 0x59b   :  { %v4590_v13 = vpop.f32.mrf.mxu2 }
 0x59c   :  { %v4591_v32 = vadd.f32 %v4590_v13, %v4577_v43  ;;  %v4604_v62 = vpop.f32.mrf.mxu3  ;;  %v4646_v24 = vmul.f32 %v10472_v31, %v4628_v22  ;;  %vm4637_vm8 = vcmp.gt.f32.partialorder %v4628_v22, 0.0  ;;  %5411 = vmatpush.bf16.msra.mxu2 %v8126_v34  ;;  %v8106_v43 = vor.u32 %v8912_v58, %v8105_v9  ;;  %v8936_v13 = vld [vmem:[#allocation11 + $0xd4] sm:$0xf0]  ;;  %v8926_v34 = vld [vmem:[#allocation11 + $0x84] sm:$0xf0] }
 0x59d   :  { %v5170_v9 = vstv %s8094_s19 }
 0x59e   :  { %v4605_v23 = vadd.f32 %v4604_v62, %v4591_v32  ;;  %v4654_v6 = vsel %vm4637_vm8, %v4628_v22, %v4646_v24  ;;  %v8911_v32 = vld [vmem:[#allocation11 + $0x14] sm:$0xf]  ;;  %v8107_v62 = vld [vmem:[#allocation11 + $0x18] sm:$0xf0] }
 0x59f   :  { %v8203_v24 = vld [vmem:[#allocation11 + $0xd8] sm:$0xf0] }
 0x5a0   :  { %v4614_v55 = vadd.f32 %v4605_v23, %v10431_v61  ;;  %v8145_v61 = vld [vmem:[#allocation11 + $0x60] sm:$0xf]  ;;  %5412 = vmatpush.bf16.msra.mxu2 %v8118_v50  ;;  %v8110_v23 = vor.u32 %v8911_v32, %v8107_v62 }
 0x5a1   :  { %v8146_v14 = vor.u32 %v8922_v12, %v8145_v61  ;;  %v8195_v61 = vld [vmem:[#allocation11 + $0xc8] sm:$0xf0] }
 0x5a2   :  { %v4632_v42 = vadd.f32 %v4620_v33, %v4614_v55  ;;  %v8201_v33 = vld [vmem:[#allocation11 + $0xd0] sm:$0xf]  ;;  %v8935_v55 = vld [vmem:[#allocation11 + $0xd4] sm:$0xf]  ;;  %v8198_v12 = vor.u32 %v8933_v21, %v8195_v61 }
 0x5a3   :  { %5380 = vmatpush.bf16.msra.mxu0 %v8146_v14  ;;  %v8202_v22 = vor.u32 %v8936_v13, %v8201_v33  ;;  %v8932_v14 = vld [vmem:[#allocation11 + $0xb4] sm:$0xf0] }
 0x5a4   :  { %vm4641_vm9 = vcmp.gt.f32.partialorder %v4632_v42, 0.0  ;;  %v4650_v52 = vmul.f32 %v10472_v31, %v4632_v42  ;;  %v8920_v31 = vld [vmem:[#allocation11 + $0x54] sm:$0xf0]  ;;  %5413 = vmatpush.bf16.msra.mxu2 %v8110_v23 }
 0x5a5   :  { %v8138_v10 = vor.u32 %v8920_v31, %v8137_v60  ;;  %5395 = vmatpush.bf16.msra.mxu1 %v8202_v22  ;;  %v8186_v60 = vor.u32 %v8932_v14, %v8185_v56  ;;  %v8187_v31 = vld [vmem:[#allocation11 + $0xb8] sm:$0xf0]  ;;  %v4730_v22 = vperm.slane %v4727_v39, 1  ;;  %v8953_v39 = vld [vmem:[#allocation13 + $0x60] sm:$0xff] }
 0x5a6   :  { %v4658_v49 = vsel %vm4641_vm9, %v4632_v42, %v4650_v52  ;;  %v8206_v42 = vor.u32 %v8935_v55, %v8203_v24  ;;  %v8097_v52 = vld [vmem:[#allocation11] sm:$0xf]  ;;  %v8190_v47 = vor.u32 %v8931_v3, %v8187_v31 }
 0x5a7   :  { %v4662_v63 = vpack.c.bf16 %v4658_v49, %v4654_v6  ;;  %5381 = vmatpush.bf16.msra.mxu0 %v8138_v10  ;;  %v8910_v6 = vld [vmem:[#allocation11 + $0x4] sm:$0xf0]  ;;  %v8193_v49 = vld [vmem:[#allocation11 + $0xc0] sm:$0xf] }
 0x5a8   :  { %v8194_v35 = vor.u32 %v8934_v44, %v8193_v49  ;;  %5414 = vmatpush.bf16.msra.mxu2 %v8102_v53  ;;  %v8930_v10 = vld [vmem:[#allocation11 + $0xa4] sm:$0xf0] }
 0x5a9   :  { %5103 = vmatmul.bf16.vlgmr.msra.gmra.mxu3 %v4662_v63  ;;  %v8178_v11 = vor.u32 %v8930_v10, %v8177_v17  ;;  %v8947_v17 = vld [vmem:[#allocation13 + $0x30] sm:$0xff]  ;;  %v8956_v10 = vld [vmem:[#allocation13 + $0x78] sm:$0xff] }
 0x5aa   :  { %5421 = vmatpush.bf16.msra.mxu3 %v8222_v27  ;;  %5396 = vmatpush.bf16.msra.mxu1 %v8194_v35  ;;  %v8162_v27 = vor.u32 %v8926_v34, %v8161_v16  ;;  %v8963_v16 = vld [vmem:[%s10536_s8 + $0x30] sm:$0xff] }
 0x5ab   :  { %5382 = vmatpush.bf16.msra.mxu0 %v8130_v20  ;;  %v8182_v20 = vor.u32 %v8929_v25, %v8179_v29  ;;  %v8946_v25 = vld [vmem:[#allocation13 + $0x28] sm:$0xff] }
 0x5ac   :  { %v8954_v29 = vld [vmem:[#allocation13 + $0x68] sm:$0xff] }
 0x5ae   :  { %5422 = vmatpush.bf16.msra.mxu3 %v8214_v0  ;;  %5397 = vmatpush.bf16.msra.mxu1 %v8186_v60 }
 0x5af   :  { %5383 = vmatpush.bf16.msra.mxu0 %v8122_v1  ;;  %v8170_v1 = vor.u32 %v8928_v37, %v8169_v19  ;;  %v8952_v19 = vld [vmem:[#allocation13 + $0x58] sm:$0xff]  ;;  %v8942_v37 = vld [vmem:[#allocation13 + $0x8] sm:$0xff] }
 0x5b2   :  { %5423 = vmatpush.bf16.msra.mxu3 %v8206_v42  ;;  %5398 = vmatpush.bf16.msra.mxu1 %v8178_v11  ;;  %v8945_v11 = vld [vmem:[#allocation13 + $0x20] sm:$0xff] }
 0x5b3   :  { %5384 = vmatpush.bf16.msra.mxu0 %v8114_v4 }
 0x5b6   :  { %5424 = vmatpush.bf16.msra.mxu3 %v8198_v12  ;;  %5399 = vmatpush.bf16.msra.mxu1 %v8170_v1  ;;  %v8941_v1 = vld [vmem:[#allocation13] sm:$0xff] }
 0x5b7   :  { %5385 = vmatpush.bf16.msra.mxu0 %v8106_v43 }
 0x5b9   :  { %5159 = vmatmul.bf16.vlgmr.msrb.gmra.mxu3 %v4662_v63  ;;  %v8098_v63 = vor.u32 %v8910_v6, %v8097_v52 }
 0x5ba   :  { %5425 = vmatpush.bf16.msra.mxu3 %v8190_v47  ;;  %5400 = vmatpush.bf16.msra.mxu1 %v8162_v27  ;;  %v5215_v27 = vperm.slane %v5213_v15, 0 }
 0x5bb   :  { %5386 = vmatpush.bf16.msra.mxu0 %v8098_v63 }
 0x5be   :  { %5426 = vmatpush.bf16.msra.mxu3 %v8182_v20  ;;  %5597 = vmatpush.bf16.msrb.mxu1 %v8956_v10  ;;  %v8944_v20 = vld [vmem:[#allocation13 + $0x18] sm:$0xff] }
 0x5c2   :  { %5427 = vmatpush.bf16.msra.mxu3 %v8174_v5  ;;  %v8949_v5 = vld [vmem:[#allocation13 + $0x40] sm:$0xff] }
 0x5c6   :  { %v5062_v38 = vpop.f32.mrf.mxu0  ;;  %5428 = vmatpush.bf16.msra.mxu3 %v8166_v46 }
 0x5c7   :  { %v5063_v4 = vadd.f32 %v5062_v38, %v4729_v18  ;;  %v8948_v38 = vld [vmem:[#allocation13 + $0x38] sm:$0xff] }
 0x5c8   :  { %5583 = vmatpush.bf16.msrb.mxu0 %v8948_v38 }
 0x5cc   :  { %5584 = vmatpush.bf16.msrb.mxu0 %v8947_v17 }
 0x5ce   :  { %v5064_v40 = vpop.f32.mrf.mxu0 }
 0x5cf   :  { %v5065_v8 = vadd.f32 %v5064_v40, %v4729_v18  ;;  %v8964_v18 = vld [vmem:[%s10536_s8 + $0x38] sm:$0xff]  ;;  %v8962_v40 = vld [vmem:[%s10536_s8 + $0x28] sm:$0xff] }
 0x5d0   :  { %5585 = vmatpush.bf16.msrb.mxu0 %v8946_v25  ;;  %5688 = vmatpush.bf16.msrb.mxu2 %v8964_v18 }
 0x5d4   :  { %5586 = vmatpush.bf16.msrb.mxu0 %v8945_v11  ;;  %5689 = vmatpush.bf16.msrb.mxu2 %v8963_v16  ;;  %v8966_v11 = vld [vmem:[%s10537_s9 + $0x8] sm:$0xff] }
 0x5d5   :  { %5741 = vmatpush.bf16.msrb.mxu3 %v8966_v11 }
 0x5d6   :  { %v5118_v0 = vpop.f32.mrf.mxu0 }
 0x5d7   :  { %v5119_v52 = vadd.f32 %v5118_v0, %v4730_v22 }
 0x5d8   :  { %5587 = vmatpush.bf16.msrb.mxu0 %v8944_v20  ;;  %5690 = vmatpush.bf16.msrb.mxu2 %v8962_v40 }
 0x5de   :  { %v5120_v6 = vpop.f32.mrf.mxu0 }
 0x5df   :  { %v5121_v48 = vadd.f32 %v5120_v6, %v4730_v22 }
 0x5e6   :  { %v5076_v28 = vpop.f32.mrf.mxu1 }
 0x5e7   :  { %v5077_v26 = vadd.f32 %v5076_v28, %v5063_v4  ;;  %v8955_v28 = vld [vmem:[#allocation13 + $0x70] sm:$0xff] }
 0x5e8   :  { %5598 = vmatpush.bf16.msrb.mxu1 %v8955_v28 }
 0x5ec   :  { %5599 = vmatpush.bf16.msrb.mxu1 %v8954_v29  ;;  %v8965_v29 = vld [vmem:[%s10537_s9] sm:$0xff] }
 0x5ed   :  { %5742 = vmatpush.bf16.msrb.mxu3 %v8965_v29 }
 0x5ee   :  { %v5078_v57 = vpop.f32.mrf.mxu1 }
 0x5ef   :  { %v5079_v41 = vadd.f32 %v5078_v57, %v5065_v8 }
 0x5f0   :  { %5600 = vmatpush.bf16.msrb.mxu1 %v8953_v39  ;;  %v8980_v39 = vld [vmem:[#allocation7 + $0x19] ss:$0 sm:$0xff] }
 0x5f4   :  { %5601 = vmatpush.bf16.msrb.mxu1 %v8952_v19  ;;  %v5705_v19 = vstv %s8321_s15 }
 0x5f6   :  { %v5132_v33 = vpop.f32.mrf.mxu1 }
 0x5f7   :  { %v5133_v63 = vadd.f32 %v5132_v33, %v5119_v52 }
 0x5f8   :  { %5602 = vmatpush.bf16.msrb.mxu1 %v8951_v51 }
 0x5fc   :  { %5603 = vmatpush.bf16.msrb.mxu1 %v8950_v2 }
 0x5fe   :  { %v5134_v44 = vpop.f32.mrf.mxu1 }
 0x5ff   :  { %v5135_v53 = vadd.f32 %v5134_v44, %v5121_v48  ;;  %v8960_v44 = vld [vmem:[%s10536_s8 + $0x18] sm:$0xff]  ;;  %v8959_v48 = vld [vmem:[%s10536_s8 + $0x10] sm:$0xff] }
 0x600   :  { %5604 = vmatpush.bf16.msrb.mxu1 %v8949_v5 }
 0x60c   :  { %v5090_v30 = vpop.f32.mrf.mxu2 }
 0x60d   :  { %v5091_v50 = vadd.f32 %v5090_v30, %v5077_v26  ;;  %v8943_v30 = vld [vmem:[#allocation13 + $0x10] sm:$0xff]  ;;  %v5440_v26 = vstv %s8223_s1 }
 0x60e   :  { %5588 = vmatpush.bf16.msrb.mxu0 %v8943_v30 }
 0x612   :  { %5589 = vmatpush.bf16.msrb.mxu0 %v8942_v37 }
 0x614   :  { %v5092_v36 = vpop.f32.mrf.mxu2 }
 0x615   :  { %v5093_v58 = vadd.f32 %v5092_v36, %v5079_v41  ;;  %v5216_v36 = vperm.slane %v5213_v15, 1 }
 0x616   :  { %5590 = vmatpush.bf16.msrb.mxu0 %v8941_v1 }
 0x61c   :  { %v5146_v62 = vpop.f32.mrf.mxu2 }
 0x61d   :  { %v5147_v59 = vadd.f32 %v5146_v62, %v5133_v63  ;;  %v8961_v63 = vld [vmem:[%s10536_s8 + $0x20] sm:$0xff] }
 0x61e   :  { %5691 = vmatpush.bf16.msrb.mxu2 %v8961_v63 }
 0x622   :  { %5692 = vmatpush.bf16.msrb.mxu2 %v8960_v44 }
 0x624   :  { %v5148_v35 = vpop.f32.mrf.mxu2 }
 0x625   :  { %v5149_v61 = vadd.f32 %v5148_v35, %v5135_v53  ;;  %v8957_v35 = vld [vmem:[%s10536_s8] sm:$0xff] }
 0x626   :  { %5693 = vmatpush.bf16.msrb.mxu2 %v8959_v48 }
 0x62c   :  { %v5104_v7 = vpop.f32.mrf.mxu3 }
 0x62d   :  { %v5105_v54 = vadd.f32 %v5104_v7, %v5091_v50 }
 0x62f   :  { %v5171_v13 = vmul.f32 %v5170_v9, %v5105_v54  ;;  %vm5166_vm10 = vcmp.gt.f32.partialorder %v5105_v54, 0.0 }
 0x631   :  { %v5175_v55 = vsel %vm5166_vm10, %v5105_v54, %v5171_v13 }
 0x634   :  { %v5106_v43 = vpop.f32.mrf.mxu3 }
 0x635   :  { %v5107_v32 = vadd.f32 %v5106_v43, %v5093_v58 }
 0x637   :  { %vm5168_vm11 = vcmp.gt.f32.partialorder %v5107_v32, 0.0  ;;  %v5173_v23 = vmul.f32 %v5170_v9, %v5107_v32 }
 0x639   :  { %v5177_v24 = vsel %vm5168_vm11, %v5107_v32, %v5173_v23 }
 0x63a   :  { %v5179_v42 = vpack.c.bf16 %v5177_v24, %v5175_v55 }
 0x63c   :  { %v5160_v49 = vpop.f32.mrf.mxu3  ;;  %5387 = vmatmul.bf16.vlgmr.msra.gmra.mxu0 %v5179_v42  ;;  %5415 = vmatmul.bf16.vlgmr.msra.gmra.mxu2 %v5179_v42 }
 0x63d   :  { %v5161_v21 = vadd.f32 %v5160_v49, %v5147_v59  ;;  %v8958_v59 = vld [vmem:[%s10536_s8 + $0x8] sm:$0xff] }
 0x63e   :  { %5694 = vmatpush.bf16.msrb.mxu2 %v8958_v59 }
 0x63f   :  { %v5172_v56 = vmul.f32 %v5170_v9, %v5161_v21  ;;  %vm5167_vm12 = vcmp.gt.f32.partialorder %v5161_v21, 0.0 }
 0x641   :  { %v5176_v60 = vsel %vm5167_vm12, %v5161_v21, %v5172_v56  ;;  %v8979_v21 = vld [vmem:[#allocation7 + $0x18] ss:$0 sm:$0xff] }
 0x642   :  { %5695 = vmatpush.bf16.msrb.mxu2 %v8957_v35 }
 0x644   :  { %v5162_v12 = vpop.f32.mrf.mxu3 }
 0x645   :  { %v5163_v14 = vadd.f32 %v5162_v12, %v5149_v61 }
 0x647   :  { %vm5169_vm13 = vcmp.gt.f32.partialorder %v5163_v14, 0.0  ;;  %v5174_v3 = vmul.f32 %v5170_v9, %v5163_v14 }
 0x649   :  { %v5178_v31 = vsel %vm5169_vm13, %v5163_v14, %v5174_v3  ;;  %v5614_v3 = vstv %s8288_s12 }
 0x64a   :  { %v5180_v47 = vpack.c.bf16 %v5178_v31, %v5176_v60 }
 0x64c   :  { %5401 = vmatmul.bf16.vlgmr.msra.gmra.mxu1 %v5180_v47  ;;  %5429 = vmatmul.bf16.vlgmr.msra.gmra.mxu3 %v5180_v47 }
 0x6b9   :  { %v5388_v34 = vpop.f32.mrf.mxu0 }
 0x6ba   :  { %v5389_v57 = vadd.f32 %v5388_v34, %v5215_v27  ;;  %v8981_v34 = vld [vmem:[#allocation7 + $0x1a] ss:$0 sm:$0xff] }
 0x6bf   :  { %v5416_v45 = vpop.f32.mrf.mxu2 }
 0x6c0   :  { %v5417_v54 = vadd.f32 %v5416_v45, %v5216_v36 }
 0x6c1   :  { %v5390_v4 = vpop.f32.mrf.mxu0 }
 0x6c2   :  { %v5391_v50 = vadd.f32 %v5390_v4, %v5215_v27 }
 0x6c7   :  { %v5418_v58 = vpop.f32.mrf.mxu2 }
 0x6c8   :  { %v5419_v13 = vadd.f32 %v5418_v58, %v5216_v36 }
 0x6c9   :  { %v5402_v46 = vpop.f32.mrf.mxu1 }
 0x6ca   :  { %v5403_v7 = vadd.f32 %v5402_v46, %v5389_v57 }
 0x6cc   :  { %v5441_v0 = vmul.f32 %v5440_v26, %v5403_v7  ;;  %vm5436_vm14 = vcmp.gt.f32.partialorder %v5403_v7, 0.0 }
 0x6ce   :  { %v5445_v32 = vsel %vm5436_vm14, %v5403_v7, %v5441_v0 }
 0x6cf   :  { %v5430_v8 = vpop.f32.mrf.mxu3 }
 0x6d0   :  { %v5431_v33 = vadd.f32 %v5430_v8, %v5417_v54 }
 0x6d1   :  { %v5404_v41 = vpop.f32.mrf.mxu1 }
 0x6d2   :  { %v5405_v9 = vadd.f32 %v5404_v41, %v5391_v50  ;;  %v5442_v55 = vmul.f32 %v5440_v26, %v5431_v33  ;;  %vm5437_vm0 = vcmp.gt.f32.partialorder %v5431_v33, 0.0 }
 0x6d4   :  { %vm5438_vm15 = vcmp.gt.f32.partialorder %v5405_v9, 0.0  ;;  %v5443_v43 = vmul.f32 %v5440_v26, %v5405_v9  ;;  %v5446_v52 = vsel %vm5437_vm0, %v5431_v33, %v5442_v55 }
 0x6d6   :  { %v5447_v62 = vsel %vm5438_vm15, %v5405_v9, %v5443_v43 }
 0x6d7   :  { %v5449_v22 = vpack.c.bf16 %v5447_v62, %v5445_v32  ;;  %v5432_v23 = vpop.f32.mrf.mxu3 }
 0x6d8   :  { %v5433_v24 = vadd.f32 %v5432_v23, %v5419_v13 }
 0x6d9   :  { %5591 = vmatmul.bf16.vlgmr.msrb.gmra.mxu0 %v5449_v22 }
 0x6da   :  { %vm5439_vm1 = vcmp.gt.f32.partialorder %v5433_v24, 0.0  ;;  %v5444_v42 = vmul.f32 %v5440_v26, %v5433_v24 }
 0x6dc   :  { %v5448_v6 = vsel %vm5439_vm1, %v5433_v24, %v5444_v42 }
 0x6dd   :  { %v5450_v49 = vpack.c.bf16 %v5448_v6, %v5446_v52 }
 0x6df   :  { %5605 = vmatmul.bf16.vlgmr.msrb.gmra.mxu1 %v5450_v49 }
 0x756   :  { %v5592_v53 = vpop.f32.mrf.mxu0 }
 0x757   :  { %v5593_v12 = vadd.f32 %v8979_v21, %v5592_v53 }
 0x75c   :  { %v5606_v61 = vpop.f32.mrf.mxu1 }
 0x75d   :  { %v5607_v14 = vadd.f32 %v5606_v61, %v5593_v12 }
 0x75e   :  { %v5594_v56 = vpop.f32.mrf.mxu0 }
 0x75f   :  { %v5595_v60 = vadd.f32 %v8979_v21, %v5594_v56  ;;  %v5615_v47 = vmul.f32 %v5614_v3, %v5607_v14  ;;  %vm5612_vm2 = vcmp.gt.f32.partialorder %v5607_v14, 0.0 }
 0x761   :  { %v5617_v10 = vsel %vm5612_vm2, %v5607_v14, %v5615_v47 }
 0x764   :  { %v5608_v31 = vpop.f32.mrf.mxu1 }
 0x765   :  { %v5609_v38 = vadd.f32 %v5608_v31, %v5595_v60 }
 0x767   :  { %vm5613_vm3 = vcmp.gt.f32.partialorder %v5609_v38, 0.0  ;;  %v5616_v17 = vmul.f32 %v5614_v3, %v5609_v38 }
 0x769   :  { %v5618_v25 = vsel %vm5613_vm3, %v5609_v38, %v5616_v17 }
 0x76a   :  { %v5619_v28 = vpack.c.bf16 %v5618_v25, %v5617_v10 }
 0x76c   :  { %5696 = vmatmul.bf16.vlgmr.msrb.gmra.mxu2 %v5619_v28 }
 0x7ef   :  { %v5697_v20 = vpop.f32.mrf.mxu2 }
 0x7f0   :  { %v5698_v30 = vadd.f32 %v8980_v39, %v5697_v20 }
 0x7f2   :  { %v5706_v51 = vmul.f32 %v5705_v19, %v5698_v30  ;;  %vm5703_vm4 = vcmp.gt.f32.partialorder %v5698_v30, 0.0 }
 0x7f4   :  { %v5708_v5 = vsel %vm5703_vm4, %v5698_v30, %v5706_v51 }
 0x7f7   :  { %v5699_v37 = vpop.f32.mrf.mxu2 }
 0x7f8   :  { %v5700_v1 = vadd.f32 %v8980_v39, %v5699_v37 }
 0x7fa   :  { %vm5704_vm5 = vcmp.gt.f32.partialorder %v5700_v1, 0.0  ;;  %v5707_v2 = vmul.f32 %v5705_v19, %v5700_v1 }
 0x7fc   :  { %v5709_v18 = vsel %vm5704_vm5, %v5700_v1, %v5707_v2 }
 0x7fd   :  { %v5710_v16 = vpack.c.bf16 %v5709_v18, %v5708_v5 }
 0x7ff   :  { %8330 = vmatmul.msk.bf16.vlgmr.msrb.gmra.mxu3 %vm5731_vm6, %v5710_v16 }
 0x882   :  { %v5744_v15 = vpop.f32.mrf.mxu3 }
 0x883   :  { %v5745_v40 = vadd.f32 %v8981_v34, %v5744_v15 }
 0x885   :  { %5750 = vst.msk [vmem:[%s10538_s10] sm:$0xff] %vm5749_vm7, %v5745_v40 }
 0x88a   :  { %v5746_v27 = vpop.f32.mrf.mxu3 }
 0x88b   :  { %v5747_v45 = vadd.f32 %v8981_v34, %v5746_v27 }
 0x88d   :  { %5751 = vst.msk [vmem:[%s10538_s10 + $0x8] sm:$0xff] %vm5749_vm7, %v5747_v45 }
 0x88e   :  { %5756 = vsyncpa [#allocation5], 1 }
 0x88f   :  { %5757 = vsyncpa [#allocation9], 1 }
 0x890   :  { %5758 = vsyncpa [#allocation12], 1 }
 0x891   :  { %5759 = vsyncpa [#allocation6], 1 }
 0x892   :  { %5760 = vsyncmov [#allocation3] }
 0x895   :  { %s5761_s2 = vpop.sfrf %5760 }
 0x896   :  { %p8331_p0 = scmp.ne.s32.totalorder %s5761_s2, 0 }
 0x898   :  { %5765 = shalt.err (%p8331_p0)  }
 0x899   :  { %5767 = vsyncmov [#allocation3 + $0x1] }
 0x89c   :  { %s5768_s4 = vpop.sfrf %5767 }
 0x89d   :  { %p8332_p1 = scmp.ne.s32.totalorder %s5768_s4, 0 }
 0x89f   :  { %5772 = shalt.err (%p8332_p1)  }

</bundles_post_ra>
